<compile_context>
chip_gen: v5e
topology: v5e:2x2
jax: 0.10.0
libtpu: 0.0.40
codegen_flags: <defaults>
</compile_context>

<pallas_src>
import jax
import jax.numpy as jnp
from jax.experimental import pallas as pl
from jax.experimental.pallas import tpu as pltpu

N_ACTIONS = 110
A_PAD = 128                 # lane-dense head width
HIDDEN = 32                 # small hidden size (module default 256; shapes scale freely)
SEQ_LEN = 8
BATCH = 8                   # full sublane utilization; raise freely for more throughput
CONV_H, CONV_W = 4, 13
C1, C2 = 32, 64
FLAT_CONV = C2 * CONV_H * CONV_W        # 3328

# padded conv raster: one shared zero pad column between y-rows, zero y-halo rows, one
# trailing pad position -> every 3x3 tap shift is a single contiguous row offset.
QW = CONV_W + 1                          # 14 raster positions per y-row
Q0 = QW + 1                              # raster index of output (y=0, x=0)
NQ = (CONV_H + 2) * QW + 1               # 85 raster positions total
NBAND = CONV_H * QW - 1                  # 55 contiguous positions covering all outputs

# ---- packed-weight slab row offsets (all multiples of 8 -> aligned slices) ----
# slab B (bfloat16, 64 lanes wide): conv1 weights+bias, conv2 weights
O_W1, O_CW2 = 0, 16
SLAB_B_ROWS = O_CW2 + 9 * C1             # 304
# slab A (float32, 128 lanes wide): all remaining small tensors
O_CB2, O_WIH, O_WHH, O_LB = 0, 8, 64, 96
O_OW, O_OB, O_F1LO, O_F1B = 104, 160, 168, 232
O_F2W, O_F2B, O_HW, O_HB = 240, 272, 280, 312
SLAB_A_ROWS = 320

_VMEM = pl.BlockSpec(memory_space=pltpu.MemorySpace.VMEM)


# ----------------------------- fused kernel --------------------------------

def policy_kernel(patch_ref, disc_ref, opp_ref, maskb_ref, a_ref, b_ref, f1wc_ref,
                  out_ref, p2_ref):
    f32, bf16 = jnp.float32, jnp.bfloat16
    B = out_ref.shape[0]
    H = HIDDEN
    T = disc_ref.shape[0] // B
    band = NBAND * B

    # conv1: whole padded raster in ONE bf16 matmul.  Patch extraction and halo zeros were
    # folded into the wrapper-built patch matrix; the bias rides along as a 10th column.
    w1 = b_ref[O_W1:O_W1 + 10, 0:C1]                                   # (10, 32) bf16
    p2_ref[...] = jnp.maximum(
        jnp.dot(patch_ref[...], w1, preferred_element_type=f32), 0.0)  # (NQ*B, 32)

    # conv2: 9 accumulating taps; each tap is ONE contiguous sublane-aligned slice of the
    # padded-raster conv1 output (no im2col concatenate, no per-slice relayout).
    acc = jnp.zeros((band, C2), f32)
    k = 0
    for dy in (-1, 0, 1):
        for dx in (-1, 0, 1):
            start = (Q0 + dy * QW + dx) * B
            lhs = p2_ref[start:start + band, :].astype(bf16)           # (55*B, 32)
            w2k = b_ref[O_CW2 + k * C1:O_CW2 + (k + 1) * C1, 0:C2]     # (32, 64) bf16
            acc = acc + jnp.dot(lhs, w2k, preferred_element_type=f32)
            k += 1
    acc = jnp.maximum(acc + a_ref[O_CB2:O_CB2 + 1, 0:C2], 0.0)         # (55*B, 64)

    # fc1 conv-feature block: 52 small batch-major MXU pushes straight off the accumulator.
    # This replaces the masked-store flatten loop and the (q,b)->(b,q*c) relayout entirely.
    zc = jnp.zeros((B, H), f32)
    for j in range(CONV_H * CONV_W):
        y, x = j // CONV_W, j % CONV_W
        qi = y * QW + x
        zc = zc + jnp.dot(acc[qi * B:(qi + 1) * B, :].astype(bf16),
                          f1wc_ref[j * C2:(j + 1) * C2, :],
                          preferred_element_type=f32)

    # LSTM over discard history: input projection hoisted out of the recurrence;
    # gate order (i, f, o, g) so sigmoid covers 3H lanes and tanh covers H lanes only.
    wih = a_ref[O_WIH:O_WIH + 52, :]
    whh = a_ref[O_WHH:O_WHH + H, :]
    lb = a_ref[O_LB:O_LB + 1, :]
    gx = jnp.dot(disc_ref[...], wih, preferred_element_type=f32) + lb  # (T*B, 4H)
    h = jnp.zeros((B, H), f32)
    c = jnp.zeros((B, H), f32)
    for t in range(T):
        g = gx[t * B:(t + 1) * B, :] + jnp.dot(h, whh, preferred_element_type=f32)
        sg = jax.nn.sigmoid(g[:, 0:3 * H])            # i, f, o
        gg = jnp.tanh(g[:, 3 * H:4 * H])              # g
        c = sg[:, H:2 * H] * c + sg[:, 0:H] * gg
        h = sg[:, 2 * H:3 * H] * jnp.tanh(c)
    x2 = h                                            # (B, H)

    # opponent-model branch
    x3 = jnp.maximum(
        jnp.dot(opp_ref[...], a_ref[O_OW:O_OW + 52, 0:H], preferred_element_type=f32)
        + a_ref[O_OB:O_OB + 1, 0:H], 0.0)

    # fc1 (LSTM + opponent feature blocks fused into one (B,2H)x(2H,H) matmul), then fc2.
    x23 = jnp.concatenate([x2, x3], axis=1)
    z = jnp.maximum(
        zc + jnp.dot(x23, a_ref[O_F1LO:O_F1LO + 2 * H, 0:H], preferred_element_type=f32)
        + a_ref[O_F1B:O_F1B + 1, 0:H], 0.0)
    # TODO(synk): nn.Dropout(0.2) -- eval-mode identity (training-mode RNG not reproduced).
    z = jnp.maximum(
        jnp.dot(z, a_ref[O_F2W:O_F2W + H, 0:H], preferred_element_type=f32)
        + a_ref[O_F2B:O_F2B + 1, 0:H], 0.0)

    # action head: lane-dense 128-wide masked softmax; mask is a precomputed additive bias.
    logits = (jnp.dot(z, a_ref[O_HW:O_HW + H, :], preferred_element_type=f32)
              + a_ref[O_HB:O_HB + 1, :] + maskb_ref[...])
    m = jnp.max(logits, axis=-1, keepdims=True)
    e = jnp.exp(logits - m)
    s = jnp.sum(e, axis=-1, keepdims=True)
    inv = pl.reciprocal(s, approx=True)
    inv = inv * (2.0 - s * inv)                       # one Newton step keeps row sums ~1
    out_ref[...] = e * inv


# ----------------------------- parameters ----------------------------------

def init_params(key, hidden=HIDDEN):
    # NOTE: this small config assumes 4*hidden <= 128 and N_ACTIONS <= 128 (slab width).
    ks = jax.random.split(key, 20)

    def u(k, shape, fan_in):
        s = 1.0 / jnp.sqrt(jnp.float32(fan_in))
        return jax.random.uniform(k, shape, jnp.float32, -s, s)

    # slab B (bf16): conv1 weights (rows 0..8, row = ky*3+kx) + bias (row 9); conv2 weights
    # (rows 16.., ordered (tap, cin)).
    w1 = u(ks[0], (9, C1), 9)
    b1 = u(ks[1], (1, C1), 9)
    cw2 = u(ks[2], (9 * C1, C2), 9 * C1)
    slabB = jnp.zeros((SLAB_B_ROWS, 64), jnp.float32)
    slabB = slabB.at[O_W1:O_W1 + 9, 0:C1].set(w1)
    slabB = slabB.at[O_W1 + 9, 0:C1].set(b1[0])
    slabB = slabB.at[O_CW2:O_CW2 + 9 * C1, 0:C2].set(cw2)
    slabB = slabB.astype(jnp.bfloat16)

    # fc1 conv-feature block (bf16), rows ordered ((y*13+x)*64 + c2).
    fc1_fan = FLAT_CONV + 2 * hidden
    f1wc = u(ks[3], (FLAT_CONV, hidden), fc1_fan).astype(jnp.bfloat16)

    # slab A (f32): every other small tensor, 128-lane padded, 8-row-aligned offsets.
    slabA = jnp.zeros((SLAB_A_ROWS, 128), jnp.float32)

    def put(sl, off, val):
        r, cw = val.shape
        return sl.at[off:off + r, 0:cw].set(val)

    slabA = put(slabA, O_CB2, u(ks[4], (1, C2), 9 * C1))
    slabA = put(slabA, O_WIH, u(ks[5], (52, 4 * hidden), hidden))       # gate order i,f,o,g
    slabA = put(slabA, O_WHH, u(ks[6], (hidden, 4 * hidden), hidden))
    slabA = put(slabA, O_LB, u(ks[7], (1, 4 * hidden), hidden)
                + u(ks[8], (1, 4 * hidden), hidden))                    # b_ih + b_hh
    slabA = put(slabA, O_OW, u(ks[9], (52, hidden), 52))
    slabA = put(slabA, O_OB, u(ks[10], (1, hidden), 52))
    slabA = put(slabA, O_F1LO, u(ks[11], (2 * hidden, hidden), fc1_fan))  # [f1wl ; f1wo]
    slabA = put(slabA, O_F1B, u(ks[12], (1, hidden), fc1_fan))
    slabA = put(slabA, O_F2W, u(ks[13], (hidden, hidden), hidden))
    slabA = put(slabA, O_F2B, u(ks[14], (1, hidden), hidden))
    hw = jnp.pad(u(ks[15], (hidden, N_ACTIONS), hidden), ((0, 0), (0, A_PAD - N_ACTIONS)))
    hb = jnp.pad(u(ks[16], (1, N_ACTIONS), hidden), ((0, 0), (0, A_PAD - N_ACTIONS)))
    slabA = put(slabA, O_HW, hw)
    slabA = put(slabA, O_HB, hb)

    return {"slabA": slabA, "slabB": slabB, "f1wc": f1wc}


# ----------------------------- forward pass --------------------------------

def _build_conv_patches(hand_matrix):
    """hand (B,1,4,13) -> (NQ*B, 10) bf16 im2col patches on the padded conv raster.

    Column 9 is an interior indicator (1.0) that multiplies the conv1 bias row, so halo /
    pad raster positions come out of the conv1 matmul as exactly zero.
    """
    B = hand_matrix.shape[0]
    hand = hand_matrix.reshape(B, CONV_H, CONV_W).astype(jnp.float32)
    hp = jnp.pad(hand, ((0, 0), (1, 1), (1, 1)))                         # (B, 6, 15)
    taps = jnp.stack([hp[:, dy:dy + CONV_H, dx:dx + CONV_W]
                      for dy in range(3) for dx in range(3)], axis=-1)   # (B,4,13,9)
    ones = jnp.ones((B, CONV_H, CONV_W, 1), jnp.float32)
    real = jnp.concatenate([taps, ones], axis=-1)                        # (B,4,13,10)
    raster = jnp.zeros((B, CONV_H + 2, QW, 10), jnp.float32)
    raster = raster.at[:, 1:1 + CONV_H, 1:1 + CONV_W, :].set(real)       # (B,6,14,10)
    raster = raster.reshape(B, (CONV_H + 2) * QW, 10)
    raster = jnp.concatenate([raster, jnp.zeros((B, 1, 10), jnp.float32)], axis=1)  # (B,85,10)
    return jnp.transpose(raster, (1, 0, 2)).reshape(NQ * B, 10).astype(jnp.bfloat16)


@jax.jit
def policy_forward(params, hand_matrix, discard_history, opponent_model,
                   valid_actions_mask):
    B, T = discard_history.shape[0], discard_history.shape[1]

    # tiny input-side layout prep (few KB of pure-JAX work)
    patch1 = _build_conv_patches(hand_matrix)                            # (NQ*B, 10) bf16
    disc_tb = jnp.transpose(discard_history.astype(jnp.float32),
                            (1, 0, 2)).reshape(T * B, 52)                # rows (t, b)
    opp = opponent_model.astype(jnp.float32)
    mask_bias = jnp.full((B, A_PAD), -1e30, jnp.float32)
    mask_bias = mask_bias.at[:, :N_ACTIONS].set(
        jnp.where(valid_actions_mask, 0.0, -1e30).astype(jnp.float32))   # additive mask

    inputs = (patch1, disc_tb, opp, mask_bias,
              params["slabA"], params["slabB"], params["f1wc"])

    probs_pad = pl.pallas_call(
        policy_kernel,
        out_shape=jax.ShapeDtypeStruct((B, A_PAD), jnp.float32),
        in_specs=[_VMEM] * len(inputs),
        out_specs=_VMEM,
        scratch_shapes=[
            pltpu.VMEM((NQ * B, C1), jnp.float32),   # conv1 output on the padded raster
        ],
    )(*inputs)

    return probs_pad[:, :N_ACTIONS]


# ----------------------------- main -----------------------------------------

if __name__ == "__main__":
    key = jax.random.PRNGKey(0)
    k_par, k_hand, k_disc, k_opp, k_mask = jax.random.split(key, 5)

    params = init_params(k_par, hidden=HIDDEN)

    hand_matrix = jax.random.bernoulli(
        k_hand, 0.2, (BATCH, 1, CONV_H, CONV_W)).astype(jnp.float32)
    discard_history = jax.random.bernoulli(
        k_disc, 0.1, (BATCH, SEQ_LEN, 52)).astype(jnp.float32)
    opponent_model = jax.random.uniform(k_opp, (BATCH, 52), jnp.float32)
    valid_actions_mask = jax.random.bernoulli(k_mask, 0.5, (BATCH, N_ACTIONS))
    # guarantee at least one valid action per row
    valid_actions_mask = valid_actions_mask.at[:, 0].set(True)

    probs = policy_forward(params, hand_matrix, discard_history,
                           opponent_model, valid_actions_mask)
    probs = jax.block_until_ready(probs)

    assert probs.shape == (BATCH, N_ACTIONS)
    assert bool(jnp.all(jnp.isfinite(probs)))
    assert bool(jnp.allclose(jnp.sum(probs, axis=1), 1.0, atol=1e-4))
    # masked-out actions must have zero probability
    assert bool(jnp.all(jnp.where(valid_actions_mask, 0.0, probs) == 0.0))

    print("KERNEL_OK")
</pallas_src>

<mosaic_0001>
module attributes {stable_mosaic.version = 11 : i64} {
  func.func @policy_kernel(%arg0: memref<680x10xbf16, #tpu.memory_space<vmem>>, %arg1: memref<64x52xf32, #tpu.memory_space<vmem>>, %arg2: memref<8x52xf32, #tpu.memory_space<vmem>>, %arg3: memref<8x128xf32, #tpu.memory_space<vmem>>, %arg4: memref<320x128xf32, #tpu.memory_space<vmem>>, %arg5: memref<304x64xbf16, #tpu.memory_space<vmem>>, %arg6: memref<3328x32xbf16, #tpu.memory_space<vmem>>, %arg7: memref<8x128xf32, #tpu.memory_space<vmem>>, %arg8: memref<680x32xf32, #tpu.memory_space<vmem>>) attributes {dimension_semantics = [], scalar_prefetch = 0 : i64, scratch_operands = 1 : i64, tpu.core_type = #tpu.core_type<tc>} {
    %c0 = arith.constant 0 : index
    %c0_0 = arith.constant 0 : index
    %0 = vector.load %arg5[%c0, %c0_0] : memref<304x64xbf16, #tpu.memory_space<vmem>>, vector<10x32xbf16>
    %c0_1 = arith.constant 0 : index
    %c0_2 = arith.constant 0 : index
    %1 = vector.load %arg0[%c0_1, %c0_2] : memref<680x10xbf16, #tpu.memory_space<vmem>>, vector<680x10xbf16>
    %cst = arith.constant dense<0.000000e+00> : vector<680x32xf32>
    %2 = tpu.matmul %1, %0, %cst {dimension_numbers = #tpu.dot_dimension_numbers<[1], [0], [0], [1], [0, 0, 1, 1], [], []>} : vector<680x10xbf16>, vector<10x32xbf16>, vector<680x32xf32> -> vector<680x32xf32>
    %cst_3 = arith.constant 0.000000e+00 : f32
    %3 = vector.broadcast %cst_3 : f32 to vector<680x32xf32>
    %4 = arith.maximumf %2, %3 : vector<680x32xf32>
    %c0_4 = arith.constant 0 : index
    %c0_5 = arith.constant 0 : index
    %5 = vector.load %arg8[%c0_4, %c0_5] : memref<680x32xf32, #tpu.memory_space<vmem>>, vector<680x32xf32>
    tpu.vector_store %arg8[%c0_4, %c0_5], %4 {strides = array<i32>} : memref<680x32xf32, #tpu.memory_space<vmem>>, vector<680x32xf32>,
    %cst_6 = arith.constant 0.000000e+00 : f32
    %6 = vector.broadcast %cst_6 : f32 to vector<440x64xf32>
    %c0_7 = arith.constant 0 : index
    %c0_8 = arith.constant 0 : index
    %7 = vector.load %arg8[%c0_7, %c0_8] : memref<680x32xf32, #tpu.memory_space<vmem>>, vector<440x32xf32>
    %8 = arith.truncf %7 : vector<440x32xf32> to vector<440x32xbf16>
    %c16 = arith.constant 16 : index
    %c0_9 = arith.constant 0 : index
    %9 = vector.load %arg5[%c16, %c0_9] : memref<304x64xbf16, #tpu.memory_space<vmem>>, vector<32x64xbf16>
    %cst_10 = arith.constant dense<0.000000e+00> : vector<440x64xf32>
    %10 = tpu.matmul %8, %9, %cst_10 {dimension_numbers = #tpu.dot_dimension_numbers<[1], [0], [0], [1], [0, 0, 1, 1], [], []>} : vector<440x32xbf16>, vector<32x64xbf16>, vector<440x64xf32> -> vector<440x64xf32>
    %11 = arith.addf %6, %10 : vector<440x64xf32>
    %c8 = arith.constant 8 : index
    %c0_11 = arith.constant 0 : index
    %12 = vector.load %arg8[%c8, %c0_11] : memref<680x32xf32, #tpu.memory_space<vmem>>, vector<440x32xf32>
    %13 = arith.truncf %12 : vector<440x32xf32> to vector<440x32xbf16>
    %c48 = arith.constant 48 : index
    %c0_12 = arith.constant 0 : index
    %14 = vector.load %arg5[%c48, %c0_12] : memref<304x64xbf16, #tpu.memory_space<vmem>>, vector<32x64xbf16>
    %cst_13 = arith.constant dense<0.000000e+00> : vector<440x64xf32>
    %15 = tpu.matmul %13, %14, %cst_13 {dimension_numbers = #tpu.dot_dimension_numbers<[1], [0], [0], [1], [0, 0, 1, 1], [], []>} : vector<440x32xbf16>, vector<32x64xbf16>, vector<440x64xf32> -> vector<440x64xf32>
    %16 = arith.addf %11, %15 : vector<440x64xf32>
    %c16_14 = arith.constant 16 : index
    %c0_15 = arith.constant 0 : index
    %17 = vector.load %arg8[%c16_14, %c0_15] : memref<680x32xf32, #tpu.memory_space<vmem>>, vector<440x32xf32>
    %18 = arith.truncf %17 : vector<440x32xf32> to vector<440x32xbf16>
    %c80 = arith.constant 80 : index
    %c0_16 = arith.constant 0 : index
    %19 = vector.load %arg5[%c80, %c0_16] : memref<304x64xbf16, #tpu.memory_space<vmem>>, vector<32x64xbf16>
    %cst_17 = arith.constant dense<0.000000e+00> : vector<440x64xf32>
    %20 = tpu.matmul %18, %19, %cst_17 {dimension_numbers = #tpu.dot_dimension_numbers<[1], [0], [0], [1], [0, 0, 1, 1], [], []>} : vector<440x32xbf16>, vector<32x64xbf16>, vector<440x64xf32> -> vector<440x64xf32>
    %21 = arith.addf %16, %20 : vector<440x64xf32>
    %c112 = arith.constant 112 : index
    %c0_18 = arith.constant 0 : index
    %22 = vector.load %arg8[%c112, %c0_18] : memref<680x32xf32, #tpu.memory_space<vmem>>, vector<440x32xf32>
    %23 = arith.truncf %22 : vector<440x32xf32> to vector<440x32xbf16>
    %c112_19 = arith.constant 112 : index
    %c0_20 = arith.constant 0 : index
    %24 = vector.load %arg5[%c112_19, %c0_20] : memref<304x64xbf16, #tpu.memory_space<vmem>>, vector<32x64xbf16>
    %cst_21 = arith.constant dense<0.000000e+00> : vector<440x64xf32>
    %25 = tpu.matmul %23, %24, %cst_21 {dimension_numbers = #tpu.dot_dimension_numbers<[1], [0], [0], [1], [0, 0, 1, 1], [], []>} : vector<440x32xbf16>, vector<32x64xbf16>, vector<440x64xf32> -> vector<440x64xf32>
    %26 = arith.addf %21, %25 : vector<440x64xf32>
    %c120 = arith.constant 120 : index
    %c0_22 = arith.constant 0 : index
    %27 = vector.load %arg8[%c120, %c0_22] : memref<680x32xf32, #tpu.memory_space<vmem>>, vector<440x32xf32>
    %28 = arith.truncf %27 : vector<440x32xf32> to vector<440x32xbf16>
    %c144 = arith.constant 144 : index
    %c0_23 = arith.constant 0 : index
    %29 = vector.load %arg5[%c144, %c0_23] : memref<304x64xbf16, #tpu.memory_space<vmem>>, vector<32x64xbf16>
    %cst_24 = arith.constant dense<0.000000e+00> : vector<440x64xf32>
    %30 = tpu.matmul %28, %29, %cst_24 {dimension_numbers = #tpu.dot_dimension_numbers<[1], [0], [0], [1], [0, 0, 1, 1], [], []>} : vector<440x32xbf16>, vector<32x64xbf16>, vector<440x64xf32> -> vector<440x64xf32>
    %31 = arith.addf %26, %30 : vector<440x64xf32>
    %c128 = arith.constant 128 : index
    %c0_25 = arith.constant 0 : index
    %32 = vector.load %arg8[%c128, %c0_25] : memref<680x32xf32, #tpu.memory_space<vmem>>, vector<440x32xf32>
    %33 = arith.truncf %32 : vector<440x32xf32> to vector<440x32xbf16>
    %c176 = arith.constant 176 : index
    %c0_26 = arith.constant 0 : index
    %34 = vector.load %arg5[%c176, %c0_26] : memref<304x64xbf16, #tpu.memory_space<vmem>>, vector<32x64xbf16>
    %cst_27 = arith.constant dense<0.000000e+00> : vector<440x64xf32>
    %35 = tpu.matmul %33, %34, %cst_27 {dimension_numbers = #tpu.dot_dimension_numbers<[1], [0], [0], [1], [0, 0, 1, 1], [], []>} : vector<440x32xbf16>, vector<32x64xbf16>, vector<440x64xf32> -> vector<440x64xf32>
    %36 = arith.addf %31, %35 : vector<440x64xf32>
    %c224 = arith.constant 224 : index
    %c0_28 = arith.constant 0 : index
    %37 = vector.load %arg8[%c224, %c0_28] : memref<680x32xf32, #tpu.memory_space<vmem>>, vector<440x32xf32>
    %38 = arith.truncf %37 : vector<440x32xf32> to vector<440x32xbf16>
    %c208 = arith.constant 208 : index
    %c0_29 = arith.constant 0 : index
    %39 = vector.load %arg5[%c208, %c0_29] : memref<304x64xbf16, #tpu.memory_space<vmem>>, vector<32x64xbf16>
    %cst_30 = arith.constant dense<0.000000e+00> : vector<440x64xf32>
    %40 = tpu.matmul %38, %39, %cst_30 {dimension_numbers = #tpu.dot_dimension_numbers<[1], [0], [0], [1], [0, 0, 1, 1], [], []>} : vector<440x32xbf16>, vector<32x64xbf16>, vector<440x64xf32> -> vector<440x64xf32>
    %41 = arith.addf %36, %40 : vector<440x64xf32>
    %c232 = arith.constant 232 : index
    %c0_31 = arith.constant 0 : index
    %42 = vector.load %arg8[%c232, %c0_31] : memref<680x32xf32, #tpu.memory_space<vmem>>, vector<440x32xf32>
    %43 = arith.truncf %42 : vector<440x32xf32> to vector<440x32xbf16>
    %c240 = arith.constant 240 : index
    %c0_32 = arith.constant 0 : index
    %44 = vector.load %arg5[%c240, %c0_32] : memref<304x64xbf16, #tpu.memory_space<vmem>>, vector<32x64xbf16>
    %cst_33 = arith.constant dense<0.000000e+00> : vector<440x64xf32>
    %45 = tpu.matmul %43, %44, %cst_33 {dimension_numbers = #tpu.dot_dimension_numbers<[1], [0], [0], [1], [0, 0, 1, 1], [], []>} : vector<440x32xbf16>, vector<32x64xbf16>, vector<440x64xf32> -> vector<440x64xf32>
    %46 = arith.addf %41, %45 : vector<440x64xf32>
    %c240_34 = arith.constant 240 : index
    %c0_35 = arith.constant 0 : index
    %47 = vector.load %arg8[%c240_34, %c0_35] : memref<680x32xf32, #tpu.memory_space<vmem>>, vector<440x32xf32>
    %48 = arith.truncf %47 : vector<440x32xf32> to vector<440x32xbf16>
    %c272 = arith.constant 272 : index
    %c0_36 = arith.constant 0 : index
    %49 = vector.load %arg5[%c272, %c0_36] : memref<304x64xbf16, #tpu.memory_space<vmem>>, vector<32x64xbf16>
    %cst_37 = arith.constant dense<0.000000e+00> : vector<440x64xf32>
    %50 = tpu.matmul %48, %49, %cst_37 {dimension_numbers = #tpu.dot_dimension_numbers<[1], [0], [0], [1], [0, 0, 1, 1], [], []>} : vector<440x32xbf16>, vector<32x64xbf16>, vector<440x64xf32> -> vector<440x64xf32>
    %51 = arith.addf %46, %50 : vector<440x64xf32>
    %c0_38 = arith.constant 0 : index
    %c0_39 = arith.constant 0 : index
    %52 = vector.load %arg4[%c0_38, %c0_39] : memref<320x128xf32, #tpu.memory_space<vmem>>, vector<1x64xf32>
    %53 = vector.broadcast %52 : vector<1x64xf32> to vector<440x64xf32>
    %54 = arith.addf %51, %53 : vector<440x64xf32>
    %cst_40 = arith.constant 0.000000e+00 : f32
    %55 = vector.broadcast %cst_40 : f32 to vector<440x64xf32>
    %56 = arith.maximumf %54, %55 : vector<440x64xf32>
    %cst_41 = arith.constant 0.000000e+00 : f32
    %57 = vector.broadcast %cst_41 : f32 to vector<8x32xf32>
    %58 = vector.extract_strided_slice %56 {offsets = [0, 0], sizes = [8, 64], strides = [1, 1]} : vector<440x64xf32> to vector<8x64xf32>
    %59 = arith.truncf %58 : vector<8x64xf32> to vector<8x64xbf16>
    %c0_42 = arith.constant 0 : index
    %c0_43 = arith.constant 0 : index
    %60 = vector.load %arg6[%c0_42, %c0_43] : memref<3328x32xbf16, #tpu.memory_space<vmem>>, vector<64x32xbf16>
    %cst_44 = arith.constant dense<0.000000e+00> : vector<8x32xf32>
    %61 = tpu.matmul %59, %60, %cst_44 {dimension_numbers = #tpu.dot_dimension_numbers<[1], [0], [0], [1], [0, 0, 1, 1], [], []>} : vector<8x64xbf16>, vector<64x32xbf16>, vector<8x32xf32> -> vector<8x32xf32>
    %62 = arith.addf %57, %61 : vector<8x32xf32>
    %63 = vector.extract_strided_slice %56 {offsets = [8, 0], sizes = [8, 64], strides = [1, 1]} : vector<440x64xf32> to vector<8x64xf32>
    %64 = arith.truncf %63 : vector<8x64xf32> to vector<8x64xbf16>
    %c64 = arith.constant 64 : index
    %c0_45 = arith.constant 0 : index
    %65 = vector.load %arg6[%c64, %c0_45] : memref<3328x32xbf16, #tpu.memory_space<vmem>>, vector<64x32xbf16>
    %cst_46 = arith.constant dense<0.000000e+00> : vector<8x32xf32>
    %66 = tpu.matmul %64, %65, %cst_46 {dimension_numbers = #tpu.dot_dimension_numbers<[1], [0], [0], [1], [0, 0, 1, 1], [], []>} : vector<8x64xbf16>, vector<64x32xbf16>, vector<8x32xf32> -> vector<8x32xf32>
    %67 = arith.addf %62, %66 : vector<8x32xf32>
    %68 = vector.extract_strided_slice %56 {offsets = [16, 0], sizes = [8, 64], strides = [1, 1]} : vector<440x64xf32> to vector<8x64xf32>
    %69 = arith.truncf %68 : vector<8x64xf32> to vector<8x64xbf16>
    %c128_47 = arith.constant 128 : index
    %c0_48 = arith.constant 0 : index
    %70 = vector.load %arg6[%c128_47, %c0_48] : memref<3328x32xbf16, #tpu.memory_space<vmem>>, vector<64x32xbf16>
    %cst_49 = arith.constant dense<0.000000e+00> : vector<8x32xf32>
    %71 = tpu.matmul %69, %70, %cst_49 {dimension_numbers = #tpu.dot_dimension_numbers<[1], [0], [0], [1], [0, 0, 1, 1], [], []>} : vector<8x64xbf16>, vector<64x32xbf16>, vector<8x32xf32> -> vector<8x32xf32>
    %72 = arith.addf %67, %71 : vector<8x32xf32>
    %73 = vector.extract_strided_slice %56 {offsets = [24, 0], sizes = [8, 64], strides = [1, 1]} : vector<440x64xf32> to vector<8x64xf32>
    %74 = arith.truncf %73 : vector<8x64xf32> to vector<8x64xbf16>
    %c192 = arith.constant 192 : index
    %c0_50 = arith.constant 0 : index
    %75 = vector.load %arg6[%c192, %c0_50] : memref<3328x32xbf16, #tpu.memory_space<vmem>>, vector<64x32xbf16>
    %cst_51 = arith.constant dense<0.000000e+00> : vector<8x32xf32>
    %76 = tpu.matmul %74, %75, %cst_51 {dimension_numbers = #tpu.dot_dimension_numbers<[1], [0], [0], [1], [0, 0, 1, 1], [], []>} : vector<8x64xbf16>, vector<64x32xbf16>, vector<8x32xf32> -> vector<8x32xf32>
    %77 = arith.addf %72, %76 : vector<8x32xf32>
    %78 = vector.extract_strided_slice %56 {offsets = [32, 0], sizes = [8, 64], strides = [1, 1]} : vector<440x64xf32> to vector<8x64xf32>
    %79 = arith.truncf %78 : vector<8x64xf32> to vector<8x64xbf16>
    %c256 = arith.constant 256 : index
    %c0_52 = arith.constant 0 : index
    %80 = vector.load %arg6[%c256, %c0_52] : memref<3328x32xbf16, #tpu.memory_space<vmem>>, vector<64x32xbf16>
    %cst_53 = arith.constant dense<0.000000e+00> : vector<8x32xf32>
    %81 = tpu.matmul %79, %80, %cst_53 {dimension_numbers = #tpu.dot_dimension_numbers<[1], [0], [0], [1], [0, 0, 1, 1], [], []>} : vector<8x64xbf16>, vector<64x32xbf16>, vector<8x32xf32> -> vector<8x32xf32>
    %82 = arith.addf %77, %81 : vector<8x32xf32>
    %83 = vector.extract_strided_slice %56 {offsets = [40, 0], sizes = [8, 64], strides = [1, 1]} : vector<440x64xf32> to vector<8x64xf32>
    %84 = arith.truncf %83 : vector<8x64xf32> to vector<8x64xbf16>
    %c320 = arith.constant 320 : index
    %c0_54 = arith.constant 0 : index
    %85 = vector.load %arg6[%c320, %c0_54] : memref<3328x32xbf16, #tpu.memory_space<vmem>>, vector<64x32xbf16>
    %cst_55 = arith.constant dense<0.000000e+00> : vector<8x32xf32>
    %86 = tpu.matmul %84, %85, %cst_55 {dimension_numbers = #tpu.dot_dimension_numbers<[1], [0], [0], [1], [0, 0, 1, 1], [], []>} : vector<8x64xbf16>, vector<64x32xbf16>, vector<8x32xf32> -> vector<8x32xf32>
    %87 = arith.addf %82, %86 : vector<8x32xf32>
    %88 = vector.extract_strided_slice %56 {offsets = [48, 0], sizes = [8, 64], strides = [1, 1]} : vector<440x64xf32> to vector<8x64xf32>
    %89 = arith.truncf %88 : vector<8x64xf32> to vector<8x64xbf16>
    %c384 = arith.constant 384 : index
    %c0_56 = arith.constant 0 : index
    %90 = vector.load %arg6[%c384, %c0_56] : memref<3328x32xbf16, #tpu.memory_space<vmem>>, vector<64x32xbf16>
    %cst_57 = arith.constant dense<0.000000e+00> : vector<8x32xf32>
    %91 = tpu.matmul %89, %90, %cst_57 {dimension_numbers = #tpu.dot_dimension_numbers<[1], [0], [0], [1], [0, 0, 1, 1], [], []>} : vector<8x64xbf16>, vector<64x32xbf16>, vector<8x32xf32> -> vector<8x32xf32>
    %92 = arith.addf %87, %91 : vector<8x32xf32>
    %93 = vector.extract_strided_slice %56 {offsets = [56, 0], sizes = [8, 64], strides = [1, 1]} : vector<440x64xf32> to vector<8x64xf32>
    %94 = arith.truncf %93 : vector<8x64xf32> to vector<8x64xbf16>
    %c448 = arith.constant 448 : index
    %c0_58 = arith.constant 0 : index
    %95 = vector.load %arg6[%c448, %c0_58] : memref<3328x32xbf16, #tpu.memory_space<vmem>>, vector<64x32xbf16>
    %cst_59 = arith.constant dense<0.000000e+00> : vector<8x32xf32>
    %96 = tpu.matmul %94, %95, %cst_59 {dimension_numbers = #tpu.dot_dimension_numbers<[1], [0], [0], [1], [0, 0, 1, 1], [], []>} : vector<8x64xbf16>, vector<64x32xbf16>, vector<8x32xf32> -> vector<8x32xf32>
    %97 = arith.addf %92, %96 : vector<8x32xf32>
    %98 = vector.extract_strided_slice %56 {offsets = [64, 0], sizes = [8, 64], strides = [1, 1]} : vector<440x64xf32> to vector<8x64xf32>
    %99 = arith.truncf %98 : vector<8x64xf32> to vector<8x64xbf16>
    %c512 = arith.constant 512 : index
    %c0_60 = arith.constant 0 : index
    %100 = vector.load %arg6[%c512, %c0_60] : memref<3328x32xbf16, #tpu.memory_space<vmem>>, vector<64x32xbf16>
    %cst_61 = arith.constant dense<0.000000e+00> : vector<8x32xf32>
    %101 = tpu.matmul %99, %100, %cst_61 {dimension_numbers = #tpu.dot_dimension_numbers<[1], [0], [0], [1], [0, 0, 1, 1], [], []>} : vector<8x64xbf16>, vector<64x32xbf16>, vector<8x32xf32> -> vector<8x32xf32>
    %102 = arith.addf %97, %101 : vector<8x32xf32>
    %103 = vector.extract_strided_slice %56 {offsets = [72, 0], sizes = [8, 64], strides = [1, 1]} : vector<440x64xf32> to vector<8x64xf32>
    %104 = arith.truncf %103 : vector<8x64xf32> to vector<8x64xbf16>
    %c576 = arith.constant 576 : index
    %c0_62 = arith.constant 0 : index
    %105 = vector.load %arg6[%c576, %c0_62] : memref<3328x32xbf16, #tpu.memory_space<vmem>>, vector<64x32xbf16>
    %cst_63 = arith.constant dense<0.000000e+00> : vector<8x32xf32>
    %106 = tpu.matmul %104, %105, %cst_63 {dimension_numbers = #tpu.dot_dimension_numbers<[1], [0], [0], [1], [0, 0, 1, 1], [], []>} : vector<8x64xbf16>, vector<64x32xbf16>, vector<8x32xf32> -> vector<8x32xf32>
    %107 = arith.addf %102, %106 : vector<8x32xf32>
    %108 = vector.extract_strided_slice %56 {offsets = [80, 0], sizes = [8, 64], strides = [1, 1]} : vector<440x64xf32> to vector<8x64xf32>
    %109 = arith.truncf %108 : vector<8x64xf32> to vector<8x64xbf16>
    %c640 = arith.constant 640 : index
    %c0_64 = arith.constant 0 : index
    %110 = vector.load %arg6[%c640, %c0_64] : memref<3328x32xbf16, #tpu.memory_space<vmem>>, vector<64x32xbf16>
    %cst_65 = arith.constant dense<0.000000e+00> : vector<8x32xf32>
    %111 = tpu.matmul %109, %110, %cst_65 {dimension_numbers = #tpu.dot_dimension_numbers<[1], [0], [0], [1], [0, 0, 1, 1], [], []>} : vector<8x64xbf16>, vector<64x32xbf16>, vector<8x32xf32> -> vector<8x32xf32>
    %112 = arith.addf %107, %111 : vector<8x32xf32>
    %113 = vector.extract_strided_slice %56 {offsets = [88, 0], sizes = [8, 64], strides = [1, 1]} : vector<440x64xf32> to vector<8x64xf32>
    %114 = arith.truncf %113 : vector<8x64xf32> to vector<8x64xbf16>
    %c704 = arith.constant 704 : index
    %c0_66 = arith.constant 0 : index
    %115 = vector.load %arg6[%c704, %c0_66] : memref<3328x32xbf16, #tpu.memory_space<vmem>>, vector<64x32xbf16>
    %cst_67 = arith.constant dense<0.000000e+00> : vector<8x32xf32>
    %116 = tpu.matmul %114, %115, %cst_67 {dimension_numbers = #tpu.dot_dimension_numbers<[1], [0], [0], [1], [0, 0, 1, 1], [], []>} : vector<8x64xbf16>, vector<64x32xbf16>, vector<8x32xf32> -> vector<8x32xf32>
    %117 = arith.addf %112, %116 : vector<8x32xf32>
    %118 = vector.extract_strided_slice %56 {offsets = [96, 0], sizes = [8, 64], strides = [1, 1]} : vector<440x64xf32> to vector<8x64xf32>
    %119 = arith.truncf %118 : vector<8x64xf32> to vector<8x64xbf16>
    %c768 = arith.constant 768 : index
    %c0_68 = arith.constant 0 : index
    %120 = vector.load %arg6[%c768, %c0_68] : memref<3328x32xbf16, #tpu.memory_space<vmem>>, vector<64x32xbf16>
    %cst_69 = arith.constant dense<0.000000e+00> : vector<8x32xf32>
    %121 = tpu.matmul %119, %120, %cst_69 {dimension_numbers = #tpu.dot_dimension_numbers<[1], [0], [0], [1], [0, 0, 1, 1], [], []>} : vector<8x64xbf16>, vector<64x32xbf16>, vector<8x32xf32> -> vector<8x32xf32>
    %122 = arith.addf %117, %121 : vector<8x32xf32>
    %123 = vector.extract_strided_slice %56 {offsets = [112, 0], sizes = [8, 64], strides = [1, 1]} : vector<440x64xf32> to vector<8x64xf32>
    %124 = arith.truncf %123 : vector<8x64xf32> to vector<8x64xbf16>
    %c832 = arith.constant 832 : index
    %c0_70 = arith.constant 0 : index
    %125 = vector.load %arg6[%c832, %c0_70] : memref<3328x32xbf16, #tpu.memory_space<vmem>>, vector<64x32xbf16>
    %cst_71 = arith.constant dense<0.000000e+00> : vector<8x32xf32>
    %126 = tpu.matmul %124, %125, %cst_71 {dimension_numbers = #tpu.dot_dimension_numbers<[1], [0], [0], [1], [0, 0, 1, 1], [], []>} : vector<8x64xbf16>, vector<64x32xbf16>, vector<8x32xf32> -> vector<8x32xf32>
    %127 = arith.addf %122, %126 : vector<8x32xf32>
    %128 = vector.extract_strided_slice %56 {offsets = [120, 0], sizes = [8, 64], strides = [1, 1]} : vector<440x64xf32> to vector<8x64xf32>
    %129 = arith.truncf %128 : vector<8x64xf32> to vector<8x64xbf16>
    %c896 = arith.constant 896 : index
    %c0_72 = arith.constant 0 : index
    %130 = vector.load %arg6[%c896, %c0_72] : memref<3328x32xbf16, #tpu.memory_space<vmem>>, vector<64x32xbf16>
    %cst_73 = arith.constant dense<0.000000e+00> : vector<8x32xf32>
    %131 = tpu.matmul %129, %130, %cst_73 {dimension_numbers = #tpu.dot_dimension_numbers<[1], [0], [0], [1], [0, 0, 1, 1], [], []>} : vector<8x64xbf16>, vector<64x32xbf16>, vector<8x32xf32> -> vector<8x32xf32>
    %132 = arith.addf %127, %131 : vector<8x32xf32>
    %133 = vector.extract_strided_slice %56 {offsets = [128, 0], sizes = [8, 64], strides = [1, 1]} : vector<440x64xf32> to vector<8x64xf32>
    %134 = arith.truncf %133 : vector<8x64xf32> to vector<8x64xbf16>
    %c960 = arith.constant 960 : index
    %c0_74 = arith.constant 0 : index
    %135 = vector.load %arg6[%c960, %c0_74] : memref<3328x32xbf16, #tpu.memory_space<vmem>>, vector<64x32xbf16>
    %cst_75 = arith.constant dense<0.000000e+00> : vector<8x32xf32>
    %136 = tpu.matmul %134, %135, %cst_75 {dimension_numbers = #tpu.dot_dimension_numbers<[1], [0], [0], [1], [0, 0, 1, 1], [], []>} : vector<8x64xbf16>, vector<64x32xbf16>, vector<8x32xf32> -> vector<8x32xf32>
    %137 = arith.addf %132, %136 : vector<8x32xf32>
    %138 = vector.extract_strided_slice %56 {offsets = [136, 0], sizes = [8, 64], strides = [1, 1]} : vector<440x64xf32> to vector<8x64xf32>
    %139 = arith.truncf %138 : vector<8x64xf32> to vector<8x64xbf16>
    %c1024 = arith.constant 1024 : index
    %c0_76 = arith.constant 0 : index
    %140 = vector.load %arg6[%c1024, %c0_76] : memref<3328x32xbf16, #tpu.memory_space<vmem>>, vector<64x32xbf16>
    %cst_77 = arith.constant dense<0.000000e+00> : vector<8x32xf32>
    %141 = tpu.matmul %139, %140, %cst_77 {dimension_numbers = #tpu.dot_dimension_numbers<[1], [0], [0], [1], [0, 0, 1, 1], [], []>} : vector<8x64xbf16>, vector<64x32xbf16>, vector<8x32xf32> -> vector<8x32xf32>
    %142 = arith.addf %137, %141 : vector<8x32xf32>
    %143 = vector.extract_strided_slice %56 {offsets = [144, 0], sizes = [8, 64], strides = [1, 1]} : vector<440x64xf32> to vector<8x64xf32>
    %144 = arith.truncf %143 : vector<8x64xf32> to vector<8x64xbf16>
    %c1088 = arith.constant 1088 : index
    %c0_78 = arith.constant 0 : index
    %145 = vector.load %arg6[%c1088, %c0_78] : memref<3328x32xbf16, #tpu.memory_space<vmem>>, vector<64x32xbf16>
    %cst_79 = arith.constant dense<0.000000e+00> : vector<8x32xf32>
    %146 = tpu.matmul %144, %145, %cst_79 {dimension_numbers = #tpu.dot_dimension_numbers<[1], [0], [0], [1], [0, 0, 1, 1], [], []>} : vector<8x64xbf16>, vector<64x32xbf16>, vector<8x32xf32> -> vector<8x32xf32>
    %147 = arith.addf %142, %146 : vector<8x32xf32>
    %148 = vector.extract_strided_slice %56 {offsets = [152, 0], sizes = [8, 64], strides = [1, 1]} : vector<440x64xf32> to vector<8x64xf32>
    %149 = arith.truncf %148 : vector<8x64xf32> to vector<8x64xbf16>
    %c1152 = arith.constant 1152 : index
    %c0_80 = arith.constant 0 : index
    %150 = vector.load %arg6[%c1152, %c0_80] : memref<3328x32xbf16, #tpu.memory_space<vmem>>, vector<64x32xbf16>
    %cst_81 = arith.constant dense<0.000000e+00> : vector<8x32xf32>
    %151 = tpu.matmul %149, %150, %cst_81 {dimension_numbers = #tpu.dot_dimension_numbers<[1], [0], [0], [1], [0, 0, 1, 1], [], []>} : vector<8x64xbf16>, vector<64x32xbf16>, vector<8x32xf32> -> vector<8x32xf32>
    %152 = arith.addf %147, %151 : vector<8x32xf32>
    %153 = vector.extract_strided_slice %56 {offsets = [160, 0], sizes = [8, 64], strides = [1, 1]} : vector<440x64xf32> to vector<8x64xf32>
    %154 = arith.truncf %153 : vector<8x64xf32> to vector<8x64xbf16>
    %c1216 = arith.constant 1216 : index
    %c0_82 = arith.constant 0 : index
    %155 = vector.load %arg6[%c1216, %c0_82] : memref<3328x32xbf16, #tpu.memory_space<vmem>>, vector<64x32xbf16>
    %cst_83 = arith.constant dense<0.000000e+00> : vector<8x32xf32>
    %156 = tpu.matmul %154, %155, %cst_83 {dimension_numbers = #tpu.dot_dimension_numbers<[1], [0], [0], [1], [0, 0, 1, 1], [], []>} : vector<8x64xbf16>, vector<64x32xbf16>, vector<8x32xf32> -> vector<8x32xf32>
    %157 = arith.addf %152, %156 : vector<8x32xf32>
    %158 = vector.extract_strided_slice %56 {offsets = [168, 0], sizes = [8, 64], strides = [1, 1]} : vector<440x64xf32> to vector<8x64xf32>
    %159 = arith.truncf %158 : vector<8x64xf32> to vector<8x64xbf16>
    %c1280 = arith.constant 1280 : index
    %c0_84 = arith.constant 0 : index
    %160 = vector.load %arg6[%c1280, %c0_84] : memref<3328x32xbf16, #tpu.memory_space<vmem>>, vector<64x32xbf16>
    %cst_85 = arith.constant dense<0.000000e+00> : vector<8x32xf32>
    %161 = tpu.matmul %159, %160, %cst_85 {dimension_numbers = #tpu.dot_dimension_numbers<[1], [0], [0], [1], [0, 0, 1, 1], [], []>} : vector<8x64xbf16>, vector<64x32xbf16>, vector<8x32xf32> -> vector<8x32xf32>
    %162 = arith.addf %157, %161 : vector<8x32xf32>
    %163 = vector.extract_strided_slice %56 {offsets = [176, 0], sizes = [8, 64], strides = [1, 1]} : vector<440x64xf32> to vector<8x64xf32>
    %164 = arith.truncf %163 : vector<8x64xf32> to vector<8x64xbf16>
    %c1344 = arith.constant 1344 : index
    %c0_86 = arith.constant 0 : index
    %165 = vector.load %arg6[%c1344, %c0_86] : memref<3328x32xbf16, #tpu.memory_space<vmem>>, vector<64x32xbf16>
    %cst_87 = arith.constant dense<0.000000e+00> : vector<8x32xf32>
    %166 = tpu.matmul %164, %165, %cst_87 {dimension_numbers = #tpu.dot_dimension_numbers<[1], [0], [0], [1], [0, 0, 1, 1], [], []>} : vector<8x64xbf16>, vector<64x32xbf16>, vector<8x32xf32> -> vector<8x32xf32>
    %167 = arith.addf %162, %166 : vector<8x32xf32>
    %168 = vector.extract_strided_slice %56 {offsets = [184, 0], sizes = [8, 64], strides = [1, 1]} : vector<440x64xf32> to vector<8x64xf32>
    %169 = arith.truncf %168 : vector<8x64xf32> to vector<8x64xbf16>
    %c1408 = arith.constant 1408 : index
    %c0_88 = arith.constant 0 : index
    %170 = vector.load %arg6[%c1408, %c0_88] : memref<3328x32xbf16, #tpu.memory_space<vmem>>, vector<64x32xbf16>
    %cst_89 = arith.constant dense<0.000000e+00> : vector<8x32xf32>
    %171 = tpu.matmul %169, %170, %cst_89 {dimension_numbers = #tpu.dot_dimension_numbers<[1], [0], [0], [1], [0, 0, 1, 1], [], []>} : vector<8x64xbf16>, vector<64x32xbf16>, vector<8x32xf32> -> vector<8x32xf32>
    %172 = arith.addf %167, %171 : vector<8x32xf32>
    %173 = vector.extract_strided_slice %56 {offsets = [192, 0], sizes = [8, 64], strides = [1, 1]} : vector<440x64xf32> to vector<8x64xf32>
    %174 = arith.truncf %173 : vector<8x64xf32> to vector<8x64xbf16>
    %c1472 = arith.constant 1472 : index
    %c0_90 = arith.constant 0 : index
    %175 = vector.load %arg6[%c1472, %c0_90] : memref<3328x32xbf16, #tpu.memory_space<vmem>>, vector<64x32xbf16>
    %cst_91 = arith.constant dense<0.000000e+00> : vector<8x32xf32>
    %176 = tpu.matmul %174, %175, %cst_91 {dimension_numbers = #tpu.dot_dimension_numbers<[1], [0], [0], [1], [0, 0, 1, 1], [], []>} : vector<8x64xbf16>, vector<64x32xbf16>, vector<8x32xf32> -> vector<8x32xf32>
    %177 = arith.addf %172, %176 : vector<8x32xf32>
    %178 = vector.extract_strided_slice %56 {offsets = [200, 0], sizes = [8, 64], strides = [1, 1]} : vector<440x64xf32> to vector<8x64xf32>
    %179 = arith.truncf %178 : vector<8x64xf32> to vector<8x64xbf16>
    %c1536 = arith.constant 1536 : index
    %c0_92 = arith.constant 0 : index
    %180 = vector.load %arg6[%c1536, %c0_92] : memref<3328x32xbf16, #tpu.memory_space<vmem>>, vector<64x32xbf16>
    %cst_93 = arith.constant dense<0.000000e+00> : vector<8x32xf32>
    %181 = tpu.matmul %179, %180, %cst_93 {dimension_numbers = #tpu.dot_dimension_numbers<[1], [0], [0], [1], [0, 0, 1, 1], [], []>} : vector<8x64xbf16>, vector<64x32xbf16>, vector<8x32xf32> -> vector<8x32xf32>
    %182 = arith.addf %177, %181 : vector<8x32xf32>
    %183 = vector.extract_strided_slice %56 {offsets = [208, 0], sizes = [8, 64], strides = [1, 1]} : vector<440x64xf32> to vector<8x64xf32>
    %184 = arith.truncf %183 : vector<8x64xf32> to vector<8x64xbf16>
    %c1600 = arith.constant 1600 : index
    %c0_94 = arith.constant 0 : index
    %185 = vector.load %arg6[%c1600, %c0_94] : memref<3328x32xbf16, #tpu.memory_space<vmem>>, vector<64x32xbf16>
    %cst_95 = arith.constant dense<0.000000e+00> : vector<8x32xf32>
    %186 = tpu.matmul %184, %185, %cst_95 {dimension_numbers = #tpu.dot_dimension_numbers<[1], [0], [0], [1], [0, 0, 1, 1], [], []>} : vector<8x64xbf16>, vector<64x32xbf16>, vector<8x32xf32> -> vector<8x32xf32>
    %187 = arith.addf %182, %186 : vector<8x32xf32>
    %188 = vector.extract_strided_slice %56 {offsets = [224, 0], sizes = [8, 64], strides = [1, 1]} : vector<440x64xf32> to vector<8x64xf32>
    %189 = arith.truncf %188 : vector<8x64xf32> to vector<8x64xbf16>
    %c1664 = arith.constant 1664 : index
    %c0_96 = arith.constant 0 : index
    %190 = vector.load %arg6[%c1664, %c0_96] : memref<3328x32xbf16, #tpu.memory_space<vmem>>, vector<64x32xbf16>
    %cst_97 = arith.constant dense<0.000000e+00> : vector<8x32xf32>
    %191 = tpu.matmul %189, %190, %cst_97 {dimension_numbers = #tpu.dot_dimension_numbers<[1], [0], [0], [1], [0, 0, 1, 1], [], []>} : vector<8x64xbf16>, vector<64x32xbf16>, vector<8x32xf32> -> vector<8x32xf32>
    %192 = arith.addf %187, %191 : vector<8x32xf32>
    %193 = vector.extract_strided_slice %56 {offsets = [232, 0], sizes = [8, 64], strides = [1, 1]} : vector<440x64xf32> to vector<8x64xf32>
    %194 = arith.truncf %193 : vector<8x64xf32> to vector<8x64xbf16>
    %c1728 = arith.constant 1728 : index
    %c0_98 = arith.constant 0 : index
    %195 = vector.load %arg6[%c1728, %c0_98] : memref<3328x32xbf16, #tpu.memory_space<vmem>>, vector<64x32xbf16>
    %cst_99 = arith.constant dense<0.000000e+00> : vector<8x32xf32>
    %196 = tpu.matmul %194, %195, %cst_99 {dimension_numbers = #tpu.dot_dimension_numbers<[1], [0], [0], [1], [0, 0, 1, 1], [], []>} : vector<8x64xbf16>, vector<64x32xbf16>, vector<8x32xf32> -> vector<8x32xf32>
    %197 = arith.addf %192, %196 : vector<8x32xf32>
    %198 = vector.extract_strided_slice %56 {offsets = [240, 0], sizes = [8, 64], strides = [1, 1]} : vector<440x64xf32> to vector<8x64xf32>
    %199 = arith.truncf %198 : vector<8x64xf32> to vector<8x64xbf16>
    %c1792 = arith.constant 1792 : index
    %c0_100 = arith.constant 0 : index
    %200 = vector.load %arg6[%c1792, %c0_100] : memref<3328x32xbf16, #tpu.memory_space<vmem>>, vector<64x32xbf16>
    %cst_101 = arith.constant dense<0.000000e+00> : vector<8x32xf32>
    %201 = tpu.matmul %199, %200, %cst_101 {dimension_numbers = #tpu.dot_dimension_numbers<[1], [0], [0], [1], [0, 0, 1, 1], [], []>} : vector<8x64xbf16>, vector<64x32xbf16>, vector<8x32xf32> -> vector<8x32xf32>
    %202 = arith.addf %197, %201 : vector<8x32xf32>
    %203 = vector.extract_strided_slice %56 {offsets = [248, 0], sizes = [8, 64], strides = [1, 1]} : vector<440x64xf32> to vector<8x64xf32>
    %204 = arith.truncf %203 : vector<8x64xf32> to vector<8x64xbf16>
    %c1856 = arith.constant 1856 : index
    %c0_102 = arith.constant 0 : index
    %205 = vector.load %arg6[%c1856, %c0_102] : memref<3328x32xbf16, #tpu.memory_space<vmem>>, vector<64x32xbf16>
    %cst_103 = arith.constant dense<0.000000e+00> : vector<8x32xf32>
    %206 = tpu.matmul %204, %205, %cst_103 {dimension_numbers = #tpu.dot_dimension_numbers<[1], [0], [0], [1], [0, 0, 1, 1], [], []>} : vector<8x64xbf16>, vector<64x32xbf16>, vector<8x32xf32> -> vector<8x32xf32>
    %207 = arith.addf %202, %206 : vector<8x32xf32>
    %208 = vector.extract_strided_slice %56 {offsets = [256, 0], sizes = [8, 64], strides = [1, 1]} : vector<440x64xf32> to vector<8x64xf32>
    %209 = arith.truncf %208 : vector<8x64xf32> to vector<8x64xbf16>
    %c1920 = arith.constant 1920 : index
    %c0_104 = arith.constant 0 : index
    %210 = vector.load %arg6[%c1920, %c0_104] : memref<3328x32xbf16, #tpu.memory_space<vmem>>, vector<64x32xbf16>
    %cst_105 = arith.constant dense<0.000000e+00> : vector<8x32xf32>
    %211 = tpu.matmul %209, %210, %cst_105 {dimension_numbers = #tpu.dot_dimension_numbers<[1], [0], [0], [1], [0, 0, 1, 1], [], []>} : vector<8x64xbf16>, vector<64x32xbf16>, vector<8x32xf32> -> vector<8x32xf32>
    %212 = arith.addf %207, %211 : vector<8x32xf32>
    %213 = vector.extract_strided_slice %56 {offsets = [264, 0], sizes = [8, 64], strides = [1, 1]} : vector<440x64xf32> to vector<8x64xf32>
    %214 = arith.truncf %213 : vector<8x64xf32> to vector<8x64xbf16>
    %c1984 = arith.constant 1984 : index
    %c0_106 = arith.constant 0 : index
    %215 = vector.load %arg6[%c1984, %c0_106] : memref<3328x32xbf16, #tpu.memory_space<vmem>>, vector<64x32xbf16>
    %cst_107 = arith.constant dense<0.000000e+00> : vector<8x32xf32>
    %216 = tpu.matmul %214, %215, %cst_107 {dimension_numbers = #tpu.dot_dimension_numbers<[1], [0], [0], [1], [0, 0, 1, 1], [], []>} : vector<8x64xbf16>, vector<64x32xbf16>, vector<8x32xf32> -> vector<8x32xf32>
    %217 = arith.addf %212, %216 : vector<8x32xf32>
    %218 = vector.extract_strided_slice %56 {offsets = [272, 0], sizes = [8, 64], strides = [1, 1]} : vector<440x64xf32> to vector<8x64xf32>
    %219 = arith.truncf %218 : vector<8x64xf32> to vector<8x64xbf16>
    %c2048 = arith.constant 2048 : index
    %c0_108 = arith.constant 0 : index
    %220 = vector.load %arg6[%c2048, %c0_108] : memref<3328x32xbf16, #tpu.memory_space<vmem>>, vector<64x32xbf16>
    %cst_109 = arith.constant dense<0.000000e+00> : vector<8x32xf32>
    %221 = tpu.matmul %219, %220, %cst_109 {dimension_numbers = #tpu.dot_dimension_numbers<[1], [0], [0], [1], [0, 0, 1, 1], [], []>} : vector<8x64xbf16>, vector<64x32xbf16>, vector<8x32xf32> -> vector<8x32xf32>
    %222 = arith.addf %217, %221 : vector<8x32xf32>
    %223 = vector.extract_strided_slice %56 {offsets = [280, 0], sizes = [8, 64], strides = [1, 1]} : vector<440x64xf32> to vector<8x64xf32>
    %224 = arith.truncf %223 : vector<8x64xf32> to vector<8x64xbf16>
    %c2112 = arith.constant 2112 : index
    %c0_110 = arith.constant 0 : index
    %225 = vector.load %arg6[%c2112, %c0_110] : memref<3328x32xbf16, #tpu.memory_space<vmem>>, vector<64x32xbf16>
    %cst_111 = arith.constant dense<0.000000e+00> : vector<8x32xf32>
    %226 = tpu.matmul %224, %225, %cst_111 {dimension_numbers = #tpu.dot_dimension_numbers<[1], [0], [0], [1], [0, 0, 1, 1], [], []>} : vector<8x64xbf16>, vector<64x32xbf16>, vector<8x32xf32> -> vector<8x32xf32>
    %227 = arith.addf %222, %226 : vector<8x32xf32>
    %228 = vector.extract_strided_slice %56 {offsets = [288, 0], sizes = [8, 64], strides = [1, 1]} : vector<440x64xf32> to vector<8x64xf32>
    %229 = arith.truncf %228 : vector<8x64xf32> to vector<8x64xbf16>
    %c2176 = arith.constant 2176 : index
    %c0_112 = arith.constant 0 : index
    %230 = vector.load %arg6[%c2176, %c0_112] : memref<3328x32xbf16, #tpu.memory_space<vmem>>, vector<64x32xbf16>
    %cst_113 = arith.constant dense<0.000000e+00> : vector<8x32xf32>
    %231 = tpu.matmul %229, %230, %cst_113 {dimension_numbers = #tpu.dot_dimension_numbers<[1], [0], [0], [1], [0, 0, 1, 1], [], []>} : vector<8x64xbf16>, vector<64x32xbf16>, vector<8x32xf32> -> vector<8x32xf32>
    %232 = arith.addf %227, %231 : vector<8x32xf32>
    %233 = vector.extract_strided_slice %56 {offsets = [296, 0], sizes = [8, 64], strides = [1, 1]} : vector<440x64xf32> to vector<8x64xf32>
    %234 = arith.truncf %233 : vector<8x64xf32> to vector<8x64xbf16>
    %c2240 = arith.constant 2240 : index
    %c0_114 = arith.constant 0 : index
    %235 = vector.load %arg6[%c2240, %c0_114] : memref<3328x32xbf16, #tpu.memory_space<vmem>>, vector<64x32xbf16>
    %cst_115 = arith.constant dense<0.000000e+00> : vector<8x32xf32>
    %236 = tpu.matmul %234, %235, %cst_115 {dimension_numbers = #tpu.dot_dimension_numbers<[1], [0], [0], [1], [0, 0, 1, 1], [], []>} : vector<8x64xbf16>, vector<64x32xbf16>, vector<8x32xf32> -> vector<8x32xf32>
    %237 = arith.addf %232, %236 : vector<8x32xf32>
    %238 = vector.extract_strided_slice %56 {offsets = [304, 0], sizes = [8, 64], strides = [1, 1]} : vector<440x64xf32> to vector<8x64xf32>
    %239 = arith.truncf %238 : vector<8x64xf32> to vector<8x64xbf16>
    %c2304 = arith.constant 2304 : index
    %c0_116 = arith.constant 0 : index
    %240 = vector.load %arg6[%c2304, %c0_116] : memref<3328x32xbf16, #tpu.memory_space<vmem>>, vector<64x32xbf16>
    %cst_117 = arith.constant dense<0.000000e+00> : vector<8x32xf32>
    %241 = tpu.matmul %239, %240, %cst_117 {dimension_numbers = #tpu.dot_dimension_numbers<[1], [0], [0], [1], [0, 0, 1, 1], [], []>} : vector<8x64xbf16>, vector<64x32xbf16>, vector<8x32xf32> -> vector<8x32xf32>
    %242 = arith.addf %237, %241 : vector<8x32xf32>
    %243 = vector.extract_strided_slice %56 {offsets = [312, 0], sizes = [8, 64], strides = [1, 1]} : vector<440x64xf32> to vector<8x64xf32>
    %244 = arith.truncf %243 : vector<8x64xf32> to vector<8x64xbf16>
    %c2368 = arith.constant 2368 : index
    %c0_118 = arith.constant 0 : index
    %245 = vector.load %arg6[%c2368, %c0_118] : memref<3328x32xbf16, #tpu.memory_space<vmem>>, vector<64x32xbf16>
    %cst_119 = arith.constant dense<0.000000e+00> : vector<8x32xf32>
    %246 = tpu.matmul %244, %245, %cst_119 {dimension_numbers = #tpu.dot_dimension_numbers<[1], [0], [0], [1], [0, 0, 1, 1], [], []>} : vector<8x64xbf16>, vector<64x32xbf16>, vector<8x32xf32> -> vector<8x32xf32>
    %247 = arith.addf %242, %246 : vector<8x32xf32>
    %248 = vector.extract_strided_slice %56 {offsets = [320, 0], sizes = [8, 64], strides = [1, 1]} : vector<440x64xf32> to vector<8x64xf32>
    %249 = arith.truncf %248 : vector<8x64xf32> to vector<8x64xbf16>
    %c2432 = arith.constant 2432 : index
    %c0_120 = arith.constant 0 : index
    %250 = vector.load %arg6[%c2432, %c0_120] : memref<3328x32xbf16, #tpu.memory_space<vmem>>, vector<64x32xbf16>
    %cst_121 = arith.constant dense<0.000000e+00> : vector<8x32xf32>
    %251 = tpu.matmul %249, %250, %cst_121 {dimension_numbers = #tpu.dot_dimension_numbers<[1], [0], [0], [1], [0, 0, 1, 1], [], []>} : vector<8x64xbf16>, vector<64x32xbf16>, vector<8x32xf32> -> vector<8x32xf32>
    %252 = arith.addf %247, %251 : vector<8x32xf32>
    %253 = vector.extract_strided_slice %56 {offsets = [336, 0], sizes = [8, 64], strides = [1, 1]} : vector<440x64xf32> to vector<8x64xf32>
    %254 = arith.truncf %253 : vector<8x64xf32> to vector<8x64xbf16>
    %c2496 = arith.constant 2496 : index
    %c0_122 = arith.constant 0 : index
    %255 = vector.load %arg6[%c2496, %c0_122] : memref<3328x32xbf16, #tpu.memory_space<vmem>>, vector<64x32xbf16>
    %cst_123 = arith.constant dense<0.000000e+00> : vector<8x32xf32>
    %256 = tpu.matmul %254, %255, %cst_123 {dimension_numbers = #tpu.dot_dimension_numbers<[1], [0], [0], [1], [0, 0, 1, 1], [], []>} : vector<8x64xbf16>, vector<64x32xbf16>, vector<8x32xf32> -> vector<8x32xf32>
    %257 = arith.addf %252, %256 : vector<8x32xf32>
    %258 = vector.extract_strided_slice %56 {offsets = [344, 0], sizes = [8, 64], strides = [1, 1]} : vector<440x64xf32> to vector<8x64xf32>
    %259 = arith.truncf %258 : vector<8x64xf32> to vector<8x64xbf16>
    %c2560 = arith.constant 2560 : index
    %c0_124 = arith.constant 0 : index
    %260 = vector.load %arg6[%c2560, %c0_124] : memref<3328x32xbf16, #tpu.memory_space<vmem>>, vector<64x32xbf16>
    %cst_125 = arith.constant dense<0.000000e+00> : vector<8x32xf32>
    %261 = tpu.matmul %259, %260, %cst_125 {dimension_numbers = #tpu.dot_dimension_numbers<[1], [0], [0], [1], [0, 0, 1, 1], [], []>} : vector<8x64xbf16>, vector<64x32xbf16>, vector<8x32xf32> -> vector<8x32xf32>
    %262 = arith.addf %257, %261 : vector<8x32xf32>
    %263 = vector.extract_strided_slice %56 {offsets = [352, 0], sizes = [8, 64], strides = [1, 1]} : vector<440x64xf32> to vector<8x64xf32>
    %264 = arith.truncf %263 : vector<8x64xf32> to vector<8x64xbf16>
    %c2624 = arith.constant 2624 : index
    %c0_126 = arith.constant 0 : index
    %265 = vector.load %arg6[%c2624, %c0_126] : memref<3328x32xbf16, #tpu.memory_space<vmem>>, vector<64x32xbf16>
    %cst_127 = arith.constant dense<0.000000e+00> : vector<8x32xf32>
    %266 = tpu.matmul %264, %265, %cst_127 {dimension_numbers = #tpu.dot_dimension_numbers<[1], [0], [0], [1], [0, 0, 1, 1], [], []>} : vector<8x64xbf16>, vector<64x32xbf16>, vector<8x32xf32> -> vector<8x32xf32>
    %267 = arith.addf %262, %266 : vector<8x32xf32>
    %268 = vector.extract_strided_slice %56 {offsets = [360, 0], sizes = [8, 64], strides = [1, 1]} : vector<440x64xf32> to vector<8x64xf32>
    %269 = arith.truncf %268 : vector<8x64xf32> to vector<8x64xbf16>
    %c2688 = arith.constant 2688 : index
    %c0_128 = arith.constant 0 : index
    %270 = vector.load %arg6[%c2688, %c0_128] : memref<3328x32xbf16, #tpu.memory_space<vmem>>, vector<64x32xbf16>
    %cst_129 = arith.constant dense<0.000000e+00> : vector<8x32xf32>
    %271 = tpu.matmul %269, %270, %cst_129 {dimension_numbers = #tpu.dot_dimension_numbers<[1], [0], [0], [1], [0, 0, 1, 1], [], []>} : vector<8x64xbf16>, vector<64x32xbf16>, vector<8x32xf32> -> vector<8x32xf32>
    %272 = arith.addf %267, %271 : vector<8x32xf32>
    %273 = vector.extract_strided_slice %56 {offsets = [368, 0], sizes = [8, 64], strides = [1, 1]} : vector<440x64xf32> to vector<8x64xf32>
    %274 = arith.truncf %273 : vector<8x64xf32> to vector<8x64xbf16>
    %c2752 = arith.constant 2752 : index
    %c0_130 = arith.constant 0 : index
    %275 = vector.load %arg6[%c2752, %c0_130] : memref<3328x32xbf16, #tpu.memory_space<vmem>>, vector<64x32xbf16>
    %cst_131 = arith.constant dense<0.000000e+00> : vector<8x32xf32>
    %276 = tpu.matmul %274, %275, %cst_131 {dimension_numbers = #tpu.dot_dimension_numbers<[1], [0], [0], [1], [0, 0, 1, 1], [], []>} : vector<8x64xbf16>, vector<64x32xbf16>, vector<8x32xf32> -> vector<8x32xf32>
    %277 = arith.addf %272, %276 : vector<8x32xf32>
    %278 = vector.extract_strided_slice %56 {offsets = [376, 0], sizes = [8, 64], strides = [1, 1]} : vector<440x64xf32> to vector<8x64xf32>
    %279 = arith.truncf %278 : vector<8x64xf32> to vector<8x64xbf16>
    %c2816 = arith.constant 2816 : index
    %c0_132 = arith.constant 0 : index
    %280 = vector.load %arg6[%c2816, %c0_132] : memref<3328x32xbf16, #tpu.memory_space<vmem>>, vector<64x32xbf16>
    %cst_133 = arith.constant dense<0.000000e+00> : vector<8x32xf32>
    %281 = tpu.matmul %279, %280, %cst_133 {dimension_numbers = #tpu.dot_dimension_numbers<[1], [0], [0], [1], [0, 0, 1, 1], [], []>} : vector<8x64xbf16>, vector<64x32xbf16>, vector<8x32xf32> -> vector<8x32xf32>
    %282 = arith.addf %277, %281 : vector<8x32xf32>
    %283 = vector.extract_strided_slice %56 {offsets = [384, 0], sizes = [8, 64], strides = [1, 1]} : vector<440x64xf32> to vector<8x64xf32>
    %284 = arith.truncf %283 : vector<8x64xf32> to vector<8x64xbf16>
    %c2880 = arith.constant 2880 : index
    %c0_134 = arith.constant 0 : index
    %285 = vector.load %arg6[%c2880, %c0_134] : memref<3328x32xbf16, #tpu.memory_space<vmem>>, vector<64x32xbf16>
    %cst_135 = arith.constant dense<0.000000e+00> : vector<8x32xf32>
    %286 = tpu.matmul %284, %285, %cst_135 {dimension_numbers = #tpu.dot_dimension_numbers<[1], [0], [0], [1], [0, 0, 1, 1], [], []>} : vector<8x64xbf16>, vector<64x32xbf16>, vector<8x32xf32> -> vector<8x32xf32>
    %287 = arith.addf %282, %286 : vector<8x32xf32>
    %288 = vector.extract_strided_slice %56 {offsets = [392, 0], sizes = [8, 64], strides = [1, 1]} : vector<440x64xf32> to vector<8x64xf32>
    %289 = arith.truncf %288 : vector<8x64xf32> to vector<8x64xbf16>
    %c2944 = arith.constant 2944 : index
    %c0_136 = arith.constant 0 : index
    %290 = vector.load %arg6[%c2944, %c0_136] : memref<3328x32xbf16, #tpu.memory_space<vmem>>, vector<64x32xbf16>
    %cst_137 = arith.constant dense<0.000000e+00> : vector<8x32xf32>
    %291 = tpu.matmul %289, %290, %cst_137 {dimension_numbers = #tpu.dot_dimension_numbers<[1], [0], [0], [1], [0, 0, 1, 1], [], []>} : vector<8x64xbf16>, vector<64x32xbf16>, vector<8x32xf32> -> vector<8x32xf32>
    %292 = arith.addf %287, %291 : vector<8x32xf32>
    %293 = vector.extract_strided_slice %56 {offsets = [400, 0], sizes = [8, 64], strides = [1, 1]} : vector<440x64xf32> to vector<8x64xf32>
    %294 = arith.truncf %293 : vector<8x64xf32> to vector<8x64xbf16>
    %c3008 = arith.constant 3008 : index
    %c0_138 = arith.constant 0 : index
    %295 = vector.load %arg6[%c3008, %c0_138] : memref<3328x32xbf16, #tpu.memory_space<vmem>>, vector<64x32xbf16>
    %cst_139 = arith.constant dense<0.000000e+00> : vector<8x32xf32>
    %296 = tpu.matmul %294, %295, %cst_139 {dimension_numbers = #tpu.dot_dimension_numbers<[1], [0], [0], [1], [0, 0, 1, 1], [], []>} : vector<8x64xbf16>, vector<64x32xbf16>, vector<8x32xf32> -> vector<8x32xf32>
    %297 = arith.addf %292, %296 : vector<8x32xf32>
    %298 = vector.extract_strided_slice %56 {offsets = [408, 0], sizes = [8, 64], strides = [1, 1]} : vector<440x64xf32> to vector<8x64xf32>
    %299 = arith.truncf %298 : vector<8x64xf32> to vector<8x64xbf16>
    %c3072 = arith.constant 3072 : index
    %c0_140 = arith.constant 0 : index
    %300 = vector.load %arg6[%c3072, %c0_140] : memref<3328x32xbf16, #tpu.memory_space<vmem>>, vector<64x32xbf16>
    %cst_141 = arith.constant dense<0.000000e+00> : vector<8x32xf32>
    %301 = tpu.matmul %299, %300, %cst_141 {dimension_numbers = #tpu.dot_dimension_numbers<[1], [0], [0], [1], [0, 0, 1, 1], [], []>} : vector<8x64xbf16>, vector<64x32xbf16>, vector<8x32xf32> -> vector<8x32xf32>
    %302 = arith.addf %297, %301 : vector<8x32xf32>
    %303 = vector.extract_strided_slice %56 {offsets = [416, 0], sizes = [8, 64], strides = [1, 1]} : vector<440x64xf32> to vector<8x64xf32>
    %304 = arith.truncf %303 : vector<8x64xf32> to vector<8x64xbf16>
    %c3136 = arith.constant 3136 : index
    %c0_142 = arith.constant 0 : index
    %305 = vector.load %arg6[%c3136, %c0_142] : memref<3328x32xbf16, #tpu.memory_space<vmem>>, vector<64x32xbf16>
    %cst_143 = arith.constant dense<0.000000e+00> : vector<8x32xf32>
    %306 = tpu.matmul %304, %305, %cst_143 {dimension_numbers = #tpu.dot_dimension_numbers<[1], [0], [0], [1], [0, 0, 1, 1], [], []>} : vector<8x64xbf16>, vector<64x32xbf16>, vector<8x32xf32> -> vector<8x32xf32>
    %307 = arith.addf %302, %306 : vector<8x32xf32>
    %308 = vector.extract_strided_slice %56 {offsets = [424, 0], sizes = [8, 64], strides = [1, 1]} : vector<440x64xf32> to vector<8x64xf32>
    %309 = arith.truncf %308 : vector<8x64xf32> to vector<8x64xbf16>
    %c3200 = arith.constant 3200 : index
    %c0_144 = arith.constant 0 : index
    %310 = vector.load %arg6[%c3200, %c0_144] : memref<3328x32xbf16, #tpu.memory_space<vmem>>, vector<64x32xbf16>
    %cst_145 = arith.constant dense<0.000000e+00> : vector<8x32xf32>
    %311 = tpu.matmul %309, %310, %cst_145 {dimension_numbers = #tpu.dot_dimension_numbers<[1], [0], [0], [1], [0, 0, 1, 1], [], []>} : vector<8x64xbf16>, vector<64x32xbf16>, vector<8x32xf32> -> vector<8x32xf32>
    %312 = arith.addf %307, %311 : vector<8x32xf32>
    %313 = vector.extract_strided_slice %56 {offsets = [432, 0], sizes = [8, 64], strides = [1, 1]} : vector<440x64xf32> to vector<8x64xf32>
    %314 = arith.truncf %313 : vector<8x64xf32> to vector<8x64xbf16>
    %c3264 = arith.constant 3264 : index
    %c0_146 = arith.constant 0 : index
    %315 = vector.load %arg6[%c3264, %c0_146] : memref<3328x32xbf16, #tpu.memory_space<vmem>>, vector<64x32xbf16>
    %cst_147 = arith.constant dense<0.000000e+00> : vector<8x32xf32>
    %316 = tpu.matmul %314, %315, %cst_147 {dimension_numbers = #tpu.dot_dimension_numbers<[1], [0], [0], [1], [0, 0, 1, 1], [], []>} : vector<8x64xbf16>, vector<64x32xbf16>, vector<8x32xf32> -> vector<8x32xf32>
    %317 = arith.addf %312, %316 : vector<8x32xf32>
    %c8_148 = arith.constant 8 : index
    %c0_149 = arith.constant 0 : index
    %318 = vector.load %arg4[%c8_148, %c0_149] : memref<320x128xf32, #tpu.memory_space<vmem>>, vector<52x128xf32>
    %c64_150 = arith.constant 64 : index
    %c0_151 = arith.constant 0 : index
    %319 = vector.load %arg4[%c64_150, %c0_151] : memref<320x128xf32, #tpu.memory_space<vmem>>, vector<32x128xf32>
    %c96 = arith.constant 96 : index
    %c0_152 = arith.constant 0 : index
    %320 = vector.load %arg4[%c96, %c0_152] : memref<320x128xf32, #tpu.memory_space<vmem>>, vector<1x128xf32>
    %c0_153 = arith.constant 0 : index
    %c0_154 = arith.constant 0 : index
    %321 = vector.load %arg1[%c0_153, %c0_154] : memref<64x52xf32, #tpu.memory_space<vmem>>, vector<64x52xf32>
    %cst_155 = arith.constant dense<0.000000e+00> : vector<64x128xf32>
    %322 = tpu.matmul %321, %318, %cst_155 {dimension_numbers = #tpu.dot_dimension_numbers<[1], [0], [0], [1], [0, 0, 1, 1], [], []>} : vector<64x52xf32>, vector<52x128xf32>, vector<64x128xf32> -> vector<64x128xf32>
    %323 = vector.broadcast %320 : vector<1x128xf32> to vector<64x128xf32>
    %324 = arith.addf %322, %323 : vector<64x128xf32>
    %cst_156 = arith.constant 0.000000e+00 : f32
    %325 = vector.broadcast %cst_156 : f32 to vector<8x32xf32>
    %cst_157 = arith.constant 0.000000e+00 : f32
    %326 = vector.broadcast %cst_157 : f32 to vector<8x32xf32>
    %327 = vector.extract_strided_slice %324 {offsets = [0, 0], sizes = [8, 128], strides = [1, 1]} : vector<64x128xf32> to vector<8x128xf32>
    %cst_158 = arith.constant dense<0.000000e+00> : vector<8x128xf32>
    %328 = tpu.matmul %325, %319, %cst_158 {dimension_numbers = #tpu.dot_dimension_numbers<[1], [0], [0], [1], [0, 0, 1, 1], [], []>} : vector<8x32xf32>, vector<32x128xf32>, vector<8x128xf32> -> vector<8x128xf32>
    %329 = arith.addf %327, %328 : vector<8x128xf32>
    %330 = vector.extract_strided_slice %329 {offsets = [0, 0], sizes = [8, 96], strides = [1, 1]} : vector<8x128xf32> to vector<8x96xf32>
    %331 = arith.negf %330 : vector<8x96xf32>
    %332 = math.exp %331 : vector<8x96xf32>
    %cst_159 = arith.constant 1.000000e+00 : f32
    %333 = vector.broadcast %cst_159 : f32 to vector<8x96xf32>
    %334 = arith.addf %333, %332 : vector<8x96xf32>
    %335 = arith.divf %333, %334 : vector<8x96xf32>
    %336 = vector.extract_strided_slice %329 {offsets = [0, 96], sizes = [8, 32], strides = [1, 1]} : vector<8x128xf32> to vector<8x32xf32>
    %337 = math.tanh %336 : vector<8x32xf32>
    %338 = vector.extract_strided_slice %335 {offsets = [0, 32], sizes = [8, 32], strides = [1, 1]} : vector<8x96xf32> to vector<8x32xf32>
    %339 = arith.mulf %338, %326 : vector<8x32xf32>
    %340 = vector.extract_strided_slice %335 {offsets = [0, 0], sizes = [8, 32], strides = [1, 1]} : vector<8x96xf32> to vector<8x32xf32>
    %341 = arith.mulf %340, %337 : vector<8x32xf32>
    %342 = arith.addf %339, %341 : vector<8x32xf32>
    %343 = vector.extract_strided_slice %335 {offsets = [0, 64], sizes = [8, 32], strides = [1, 1]} : vector<8x96xf32> to vector<8x32xf32>
    %344 = math.tanh %342 : vector<8x32xf32>
    %345 = arith.mulf %343, %344 : vector<8x32xf32>
    %346 = vector.extract_strided_slice %324 {offsets = [8, 0], sizes = [8, 128], strides = [1, 1]} : vector<64x128xf32> to vector<8x128xf32>
    %cst_160 = arith.constant dense<0.000000e+00> : vector<8x128xf32>
    %347 = tpu.matmul %345, %319, %cst_160 {dimension_numbers = #tpu.dot_dimension_numbers<[1], [0], [0], [1], [0, 0, 1, 1], [], []>} : vector<8x32xf32>, vector<32x128xf32>, vector<8x128xf32> -> vector<8x128xf32>
    %348 = arith.addf %346, %347 : vector<8x128xf32>
    %349 = vector.extract_strided_slice %348 {offsets = [0, 0], sizes = [8, 96], strides = [1, 1]} : vector<8x128xf32> to vector<8x96xf32>
    %350 = arith.negf %349 : vector<8x96xf32>
    %351 = math.exp %350 : vector<8x96xf32>
    %cst_161 = arith.constant 1.000000e+00 : f32
    %352 = vector.broadcast %cst_161 : f32 to vector<8x96xf32>
    %353 = arith.addf %352, %351 : vector<8x96xf32>
    %354 = arith.divf %352, %353 : vector<8x96xf32>
    %355 = vector.extract_strided_slice %348 {offsets = [0, 96], sizes = [8, 32], strides = [1, 1]} : vector<8x128xf32> to vector<8x32xf32>
    %356 = math.tanh %355 : vector<8x32xf32>
    %357 = vector.extract_strided_slice %354 {offsets = [0, 32], sizes = [8, 32], strides = [1, 1]} : vector<8x96xf32> to vector<8x32xf32>
    %358 = arith.mulf %357, %342 : vector<8x32xf32>
    %359 = vector.extract_strided_slice %354 {offsets = [0, 0], sizes = [8, 32], strides = [1, 1]} : vector<8x96xf32> to vector<8x32xf32>
    %360 = arith.mulf %359, %356 : vector<8x32xf32>
    %361 = arith.addf %358, %360 : vector<8x32xf32>
    %362 = vector.extract_strided_slice %354 {offsets = [0, 64], sizes = [8, 32], strides = [1, 1]} : vector<8x96xf32> to vector<8x32xf32>
    %363 = math.tanh %361 : vector<8x32xf32>
    %364 = arith.mulf %362, %363 : vector<8x32xf32>
    %365 = vector.extract_strided_slice %324 {offsets = [16, 0], sizes = [8, 128], strides = [1, 1]} : vector<64x128xf32> to vector<8x128xf32>
    %cst_162 = arith.constant dense<0.000000e+00> : vector<8x128xf32>
    %366 = tpu.matmul %364, %319, %cst_162 {dimension_numbers = #tpu.dot_dimension_numbers<[1], [0], [0], [1], [0, 0, 1, 1], [], []>} : vector<8x32xf32>, vector<32x128xf32>, vector<8x128xf32> -> vector<8x128xf32>
    %367 = arith.addf %365, %366 : vector<8x128xf32>
    %368 = vector.extract_strided_slice %367 {offsets = [0, 0], sizes = [8, 96], strides = [1, 1]} : vector<8x128xf32> to vector<8x96xf32>
    %369 = arith.negf %368 : vector<8x96xf32>
    %370 = math.exp %369 : vector<8x96xf32>
    %cst_163 = arith.constant 1.000000e+00 : f32
    %371 = vector.broadcast %cst_163 : f32 to vector<8x96xf32>
    %372 = arith.addf %371, %370 : vector<8x96xf32>
    %373 = arith.divf %371, %372 : vector<8x96xf32>
    %374 = vector.extract_strided_slice %367 {offsets = [0, 96], sizes = [8, 32], strides = [1, 1]} : vector<8x128xf32> to vector<8x32xf32>
    %375 = math.tanh %374 : vector<8x32xf32>
    %376 = vector.extract_strided_slice %373 {offsets = [0, 32], sizes = [8, 32], strides = [1, 1]} : vector<8x96xf32> to vector<8x32xf32>
    %377 = arith.mulf %376, %361 : vector<8x32xf32>
    %378 = vector.extract_strided_slice %373 {offsets = [0, 0], sizes = [8, 32], strides = [1, 1]} : vector<8x96xf32> to vector<8x32xf32>
    %379 = arith.mulf %378, %375 : vector<8x32xf32>
    %380 = arith.addf %377, %379 : vector<8x32xf32>
    %381 = vector.extract_strided_slice %373 {offsets = [0, 64], sizes = [8, 32], strides = [1, 1]} : vector<8x96xf32> to vector<8x32xf32>
    %382 = math.tanh %380 : vector<8x32xf32>
    %383 = arith.mulf %381, %382 : vector<8x32xf32>
    %384 = vector.extract_strided_slice %324 {offsets = [24, 0], sizes = [8, 128], strides = [1, 1]} : vector<64x128xf32> to vector<8x128xf32>
    %cst_164 = arith.constant dense<0.000000e+00> : vector<8x128xf32>
    %385 = tpu.matmul %383, %319, %cst_164 {dimension_numbers = #tpu.dot_dimension_numbers<[1], [0], [0], [1], [0, 0, 1, 1], [], []>} : vector<8x32xf32>, vector<32x128xf32>, vector<8x128xf32> -> vector<8x128xf32>
    %386 = arith.addf %384, %385 : vector<8x128xf32>
    %387 = vector.extract_strided_slice %386 {offsets = [0, 0], sizes = [8, 96], strides = [1, 1]} : vector<8x128xf32> to vector<8x96xf32>
    %388 = arith.negf %387 : vector<8x96xf32>
    %389 = math.exp %388 : vector<8x96xf32>
    %cst_165 = arith.constant 1.000000e+00 : f32
    %390 = vector.broadcast %cst_165 : f32 to vector<8x96xf32>
    %391 = arith.addf %390, %389 : vector<8x96xf32>
    %392 = arith.divf %390, %391 : vector<8x96xf32>
    %393 = vector.extract_strided_slice %386 {offsets = [0, 96], sizes = [8, 32], strides = [1, 1]} : vector<8x128xf32> to vector<8x32xf32>
    %394 = math.tanh %393 : vector<8x32xf32>
    %395 = vector.extract_strided_slice %392 {offsets = [0, 32], sizes = [8, 32], strides = [1, 1]} : vector<8x96xf32> to vector<8x32xf32>
    %396 = arith.mulf %395, %380 : vector<8x32xf32>
    %397 = vector.extract_strided_slice %392 {offsets = [0, 0], sizes = [8, 32], strides = [1, 1]} : vector<8x96xf32> to vector<8x32xf32>
    %398 = arith.mulf %397, %394 : vector<8x32xf32>
    %399 = arith.addf %396, %398 : vector<8x32xf32>
    %400 = vector.extract_strided_slice %392 {offsets = [0, 64], sizes = [8, 32], strides = [1, 1]} : vector<8x96xf32> to vector<8x32xf32>
    %401 = math.tanh %399 : vector<8x32xf32>
    %402 = arith.mulf %400, %401 : vector<8x32xf32>
    %403 = vector.extract_strided_slice %324 {offsets = [32, 0], sizes = [8, 128], strides = [1, 1]} : vector<64x128xf32> to vector<8x128xf32>
    %cst_166 = arith.constant dense<0.000000e+00> : vector<8x128xf32>
    %404 = tpu.matmul %402, %319, %cst_166 {dimension_numbers = #tpu.dot_dimension_numbers<[1], [0], [0], [1], [0, 0, 1, 1], [], []>} : vector<8x32xf32>, vector<32x128xf32>, vector<8x128xf32> -> vector<8x128xf32>
    %405 = arith.addf %403, %404 : vector<8x128xf32>
    %406 = vector.extract_strided_slice %405 {offsets = [0, 0], sizes = [8, 96], strides = [1, 1]} : vector<8x128xf32> to vector<8x96xf32>
    %407 = arith.negf %406 : vector<8x96xf32>
    %408 = math.exp %407 : vector<8x96xf32>
    %cst_167 = arith.constant 1.000000e+00 : f32
    %409 = vector.broadcast %cst_167 : f32 to vector<8x96xf32>
    %410 = arith.addf %409, %408 : vector<8x96xf32>
    %411 = arith.divf %409, %410 : vector<8x96xf32>
    %412 = vector.extract_strided_slice %405 {offsets = [0, 96], sizes = [8, 32], strides = [1, 1]} : vector<8x128xf32> to vector<8x32xf32>
    %413 = math.tanh %412 : vector<8x32xf32>
    %414 = vector.extract_strided_slice %411 {offsets = [0, 32], sizes = [8, 32], strides = [1, 1]} : vector<8x96xf32> to vector<8x32xf32>
    %415 = arith.mulf %414, %399 : vector<8x32xf32>
    %416 = vector.extract_strided_slice %411 {offsets = [0, 0], sizes = [8, 32], strides = [1, 1]} : vector<8x96xf32> to vector<8x32xf32>
    %417 = arith.mulf %416, %413 : vector<8x32xf32>
    %418 = arith.addf %415, %417 : vector<8x32xf32>
    %419 = vector.extract_strided_slice %411 {offsets = [0, 64], sizes = [8, 32], strides = [1, 1]} : vector<8x96xf32> to vector<8x32xf32>
    %420 = math.tanh %418 : vector<8x32xf32>
    %421 = arith.mulf %419, %420 : vector<8x32xf32>
    %422 = vector.extract_strided_slice %324 {offsets = [40, 0], sizes = [8, 128], strides = [1, 1]} : vector<64x128xf32> to vector<8x128xf32>
    %cst_168 = arith.constant dense<0.000000e+00> : vector<8x128xf32>
    %423 = tpu.matmul %421, %319, %cst_168 {dimension_numbers = #tpu.dot_dimension_numbers<[1], [0], [0], [1], [0, 0, 1, 1], [], []>} : vector<8x32xf32>, vector<32x128xf32>, vector<8x128xf32> -> vector<8x128xf32>
    %424 = arith.addf %422, %423 : vector<8x128xf32>
    %425 = vector.extract_strided_slice %424 {offsets = [0, 0], sizes = [8, 96], strides = [1, 1]} : vector<8x128xf32> to vector<8x96xf32>
    %426 = arith.negf %425 : vector<8x96xf32>
    %427 = math.exp %426 : vector<8x96xf32>
    %cst_169 = arith.constant 1.000000e+00 : f32
    %428 = vector.broadcast %cst_169 : f32 to vector<8x96xf32>
    %429 = arith.addf %428, %427 : vector<8x96xf32>
    %430 = arith.divf %428, %429 : vector<8x96xf32>
    %431 = vector.extract_strided_slice %424 {offsets = [0, 96], sizes = [8, 32], strides = [1, 1]} : vector<8x128xf32> to vector<8x32xf32>
    %432 = math.tanh %431 : vector<8x32xf32>
    %433 = vector.extract_strided_slice %430 {offsets = [0, 32], sizes = [8, 32], strides = [1, 1]} : vector<8x96xf32> to vector<8x32xf32>
    %434 = arith.mulf %433, %418 : vector<8x32xf32>
    %435 = vector.extract_strided_slice %430 {offsets = [0, 0], sizes = [8, 32], strides = [1, 1]} : vector<8x96xf32> to vector<8x32xf32>
    %436 = arith.mulf %435, %432 : vector<8x32xf32>
    %437 = arith.addf %434, %436 : vector<8x32xf32>
    %438 = vector.extract_strided_slice %430 {offsets = [0, 64], sizes = [8, 32], strides = [1, 1]} : vector<8x96xf32> to vector<8x32xf32>
    %439 = math.tanh %437 : vector<8x32xf32>
    %440 = arith.mulf %438, %439 : vector<8x32xf32>
    %441 = vector.extract_strided_slice %324 {offsets = [48, 0], sizes = [8, 128], strides = [1, 1]} : vector<64x128xf32> to vector<8x128xf32>
    %cst_170 = arith.constant dense<0.000000e+00> : vector<8x128xf32>
    %442 = tpu.matmul %440, %319, %cst_170 {dimension_numbers = #tpu.dot_dimension_numbers<[1], [0], [0], [1], [0, 0, 1, 1], [], []>} : vector<8x32xf32>, vector<32x128xf32>, vector<8x128xf32> -> vector<8x128xf32>
    %443 = arith.addf %441, %442 : vector<8x128xf32>
    %444 = vector.extract_strided_slice %443 {offsets = [0, 0], sizes = [8, 96], strides = [1, 1]} : vector<8x128xf32> to vector<8x96xf32>
    %445 = arith.negf %444 : vector<8x96xf32>
    %446 = math.exp %445 : vector<8x96xf32>
    %cst_171 = arith.constant 1.000000e+00 : f32
    %447 = vector.broadcast %cst_171 : f32 to vector<8x96xf32>
    %448 = arith.addf %447, %446 : vector<8x96xf32>
    %449 = arith.divf %447, %448 : vector<8x96xf32>
    %450 = vector.extract_strided_slice %443 {offsets = [0, 96], sizes = [8, 32], strides = [1, 1]} : vector<8x128xf32> to vector<8x32xf32>
    %451 = math.tanh %450 : vector<8x32xf32>
    %452 = vector.extract_strided_slice %449 {offsets = [0, 32], sizes = [8, 32], strides = [1, 1]} : vector<8x96xf32> to vector<8x32xf32>
    %453 = arith.mulf %452, %437 : vector<8x32xf32>
    %454 = vector.extract_strided_slice %449 {offsets = [0, 0], sizes = [8, 32], strides = [1, 1]} : vector<8x96xf32> to vector<8x32xf32>
    %455 = arith.mulf %454, %451 : vector<8x32xf32>
    %456 = arith.addf %453, %455 : vector<8x32xf32>
    %457 = vector.extract_strided_slice %449 {offsets = [0, 64], sizes = [8, 32], strides = [1, 1]} : vector<8x96xf32> to vector<8x32xf32>
    %458 = math.tanh %456 : vector<8x32xf32>
    %459 = arith.mulf %457, %458 : vector<8x32xf32>
    %460 = vector.extract_strided_slice %324 {offsets = [56, 0], sizes = [8, 128], strides = [1, 1]} : vector<64x128xf32> to vector<8x128xf32>
    %cst_172 = arith.constant dense<0.000000e+00> : vector<8x128xf32>
    %461 = tpu.matmul %459, %319, %cst_172 {dimension_numbers = #tpu.dot_dimension_numbers<[1], [0], [0], [1], [0, 0, 1, 1], [], []>} : vector<8x32xf32>, vector<32x128xf32>, vector<8x128xf32> -> vector<8x128xf32>
    %462 = arith.addf %460, %461 : vector<8x128xf32>
    %463 = vector.extract_strided_slice %462 {offsets = [0, 0], sizes = [8, 96], strides = [1, 1]} : vector<8x128xf32> to vector<8x96xf32>
    %464 = arith.negf %463 : vector<8x96xf32>
    %465 = math.exp %464 : vector<8x96xf32>
    %cst_173 = arith.constant 1.000000e+00 : f32
    %466 = vector.broadcast %cst_173 : f32 to vector<8x96xf32>
    %467 = arith.addf %466, %465 : vector<8x96xf32>
    %468 = arith.divf %466, %467 : vector<8x96xf32>
    %469 = vector.extract_strided_slice %462 {offsets = [0, 96], sizes = [8, 32], strides = [1, 1]} : vector<8x128xf32> to vector<8x32xf32>
    %470 = math.tanh %469 : vector<8x32xf32>
    %471 = vector.extract_strided_slice %468 {offsets = [0, 32], sizes = [8, 32], strides = [1, 1]} : vector<8x96xf32> to vector<8x32xf32>
    %472 = arith.mulf %471, %456 : vector<8x32xf32>
    %473 = vector.extract_strided_slice %468 {offsets = [0, 0], sizes = [8, 32], strides = [1, 1]} : vector<8x96xf32> to vector<8x32xf32>
    %474 = arith.mulf %473, %470 : vector<8x32xf32>
    %475 = arith.addf %472, %474 : vector<8x32xf32>
    %476 = vector.extract_strided_slice %468 {offsets = [0, 64], sizes = [8, 32], strides = [1, 1]} : vector<8x96xf32> to vector<8x32xf32>
    %477 = math.tanh %475 : vector<8x32xf32>
    %478 = arith.mulf %476, %477 : vector<8x32xf32>
    %c0_174 = arith.constant 0 : index
    %c0_175 = arith.constant 0 : index
    %479 = vector.load %arg2[%c0_174, %c0_175] : memref<8x52xf32, #tpu.memory_space<vmem>>, vector<8x52xf32>
    %c104 = arith.constant 104 : index
    %c0_176 = arith.constant 0 : index
    %480 = vector.load %arg4[%c104, %c0_176] : memref<320x128xf32, #tpu.memory_space<vmem>>, vector<52x32xf32>
    %cst_177 = arith.constant dense<0.000000e+00> : vector<8x32xf32>
    %481 = tpu.matmul %479, %480, %cst_177 {dimension_numbers = #tpu.dot_dimension_numbers<[1], [0], [0], [1], [0, 0, 1, 1], [], []>} : vector<8x52xf32>, vector<52x32xf32>, vector<8x32xf32> -> vector<8x32xf32>
    %c160 = arith.constant 160 : index
    %c0_178 = arith.constant 0 : index
    %482 = vector.load %arg4[%c160, %c0_178] : memref<320x128xf32, #tpu.memory_space<vmem>>, vector<1x32xf32>
    %483 = vector.broadcast %482 : vector<1x32xf32> to vector<8x32xf32>
    %484 = arith.addf %481, %483 : vector<8x32xf32>
    %cst_179 = arith.constant 0.000000e+00 : f32
    %485 = vector.broadcast %cst_179 : f32 to vector<8x32xf32>
    %486 = arith.maximumf %484, %485 : vector<8x32xf32>
    %487 = tpu.concatenate %478, %486 in 1 : vector<8x32xf32>, vector<8x32xf32> -> vector<8x64xf32>
    %c168 = arith.constant 168 : index
    %c0_180 = arith.constant 0 : index
    %488 = vector.load %arg4[%c168, %c0_180] : memref<320x128xf32, #tpu.memory_space<vmem>>, vector<64x32xf32>
    %cst_181 = arith.constant dense<0.000000e+00> : vector<8x32xf32>
    %489 = tpu.matmul %487, %488, %cst_181 {dimension_numbers = #tpu.dot_dimension_numbers<[1], [0], [0], [1], [0, 0, 1, 1], [], []>} : vector<8x64xf32>, vector<64x32xf32>, vector<8x32xf32> -> vector<8x32xf32>
    %490 = arith.addf %317, %489 : vector<8x32xf32>
    %c232_182 = arith.constant 232 : index
    %c0_183 = arith.constant 0 : index
    %491 = vector.load %arg4[%c232_182, %c0_183] : memref<320x128xf32, #tpu.memory_space<vmem>>, vector<1x32xf32>
    %492 = vector.broadcast %491 : vector<1x32xf32> to vector<8x32xf32>
    %493 = arith.addf %490, %492 : vector<8x32xf32>
    %cst_184 = arith.constant 0.000000e+00 : f32
    %494 = vector.broadcast %cst_184 : f32 to vector<8x32xf32>
    %495 = arith.maximumf %493, %494 : vector<8x32xf32>
    %c240_185 = arith.constant 240 : index
    %c0_186 = arith.constant 0 : index
    %496 = vector.load %arg4[%c240_185, %c0_186] : memref<320x128xf32, #tpu.memory_space<vmem>>, vector<32x32xf32>
    %cst_187 = arith.constant dense<0.000000e+00> : vector<8x32xf32>
    %497 = tpu.matmul %495, %496, %cst_187 {dimension_numbers = #tpu.dot_dimension_numbers<[1], [0], [0], [1], [0, 0, 1, 1], [], []>} : vector<8x32xf32>, vector<32x32xf32>, vector<8x32xf32> -> vector<8x32xf32>
    %c272_188 = arith.constant 272 : index
    %c0_189 = arith.constant 0 : index
    %498 = vector.load %arg4[%c272_188, %c0_189] : memref<320x128xf32, #tpu.memory_space<vmem>>, vector<1x32xf32>
    %499 = vector.broadcast %498 : vector<1x32xf32> to vector<8x32xf32>
    %500 = arith.addf %497, %499 : vector<8x32xf32>
    %cst_190 = arith.constant 0.000000e+00 : f32
    %501 = vector.broadcast %cst_190 : f32 to vector<8x32xf32>
    %502 = arith.maximumf %500, %501 : vector<8x32xf32>
    %c280 = arith.constant 280 : index
    %c0_191 = arith.constant 0 : index
    %503 = vector.load %arg4[%c280, %c0_191] : memref<320x128xf32, #tpu.memory_space<vmem>>, vector<32x128xf32>
    %cst_192 = arith.constant dense<0.000000e+00> : vector<8x128xf32>
    %504 = tpu.matmul %502, %503, %cst_192 {dimension_numbers = #tpu.dot_dimension_numbers<[1], [0], [0], [1], [0, 0, 1, 1], [], []>} : vector<8x32xf32>, vector<32x128xf32>, vector<8x128xf32> -> vector<8x128xf32>
    %c312 = arith.constant 312 : index
    %c0_193 = arith.constant 0 : index
    %505 = vector.load %arg4[%c312, %c0_193] : memref<320x128xf32, #tpu.memory_space<vmem>>, vector<1x128xf32>
    %506 = vector.broadcast %505 : vector<1x128xf32> to vector<8x128xf32>
    %507 = arith.addf %504, %506 : vector<8x128xf32>
    %c0_194 = arith.constant 0 : index
    %c0_195 = arith.constant 0 : index
    %508 = vector.load %arg3[%c0_194, %c0_195] : memref<8x128xf32, #tpu.memory_space<vmem>>, vector<8x128xf32>
    %509 = arith.addf %507, %508 : vector<8x128xf32>
    %cst_196 = arith.constant dense<0xFF800000> : vector<8xf32>
    %510 = vector.multi_reduction <maximumf>, %509, %cst_196 [1] : vector<8x128xf32> to vector<8xf32>
    %511 = vector.shape_cast %510 : vector<8xf32> to vector<8x1xf32>
    %512 = vector.broadcast %511 : vector<8x1xf32> to vector<8x128xf32>
    %513 = arith.subf %509, %512 : vector<8x128xf32>
    %514 = math.exp %513 : vector<8x128xf32>
    %cst_197 = arith.constant dense<0.000000e+00> : vector<8xf32>
    %515 = vector.multi_reduction <add>, %514, %cst_197 [1] : vector<8x128xf32> to vector<8xf32>
    %516 = vector.shape_cast %515 : vector<8xf32> to vector<8x1xf32>
    %517 = tpu.reciprocal %516 {approx = true} : vector<8x1xf32> -> vector<8x1xf32>
    %518 = arith.mulf %516, %517 : vector<8x1xf32>
    %cst_198 = arith.constant 2.000000e+00 : f32
    %519 = vector.broadcast %cst_198 : f32 to vector<8x1xf32>
    %520 = arith.subf %519, %518 : vector<8x1xf32>
    %521 = arith.mulf %517, %520 : vector<8x1xf32>
    %522 = vector.broadcast %521 : vector<8x1xf32> to vector<8x128xf32>
    %523 = arith.mulf %514, %522 : vector<8x128xf32>
    %c0_199 = arith.constant 0 : index
    %c0_200 = arith.constant 0 : index
    %524 = vector.load %arg7[%c0_199, %c0_200] : memref<8x128xf32, #tpu.memory_space<vmem>>, vector<8x128xf32>
    tpu.vector_store %arg7[%c0_199, %c0_200], %523 {strides = array<i32>} : memref<8x128xf32, #tpu.memory_space<vmem>>, vector<8x128xf32>,
    return
  }
}

</mosaic_0001>

<bundles_post_ra>
// kernel: policy_forward.1
= control target key start
LH: loop header
LB: loop body
LE: loop exit
PB: predicated region body
PF: predicated region fallthrough
CT: control target
= control target key end

     0   :  { %vm463_vm0 = vcmask 1044480   ;;  %vm333_vm1 = vcmask 80896   ;;  %s11741_s0 = inlined_call_operand.vmem [shape: bf16[680,10], index: 0, kind: input, shape index: {}]   ;;  %s11742_s1 = inlined_call_operand.vmem [shape: f32[64,52], index: 1, kind: input, shape index: {}]   ;;  %s11743_s2 = inlined_call_operand.vmem [shape: f32[8,52], index: 2, kind: input, shape index: {}]   ;;  %s11744_s3 = inlined_call_operand.vmem [shape: f32[8,128], index: 3, kind: input, shape index: {}]   ;;  %s11745_s4 = inlined_call_operand.vmem [shape: f32[320,128], index: 4, kind: input, shape index: {}]   ;;  %s11746_s5 = inlined_call_operand.vmem [shape: bf16[304,64], index: 5, kind: input, shape index: {}]   ;;  %s11747_s6 = inlined_call_operand.vmem [shape: bf16[3328,32], index: 6, kind: input, shape index: {}]   ;;  %s11748_s7 = inlined_call_operand.hbm [shape: f32[8,128], index: 7, kind: output, shape index: {}]  }
   0x1   :  { %v7763_v0 = vld [vmem:[%s11746_s5] sm:$0xf]  ;;  %v9045_v1 = vld [vmem:[%s11746_s5] sm:$0x10] }
   0x2   :  { %v7764_v2 = vor.u32 %v9045_v1, %v7763_v0  ;;  %v9046_v4 = vld [vmem:[%s11741_s0] sm:$0xff] }
   0x4   :  { %v465_v3 = vsel %vm463_vm0, %v7764_v2, 0 }
   0x5   :  { %474 = vmatpush.bf16.msra.mxu0 %v465_v3 }
   0x6   :  { %12 = vsyncpa [#allocation4], 0  ;;  %v9047_v5 = vld [vmem:[%s11741_s0 + $0x8] sm:$0xff]  ;;  %v9048_v6 = vld [vmem:[%s11741_s0 + $0x10] sm:$0xff]  ;;  %vm775_vm2 = vcmask 261120   ;;  %vm4271_vm3 = vcmask 523264  }
   0x7   :  { %v9049_v7 = vld [vmem:[%s11741_s0 + $0x18] sm:$0xff]  ;;  %v9050_v8 = vld [vmem:[%s11741_s0 + $0x20] sm:$0xff]  ;;  %v9051_v9 = vld [vmem:[%s11741_s0 + $0x28] sm:$0xff]  ;;  %vm6874_vm4 = vcmask 1043456   ;;  %vm6849_vm5 = vcmask 424960   ;;  %s9428_s8 = smov 32  }
   0x8   :  { %7765 = vmatmul.msk.bf16.vlgmr.msra.gmra.mxu0 %vm333_vm1, %v9046_v4  ;;  %v9052_v10 = vld [vmem:[%s11741_s0 + $0x30] sm:$0xff]  ;;  %v9053_v12 = vld [vmem:[%s11741_s0 + $0x38] sm:$0xff]  ;;  %v9088_v13 = vld [vmem:[%s11746_s5 + $0x8] sm:$0xff] }
   0x9   :  { %v9089_v11 = vld [vmem:[%s11746_s5 + $0x10] sm:$0xff]  ;;  %v9091_v14 = vld [vmem:[%s11746_s5 + $0x20] sm:$0xff]  ;;  %v9090_v15 = vld [vmem:[%s11746_s5 + $0x18] sm:$0xff] }
   0xa   :  { %1324 = vmatpush.bf16.msra.mxu2 %v9089_v11  ;;  %1083 = vmatpush.bf16.msra.mxu1 %v9091_v14  ;;  %v9097_v16 = vld [vmem:[%s11746_s5 + $0x50] sm:$0xff]  ;;  %v9095_v18 = vld [vmem:[%s11746_s5 + $0x40] sm:$0xff]  ;;  %v9092_v21 = vld [vmem:[%s11746_s5 + $0x28] sm:$0xff] }
   0xb   :  { %v9093_v17 = vld [vmem:[%s11746_s5 + $0x30] sm:$0xff]  ;;  %v9054_v19 = vld [vmem:[%s11741_s0 + $0x40] sm:$0xff]  ;;  %v9055_v25 = vld [vmem:[%s11741_s0 + $0x48] sm:$0xff] }
   0xc   :  { %1652 = vmatpush.bf16.msra.mxu3 %v9093_v17  ;;  %v9056_v35 = vld [vmem:[%s11741_s0 + $0x50] sm:$0xff]  ;;  %v9057_v44 = vld [vmem:[%s11741_s0 + $0x58] sm:$0xff]  ;;  %v9058_v53 = vld [vmem:[%s11741_s0 + $0x60] sm:$0xff] }
   0xd   :  { %v9101_v62 = vld [vmem:[%s11746_s5 + $0x70] sm:$0xff]  ;;  %v9059_v63 = vld [vmem:[%s11741_s0 + $0x68] sm:$0xff]  ;;  %v9061_v17 = vld [vmem:[%s11741_s0 + $0x78] sm:$0xff] }
   0xe   :  { %1325 = vmatpush.bf16.msra.mxu2 %v9088_v13  ;;  %1084 = vmatpush.bf16.msra.mxu1 %v9090_v15 }
   0xf   :  { %3172 = vmatpush.bf16.msrb.mxu0 %v9101_v62 }
  0x10   :  { %1653 = vmatpush.bf16.msra.mxu3 %v9092_v21 }
  0x12   :  { %2412 = vmatpush.bf16.msrb.mxu2 %v9097_v16  ;;  %2032 = vmatpush.bf16.msrb.mxu1 %v9095_v18 }
  0x18   :  { %7766 = vmatmul.msk.bf16.gmra.mxu0 %vm333_vm1, %v9047_v5 }
  0x28   :  { %7767 = vmatmul.msk.bf16.gmra.mxu0 %vm333_vm1, %v9048_v6 }
  0x38   :  { %7768 = vmatmul.msk.bf16.gmra.mxu0 %vm333_vm1, %v9049_v7 }
  0x48   :  { %7769 = vmatmul.msk.bf16.gmra.mxu0 %vm333_vm1, %v9050_v8  ;;  %v9060_v8 = vld [vmem:[%s11741_s0 + $0x70] sm:$0xff] }
  0x58   :  { %7770 = vmatmul.msk.bf16.gmra.mxu0 %vm333_vm1, %v9051_v9 }
  0x68   :  { %7771 = vmatmul.msk.bf16.gmra.mxu0 %vm333_vm1, %v9052_v10 }
  0x78   :  { %7772 = vmatmul.msk.bf16.gmra.mxu0 %vm333_vm1, %v9053_v12 }
  0x85   :  { %v476_v20 = vpop.f32.mrf.mxu0 }
  0x86   :  { %v690_v22 = vmax.f32 %v476_v20, 0.0 }
  0x88   :  { %776 = vst.msk [vmem:[#allocation2] sm:$0xff] %vm775_vm2, %v690_v22  ;;  %7773 = vmatmul.msk.bf16.gmra.mxu0 %vm333_vm1, %v9054_v19 }
  0x8d   :  { %v478_v23 = vpop.f32.mrf.mxu0 }
  0x8e   :  { %v691_v24 = vmax.f32 %v478_v23, 0.0 }
  0x8f   :  { %v861_v28 = vld [vmem:[#allocation2] sm:$0xff] }
  0x90   :  { %777 = vst.msk [vmem:[#allocation2 + $0x8] sm:$0xff] %vm775_vm2, %v691_v24 }
  0x95   :  { %v481_v26 = vpop.f32.mrf.mxu0 }
  0x96   :  { %v692_v27 = vmax.f32 %v481_v26, 0.0  ;;  %v9062_v26 = vld [vmem:[%s11741_s0 + $0x80] sm:$0xff] }
  0x97   :  { %v862_v29 = vld [vmem:[#allocation2 + $0x8] sm:$0xff] }
  0x98   :  { %778 = vst.msk [vmem:[#allocation2 + $0x10] sm:$0xff] %vm775_vm2, %v692_v27  ;;  %7774 = vmatmul.msk.bf16.gmra.mxu0 %vm333_vm1, %v9055_v25  ;;  %v916_v30 = vpack.c.bf16 %v862_v29, %v861_v28 }
  0x9a   :  { %7852 = vmatmul.msk.bf16.vlgmr.msra.gmra.mxu2 %vm775_vm2, %v916_v30 }
  0x9d   :  { %v483_v31 = vpop.f32.mrf.mxu0 }
  0x9e   :  { %v693_v32 = vmax.f32 %v483_v31, 0.0 }
  0x9f   :  { %v863_v33 = vld [vmem:[#allocation2 + $0x10] sm:$0xff] }
  0xa0   :  { %779 = vst.msk [vmem:[#allocation2 + $0x18] sm:$0xff] %vm775_vm2, %v693_v32  ;;  %v949_v34 = vpack.c.bf16 %v863_v33, %v862_v29 }
  0xa2   :  { %7816 = vmatmul.msk.bf16.vlgmr.msra.gmra.mxu1 %vm775_vm2, %v949_v34 }
  0xa5   :  { %v486_v36 = vpop.f32.mrf.mxu0 }
  0xa6   :  { %v694_v37 = vmax.f32 %v486_v36, 0.0 }
  0xa7   :  { %v864_v38 = vld [vmem:[#allocation2 + $0x18] sm:$0xff] }
  0xa8   :  { %780 = vst.msk [vmem:[#allocation2 + $0x20] sm:$0xff] %vm775_vm2, %v694_v37  ;;  %7775 = vmatmul.msk.bf16.gmra.mxu0 %vm333_vm1, %v9056_v35  ;;  %v917_v39 = vpack.c.bf16 %v864_v38, %v863_v33  ;;  %v9063_v35 = vld [vmem:[%s11741_s0 + $0x88] sm:$0xff] }
  0xaa   :  { %7853 = vmatmul.msk.bf16.gmra.mxu2 %vm775_vm2, %v917_v39  ;;  %7888 = vmatmul.msk.bf16.vlgmr.msra.gmra.mxu3 %vm775_vm2, %v917_v39 }
  0xad   :  { %v488_v40 = vpop.f32.mrf.mxu0 }
  0xae   :  { %v695_v41 = vmax.f32 %v488_v40, 0.0 }
  0xaf   :  { %v865_v42 = vld [vmem:[#allocation2 + $0x20] sm:$0xff] }
  0xb0   :  { %781 = vst.msk [vmem:[#allocation2 + $0x28] sm:$0xff] %vm775_vm2, %v695_v41  ;;  %v950_v43 = vpack.c.bf16 %v865_v42, %v864_v38 }
  0xb2   :  { %7817 = vmatmul.msk.bf16.gmra.mxu1 %vm775_vm2, %v950_v43 }
  0xb5   :  { %v491_v45 = vpop.f32.mrf.mxu0 }
  0xb6   :  { %v696_v46 = vmax.f32 %v491_v45, 0.0 }
  0xb7   :  { %v866_v47 = vld [vmem:[#allocation2 + $0x28] sm:$0xff] }
  0xb8   :  { %782 = vst.msk [vmem:[#allocation2 + $0x30] sm:$0xff] %vm775_vm2, %v696_v46  ;;  %7776 = vmatmul.msk.bf16.gmra.mxu0 %vm333_vm1, %v9057_v44  ;;  %v918_v48 = vpack.c.bf16 %v866_v47, %v865_v42 }
  0xba   :  { %7854 = vmatmul.msk.bf16.gmra.mxu2 %vm775_vm2, %v918_v48  ;;  %7889 = vmatmul.msk.bf16.gmra.mxu3 %vm775_vm2, %v918_v48 }
  0xbd   :  { %v493_v49 = vpop.f32.mrf.mxu0 }
  0xbe   :  { %v697_v50 = vmax.f32 %v493_v49, 0.0 }
  0xbf   :  { %v867_v51 = vld [vmem:[#allocation2 + $0x30] sm:$0xff] }
  0xc0   :  { %783 = vst.msk [vmem:[#allocation2 + $0x38] sm:$0xff] %vm775_vm2, %v697_v50  ;;  %v951_v52 = vpack.c.bf16 %v867_v51, %v866_v47  ;;  %v9064_v47 = vld [vmem:[%s11741_s0 + $0x90] sm:$0xff] }
  0xc2   :  { %7818 = vmatmul.msk.bf16.gmra.mxu1 %vm775_vm2, %v951_v52 }
  0xc5   :  { %v496_v54 = vpop.f32.mrf.mxu0 }
  0xc6   :  { %v698_v55 = vmax.f32 %v496_v54, 0.0 }
  0xc7   :  { %v868_v56 = vld [vmem:[#allocation2 + $0x38] sm:$0xff] }
  0xc8   :  { %784 = vst.msk [vmem:[#allocation2 + $0x40] sm:$0xff] %vm775_vm2, %v698_v55  ;;  %7777 = vmatmul.msk.bf16.gmra.mxu0 %vm333_vm1, %v9058_v53  ;;  %v919_v57 = vpack.c.bf16 %v868_v56, %v867_v51 }
  0xca   :  { %7855 = vmatmul.msk.bf16.gmra.mxu2 %vm775_vm2, %v919_v57  ;;  %7890 = vmatmul.msk.bf16.gmra.mxu3 %vm775_vm2, %v919_v57 }
  0xcd   :  { %v498_v58 = vpop.f32.mrf.mxu0 }
  0xce   :  { %v699_v59 = vmax.f32 %v498_v58, 0.0 }
  0xcf   :  { %v869_v60 = vld [vmem:[#allocation2 + $0x40] sm:$0xff] }
  0xd0   :  { %785 = vst.msk [vmem:[#allocation2 + $0x48] sm:$0xff] %vm775_vm2, %v699_v59  ;;  %v952_v61 = vpack.c.bf16 %v869_v60, %v868_v56 }
  0xd2   :  { %7819 = vmatmul.msk.bf16.gmra.mxu1 %vm775_vm2, %v952_v61 }
  0xd5   :  { %v501_v0 = vpop.f32.mrf.mxu0 }
  0xd6   :  { %v700_v1 = vmax.f32 %v501_v0, 0.0  ;;  %v9065_v0 = vld [vmem:[%s11741_s0 + $0x98] sm:$0xff] }
  0xd7   :  { %v870_v2 = vld [vmem:[#allocation2 + $0x48] sm:$0xff] }
  0xd8   :  { %786 = vst.msk [vmem:[#allocation2 + $0x50] sm:$0xff] %vm775_vm2, %v700_v1  ;;  %7778 = vmatmul.msk.bf16.gmra.mxu0 %vm333_vm1, %v9059_v63  ;;  %v920_v3 = vpack.c.bf16 %v870_v2, %v869_v60 }
  0xda   :  { %7856 = vmatmul.msk.bf16.gmra.mxu2 %vm775_vm2, %v920_v3  ;;  %7891 = vmatmul.msk.bf16.gmra.mxu3 %vm775_vm2, %v920_v3 }
  0xdd   :  { %v503_v4 = vpop.f32.mrf.mxu0 }
  0xde   :  { %v701_v5 = vmax.f32 %v503_v4, 0.0 }
  0xdf   :  { %v871_v6 = vld [vmem:[#allocation2 + $0x50] sm:$0xff] }
  0xe0   :  { %787 = vst.msk [vmem:[#allocation2 + $0x58] sm:$0xff] %vm775_vm2, %v701_v5  ;;  %v953_v7 = vpack.c.bf16 %v871_v6, %v870_v2 }
  0xe2   :  { %7820 = vmatmul.msk.bf16.gmra.mxu1 %vm775_vm2, %v953_v7 }
  0xe5   :  { %v506_v9 = vpop.f32.mrf.mxu0 }
  0xe6   :  { %v702_v10 = vmax.f32 %v506_v9, 0.0 }
  0xe7   :  { %v872_v11 = vld [vmem:[#allocation2 + $0x58] sm:$0xff] }
  0xe8   :  { %788 = vst.msk [vmem:[#allocation2 + $0x60] sm:$0xff] %vm775_vm2, %v702_v10  ;;  %7779 = vmatmul.msk.bf16.gmra.mxu0 %vm333_vm1, %v9060_v8  ;;  %v921_v12 = vpack.c.bf16 %v872_v11, %v871_v6 }
  0xea   :  { %7857 = vmatmul.msk.bf16.gmra.mxu2 %vm775_vm2, %v921_v12  ;;  %7892 = vmatmul.msk.bf16.gmra.mxu3 %vm775_vm2, %v921_v12 }
  0xed   :  { %v508_v13 = vpop.f32.mrf.mxu0 }
  0xee   :  { %v703_v14 = vmax.f32 %v508_v13, 0.0 }
  0xef   :  { %v873_v15 = vld [vmem:[#allocation2 + $0x60] sm:$0xff] }
  0xf0   :  { %789 = vst.msk [vmem:[#allocation2 + $0x68] sm:$0xff] %vm775_vm2, %v703_v14  ;;  %v954_v16 = vpack.c.bf16 %v873_v15, %v872_v11 }
  0xf2   :  { %7821 = vmatmul.msk.bf16.gmra.mxu1 %vm775_vm2, %v954_v16 }
  0xf5   :  { %v511_v18 = vpop.f32.mrf.mxu0 }
  0xf6   :  { %v704_v19 = vmax.f32 %v511_v18, 0.0 }
  0xf7   :  { %v874_v20 = vld [vmem:[#allocation2 + $0x68] sm:$0xff] }
  0xf8   :  { %790 = vst.msk [vmem:[#allocation2 + $0x70] sm:$0xff] %vm775_vm2, %v704_v19  ;;  %7780 = vmatmul.msk.bf16.gmra.mxu0 %vm333_vm1, %v9061_v17  ;;  %v922_v21 = vpack.c.bf16 %v874_v20, %v873_v15  ;;  %v9066_v19 = vld [vmem:[%s11741_s0 + $0xa0] sm:$0xff] }
  0xfa   :  { %7858 = vmatmul.msk.bf16.gmra.mxu2 %vm775_vm2, %v922_v21  ;;  %7893 = vmatmul.msk.bf16.gmra.mxu3 %vm775_vm2, %v922_v21 }
  0xfd   :  { %v513_v22 = vpop.f32.mrf.mxu0 }
  0xfe   :  { %v705_v23 = vmax.f32 %v513_v22, 0.0 }
  0xff   :  { %v875_v24 = vld [vmem:[#allocation2 + $0x70] sm:$0xff] }
 0x100   :  { %791 = vst.msk [vmem:[#allocation2 + $0x78] sm:$0xff] %vm775_vm2, %v705_v23  ;;  %v955_v25 = vpack.c.bf16 %v875_v24, %v874_v20 }
 0x102   :  { %7822 = vmatmul.msk.bf16.gmra.mxu1 %vm775_vm2, %v955_v25 }
 0x105   :  { %v516_v27 = vpop.f32.mrf.mxu0 }
 0x106   :  { %v706_v28 = vmax.f32 %v516_v27, 0.0 }
 0x107   :  { %v876_v29 = vld [vmem:[#allocation2 + $0x78] sm:$0xff] }
 0x108   :  { %792 = vst.msk [vmem:[#allocation2 + $0x80] sm:$0xff] %vm775_vm2, %v706_v28  ;;  %7781 = vmatmul.msk.bf16.gmra.mxu0 %vm333_vm1, %v9062_v26  ;;  %v923_v30 = vpack.c.bf16 %v876_v29, %v875_v24 }
 0x10a   :  { %7859 = vmatmul.msk.bf16.gmra.mxu2 %vm775_vm2, %v923_v30  ;;  %7894 = vmatmul.msk.bf16.gmra.mxu3 %vm775_vm2, %v923_v30 }
 0x10d   :  { %v518_v31 = vpop.f32.mrf.mxu0 }
 0x10e   :  { %v707_v32 = vmax.f32 %v518_v31, 0.0 }
 0x10f   :  { %v877_v33 = vld [vmem:[#allocation2 + $0x80] sm:$0xff] }
 0x110   :  { %793 = vst.msk [vmem:[#allocation2 + $0x88] sm:$0xff] %vm775_vm2, %v707_v32  ;;  %v956_v34 = vpack.c.bf16 %v877_v33, %v876_v29 }
 0x112   :  { %7823 = vmatmul.msk.bf16.gmra.mxu1 %vm775_vm2, %v956_v34 }
 0x115   :  { %v521_v36 = vpop.f32.mrf.mxu0 }
 0x116   :  { %v708_v37 = vmax.f32 %v521_v36, 0.0 }
 0x117   :  { %v878_v38 = vld [vmem:[#allocation2 + $0x88] sm:$0xff] }
 0x118   :  { %794 = vst.msk [vmem:[#allocation2 + $0x90] sm:$0xff] %vm775_vm2, %v708_v37  ;;  %7782 = vmatmul.msk.bf16.gmra.mxu0 %vm333_vm1, %v9063_v35  ;;  %v924_v39 = vpack.c.bf16 %v878_v38, %v877_v33 }
 0x11a   :  { %7860 = vmatmul.msk.bf16.gmra.mxu2 %vm775_vm2, %v924_v39  ;;  %7895 = vmatmul.msk.bf16.gmra.mxu3 %vm775_vm2, %v924_v39 }
 0x11d   :  { %v523_v40 = vpop.f32.mrf.mxu0  ;;  %v1327_v41 = vpop.f32.mrf.mxu2 }
 0x11e   :  { %v709_v42 = vmax.f32 %v523_v40, 0.0 }
 0x11f   :  { %v1086_v43 = vpop.f32.mrf.mxu1  ;;  %v879_v44 = vld [vmem:[#allocation2 + $0x90] sm:$0xff] }
 0x120   :  { %795 = vst.msk [vmem:[#allocation2 + $0x98] sm:$0xff] %vm775_vm2, %v709_v42  ;;  %v1328_v45 = vadd.f32 %v1327_v41, %v1086_v43  ;;  %v957_v46 = vpack.c.bf16 %v879_v44, %v878_v38  ;;  %v9067_v38 = vld [vmem:[%s11741_s0 + $0xa8] sm:$0xff] }
 0x122   :  { %7824 = vmatmul.msk.bf16.gmra.mxu1 %vm775_vm2, %v957_v46 }
 0x125   :  { %v526_v48 = vpop.f32.mrf.mxu0  ;;  %v1329_v49 = vpop.f32.mrf.mxu2 }
 0x126   :  { %v710_v50 = vmax.f32 %v526_v48, 0.0 }
 0x127   :  { %v1088_v51 = vpop.f32.mrf.mxu1  ;;  %v880_v52 = vld [vmem:[#allocation2 + $0x98] sm:$0xff] }
 0x128   :  { %796 = vst.msk [vmem:[#allocation2 + $0xa0] sm:$0xff] %vm775_vm2, %v710_v50  ;;  %v1330_v53 = vadd.f32 %v1329_v49, %v1088_v51  ;;  %7783 = vmatmul.msk.bf16.gmra.mxu0 %vm333_vm1, %v9064_v47  ;;  %v925_v54 = vpack.c.bf16 %v880_v52, %v879_v44 }
 0x12a   :  { %7861 = vmatmul.msk.bf16.gmra.mxu2 %vm775_vm2, %v925_v54  ;;  %7896 = vmatmul.msk.bf16.gmra.mxu3 %vm775_vm2, %v925_v54 }
 0x12d   :  { %v528_v55 = vpop.f32.mrf.mxu0  ;;  %v1332_v56 = vpop.f32.mrf.mxu2 }
 0x12e   :  { %v711_v57 = vmax.f32 %v528_v55, 0.0  ;;  %v1655_v58 = vpop.f32.mrf.mxu3 }
 0x12f   :  { %v9629_v59 = vadd.f32 %v1655_v58, %v1328_v45  ;;  %v1091_v60 = vpop.f32.mrf.mxu1  ;;  %v881_v61 = vld [vmem:[#allocation2 + $0xa0] sm:$0xff]  ;;  %v9094_v58 = vld [vmem:[%s11746_s5 + $0x38] sm:$0xff] }
 0x130   :  { %797 = vst.msk [vmem:[#allocation2 + $0xa8] sm:$0xff] %vm775_vm2, %v711_v57  ;;  %v1333_v62 = vadd.f32 %v1332_v56, %v1091_v60  ;;  %v958_v63 = vpack.c.bf16 %v881_v61, %v880_v52  ;;  %v9096_v57 = vld [vmem:[%s11746_s5 + $0x48] sm:$0xff]  ;;  %v9068_v60 = vld [vmem:[%s11741_s0 + $0xb0] sm:$0xff]  ;;  %2033 = vmatpush.bf16.msrb.mxu1 %v9094_v58 }
 0x131   :  { %2413 = vmatpush.bf16.msrb.mxu2 %v9096_v57  ;;  %v9071_v58 = vld [vmem:[%s11741_s0 + $0xc8] sm:$0xff] }
 0x132   :  { %7825 = vmatmul.msk.bf16.gmra.mxu1 %vm775_vm2, %v958_v63 }
 0x135   :  { %v531_v1 = vpop.f32.mrf.mxu0  ;;  %v1334_v2 = vpop.f32.mrf.mxu2 }
 0x136   :  { %v712_v3 = vmax.f32 %v531_v1, 0.0  ;;  %v1657_v4 = vpop.f32.mrf.mxu3 }
 0x137   :  { %v9636_v5 = vadd.f32 %v1657_v4, %v1330_v53  ;;  %v1093_v6 = vpop.f32.mrf.mxu1  ;;  %v882_v7 = vld [vmem:[#allocation2 + $0xa8] sm:$0xff] }
 0x138   :  { %798 = vst.msk [vmem:[#allocation2 + $0xb0] sm:$0xff] %vm775_vm2, %v712_v3  ;;  %v1335_v8 = vadd.f32 %v1334_v2, %v1093_v6  ;;  %7784 = vmatmul.msk.bf16.gmra.mxu0 %vm333_vm1, %v9065_v0  ;;  %v926_v9 = vpack.c.bf16 %v882_v7, %v881_v61 }
 0x13a   :  { %7862 = vmatmul.msk.bf16.gmra.mxu2 %vm775_vm2, %v926_v9  ;;  %7897 = vmatmul.msk.bf16.gmra.mxu3 %vm775_vm2, %v926_v9 }
 0x13d   :  { %v533_v10 = vpop.f32.mrf.mxu0  ;;  %v1337_v11 = vpop.f32.mrf.mxu2 }
 0x13e   :  { %v713_v12 = vmax.f32 %v533_v10, 0.0  ;;  %v1660_v13 = vpop.f32.mrf.mxu3 }
 0x13f   :  { %v9642_v14 = vadd.f32 %v1660_v13, %v1333_v62  ;;  %v1096_v15 = vpop.f32.mrf.mxu1  ;;  %v883_v16 = vld [vmem:[#allocation2 + $0xb0] sm:$0xff] }
 0x140   :  { %799 = vst.msk [vmem:[#allocation2 + $0xb8] sm:$0xff] %vm775_vm2, %v713_v12  ;;  %v1338_v17 = vadd.f32 %v1337_v11, %v1096_v15  ;;  %v959_v18 = vpack.c.bf16 %v883_v16, %v882_v7 }
 0x142   :  { %7826 = vmatmul.msk.bf16.gmra.mxu1 %vm775_vm2, %v959_v18 }
 0x145   :  { %v536_v20 = vpop.f32.mrf.mxu0  ;;  %v1339_v21 = vpop.f32.mrf.mxu2 }
 0x146   :  { %v714_v22 = vmax.f32 %v536_v20, 0.0  ;;  %v1662_v23 = vpop.f32.mrf.mxu3 }
 0x147   :  { %v9649_v24 = vadd.f32 %v1662_v23, %v1335_v8  ;;  %v1098_v25 = vpop.f32.mrf.mxu1  ;;  %v884_v26 = vld [vmem:[#allocation2 + $0xb8] sm:$0xff] }
 0x148   :  { %800 = vst.msk [vmem:[#allocation2 + $0xc0] sm:$0xff] %vm775_vm2, %v714_v22  ;;  %v1340_v27 = vadd.f32 %v1339_v21, %v1098_v25  ;;  %7785 = vmatmul.msk.bf16.gmra.mxu0 %vm333_vm1, %v9066_v19  ;;  %v927_v28 = vpack.c.bf16 %v884_v26, %v883_v16 }
 0x14a   :  { %7863 = vmatmul.msk.bf16.gmra.mxu2 %vm775_vm2, %v927_v28  ;;  %7898 = vmatmul.msk.bf16.gmra.mxu3 %vm775_vm2, %v927_v28 }
 0x14d   :  { %v538_v29 = vpop.f32.mrf.mxu0  ;;  %v1342_v30 = vpop.f32.mrf.mxu2 }
 0x14e   :  { %v715_v31 = vmax.f32 %v538_v29, 0.0  ;;  %v1665_v32 = vpop.f32.mrf.mxu3 }
 0x14f   :  { %v9655_v33 = vadd.f32 %v1665_v32, %v1338_v17  ;;  %v1101_v34 = vpop.f32.mrf.mxu1  ;;  %v885_v35 = vld [vmem:[#allocation2 + $0xc0] sm:$0xff]  ;;  %v9069_v17 = vld [vmem:[%s11741_s0 + $0xb8] sm:$0xff] }
 0x150   :  { %801 = vst.msk [vmem:[#allocation2 + $0xc8] sm:$0xff] %vm775_vm2, %v715_v31  ;;  %v1343_v36 = vadd.f32 %v1342_v30, %v1101_v34  ;;  %v960_v37 = vpack.c.bf16 %v885_v35, %v884_v26 }
 0x152   :  { %7827 = vmatmul.msk.bf16.gmra.mxu1 %vm775_vm2, %v960_v37 }
 0x155   :  { %v541_v39 = vpop.f32.mrf.mxu0  ;;  %v1344_v40 = vpop.f32.mrf.mxu2 }
 0x156   :  { %v716_v41 = vmax.f32 %v541_v39, 0.0  ;;  %v1667_v42 = vpop.f32.mrf.mxu3 }
 0x157   :  { %v886_v43 = vld [vmem:[#allocation2 + $0xc8] sm:$0xff]  ;;  %v9662_v44 = vadd.f32 %v1667_v42, %v1340_v27  ;;  %v1103_v45 = vpop.f32.mrf.mxu1 }
 0x158   :  { %v928_v46 = vpack.c.bf16 %v886_v43, %v885_v35  ;;  %802 = vst.msk [vmem:[#allocation2 + $0xd0] sm:$0xff] %vm775_vm2, %v716_v41  ;;  %v1345_v47 = vadd.f32 %v1344_v40, %v1103_v45  ;;  %7786 = vmatmul.msk.bf16.gmra.mxu0 %vm333_vm1, %v9067_v38  ;;  %v9070_v38 = vld [vmem:[%s11741_s0 + $0xc0] sm:$0xff] }
 0x15a   :  { %7864 = vmatmul.msk.bf16.gmra.mxu2 %vm775_vm2, %v928_v46  ;;  %7899 = vmatmul.msk.bf16.gmra.mxu3 %vm775_vm2, %v928_v46 }
 0x15d   :  { %v543_v48 = vpop.f32.mrf.mxu0  ;;  %v1347_v49 = vpop.f32.mrf.mxu2 }
 0x15e   :  { %v717_v50 = vmax.f32 %v543_v48, 0.0  ;;  %v1670_v51 = vpop.f32.mrf.mxu3 }
 0x15f   :  { %v9668_v52 = vadd.f32 %v1670_v51, %v1343_v36  ;;  %v1106_v53 = vpop.f32.mrf.mxu1  ;;  %v887_v54 = vld [vmem:[#allocation2 + $0xd0] sm:$0xff] }
 0x160   :  { %803 = vst.msk [vmem:[#allocation2 + $0xd8] sm:$0xff] %vm775_vm2, %v717_v50  ;;  %v1348_v55 = vadd.f32 %v1347_v49, %v1106_v53  ;;  %v961_v56 = vpack.c.bf16 %v887_v54, %v886_v43 }
 0x162   :  { %7828 = vmatmul.msk.bf16.gmra.mxu1 %vm775_vm2, %v961_v56 }
 0x165   :  { %v546_v61 = vpop.f32.mrf.mxu0  ;;  %v1349_v62 = vpop.f32.mrf.mxu2 }
 0x166   :  { %v718_v63 = vmax.f32 %v546_v61, 0.0  ;;  %v1672_v0 = vpop.f32.mrf.mxu3 }
 0x167   :  { %v9681_v1 = vadd.f32 %v1672_v0, %v1345_v47  ;;  %v1108_v2 = vpop.f32.mrf.mxu1  ;;  %v888_v3 = vld [vmem:[#allocation2 + $0xd8] sm:$0xff] }
 0x168   :  { %804 = vst.msk [vmem:[#allocation2 + $0xe0] sm:$0xff] %vm775_vm2, %v718_v63  ;;  %v1350_v4 = vadd.f32 %v1349_v62, %v1108_v2  ;;  %7787 = vmatmul.msk.bf16.gmra.mxu0 %vm333_vm1, %v9068_v60  ;;  %v929_v6 = vpack.c.bf16 %v888_v3, %v887_v54 }
 0x16a   :  { %7865 = vmatmul.msk.bf16.gmra.mxu2 %vm775_vm2, %v929_v6  ;;  %7900 = vmatmul.msk.bf16.gmra.mxu3 %vm775_vm2, %v929_v6 }
 0x16d   :  { %v548_v7 = vpop.f32.mrf.mxu0  ;;  %v1352_v8 = vpop.f32.mrf.mxu2 }
 0x16e   :  { %v719_v9 = vmax.f32 %v548_v7, 0.0  ;;  %v1675_v10 = vpop.f32.mrf.mxu3 }
 0x16f   :  { %v9687_v11 = vadd.f32 %v1675_v10, %v1348_v55  ;;  %v1111_v12 = vpop.f32.mrf.mxu1  ;;  %v889_v13 = vld [vmem:[#allocation2 + $0xe0] sm:$0xff] }
 0x170   :  { %805 = vst.msk [vmem:[#allocation2 + $0xe8] sm:$0xff] %vm775_vm2, %v719_v9  ;;  %v1353_v15 = vadd.f32 %v1352_v8, %v1111_v12  ;;  %v962_v16 = vpack.c.bf16 %v889_v13, %v888_v3 }
 0x172   :  { %7829 = vmatmul.msk.bf16.gmra.mxu1 %vm775_vm2, %v962_v16 }
 0x175   :  { %v551_v18 = vpop.f32.mrf.mxu0  ;;  %v1354_v19 = vpop.f32.mrf.mxu2 }
 0x176   :  { %v720_v20 = vmax.f32 %v551_v18, 0.0  ;;  %v1677_v21 = vpop.f32.mrf.mxu3 }
 0x177   :  { %v9694_v22 = vadd.f32 %v1677_v21, %v1350_v4  ;;  %v1113_v23 = vpop.f32.mrf.mxu1  ;;  %v890_v25 = vld [vmem:[#allocation2 + $0xe8] sm:$0xff] }
 0x178   :  { %806 = vst.msk [vmem:[#allocation2 + $0xf0] sm:$0xff] %vm775_vm2, %v720_v20  ;;  %v1355_v26 = vadd.f32 %v1354_v19, %v1113_v23  ;;  %7788 = vmatmul.msk.bf16.gmra.mxu0 %vm333_vm1, %v9069_v17  ;;  %v930_v27 = vpack.c.bf16 %v890_v25, %v889_v13  ;;  %v9072_v17 = vld [vmem:[%s11741_s0 + $0xd0] sm:$0xff] }
 0x17a   :  { %7866 = vmatmul.msk.bf16.gmra.mxu2 %vm775_vm2, %v930_v27  ;;  %7901 = vmatmul.msk.bf16.gmra.mxu3 %vm775_vm2, %v930_v27 }
 0x17d   :  { %v553_v28 = vpop.f32.mrf.mxu0  ;;  %v1357_v29 = vpop.f32.mrf.mxu2 }
 0x17e   :  { %v721_v30 = vmax.f32 %v553_v28, 0.0  ;;  %v1680_v31 = vpop.f32.mrf.mxu3 }
 0x17f   :  { %v9700_v32 = vadd.f32 %v1680_v31, %v1353_v15  ;;  %v1116_v34 = vpop.f32.mrf.mxu1  ;;  %v891_v35 = vld [vmem:[#allocation2 + $0xf0] sm:$0xff] }
 0x180   :  { %807 = vst.msk [vmem:[#allocation2 + $0xf8] sm:$0xff] %vm775_vm2, %v721_v30  ;;  %v1358_v36 = vadd.f32 %v1357_v29, %v1116_v34  ;;  %v963_v37 = vpack.c.bf16 %v891_v35, %v890_v25 }
 0x182   :  { %7830 = vmatmul.msk.bf16.gmra.mxu1 %vm775_vm2, %v963_v37 }
 0x185   :  { %v556_v39 = vpop.f32.mrf.mxu0  ;;  %v1359_v40 = vpop.f32.mrf.mxu2 }
 0x186   :  { %v722_v41 = vmax.f32 %v556_v39, 0.0  ;;  %v1682_v42 = vpop.f32.mrf.mxu3  ;;  %v9073_v40 = vld [vmem:[%s11741_s0 + $0xd8] sm:$0xff] }
 0x187   :  { %v9707_v43 = vadd.f32 %v1682_v42, %v1355_v26  ;;  %v1118_v45 = vpop.f32.mrf.mxu1  ;;  %v892_v46 = vld [vmem:[#allocation2 + $0xf8] sm:$0xff] }
 0x188   :  { %808 = vst.msk [vmem:[#allocation2 + $0x100] sm:$0xff] %vm775_vm2, %v722_v41  ;;  %7789 = vmatmul.msk.bf16.gmra.mxu0 %vm333_vm1, %v9070_v38  ;;  %v931_v47 = vpack.c.bf16 %v892_v46, %v891_v35 }
 0x18a   :  { %7867 = vmatmul.msk.bf16.gmra.mxu2 %vm775_vm2, %v931_v47  ;;  %7902 = vmatmul.msk.bf16.gmra.mxu3 %vm775_vm2, %v931_v47 }
 0x18d   :  { %v558_v48 = vpop.f32.mrf.mxu0  ;;  %v1361_v49 = vpop.f32.mrf.mxu2 }
 0x18e   :  { %v723_v50 = vmax.f32 %v558_v48, 0.0  ;;  %v1685_v51 = vpop.f32.mrf.mxu3 }
 0x18f   :  { %v9713_v53 = vadd.f32 %v1685_v51, %v1358_v36  ;;  %v1120_v54 = vpop.f32.mrf.mxu1  ;;  %v893_v55 = vld [vmem:[#allocation2 + $0x100] sm:$0xff] }
 0x190   :  { %809 = vst.msk [vmem:[#allocation2 + $0x108] sm:$0xff] %vm775_vm2, %v723_v50  ;;  %v1362_v56 = vadd.f32 %v1361_v49, %v1120_v54  ;;  %v964_v57 = vpack.c.bf16 %v893_v55, %v892_v46 }
 0x192   :  { %7831 = vmatmul.msk.bf16.gmra.mxu1 %vm775_vm2, %v964_v57 }
 0x195   :  { %v561_v60 = vpop.f32.mrf.mxu0  ;;  %v1363_v61 = vpop.f32.mrf.mxu2 }
 0x196   :  { %v724_v62 = vmax.f32 %v561_v60, 0.0  ;;  %v1687_v63 = vpop.f32.mrf.mxu3 }
 0x197   :  { %v1122_v0 = vpop.f32.mrf.mxu1  ;;  %v894_v2 = vld [vmem:[#allocation2 + $0x108] sm:$0xff] }
 0x198   :  { %810 = vst.msk [vmem:[#allocation2 + $0x110] sm:$0xff] %vm775_vm2, %v724_v62  ;;  %v1364_v3 = vadd.f32 %v1363_v61, %v1122_v0  ;;  %7790 = vmatmul.msk.bf16.gmra.mxu0 %vm333_vm1, %v9071_v58  ;;  %v932_v4 = vpack.c.bf16 %v894_v2, %v893_v55  ;;  %v9074_v0 = vld [vmem:[%s11741_s0 + $0xe0] sm:$0xff] }
 0x19a   :  { %7868 = vmatmul.msk.bf16.gmra.mxu2 %vm775_vm2, %v932_v4  ;;  %7903 = vmatmul.msk.bf16.gmra.mxu3 %vm775_vm2, %v932_v4 }
 0x19d   :  { %v563_v6 = vpop.f32.mrf.mxu0  ;;  %v1366_v7 = vpop.f32.mrf.mxu2 }
 0x19e   :  { %v725_v8 = vmax.f32 %v563_v6, 0.0  ;;  %v1689_v9 = vpop.f32.mrf.mxu3 }
 0x19f   :  { %v9724_v10 = vadd.f32 %v1689_v9, %v1362_v56  ;;  %v1125_v12 = vpop.f32.mrf.mxu1  ;;  %v895_v13 = vld [vmem:[#allocation2 + $0x110] sm:$0xff] }
 0x1a0   :  { %811 = vst.msk [vmem:[#allocation2 + $0x118] sm:$0xff] %vm775_vm2, %v725_v8  ;;  %v1367_v15 = vadd.f32 %v1366_v7, %v1125_v12  ;;  %v965_v16 = vpack.c.bf16 %v895_v13, %v894_v2 }
 0x1a2   :  { %7832 = vmatmul.msk.bf16.gmra.mxu1 %vm775_vm2, %v965_v16 }
 0x1a5   :  { %v566_v18 = vpop.f32.mrf.mxu0  ;;  %v1368_v19 = vpop.f32.mrf.mxu2 }
 0x1a6   :  { %v726_v20 = vmax.f32 %v566_v18, 0.0  ;;  %v1691_v21 = vpop.f32.mrf.mxu3 }
 0x1a7   :  { %v9731_v23 = vadd.f32 %v1691_v21, %v1364_v3  ;;  %v1127_v25 = vpop.f32.mrf.mxu1  ;;  %v896_v26 = vld [vmem:[#allocation2 + $0x118] sm:$0xff] }
 0x1a8   :  { %812 = vst.msk [vmem:[#allocation2 + $0x120] sm:$0xff] %vm775_vm2, %v726_v20  ;;  %v1369_v27 = vadd.f32 %v1368_v19, %v1127_v25  ;;  %7791 = vmatmul.msk.bf16.gmra.mxu0 %vm333_vm1, %v9072_v17  ;;  %v933_v28 = vpack.c.bf16 %v896_v26, %v895_v13 }
 0x1aa   :  { %7869 = vmatmul.msk.bf16.gmra.mxu2 %vm775_vm2, %v933_v28  ;;  %7904 = vmatmul.msk.bf16.gmra.mxu3 %vm775_vm2, %v933_v28 }
 0x1ad   :  { %v568_v29 = vpop.f32.mrf.mxu0  ;;  %v1371_v30 = vpop.f32.mrf.mxu2 }
 0x1ae   :  { %v727_v31 = vmax.f32 %v568_v29, 0.0  ;;  %v1694_v34 = vpop.f32.mrf.mxu3 }
 0x1af   :  { %v9737_v35 = vadd.f32 %v1694_v34, %v1367_v15  ;;  %v1130_v36 = vpop.f32.mrf.mxu1  ;;  %v897_v37 = vld [vmem:[#allocation2 + $0x120] sm:$0xff] }
 0x1b0   :  { %813 = vst.msk [vmem:[#allocation2 + $0x128] sm:$0xff] %vm775_vm2, %v727_v31  ;;  %v1372_v38 = vadd.f32 %v1371_v30, %v1130_v36  ;;  %v966_v39 = vpack.c.bf16 %v897_v37, %v896_v26 }
 0x1b2   :  { %7833 = vmatmul.msk.bf16.gmra.mxu1 %vm775_vm2, %v966_v39 }
 0x1b5   :  { %v571_v41 = vpop.f32.mrf.mxu0  ;;  %v1373_v42 = vpop.f32.mrf.mxu2 }
 0x1b6   :  { %v728_v45 = vmax.f32 %v571_v41, 0.0  ;;  %v1696_v46 = vpop.f32.mrf.mxu3 }
 0x1b7   :  { %v9744_v47 = vadd.f32 %v1696_v46, %v1369_v27  ;;  %v1132_v48 = vpop.f32.mrf.mxu1  ;;  %v898_v49 = vld [vmem:[#allocation2 + $0x128] sm:$0xff] }
 0x1b8   :  { %814 = vst.msk [vmem:[#allocation2 + $0x130] sm:$0xff] %vm775_vm2, %v728_v45  ;;  %v1374_v50 = vadd.f32 %v1373_v42, %v1132_v48  ;;  %7792 = vmatmul.msk.bf16.gmra.mxu0 %vm333_vm1, %v9073_v40  ;;  %v934_v51 = vpack.c.bf16 %v898_v49, %v897_v37  ;;  %v9075_v27 = vld [vmem:[%s11741_s0 + $0xe8] sm:$0xff] }
 0x1ba   :  { %7870 = vmatmul.msk.bf16.gmra.mxu2 %vm775_vm2, %v934_v51  ;;  %7905 = vmatmul.msk.bf16.gmra.mxu3 %vm775_vm2, %v934_v51 }
 0x1bd   :  { %v573_v54 = vpop.f32.mrf.mxu0  ;;  %v1376_v55 = vpop.f32.mrf.mxu2 }
 0x1be   :  { %v729_v56 = vmax.f32 %v573_v54, 0.0  ;;  %v1699_v57 = vpop.f32.mrf.mxu3  ;;  %v9076_v54 = vld [vmem:[%s11741_s0 + $0xf0] sm:$0xff] }
 0x1bf   :  { %v9750_v58 = vadd.f32 %v1699_v57, %v1372_v38  ;;  %v1135_v60 = vpop.f32.mrf.mxu1  ;;  %v899_v61 = vld [vmem:[#allocation2 + $0x130] sm:$0xff] }
 0x1c0   :  { %815 = vst.msk [vmem:[#allocation2 + $0x138] sm:$0xff] %vm775_vm2, %v729_v56  ;;  %v1377_v62 = vadd.f32 %v1376_v55, %v1135_v60  ;;  %v967_v63 = vpack.c.bf16 %v899_v61, %v898_v49 }
 0x1c2   :  { %7834 = vmatmul.msk.bf16.gmra.mxu1 %vm775_vm2, %v967_v63 }
 0x1c5   :  { %v576_v2 = vpop.f32.mrf.mxu0  ;;  %v1378_v3 = vpop.f32.mrf.mxu2 }
 0x1c6   :  { %v730_v4 = vmax.f32 %v576_v2, 0.0  ;;  %v1701_v6 = vpop.f32.mrf.mxu3 }
 0x1c7   :  { %v9757_v7 = vadd.f32 %v1701_v6, %v1374_v50  ;;  %v1137_v8 = vpop.f32.mrf.mxu1  ;;  %v900_v9 = vld [vmem:[#allocation2 + $0x138] sm:$0xff] }
 0x1c8   :  { %816 = vst.msk [vmem:[#allocation2 + $0x140] sm:$0xff] %vm775_vm2, %v730_v4  ;;  %v1379_v12 = vadd.f32 %v1378_v3, %v1137_v8  ;;  %7793 = vmatmul.msk.bf16.gmra.mxu0 %vm333_vm1, %v9074_v0  ;;  %v935_v13 = vpack.c.bf16 %v900_v9, %v899_v61 }
 0x1ca   :  { %7871 = vmatmul.msk.bf16.gmra.mxu2 %vm775_vm2, %v935_v13  ;;  %7906 = vmatmul.msk.bf16.gmra.mxu3 %vm775_vm2, %v935_v13 }
 0x1cd   :  { %v578_v15 = vpop.f32.mrf.mxu0  ;;  %v1381_v16 = vpop.f32.mrf.mxu2 }
 0x1ce   :  { %v731_v17 = vmax.f32 %v578_v15, 0.0  ;;  %v1704_v18 = vpop.f32.mrf.mxu3 }
 0x1cf   :  { %v9763_v19 = vadd.f32 %v1704_v18, %v1377_v62  ;;  %v1140_v20 = vpop.f32.mrf.mxu1  ;;  %v901_v21 = vld [vmem:[#allocation2 + $0x140] sm:$0xff] }
 0x1d0   :  { %817 = vst.msk [vmem:[#allocation2 + $0x148] sm:$0xff] %vm775_vm2, %v731_v17  ;;  %v1382_v25 = vadd.f32 %v1381_v16, %v1140_v20  ;;  %v968_v26 = vpack.c.bf16 %v901_v21, %v900_v9  ;;  %v9077_v17 = vld [vmem:[%s11741_s0 + $0xf8] sm:$0xff] }
 0x1d2   :  { %7835 = vmatmul.msk.bf16.gmra.mxu1 %vm775_vm2, %v968_v26 }
 0x1d5   :  { %v581_v28 = vpop.f32.mrf.mxu0  ;;  %v1383_v29 = vpop.f32.mrf.mxu2 }
 0x1d6   :  { %v732_v30 = vmax.f32 %v581_v28, 0.0  ;;  %v1706_v31 = vpop.f32.mrf.mxu3 }
 0x1d7   :  { %v9770_v34 = vadd.f32 %v1706_v31, %v1379_v12  ;;  %v1142_v36 = vpop.f32.mrf.mxu1  ;;  %v902_v37 = vld [vmem:[#allocation2 + $0x148] sm:$0xff] }
 0x1d8   :  { %818 = vst.msk [vmem:[#allocation2 + $0x150] sm:$0xff] %vm775_vm2, %v732_v30  ;;  %v1384_v38 = vadd.f32 %v1383_v29, %v1142_v36  ;;  %7794 = vmatmul.msk.bf16.gmra.mxu0 %vm333_vm1, %v9075_v27  ;;  %v936_v39 = vpack.c.bf16 %v902_v37, %v901_v21 }
 0x1da   :  { %7872 = vmatmul.msk.bf16.gmra.mxu2 %vm775_vm2, %v936_v39  ;;  %7907 = vmatmul.msk.bf16.gmra.mxu3 %vm775_vm2, %v936_v39 }
 0x1dd   :  { %v583_v40 = vpop.f32.mrf.mxu0  ;;  %v1386_v41 = vpop.f32.mrf.mxu2 }
 0x1de   :  { %v733_v42 = vmax.f32 %v583_v40, 0.0  ;;  %v1709_v45 = vpop.f32.mrf.mxu3 }
 0x1df   :  { %v9776_v46 = vadd.f32 %v1709_v45, %v1382_v25  ;;  %v1145_v48 = vpop.f32.mrf.mxu1  ;;  %v903_v49 = vld [vmem:[#allocation2 + $0x150] sm:$0xff]  ;;  %v9078_v45 = vld [vmem:[%s11741_s0 + $0x100] sm:$0xff] }
 0x1e0   :  { %819 = vst.msk [vmem:[#allocation2 + $0x158] sm:$0xff] %vm775_vm2, %v733_v42  ;;  %v1387_v50 = vadd.f32 %v1386_v41, %v1145_v48  ;;  %v969_v51 = vpack.c.bf16 %v903_v49, %v902_v37 }
 0x1e2   :  { %7836 = vmatmul.msk.bf16.gmra.mxu1 %vm775_vm2, %v969_v51 }
 0x1e5   :  { %v586_v55 = vpop.f32.mrf.mxu0  ;;  %v1388_v56 = vpop.f32.mrf.mxu2 }
 0x1e6   :  { %v734_v57 = vmax.f32 %v586_v55, 0.0  ;;  %v1711_v60 = vpop.f32.mrf.mxu3 }
 0x1e7   :  { %v9783_v61 = vadd.f32 %v1711_v60, %v1384_v38  ;;  %v1147_v62 = vpop.f32.mrf.mxu1  ;;  %v904_v63 = vld [vmem:[#allocation2 + $0x158] sm:$0xff] }
 0x1e8   :  { %820 = vst.msk [vmem:[#allocation2 + $0x160] sm:$0xff] %vm775_vm2, %v734_v57  ;;  %v1389_v0 = vadd.f32 %v1388_v56, %v1147_v62  ;;  %7795 = vmatmul.msk.bf16.gmra.mxu0 %vm333_vm1, %v9076_v54  ;;  %v937_v2 = vpack.c.bf16 %v904_v63, %v903_v49 }
 0x1ea   :  { %7873 = vmatmul.msk.bf16.gmra.mxu2 %vm775_vm2, %v937_v2  ;;  %7908 = vmatmul.msk.bf16.gmra.mxu3 %vm775_vm2, %v937_v2 }
 0x1ed   :  { %v588_v3 = vpop.f32.mrf.mxu0  ;;  %v1391_v4 = vpop.f32.mrf.mxu2 }
 0x1ee   :  { %v735_v6 = vmax.f32 %v588_v3, 0.0  ;;  %v1714_v8 = vpop.f32.mrf.mxu3 }
 0x1ef   :  { %v9789_v9 = vadd.f32 %v1714_v8, %v1387_v50  ;;  %v1150_v12 = vpop.f32.mrf.mxu1  ;;  %v905_v13 = vld [vmem:[#allocation2 + $0x160] sm:$0xff] }
 0x1f0   :  { %821 = vst.msk [vmem:[#allocation2 + $0x168] sm:$0xff] %vm775_vm2, %v735_v6  ;;  %v1392_v15 = vadd.f32 %v1391_v4, %v1150_v12  ;;  %v970_v16 = vpack.c.bf16 %v905_v13, %v904_v63  ;;  %v9079_v12 = vld [vmem:[%s11741_s0 + $0x108] sm:$0xff] }
 0x1f2   :  { %7837 = vmatmul.msk.bf16.gmra.mxu1 %vm775_vm2, %v970_v16 }
 0x1f5   :  { %v591_v18 = vpop.f32.mrf.mxu0  ;;  %v1393_v20 = vpop.f32.mrf.mxu2 }
 0x1f6   :  { %v736_v21 = vmax.f32 %v591_v18, 0.0  ;;  %v1716_v25 = vpop.f32.mrf.mxu3 }
 0x1f7   :  { %v9796_v26 = vadd.f32 %v1716_v25, %v1389_v0  ;;  %v1152_v27 = vpop.f32.mrf.mxu1  ;;  %v906_v28 = vld [vmem:[#allocation2 + $0x168] sm:$0xff] }
 0x1f8   :  { %822 = vst.msk [vmem:[#allocation2 + $0x170] sm:$0xff] %vm775_vm2, %v736_v21  ;;  %7796 = vmatmul.msk.bf16.gmra.mxu0 %vm333_vm1, %v9077_v17  ;;  %v938_v29 = vpack.c.bf16 %v906_v28, %v905_v13 }
 0x1fa   :  { %7874 = vmatmul.msk.bf16.gmra.mxu2 %vm775_vm2, %v938_v29  ;;  %7909 = vmatmul.msk.bf16.gmra.mxu3 %vm775_vm2, %v938_v29 }
 0x1fd   :  { %v593_v30 = vpop.f32.mrf.mxu0  ;;  %v1395_v31 = vpop.f32.mrf.mxu2 }
 0x1fe   :  { %v737_v36 = vmax.f32 %v593_v30, 0.0  ;;  %v1719_v37 = vpop.f32.mrf.mxu3 }
 0x1ff   :  { %v9802_v38 = vadd.f32 %v1719_v37, %v1392_v15  ;;  %v1154_v39 = vpop.f32.mrf.mxu1  ;;  %v907_v40 = vld [vmem:[#allocation2 + $0x170] sm:$0xff] }
 0x200   :  { %823 = vst.msk [vmem:[#allocation2 + $0x178] sm:$0xff] %vm775_vm2, %v737_v36  ;;  %v1396_v41 = vadd.f32 %v1395_v31, %v1154_v39  ;;  %v971_v42 = vpack.c.bf16 %v907_v40, %v906_v28 }
 0x202   :  { %7838 = vmatmul.msk.bf16.gmra.mxu1 %vm775_vm2, %v971_v42  ;;  %v9080_v42 = vld [vmem:[%s11741_s0 + $0x110] sm:$0xff] }
 0x205   :  { %v596_v48 = vpop.f32.mrf.mxu0  ;;  %v1397_v49 = vpop.f32.mrf.mxu2 }
 0x206   :  { %v738_v50 = vmax.f32 %v596_v48, 0.0  ;;  %v1721_v51 = vpop.f32.mrf.mxu3 }
 0x207   :  { %v1156_v54 = vpop.f32.mrf.mxu1  ;;  %v908_v55 = vld [vmem:[#allocation2 + $0x178] sm:$0xff] }
 0x208   :  { %824 = vst.msk [vmem:[#allocation2 + $0x180] sm:$0xff] %vm775_vm2, %v738_v50  ;;  %v1398_v56 = vadd.f32 %v1397_v49, %v1156_v54  ;;  %7797 = vmatmul.msk.bf16.gmra.mxu0 %vm333_vm1, %v9078_v45  ;;  %v939_v57 = vpack.c.bf16 %v908_v55, %v907_v40 }
 0x20a   :  { %7875 = vmatmul.msk.bf16.gmra.mxu2 %vm775_vm2, %v939_v57  ;;  %7910 = vmatmul.msk.bf16.gmra.mxu3 %vm775_vm2, %v939_v57 }
 0x20d   :  { %v598_v60 = vpop.f32.mrf.mxu0  ;;  %v1400_v62 = vpop.f32.mrf.mxu2 }
 0x20e   :  { %v739_v63 = vmax.f32 %v598_v60, 0.0  ;;  %v1723_v0 = vpop.f32.mrf.mxu3  ;;  %v9100_v60 = vld [vmem:[%s11746_s5 + $0x68] sm:$0xff] }
 0x20f   :  { %v9813_v2 = vadd.f32 %v1723_v0, %v1396_v41  ;;  %v1159_v3 = vpop.f32.mrf.mxu1  ;;  %v909_v4 = vld [vmem:[#allocation2 + $0x180] sm:$0xff]  ;;  %3173 = vmatpush.bf16.msrb.mxu0 %v9100_v60 }
 0x210   :  { %825 = vst.msk [vmem:[#allocation2 + $0x188] sm:$0xff] %vm775_vm2, %v739_v63  ;;  %v1401_v6 = vadd.f32 %v1400_v62, %v1159_v3  ;;  %v972_v8 = vpack.c.bf16 %v909_v4, %v908_v55 }
 0x212   :  { %7839 = vmatmul.msk.bf16.gmra.mxu1 %vm775_vm2, %v972_v8 }
 0x215   :  { %v601_v13 = vpop.f32.mrf.mxu0  ;;  %v1402_v15 = vpop.f32.mrf.mxu2 }
 0x216   :  { %v740_v16 = vmax.f32 %v601_v13, 0.0  ;;  %v1725_v17 = vpop.f32.mrf.mxu3 }
 0x217   :  { %v9820_v18 = vadd.f32 %v1725_v17, %v1398_v56  ;;  %v1161_v20 = vpop.f32.mrf.mxu1  ;;  %v910_v21 = vld [vmem:[#allocation2 + $0x188] sm:$0xff] }
 0x218   :  { %826 = vst.msk [vmem:[#allocation2 + $0x190] sm:$0xff] %vm775_vm2, %v740_v16  ;;  %v1403_v25 = vadd.f32 %v1402_v15, %v1161_v20  ;;  %7798 = vmatmul.msk.bf16.gmra.mxu0 %vm333_vm1, %v9079_v12  ;;  %v940_v27 = vpack.c.bf16 %v910_v21, %v909_v4  ;;  %v9081_v15 = vld [vmem:[%s11741_s0 + $0x118] sm:$0xff] }
 0x21a   :  { %7876 = vmatmul.msk.bf16.gmra.mxu2 %vm775_vm2, %v940_v27  ;;  %7911 = vmatmul.msk.bf16.gmra.mxu3 %vm775_vm2, %v940_v27 }
 0x21d   :  { %v603_v28 = vpop.f32.mrf.mxu0  ;;  %v1405_v29 = vpop.f32.mrf.mxu2 }
 0x21e   :  { %v741_v30 = vmax.f32 %v603_v28, 0.0  ;;  %v1728_v31 = vpop.f32.mrf.mxu3 }
 0x21f   :  { %v9826_v36 = vadd.f32 %v1728_v31, %v1401_v6  ;;  %v1164_v37 = vpop.f32.mrf.mxu1  ;;  %v911_v39 = vld [vmem:[#allocation2 + $0x190] sm:$0xff]  ;;  %v9099_v31 = vld [vmem:[%s11746_s5 + $0x60] sm:$0xff] }
 0x220   :  { %827 = vst.msk [vmem:[#allocation2 + $0x198] sm:$0xff] %vm775_vm2, %v741_v30  ;;  %v1406_v40 = vadd.f32 %v1405_v29, %v1164_v37  ;;  %v973_v41 = vpack.c.bf16 %v911_v39, %v910_v21  ;;  %2792 = vmatpush.bf16.msrb.mxu3 %v9099_v31 }
 0x222   :  { %7840 = vmatmul.msk.bf16.gmra.mxu1 %vm775_vm2, %v973_v41 }
 0x225   :  { %v606_v45 = vpop.f32.mrf.mxu0  ;;  %v1407_v48 = vpop.f32.mrf.mxu2 }
 0x226   :  { %v742_v49 = vmax.f32 %v606_v45, 0.0  ;;  %v1730_v50 = vpop.f32.mrf.mxu3 }
 0x227   :  { %v9833_v51 = vadd.f32 %v1730_v50, %v1403_v25  ;;  %v1166_v54 = vpop.f32.mrf.mxu1  ;;  %v912_v55 = vld [vmem:[#allocation2 + $0x198] sm:$0xff] }
 0x228   :  { %828 = vst.msk [vmem:[#allocation2 + $0x1a0] sm:$0xff] %vm775_vm2, %v742_v49  ;;  %v1408_v56 = vadd.f32 %v1407_v48, %v1166_v54  ;;  %7799 = vmatmul.msk.bf16.gmra.mxu0 %vm333_vm1, %v9080_v42  ;;  %v941_v57 = vpack.c.bf16 %v912_v55, %v911_v39  ;;  %v9105_v54 = vld [vmem:[%s11746_s5 + $0x90] sm:$0xff] }
 0x229   :  { %3932 = vmatpush.bf16.msra.mxu2 %v9105_v54 }
 0x22a   :  { %7877 = vmatmul.msk.bf16.gmra.mxu2 %vm775_vm2, %v941_v57  ;;  %7912 = vmatmul.msk.bf16.gmra.mxu3 %vm775_vm2, %v941_v57 }
 0x22d   :  { %v608_v62 = vpop.f32.mrf.mxu0  ;;  %v1410_v63 = vpop.f32.mrf.mxu2 }
 0x22e   :  { %v743_v0 = vmax.f32 %v608_v62, 0.0  ;;  %v1733_v3 = vpop.f32.mrf.mxu3 }
 0x22f   :  { %v9842_v4 = vadd.f32 %v1733_v3, %v1406_v40  ;;  %v1169_v6 = vpop.f32.mrf.mxu1  ;;  %v913_v8 = vld [vmem:[#allocation2 + $0x1a0] sm:$0xff] }
 0x230   :  { %829 = vst.msk [vmem:[#allocation2 + $0x1a8] sm:$0xff] %vm775_vm2, %v743_v0  ;;  %v1411_v12 = vadd.f32 %v1410_v63, %v1169_v6  ;;  %v974_v13 = vpack.c.bf16 %v913_v8, %v912_v55  ;;  %v9103_v55 = vld [vmem:[%s11746_s5 + $0x80] sm:$0xff]  ;;  %v9098_v0 = vld [vmem:[%s11746_s5 + $0x58] sm:$0xff] }
 0x231   :  { %3552 = vmatpush.bf16.msra.mxu1 %v9103_v55  ;;  %2793 = vmatpush.bf16.msrb.mxu3 %v9098_v0  ;;  %v2223_v55 = vld [vmem:[#allocation2 + $0x78] sm:$0xff] }
 0x232   :  { %7841 = vmatmul.msk.bf16.gmra.mxu1 %vm775_vm2, %v974_v13 }
 0x235   :  { %v611_v16 = vpop.f32.mrf.mxu0  ;;  %v1412_v17 = vpop.f32.mrf.mxu2 }
 0x236   :  { %v744_v20 = vmax.f32 %v611_v16, 0.0  ;;  %v1735_v21 = vpop.f32.mrf.mxu3 }
 0x237   :  { %v9849_v25 = vadd.f32 %v1735_v21, %v1408_v56  ;;  %v1171_v27 = vpop.f32.mrf.mxu1  ;;  %v914_v28 = vld [vmem:[#allocation2 + $0x1a8] sm:$0xff]  ;;  %v9082_v56 = vld [vmem:[%s11741_s0 + $0x120] sm:$0xff] }
 0x238   :  { %830 = vst.msk [vmem:[#allocation2 + $0x1b0] sm:$0xff] %vm775_vm2, %v744_v20  ;;  %v1413_v29 = vadd.f32 %v1412_v17, %v1171_v27  ;;  %7800 = vmatmul.msk.bf16.gmra.mxu0 %vm333_vm1, %v9081_v15  ;;  %v942_v30 = vpack.c.bf16 %v914_v28, %v913_v8 }
 0x23a   :  { %7878 = vmatmul.msk.bf16.gmra.mxu2 %vm775_vm2, %v942_v30  ;;  %7913 = vmatmul.msk.bf16.gmra.mxu3 %vm775_vm2, %v942_v30 }
 0x23d   :  { %v613_v37 = vpop.f32.mrf.mxu0  ;;  %v1415_v39 = vpop.f32.mrf.mxu2 }
 0x23e   :  { %v745_v40 = vmax.f32 %v613_v37, 0.0  ;;  %v1738_v41 = vpop.f32.mrf.mxu3  ;;  %v9083_v37 = vld [vmem:[%s11741_s0 + $0x128] sm:$0xff] }
 0x23f   :  { %v9858_v42 = vadd.f32 %v1738_v41, %v1411_v12  ;;  %v1174_v45 = vpop.f32.mrf.mxu1  ;;  %v915_v48 = vld [vmem:[#allocation2 + $0x1b0] sm:$0xff]  ;;  %v2224_v41 = vld [vmem:[#allocation2 + $0x80] sm:$0xff] }
 0x240   :  { %831 = vst.msk [vmem:[#allocation2 + $0x1b8] sm:$0xff] %vm775_vm2, %v745_v40  ;;  %v1416_v49 = vadd.f32 %v1415_v39, %v1174_v45  ;;  %v975_v50 = vpack.c.bf16 %v915_v48, %v914_v28  ;;  %v943_v13 = vpack.c.bf16 %v915_v48, %v915_v48 }
 0x242   :  { %7842 = vmatmul.msk.bf16.gmra.mxu1 %vm775_vm2, %v975_v50 }
 0x245   :  { %v616_v57 = vpop.f32.mrf.mxu0  ;;  %v1417_v60 = vpop.f32.mrf.mxu2 }
 0x246   :  { %v746_v62 = vmax.f32 %v616_v57, 0.0  ;;  %v1740_v63 = vpop.f32.mrf.mxu3  ;;  %v2278_v57 = vpack.c.bf16 %v2224_v41, %v2223_v55 }
 0x247   :  { %v9874_v3 = vadd.f32 %v1740_v63, %v1413_v29  ;;  %v1176_v6 = vpop.f32.mrf.mxu1  ;;  %v1516_v8 = vld [vmem:[#allocation2 + $0x1b8] sm:$0xff] }
 0x248   :  { %832 = vst.msk [vmem:[#allocation2 + $0x1c0] sm:$0xff] %vm775_vm2, %v746_v62  ;;  %v1418_v12 = vadd.f32 %v1417_v60, %v1176_v6  ;;  %7801 = vmatmul.msk.bf16.gmra.mxu0 %vm333_vm1, %v9082_v56  ;;  %v1544_v15 = vpack.c.bf16 %v1516_v8, %v915_v48  ;;  %v976_v30 = vpack.c.bf16 %v1516_v8, %v1516_v8 }
 0x24a   :  { %7879 = vmatmul.msk.bf16.gmra.mxu2 %vm775_vm2, %v943_v13  ;;  %7914 = vmatmul.msk.bf16.gmra.mxu3 %vm775_vm2, %v1544_v15 }
 0x24d   :  { %v618_v16 = vpop.f32.mrf.mxu0  ;;  %v1420_v17 = vpop.f32.mrf.mxu2 }
 0x24e   :  { %v747_v20 = vmax.f32 %v618_v16, 0.0  ;;  %v1743_v21 = vpop.f32.mrf.mxu3  ;;  %v9084_v16 = vld [vmem:[%s11741_s0 + $0x130] sm:$0xff] }
 0x24f   :  { %v9880_v27 = vadd.f32 %v1743_v21, %v1416_v49  ;;  %v1179_v28 = vpop.f32.mrf.mxu1  ;;  %v1517_v31 = vld [vmem:[#allocation2 + $0x1c0] sm:$0xff]  ;;  %v2225_v21 = vld [vmem:[#allocation2 + $0x88] sm:$0xff] }
 0x250   :  { %833 = vst.msk [vmem:[#allocation2 + $0x1c8] sm:$0xff] %vm775_vm2, %v747_v20  ;;  %v1421_v29 = vadd.f32 %v1420_v17, %v1179_v28  ;;  %v1545_v50 = vpack.c.bf16 %v1517_v31, %v1517_v31  ;;  %v2226_v28 = vld [vmem:[#allocation2 + $0x90] sm:$0xff] }
 0x252   :  { %7843 = vmatmul.msk.bf16.gmra.mxu1 %vm775_vm2, %v976_v30 }
 0x255   :  { %v621_v39 = vpop.f32.mrf.mxu0  ;;  %v1422_v40 = vpop.f32.mrf.mxu2 }
 0x256   :  { %v748_v45 = vmax.f32 %v621_v39, 0.0  ;;  %v1745_v48 = vpop.f32.mrf.mxu3  ;;  %v2279_v39 = vpack.c.bf16 %v2226_v28, %v2225_v21 }
 0x257   :  { %v9887_v49 = vadd.f32 %v1745_v48, %v1418_v12  ;;  %v1181_v54 = vpop.f32.mrf.mxu1  ;;  %v1843_v12 = vld [vmem:[#allocation2 + $0x70] sm:$0xff] }
 0x258   :  { %834 = vst.msk [vmem:[#allocation2 + $0x1d0] sm:$0xff] %vm775_vm2, %v748_v45  ;;  %v1423_v56 = vadd.f32 %v1422_v40, %v1181_v54  ;;  %7802 = vmatmul.msk.bf16.gmra.mxu0 %vm333_vm1, %v9083_v37  ;;  %v1898_v15 = vpack.c.bf16 %v2223_v55, %v1843_v12  ;;  %v2658_v40 = vpack.c.bf16 %v2225_v21, %v2224_v41  ;;  %v9085_v41 = vld [vmem:[%s11741_s0 + $0x138] sm:$0xff] }
 0x25a   :  { %7915 = vmatmul.msk.bf16.gmra.mxu3 %vm775_vm2, %v1545_v50  ;;  %7960 = vmatmul.msk.bf16.vlgmr.msrb.gmra.mxu2 %vm775_vm2, %v2278_v57 }
 0x25d   :  { %v623_v60 = vpop.f32.mrf.mxu0  ;;  %v1425_v62 = vpop.f32.mrf.mxu2 }
 0x25e   :  { %v749_v63 = vmax.f32 %v623_v60, 0.0  ;;  %v1748_v0 = vpop.f32.mrf.mxu3 }
 0x25f   :  { %v9893_v6 = vadd.f32 %v1748_v0, %v1421_v29  ;;  %v1184_v8 = vpop.f32.mrf.mxu1  ;;  %v2228_v0 = vld [vmem:[#allocation2 + $0xa0] sm:$0xff] }
 0x260   :  { %835 = vst.msk [vmem:[#allocation2 + $0x1d8] sm:$0xff] %vm775_vm2, %v749_v63  ;;  %v1426_v13 = vadd.f32 %v1425_v62, %v1184_v8  ;;  %v2227_v63 = vld [vmem:[#allocation2 + $0x98] sm:$0xff] }
 0x262   :  { %7924 = vmatmul.msk.bf16.vlgmr.msrb.gmra.mxu1 %vm775_vm2, %v1898_v15 }
 0x265   :  { %v626_v17 = vpop.f32.mrf.mxu0  ;;  %v1427_v20 = vpop.f32.mrf.mxu2 }
 0x266   :  { %v750_v30 = vmax.f32 %v626_v17, 0.0  ;;  %v1750_v31 = vpop.f32.mrf.mxu3  ;;  %v2659_v17 = vpack.c.bf16 %v2227_v63, %v2226_v28  ;;  %v9086_v28 = vld [vmem:[%s11741_s0 + $0x140] sm:$0xff] }
 0x267   :  { %v9900_v29 = vadd.f32 %v1750_v31, %v1423_v56  ;;  %v1186_v37 = vpop.f32.mrf.mxu1 }
 0x268   :  { %836 = vst.msk [vmem:[#allocation2 + $0x1e0] sm:$0xff] %vm775_vm2, %v750_v30  ;;  %7803 = vmatmul.msk.bf16.gmra.mxu0 %vm333_vm1, %v9084_v16  ;;  %v2280_v16 = vpack.c.bf16 %v2228_v0, %v2227_v63 }
 0x26a   :  { %7961 = vmatmul.msk.bf16.gmra.mxu2 %vm775_vm2, %v2279_v39  ;;  %7996 = vmatmul.msk.bf16.vlgmr.msrb.gmra.mxu3 %vm775_vm2, %v2658_v40 }
 0x26d   :  { %v628_v45 = vpop.f32.mrf.mxu0  ;;  %v1429_v48 = vpop.f32.mrf.mxu2 }
 0x26e   :  { %v751_v50 = vmax.f32 %v628_v45, 0.0  ;;  %v1753_v54 = vpop.f32.mrf.mxu3 }
 0x26f   :  { %v9906_v55 = vadd.f32 %v1753_v54, %v1426_v13  ;;  %v1188_v57 = vpop.f32.mrf.mxu1  ;;  %v2230_v54 = vld [vmem:[#allocation2 + $0xb0] sm:$0xff] }
 0x270   :  { %837 = vst.msk [vmem:[#allocation2 + $0x1e8] sm:$0xff] %vm775_vm2, %v751_v50  ;;  %v1430_v56 = vadd.f32 %v1429_v48, %v1188_v57  ;;  %v2229_v50 = vld [vmem:[#allocation2 + $0xa8] sm:$0xff] }
 0x271   :  { %v2281_v63 = vpack.c.bf16 %v2230_v54, %v2229_v50 }
 0x272   :  { %7925 = vmatmul.msk.bf16.gmra.mxu1 %vm775_vm2, %v2658_v40 }
 0x275   :  { %v631_v60 = vpop.f32.mrf.mxu0  ;;  %v1431_v62 = vpop.f32.mrf.mxu2 }
 0x276   :  { %v752_v8 = vmax.f32 %v631_v60, 0.0  ;;  %v1755_v12 = vpop.f32.mrf.mxu3 }
 0x277   :  { %v1190_v15 = vpop.f32.mrf.mxu1 }
 0x278   :  { %838 = vst.msk [vmem:[#allocation2 + $0x1f0] sm:$0xff] %vm775_vm2, %v752_v8  ;;  %v1432_v13 = vadd.f32 %v1431_v62, %v1190_v15  ;;  %7804 = vmatmul.msk.bf16.gmra.mxu0 %vm333_vm1, %v9085_v41  ;;  %v2660_v8 = vpack.c.bf16 %v2229_v50, %v2228_v0  ;;  %v9087_v0 = vld [vmem:[%s11741_s0 + $0x148] sm:$0xff] }
 0x27a   :  { %7962 = vmatmul.msk.bf16.gmra.mxu2 %vm775_vm2, %v2280_v16  ;;  %7997 = vmatmul.msk.bf16.gmra.mxu3 %vm775_vm2, %v2659_v17 }
 0x27d   :  { %v633_v20 = vpop.f32.mrf.mxu0  ;;  %v1434_v21 = vpop.f32.mrf.mxu2 }
 0x27e   :  { %v753_v30 = vmax.f32 %v633_v20, 0.0  ;;  %v1757_v31 = vpop.f32.mrf.mxu3 }
 0x27f   :  { %v9917_v37 = vadd.f32 %v1757_v31, %v1430_v56  ;;  %v1193_v39 = vpop.f32.mrf.mxu1 }
 0x280   :  { %839 = vst.msk [vmem:[#allocation2 + $0x1f8] sm:$0xff] %vm775_vm2, %v753_v30  ;;  %v1435_v40 = vadd.f32 %v1434_v21, %v1193_v39  ;;  %v2231_v39 = vld [vmem:[#allocation2 + $0xb8] sm:$0xff] }
 0x282   :  { %7926 = vmatmul.msk.bf16.gmra.mxu1 %vm775_vm2, %v2659_v17 }
 0x285   :  { %v636_v45 = vpop.f32.mrf.mxu0  ;;  %v1436_v48 = vpop.f32.mrf.mxu2 }
 0x286   :  { %v754_v57 = vmax.f32 %v636_v45, 0.0  ;;  %v1759_v41 = vpop.f32.mrf.mxu3 }
 0x287   :  { %v9924_v60 = vadd.f32 %v1759_v41, %v1432_v13  ;;  %v1195_v56 = vpop.f32.mrf.mxu1 }
 0x288   :  { %840 = vst.msk [vmem:[#allocation2 + $0x200] sm:$0xff] %vm775_vm2, %v754_v57  ;;  %v1437_v62 = vadd.f32 %v1436_v48, %v1195_v56  ;;  %7805 = vmatmul.msk.bf16.gmra.mxu0 %vm333_vm1, %v9086_v28  ;;  %v2232_v28 = vld [vmem:[#allocation2 + $0xc0] sm:$0xff]  ;;  %v2661_v56 = vpack.c.bf16 %v2231_v39, %v2230_v54 }
 0x289   :  { %v2282_v41 = vpack.c.bf16 %v2232_v28, %v2231_v39  ;;  %v2233_v39 = vld [vmem:[#allocation2 + $0xc8] sm:$0xff] }
 0x28a   :  { %7963 = vmatmul.msk.bf16.gmra.mxu2 %vm775_vm2, %v2281_v63  ;;  %7998 = vmatmul.msk.bf16.gmra.mxu3 %vm775_vm2, %v2660_v8 }
 0x28d   :  { %v638_v12 = vpop.f32.mrf.mxu0  ;;  %v1439_v15 = vpop.f32.mrf.mxu2 }
 0x28e   :  { %v755_v16 = vmax.f32 %v638_v12, 0.0  ;;  %v1762_v17 = vpop.f32.mrf.mxu3  ;;  %v114_v12 = vld [vmem:[%s11741_s0 + $0x150] sm:$0xf] }
 0x28f   :  { %v9930_v20 = vadd.f32 %v1762_v17, %v1435_v40  ;;  %v1198_v13 = vpop.f32.mrf.mxu1 }
 0x290   :  { %841 = vst.msk [vmem:[#allocation2 + $0x208] sm:$0xff] %vm775_vm2, %v755_v16  ;;  %v1440_v21 = vadd.f32 %v1439_v15, %v1198_v13 }
 0x292   :  { %7927 = vmatmul.msk.bf16.gmra.mxu1 %vm775_vm2, %v2660_v8 }
 0x295   :  { %v641_v30 = vpop.f32.mrf.mxu0  ;;  %v1441_v31 = vpop.f32.mrf.mxu2 }
 0x296   :  { %v756_v45 = vmax.f32 %v641_v30, 0.0  ;;  %v1764_v48 = vpop.f32.mrf.mxu3 }
 0x297   :  { %v9937_v50 = vadd.f32 %v1764_v48, %v1437_v62  ;;  %v1200_v40 = vpop.f32.mrf.mxu1 }
 0x298   :  { %842 = vst.msk [vmem:[#allocation2 + $0x210] sm:$0xff] %vm775_vm2, %v756_v45  ;;  %v1442_v57 = vadd.f32 %v1441_v31, %v1200_v40  ;;  %7806 = vmatmul.msk.bf16.gmra.mxu0 %vm333_vm1, %v9087_v0  ;;  %v284_v0 = vunpack.c.l.b16 %v114_v12  ;;  %v2234_v45 = vld [vmem:[#allocation2 + $0xd0] sm:$0xff] }
 0x29a   :  { %7964 = vmatmul.msk.bf16.gmra.mxu2 %vm775_vm2, %v2282_v41  ;;  %7999 = vmatmul.msk.bf16.gmra.mxu3 %vm775_vm2, %v2661_v56  ;;  %v327_v54 = vpack.c.b16 %v284_v0, %v284_v0 }
 0x29d   :  { %v643_v63 = vpop.f32.mrf.mxu0  ;;  %v1444_v8 = vpop.f32.mrf.mxu2 }
 0x29e   :  { %v757_v62 = vmax.f32 %v643_v63, 0.0  ;;  %v1767_v15 = vpop.f32.mrf.mxu3 }
 0x29f   :  { %v9946_v16 = vadd.f32 %v1767_v15, %v1440_v21  ;;  %v1203_v17 = vpop.f32.mrf.mxu1 }
 0x2a0   :  { %843 = vst.msk [vmem:[#allocation2 + $0x218] sm:$0xff] %vm775_vm2, %v757_v62  ;;  %v1445_v13 = vadd.f32 %v1444_v8, %v1203_v17  ;;  %v2283_v62 = vpack.c.bf16 %v2234_v45, %v2233_v39  ;;  %v2662_v8 = vpack.c.bf16 %v2233_v39, %v2232_v28  ;;  %v2983_v28 = vld [vmem:[#allocation2 + $0xe0] sm:$0xff]  ;;  %v2235_v39 = vld [vmem:[#allocation2 + $0xd8] sm:$0xff] }
 0x2a1   :  { %11749 = vst [vmem:[#allocation6_spill] sm:$0xff] %v9946_v16 }
 0x2a2   :  { %7928 = vmatmul.msk.bf16.gmra.mxu1 %vm775_vm2, %v2661_v56 }
 0x2a5   :  { %v646_v30 = vpop.f32.mrf.mxu0  ;;  %v1446_v31 = vpop.f32.mrf.mxu2 }
 0x2a6   :  { %v758_v48 = vmax.f32 %v646_v30, 0.0  ;;  %v1769_v40 = vpop.f32.mrf.mxu3 }
 0x2a7   :  { %v9950_v41 = vadd.f32 %v1769_v40, %v1442_v57  ;;  %v1205_v63 = vpop.f32.mrf.mxu1 }
 0x2a8   :  { %844 = vst.msk [vmem:[#allocation2 + $0x220] sm:$0xff] %vm775_vm2, %v758_v48  ;;  %v1447_v21 = vadd.f32 %v1446_v31, %v1205_v63  ;;  %7807 = vmatmul.msk.bf16.gmra.mxu0 %vm333_vm1, %v327_v54  ;;  %v2984_v31 = vld [vmem:[#allocation2 + $0xe8] sm:$0xff] }
 0x2a9   :  { %11750 = vst [vmem:[#allocation7_spill] sm:$0xff] %v9950_v41 }
 0x2aa   :  { %7965 = vmatmul.msk.bf16.gmra.mxu2 %vm775_vm2, %v2283_v62  ;;  %8000 = vmatmul.msk.bf16.gmra.mxu3 %vm775_vm2, %v2662_v8  ;;  %v3038_v62 = vpack.c.bf16 %v2984_v31, %v2983_v28 }
 0x2ad   :  { %v648_v56 = vpop.f32.mrf.mxu0  ;;  %v1449_v12 = vpop.f32.mrf.mxu2 }
 0x2ae   :  { %v759_v15 = vmax.f32 %v648_v56, 0.0  ;;  %v1772_v17 = vpop.f32.mrf.mxu3 }
 0x2af   :  { %v9956_v0 = vadd.f32 %v1772_v17, %v1445_v13  ;;  %v1208_v57 = vpop.f32.mrf.mxu1 }
 0x2b0   :  { %845 = vst.msk [vmem:[#allocation2 + $0x228] sm:$0xff] %vm775_vm2, %v759_v15  ;;  %v1450_v30 = vadd.f32 %v1449_v12, %v1208_v57  ;;  %v2284_v15 = vpack.c.bf16 %v2983_v28, %v2235_v39  ;;  %v2663_v12 = vpack.c.bf16 %v2235_v39, %v2234_v45  ;;  %v2985_v45 = vld [vmem:[#allocation2 + $0xf0] sm:$0xff] }
 0x2b1   :  { %11751 = vst [vmem:[#allocation8_spill] sm:$0xff] %v9956_v0 }
 0x2b2   :  { %7929 = vmatmul.msk.bf16.gmra.mxu1 %vm775_vm2, %v2662_v8 }
 0x2b5   :  { %v651_v54 = vpop.f32.mrf.mxu0  ;;  %v1451_v48 = vpop.f32.mrf.mxu2 }
 0x2b6   :  { %v760_v40 = vmax.f32 %v651_v54, 0.0  ;;  %v1774_v63 = vpop.f32.mrf.mxu3 }
 0x2b7   :  { %v9960_v41 = vadd.f32 %v1774_v63, %v1447_v21  ;;  %v1210_v56 = vpop.f32.mrf.mxu1 }
 0x2b8   :  { %846 = vst.msk [vmem:[#allocation2 + $0x230] sm:$0xff] %vm775_vm2, %v760_v40  ;;  %v1452_v13 = vadd.f32 %v1451_v48, %v1210_v56  ;;  %8032 = vmatmul.msk.bf16.vlgmr.msrb.gmra.mxu0 %vm775_vm2, %v3038_v62  ;;  %v2986_v48 = vld [vmem:[#allocation2 + $0xf8] sm:$0xff] }
 0x2b9   :  { %11752 = vst [vmem:[#allocation9_spill] sm:$0xff] %v9960_v41 }
 0x2ba   :  { %7966 = vmatmul.msk.bf16.gmra.mxu2 %vm775_vm2, %v2284_v15  ;;  %8001 = vmatmul.msk.bf16.gmra.mxu3 %vm775_vm2, %v2663_v12  ;;  %v3039_v15 = vpack.c.bf16 %v2986_v48, %v2985_v45 }
 0x2bd   :  { %v653_v8 = vpop.f32.mrf.mxu0  ;;  %v1454_v17 = vpop.f32.mrf.mxu2 }
 0x2be   :  { %v761_v57 = vmax.f32 %v653_v8, 0.0  ;;  %v1777_v54 = vpop.f32.mrf.mxu3  ;;  %v2285_v8 = vpack.c.bf16 %v2985_v45, %v2984_v31  ;;  %v2987_v31 = vld [vmem:[#allocation2 + $0x100] sm:$0xff] }
 0x2bf   :  { %v9966_v0 = vadd.f32 %v1777_v54, %v1450_v30  ;;  %v1213_v21 = vpop.f32.mrf.mxu1 }
 0x2c0   :  { %847 = vst.msk [vmem:[#allocation2 + $0x238] sm:$0xff] %vm775_vm2, %v761_v57  ;;  %v1455_v63 = vadd.f32 %v1454_v17, %v1213_v21 }
 0x2c1   :  { %11753 = vst [vmem:[#allocation10_spill] sm:$0xff] %v9966_v0 }
 0x2c2   :  { %7930 = vmatmul.msk.bf16.gmra.mxu1 %vm775_vm2, %v2663_v12 }
 0x2c5   :  { %v656_v40 = vpop.f32.mrf.mxu0  ;;  %v1456_v28 = vpop.f32.mrf.mxu2 }
 0x2c6   :  { %v762_v39 = vmax.f32 %v656_v40, 0.0  ;;  %v1779_v56 = vpop.f32.mrf.mxu3 }
 0x2c7   :  { %v9970_v41 = vadd.f32 %v1779_v56, %v1452_v13  ;;  %v1215_v16 = vpop.f32.mrf.mxu1 }
 0x2c8   :  { %848 = vst.msk [vmem:[#allocation2 + $0x240] sm:$0xff] %vm775_vm2, %v762_v39  ;;  %v1457_v30 = vadd.f32 %v1456_v28, %v1215_v16  ;;  %8033 = vmatmul.msk.bf16.gmra.mxu0 %vm775_vm2, %v3039_v15  ;;  %v2988_v16 = vld [vmem:[#allocation2 + $0x108] sm:$0xff] }
 0x2c9   :  { %11754 = vst [vmem:[#allocation11_spill] sm:$0xff] %v9970_v41 }
 0x2ca   :  { %7967 = vmatmul.msk.bf16.gmra.mxu2 %vm775_vm2, %v2285_v8  ;;  %8002 = vmatmul.msk.bf16.gmra.mxu3 %vm775_vm2, %v3038_v62  ;;  %v3040_v8 = vpack.c.bf16 %v2988_v16, %v2987_v31 }
 0x2cd   :  { %v658_v12 = vpop.f32.mrf.mxu0  ;;  %v1459_v17 = vpop.f32.mrf.mxu2 }
 0x2ce   :  { %v763_v57 = vmax.f32 %v658_v12, 0.0  ;;  %v1782_v54 = vpop.f32.mrf.mxu3 }
 0x2cf   :  { %v9976_v21 = vadd.f32 %v1782_v54, %v1455_v63  ;;  %v1218_v40 = vpop.f32.mrf.mxu1  ;;  %v2286_v63 = vpack.c.bf16 %v2987_v31, %v2986_v48  ;;  %v2989_v31 = vld [vmem:[#allocation2 + $0x110] sm:$0xff] }
 0x2d0   :  { %849 = vst.msk [vmem:[#allocation2 + $0x248] sm:$0xff] %vm775_vm2, %v763_v57  ;;  %v1460_v13 = vadd.f32 %v1459_v17, %v1218_v40 }
 0x2d2   :  { %7931 = vmatmul.msk.bf16.gmra.mxu1 %vm775_vm2, %v3038_v62 }
 0x2d5   :  { %v661_v28 = vpop.f32.mrf.mxu0  ;;  %v1461_v39 = vpop.f32.mrf.mxu2 }
 0x2d6   :  { %v764_v45 = vmax.f32 %v661_v28, 0.0  ;;  %v1784_v56 = vpop.f32.mrf.mxu3  ;;  %v2990_v28 = vld [vmem:[#allocation2 + $0x118] sm:$0xff] }
 0x2d7   :  { %v9980_v41 = vadd.f32 %v1784_v56, %v1457_v30  ;;  %v1220_v0 = vpop.f32.mrf.mxu1 }
 0x2d8   :  { %850 = vst.msk [vmem:[#allocation2 + $0x250] sm:$0xff] %vm775_vm2, %v764_v45  ;;  %8034 = vmatmul.msk.bf16.gmra.mxu0 %vm775_vm2, %v3040_v8 }
 0x2d9   :  { %11755 = vst [vmem:[#allocation12_spill] sm:$0xff] %v9980_v41 }
 0x2da   :  { %7968 = vmatmul.msk.bf16.gmra.mxu2 %vm775_vm2, %v2286_v63  ;;  %8003 = vmatmul.msk.bf16.gmra.mxu3 %vm775_vm2, %v3039_v15  ;;  %v3041_v63 = vpack.c.bf16 %v2990_v28, %v2989_v31 }
 0x2dd   :  { %v663_v62 = vpop.f32.mrf.mxu0  ;;  %v2415_v12 = vpop.f32.mrf.mxu2 }
 0x2de   :  { %v765_v17 = vmax.f32 %v663_v62, 0.0  ;;  %v1787_v57 = vpop.f32.mrf.mxu3  ;;  %v2287_v62 = vpack.c.bf16 %v2989_v31, %v2988_v16 }
 0x2df   :  { %v9986_v54 = vadd.f32 %v1787_v57, %v1460_v13  ;;  %v2035_v40 = vpop.f32.mrf.mxu1 }
 0x2e0   :  { %851 = vst.msk [vmem:[#allocation2 + $0x258] sm:$0xff] %vm775_vm2, %v765_v17  ;;  %v2171_v0 = vadd.f32 %v2035_v40, %v9629_v59 }
 0x2e2   :  { %7932 = vmatmul.msk.bf16.gmra.mxu1 %vm775_vm2, %v3039_v15  ;;  %v2551_v30 = vadd.f32 %v2415_v12, %v2171_v0 }
 0x2e5   :  { %v666_v48 = vpop.f32.mrf.mxu0  ;;  %v2417_v39 = vpop.f32.mrf.mxu2 }
 0x2e6   :  { %v766_v45 = vmax.f32 %v666_v48, 0.0  ;;  %v1789_v56 = vpop.f32.mrf.mxu3 }
 0x2e7   :  { %v2037_v41 = vpop.f32.mrf.mxu1 }
 0x2e8   :  { %852 = vst.msk [vmem:[#allocation2 + $0x260] sm:$0xff] %vm775_vm2, %v766_v45  ;;  %v2172_v13 = vadd.f32 %v2037_v41, %v9636_v5  ;;  %8035 = vmatmul.msk.bf16.gmra.mxu0 %vm775_vm2, %v3041_v63  ;;  %v2992_v41 = vld [vmem:[#allocation2 + $0x128] sm:$0xff]  ;;  %v2991_v45 = vld [vmem:[#allocation2 + $0x120] sm:$0xff] }
 0x2ea   :  { %7969 = vmatmul.msk.bf16.gmra.mxu2 %vm775_vm2, %v2287_v62  ;;  %8004 = vmatmul.msk.bf16.gmra.mxu3 %vm775_vm2, %v3040_v8  ;;  %v2552_v59 = vadd.f32 %v2417_v39, %v2172_v13  ;;  %v3042_v13 = vpack.c.bf16 %v2992_v41, %v2991_v45 }
 0x2ed   :  { %v668_v15 = vpop.f32.mrf.mxu0  ;;  %v2420_v12 = vpop.f32.mrf.mxu2 }
 0x2ee   :  { %v767_v17 = vmax.f32 %v668_v15, 0.0  ;;  %v2795_v57 = vpop.f32.mrf.mxu3 }
 0x2ef   :  { %v9996_v40 = vadd.f32 %v2795_v57, %v2551_v30  ;;  %v2040_v0 = vpop.f32.mrf.mxu1 }
 0x2f0   :  { %853 = vst.msk [vmem:[#allocation2 + $0x268] sm:$0xff] %vm775_vm2, %v767_v17  ;;  %v2173_v48 = vadd.f32 %v2040_v0, %v9642_v14  ;;  %v2288_v14 = vpack.c.bf16 %v2991_v45, %v2990_v28  ;;  %v2994_v28 = vld [vmem:[#allocation2 + $0x138] sm:$0xff] }
 0x2f2   :  { %7933 = vmatmul.msk.bf16.gmra.mxu1 %vm775_vm2, %v3040_v8  ;;  %v2553_v5 = vadd.f32 %v2420_v12, %v2173_v48 }
 0x2f5   :  { %v671_v16 = vpop.f32.mrf.mxu0  ;;  %v2422_v31 = vpop.f32.mrf.mxu2 }
 0x2f6   :  { %v768_v56 = vmax.f32 %v671_v16, 0.0  ;;  %v2797_v39 = vpop.f32.mrf.mxu3 }
 0x2f7   :  { %v10001_v62 = vadd.f32 %v2797_v39, %v2552_v59  ;;  %v2042_v15 = vpop.f32.mrf.mxu1  ;;  %v2993_v39 = vld [vmem:[#allocation2 + $0x130] sm:$0xff] }
 0x2f8   :  { %854 = vst.msk [vmem:[#allocation2 + $0x270] sm:$0xff] %vm775_vm2, %v768_v56  ;;  %v2174_v30 = vadd.f32 %v2042_v15, %v9649_v24  ;;  %8036 = vmatmul.msk.bf16.gmra.mxu0 %vm775_vm2, %v3042_v13 }
 0x2fa   :  { %7970 = vmatmul.msk.bf16.gmra.mxu2 %vm775_vm2, %v2288_v14  ;;  %8005 = vmatmul.msk.bf16.gmra.mxu3 %vm775_vm2, %v3041_v63  ;;  %v2554_v8 = vadd.f32 %v2422_v31, %v2174_v30  ;;  %v3043_v30 = vpack.c.bf16 %v2994_v28, %v2993_v39 }
 0x2fd   :  { %v673_v12 = vpop.f32.mrf.mxu0  ;;  %v2425_v17 = vpop.f32.mrf.mxu2 }
 0x2fe   :  { %v769_v57 = vmax.f32 %v673_v12, 0.0  ;;  %v2800_v0 = vpop.f32.mrf.mxu3 }
 0x2ff   :  { %v10008_v48 = vadd.f32 %v2800_v0, %v2553_v5  ;;  %v2045_v59 = vpop.f32.mrf.mxu1 }
 0x300   :  { %855 = vst.msk [vmem:[#allocation2 + $0x278] sm:$0xff] %vm775_vm2, %v769_v57  ;;  %v2175_v16 = vadd.f32 %v2045_v59, %v9655_v33  ;;  %v2289_v33 = vpack.c.bf16 %v2993_v39, %v2992_v41  ;;  %v2996_v41 = vld [vmem:[#allocation2 + $0x148] sm:$0xff] }
 0x302   :  { %7934 = vmatmul.msk.bf16.gmra.mxu1 %vm775_vm2, %v3041_v63  ;;  %v2555_v24 = vadd.f32 %v2425_v17, %v2175_v16 }
 0x305   :  { %v676_v45 = vpop.f32.mrf.mxu0  ;;  %v2427_v56 = vpop.f32.mrf.mxu2 }
 0x306   :  { %v770_v15 = vmax.f32 %v676_v45, 0.0  ;;  %v2802_v31 = vpop.f32.mrf.mxu3 }
 0x307   :  { %v10013_v14 = vadd.f32 %v2802_v31, %v2554_v8  ;;  %v2047_v12 = vpop.f32.mrf.mxu1  ;;  %v2995_v31 = vld [vmem:[#allocation2 + $0x140] sm:$0xff] }
 0x308   :  { %856 = vst.msk [vmem:[#allocation2 + $0x280] sm:$0xff] %vm775_vm2, %v770_v15  ;;  %v2176_v5 = vadd.f32 %v2047_v12, %v9662_v44  ;;  %8037 = vmatmul.msk.bf16.gmra.mxu0 %vm775_vm2, %v3043_v30 }
 0x30a   :  { %7971 = vmatmul.msk.bf16.gmra.mxu2 %vm775_vm2, %v2289_v33  ;;  %8006 = vmatmul.msk.bf16.gmra.mxu3 %vm775_vm2, %v3042_v13  ;;  %v2556_v63 = vadd.f32 %v2427_v56, %v2176_v5  ;;  %v3044_v5 = vpack.c.bf16 %v2996_v41, %v2995_v31 }
 0x30d   :  { %v678_v17 = vpop.f32.mrf.mxu0  ;;  %v2430_v57 = vpop.f32.mrf.mxu2 }
 0x30e   :  { %v771_v0 = vmax.f32 %v678_v17, 0.0  ;;  %v2805_v59 = vpop.f32.mrf.mxu3 }
 0x30f   :  { %v10020_v16 = vadd.f32 %v2805_v59, %v2555_v24  ;;  %v2050_v8 = vpop.f32.mrf.mxu1 }
 0x310   :  { %857 = vst.msk [vmem:[#allocation2 + $0x288] sm:$0xff] %vm775_vm2, %v771_v0  ;;  %v2177_v45 = vadd.f32 %v2050_v8, %v9668_v52  ;;  %v2290_v52 = vpack.c.bf16 %v2995_v31, %v2994_v28  ;;  %v2998_v31 = vld [vmem:[#allocation2 + $0x158] sm:$0xff] }
 0x312   :  { %7935 = vmatmul.msk.bf16.gmra.mxu1 %vm775_vm2, %v3042_v13  ;;  %v2557_v44 = vadd.f32 %v2430_v57, %v2177_v45 }
 0x315   :  { %v681_v39 = vpop.f32.mrf.mxu0  ;;  %v2432_v15 = vpop.f32.mrf.mxu2 }
 0x316   :  { %v772_v12 = vmax.f32 %v681_v39, 0.0  ;;  %v2807_v56 = vpop.f32.mrf.mxu3  ;;  %v9104_v39 = vld [vmem:[%s11746_s5 + $0x88] sm:$0xff] }
 0x317   :  { %v10025_v33 = vadd.f32 %v2807_v56, %v2556_v63  ;;  %v2052_v17 = vpop.f32.mrf.mxu1  ;;  %3933 = vmatpush.bf16.msra.mxu2 %v9104_v39  ;;  %v2997_v56 = vld [vmem:[#allocation2 + $0x150] sm:$0xff] }
 0x318   :  { %858 = vst.msk [vmem:[#allocation2 + $0x290] sm:$0xff] %vm775_vm2, %v772_v12  ;;  %v2178_v24 = vadd.f32 %v2052_v17, %v9681_v1  ;;  %8038 = vmatmul.msk.bf16.gmra.mxu0 %vm775_vm2, %v3044_v5 }
 0x31a   :  { %7972 = vmatmul.msk.bf16.gmra.mxu2 %vm775_vm2, %v2290_v52  ;;  %8007 = vmatmul.msk.bf16.gmra.mxu3 %vm775_vm2, %v3043_v30  ;;  %v2558_v13 = vadd.f32 %v2432_v15, %v2178_v24  ;;  %v9102_v15 = vld [vmem:[%s11746_s5 + $0x78] sm:$0xff]  ;;  %v3045_v52 = vpack.c.bf16 %v2998_v31, %v2997_v56  ;;  %s9429_s5 = smov 64  }
 0x31b   :  { %3553 = vmatpush.bf16.msra.mxu1 %v9102_v15 }
 0x31d   :  { %v683_v57 = vpop.f32.mrf.mxu0  ;;  %v2435_v0 = vpop.f32.mrf.mxu2 }
 0x31e   :  { %v773_v59 = vmax.f32 %v683_v57, 0.0  ;;  %v2810_v8 = vpop.f32.mrf.mxu3 }
 0x31f   :  { %v10032_v45 = vadd.f32 %v2810_v8, %v2557_v44  ;;  %v2055_v63 = vpop.f32.mrf.mxu1 }
 0x320   :  { %859 = vst.msk [vmem:[#allocation2 + $0x298] sm:$0xff] %vm775_vm2, %v773_v59  ;;  %v2179_v1 = vadd.f32 %v2055_v63, %v9687_v11 }
 0x322   :  { %7936 = vmatmul.msk.bf16.gmra.mxu1 %vm775_vm2, %v3043_v30  ;;  %v2559_v28 = vadd.f32 %v2435_v0, %v2179_v1  ;;  %v2291_v30 = vpack.c.bf16 %v2997_v56, %v2996_v41  ;;  %v2999_v41 = vld [vmem:[#allocation2 + $0x160] sm:$0xff] }
 0x325   :  { %v686_v44 = vpop.f32.mrf.mxu0  ;;  %v2437_v12 = vpop.f32.mrf.mxu2 }
 0x326   :  { %v774_v17 = vmax.f32 %v686_v44, 0.0  ;;  %v2812_v24 = vpop.f32.mrf.mxu3 }
 0x327   :  { %v10043_v57 = vadd.f32 %v2812_v24, %v2558_v13  ;;  %v2057_v59 = vpop.f32.mrf.mxu1 }
 0x328   :  { %860 = vst.msk [vmem:[#allocation2 + $0x2a0] sm:$0xff] %vm775_vm2, %v774_v17  ;;  %v2180_v11 = vadd.f32 %v2057_v59, %v9694_v22  ;;  %8039 = vmatmul.msk.bf16.gmra.mxu0 %vm775_vm2, %v3045_v52  ;;  %v3000_v22 = vld [vmem:[#allocation2 + $0x168] sm:$0xff] }
 0x32a   :  { %7973 = vmatmul.msk.bf16.gmra.mxu2 %vm775_vm2, %v2291_v30  ;;  %8008 = vmatmul.msk.bf16.gmra.mxu3 %vm775_vm2, %v3044_v5  ;;  %v2560_v0 = vadd.f32 %v2437_v12, %v2180_v11  ;;  %v3046_v12 = vpack.c.bf16 %v3000_v22, %v2999_v41 }
 0x32d   :  { %v688_v8 = vpop.f32.mrf.mxu0  ;;  %v2440_v63 = vpop.f32.mrf.mxu2 }
 0x32e   :  { %v2815_v39 = vpop.f32.mrf.mxu3 }
 0x32f   :  { %v10050_v1 = vadd.f32 %v2815_v39, %v2559_v28  ;;  %v2060_v13 = vpop.f32.mrf.mxu1 }
 0x330   :  { %v2181_v15 = vadd.f32 %v2060_v13, %v9700_v32  ;;  %v2292_v32 = vpack.c.bf16 %v2999_v41, %v2998_v31  ;;  %v3002_v31 = vld [vmem:[#allocation2 + $0x178] sm:$0xff] }
 0x332   :  { %7937 = vmatmul.msk.bf16.gmra.mxu1 %vm775_vm2, %v3044_v5  ;;  %v2561_v44 = vadd.f32 %v2440_v63, %v2181_v15 }
 0x335   :  { %v2442_v17 = vpop.f32.mrf.mxu2  ;;  %v3175_v24 = vpop.f32.mrf.mxu0 }
 0x336   :  { %v2817_v56 = vpop.f32.mrf.mxu3  ;;  %v10055_v59 = vadd.f32 %v3175_v24, %v9996_v40 }
 0x337   :  { %v10057_v11 = vadd.f32 %v2817_v56, %v2560_v0  ;;  %v2062_v30 = vpop.f32.mrf.mxu1  ;;  %v3001_v56 = vld [vmem:[#allocation2 + $0x170] sm:$0xff] }
 0x338   :  { %v2182_v28 = vadd.f32 %v2062_v30, %v9707_v43  ;;  %8040 = vmatmul.msk.bf16.gmra.mxu0 %vm775_vm2, %v3046_v12 }
 0x33a   :  { %7974 = vmatmul.msk.bf16.gmra.mxu2 %vm775_vm2, %v2292_v32  ;;  %8009 = vmatmul.msk.bf16.gmra.mxu3 %vm775_vm2, %v3045_v52  ;;  %v2562_v5 = vadd.f32 %v2442_v17, %v2182_v28  ;;  %v3047_v28 = vpack.c.bf16 %v3002_v31, %v3001_v56 }
 0x33d   :  { %v2445_v8 = vpop.f32.mrf.mxu2  ;;  %v3177_v63 = vpop.f32.mrf.mxu0 }
 0x33e   :  { %v2820_v39 = vpop.f32.mrf.mxu3  ;;  %v10064_v40 = vadd.f32 %v3177_v63, %v10001_v62 }
 0x33f   :  { %v10066_v13 = vadd.f32 %v2820_v39, %v2561_v44  ;;  %v2065_v0 = vpop.f32.mrf.mxu1  ;;  %v2293_v44 = vpack.c.bf16 %v3001_v56, %v3000_v22 }
 0x340   :  { %v2183_v15 = vadd.f32 %v2065_v0, %v9713_v53 }
 0x342   :  { %7938 = vmatmul.msk.bf16.gmra.mxu1 %vm775_vm2, %v3045_v52  ;;  %v2563_v43 = vadd.f32 %v2445_v8, %v2183_v15  ;;  %v3004_v15 = vld [vmem:[#allocation2 + $0x188] sm:$0xff] }
 0x345   :  { %v2447_v24 = vpop.f32.mrf.mxu2  ;;  %v3180_v41 = vpop.f32.mrf.mxu0 }
 0x346   :  { %v2822_v30 = vpop.f32.mrf.mxu3  ;;  %v10071_v17 = vadd.f32 %v3180_v41, %v10008_v48  ;;  %v3003_v41 = vld [vmem:[#allocation2 + $0x180] sm:$0xff] }
 0x347   :  { %v10073_v32 = vadd.f32 %v2822_v30, %v2562_v5  ;;  %v2067_v62 = vpop.f32.mrf.mxu1 }
 0x348   :  { %8041 = vmatmul.msk.bf16.gmra.mxu0 %vm775_vm2, %v3047_v28  ;;  %v3048_v62 = vpack.c.bf16 %v3004_v15, %v3003_v41 }
 0x34a   :  { %7975 = vmatmul.msk.bf16.gmra.mxu2 %vm775_vm2, %v2293_v44  ;;  %8010 = vmatmul.msk.bf16.gmra.mxu3 %vm775_vm2, %v3046_v12 }
 0x34d   :  { %v2449_v53 = vpop.f32.mrf.mxu2  ;;  %v3182_v52 = vpop.f32.mrf.mxu0 }
 0x34e   :  { %v2825_v8 = vpop.f32.mrf.mxu3  ;;  %v10079_v63 = vadd.f32 %v3182_v52, %v10013_v14 }
 0x34f   :  { %v10081_v39 = vadd.f32 %v2825_v8, %v2563_v43  ;;  %v2069_v48 = vpop.f32.mrf.mxu1  ;;  %v2294_v43 = vpack.c.bf16 %v3003_v41, %v3002_v31  ;;  %v3006_v31 = vld [vmem:[#allocation2 + $0x198] sm:$0xff] }
 0x350   :  { %v2184_v5 = vadd.f32 %v2069_v48, %v9724_v10 }
 0x352   :  { %7939 = vmatmul.msk.bf16.gmra.mxu1 %vm775_vm2, %v3046_v12  ;;  %v2564_v0 = vadd.f32 %v2449_v53, %v2184_v5 }
 0x355   :  { %v2451_v22 = vpop.f32.mrf.mxu2  ;;  %v3185_v24 = vpop.f32.mrf.mxu0 }
 0x356   :  { %v2827_v56 = vpop.f32.mrf.mxu3  ;;  %v10086_v30 = vadd.f32 %v3185_v24, %v10020_v16 }
 0x357   :  { %v2071_v44 = vpop.f32.mrf.mxu1  ;;  %v3005_v56 = vld [vmem:[#allocation2 + $0x190] sm:$0xff] }
 0x358   :  { %v2185_v14 = vadd.f32 %v2071_v44, %v9731_v23  ;;  %8042 = vmatmul.msk.bf16.gmra.mxu0 %vm775_vm2, %v3048_v62 }
 0x35a   :  { %7976 = vmatmul.msk.bf16.gmra.mxu2 %vm775_vm2, %v2294_v43  ;;  %8011 = vmatmul.msk.bf16.gmra.mxu3 %vm775_vm2, %v3047_v28  ;;  %v2565_v10 = vadd.f32 %v2451_v22, %v2185_v14  ;;  %v3049_v14 = vpack.c.bf16 %v3006_v31, %v3005_v56 }
 0x35d   :  { %v2454_v12 = vpop.f32.mrf.mxu2  ;;  %v3187_v53 = vpop.f32.mrf.mxu0 }
 0x35e   :  { %v2829_v52 = vpop.f32.mrf.mxu3  ;;  %v10093_v8 = vadd.f32 %v3187_v53, %v10025_v33 }
 0x35f   :  { %v10095_v16 = vadd.f32 %v2829_v52, %v2564_v0  ;;  %v2074_v48 = vpop.f32.mrf.mxu1 }
 0x360   :  { %v2186_v5 = vadd.f32 %v2074_v48, %v9737_v35  ;;  %v2295_v35 = vpack.c.bf16 %v3005_v56, %v3004_v15  ;;  %v3008_v15 = vld [vmem:[#allocation2 + $0x1a8] sm:$0xff] }
 0x362   :  { %7940 = vmatmul.msk.bf16.gmra.mxu1 %vm775_vm2, %v3047_v28  ;;  %v2566_v23 = vadd.f32 %v2454_v12, %v2186_v5 }
 0x365   :  { %v2456_v24 = vpop.f32.mrf.mxu2  ;;  %v3190_v41 = vpop.f32.mrf.mxu0 }
 0x366   :  { %v2831_v44 = vpop.f32.mrf.mxu3  ;;  %v10100_v22 = vadd.f32 %v3190_v41, %v10032_v45 }
 0x367   :  { %v10102_v43 = vadd.f32 %v2831_v44, %v2565_v10  ;;  %v2076_v33 = vpop.f32.mrf.mxu1  ;;  %v3007_v44 = vld [vmem:[#allocation2 + $0x1a0] sm:$0xff] }
 0x368   :  { %v2187_v0 = vadd.f32 %v2076_v33, %v9744_v47  ;;  %8043 = vmatmul.msk.bf16.gmra.mxu0 %vm775_vm2, %v3049_v14 }
 0x36a   :  { %7977 = vmatmul.msk.bf16.gmra.mxu2 %vm775_vm2, %v2295_v35  ;;  %8012 = vmatmul.msk.bf16.gmra.mxu3 %vm775_vm2, %v3048_v62  ;;  %v2567_v28 = vadd.f32 %v2456_v24, %v2187_v0  ;;  %v3050_v0 = vpack.c.bf16 %v3008_v15, %v3007_v44 }
 0x36d   :  { %v2459_v12 = vpop.f32.mrf.mxu2  ;;  %v3192_v53 = vpop.f32.mrf.mxu0 }
 0x36e   :  { %v2834_v52 = vpop.f32.mrf.mxu3  ;;  %v10109_v45 = vadd.f32 %v3192_v53, %v10043_v57 }
 0x36f   :  { %v10111_v48 = vadd.f32 %v2834_v52, %v2566_v23  ;;  %v2079_v10 = vpop.f32.mrf.mxu1 }
 0x370   :  { %v2188_v5 = vadd.f32 %v2079_v10, %v9750_v58  ;;  %v2296_v58 = vpack.c.bf16 %v3007_v44, %v3006_v31  ;;  %v9169_v31 = vld [vmem:[%s11747_s6 + $0x1f8] sm:$0xff] }
 0x371   :  { %5018 = vmatpush.bf16.msra.mxu0 %v9169_v31 }
 0x372   :  { %7941 = vmatmul.msk.bf16.gmra.mxu1 %vm775_vm2, %v3048_v62  ;;  %v2568_v47 = vadd.f32 %v2459_v12, %v2188_v5 }
 0x375   :  { %v2461_v41 = vpop.f32.mrf.mxu2  ;;  %v3195_v56 = vpop.f32.mrf.mxu0 }
 0x376   :  { %v2836_v33 = vpop.f32.mrf.mxu3  ;;  %v10116_v24 = vadd.f32 %v3195_v56, %v10050_v1  ;;  %v3010_v56 = vld [vmem:[#allocation2 + $0x1b8] sm:$0xff] }
 0x377   :  { %v10118_v35 = vadd.f32 %v2836_v33, %v2567_v28  ;;  %v2081_v57 = vpop.f32.mrf.mxu1  ;;  %v3009_v33 = vld [vmem:[#allocation2 + $0x1b0] sm:$0xff] }
 0x378   :  { %v2189_v23 = vadd.f32 %v2081_v57, %v9757_v7  ;;  %8044 = vmatmul.msk.bf16.gmra.mxu0 %vm775_vm2, %v3050_v0 }
 0x37a   :  { %7978 = vmatmul.msk.bf16.gmra.mxu2 %vm775_vm2, %v2296_v58  ;;  %8013 = vmatmul.msk.bf16.gmra.mxu3 %vm775_vm2, %v3049_v14  ;;  %v2569_v62 = vadd.f32 %v2461_v41, %v2189_v23  ;;  %v2297_v58 = vpack.c.bf16 %v3009_v33, %v3008_v15  ;;  %v3012_v15 = vld [vmem:[#allocation2 + $0x1c8] sm:$0xff] }
 0x37d   :  { %v2464_v12 = vpop.f32.mrf.mxu2  ;;  %v3197_v53 = vpop.f32.mrf.mxu0 }
 0x37e   :  { %v2839_v52 = vpop.f32.mrf.mxu3  ;;  %v10125_v1 = vadd.f32 %v3197_v53, %v10057_v11 }
 0x37f   :  { %v10127_v10 = vadd.f32 %v2839_v52, %v2568_v47  ;;  %v2084_v28 = vpop.f32.mrf.mxu1  ;;  %v3051_v47 = vpack.c.bf16 %v3010_v56, %v3009_v33 }
 0x380   :  { %v2190_v5 = vadd.f32 %v2084_v28, %v9763_v19 }
 0x382   :  { %7942 = vmatmul.msk.bf16.gmra.mxu1 %vm775_vm2, %v3049_v14  ;;  %v2570_v7 = vadd.f32 %v2464_v12, %v2190_v5 }
 0x385   :  { %v2466_v41 = vpop.f32.mrf.mxu2  ;;  %v3200_v44 = vpop.f32.mrf.mxu0 }
 0x386   :  { %v2841_v57 = vpop.f32.mrf.mxu3  ;;  %v10135_v11 = vadd.f32 %v3200_v44, %v10066_v13 }
 0x387   :  { %v10137_v23 = vadd.f32 %v2841_v57, %v2569_v62  ;;  %v2086_v19 = vpop.f32.mrf.mxu1  ;;  %v3011_v57 = vld [vmem:[#allocation2 + $0x1c0] sm:$0xff] }
 0x388   :  { %v2191_v14 = vadd.f32 %v2086_v19, %v9770_v34  ;;  %8045 = vmatmul.msk.bf16.gmra.mxu0 %vm775_vm2, %v3051_v47 }
 0x38a   :  { %7979 = vmatmul.msk.bf16.gmra.mxu2 %vm775_vm2, %v2297_v58  ;;  %8014 = vmatmul.msk.bf16.gmra.mxu3 %vm775_vm2, %v3050_v0  ;;  %v2571_v12 = vadd.f32 %v2466_v41, %v2191_v14  ;;  %v3052_v14 = vpack.c.bf16 %v3012_v15, %v3011_v57 }
 0x38d   :  { %v2469_v53 = vpop.f32.mrf.mxu2  ;;  %v3202_v52 = vpop.f32.mrf.mxu0 }
 0x38e   :  { %v2844_v28 = vpop.f32.mrf.mxu3  ;;  %v10144_v13 = vadd.f32 %v3202_v52, %v10073_v32 }
 0x38f   :  { %v10146_v5 = vadd.f32 %v2844_v28, %v2570_v7  ;;  %v2089_v62 = vpop.f32.mrf.mxu1 }
 0x390   :  { %v2192_v31 = vadd.f32 %v2089_v62, %v9776_v46  ;;  %v2298_v46 = vpack.c.bf16 %v3011_v57, %v3010_v56  ;;  %v3013_v56 = vld [vmem:[#allocation2 + $0x1d0] sm:$0xff] }
 0x392   :  { %7943 = vmatmul.msk.bf16.gmra.mxu1 %vm775_vm2, %v3050_v0  ;;  %v2572_v34 = vadd.f32 %v2469_v53, %v2192_v31 }
 0x395   :  { %v2471_v44 = vpop.f32.mrf.mxu2  ;;  %v3205_v33 = vpop.f32.mrf.mxu0 }
 0x396   :  { %v2846_v19 = vpop.f32.mrf.mxu3  ;;  %v10151_v41 = vadd.f32 %v3205_v33, %v10081_v39 }
 0x397   :  { %v10153_v58 = vadd.f32 %v2846_v19, %v2571_v12  ;;  %v2091_v32 = vpop.f32.mrf.mxu1 }
 0x398   :  { %v2193_v7 = vadd.f32 %v2091_v32, %v9783_v61  ;;  %8046 = vmatmul.msk.bf16.gmra.mxu0 %vm775_vm2, %v3052_v14  ;;  %v3014_v61 = vld [vmem:[#allocation2 + $0x1d8] sm:$0xff] }
 0x39a   :  { %7980 = vmatmul.msk.bf16.gmra.mxu2 %vm775_vm2, %v2298_v46  ;;  %8015 = vmatmul.msk.bf16.gmra.mxu3 %vm775_vm2, %v3051_v47  ;;  %v2573_v0 = vadd.f32 %v2471_v44, %v2193_v7  ;;  %v3053_v44 = vpack.c.bf16 %v3014_v61, %v3013_v56 }
 0x39d   :  { %v2474_v53 = vpop.f32.mrf.mxu2  ;;  %v3207_v52 = vpop.f32.mrf.mxu0 }
 0x39e   :  { %v2849_v28 = vpop.f32.mrf.mxu3 }
 0x39f   :  { %v10159_v62 = vadd.f32 %v2849_v28, %v2572_v34  ;;  %v2094_v39 = vpop.f32.mrf.mxu1 }
 0x3a0   :  { %v2194_v12 = vadd.f32 %v2094_v39, %v9789_v9  ;;  %v2299_v9 = vpack.c.bf16 %v3013_v56, %v3012_v15  ;;  %v3016_v15 = vld [vmem:[#allocation2 + $0x1e8] sm:$0xff] }
 0x3a2   :  { %7944 = vmatmul.msk.bf16.gmra.mxu1 %vm775_vm2, %v3051_v47  ;;  %v2574_v31 = vadd.f32 %v2474_v53, %v2194_v12 }
 0x3a5   :  { %v2476_v33 = vpop.f32.mrf.mxu2  ;;  %v3209_v19 = vpop.f32.mrf.mxu0 }
 0x3a6   :  { %v2851_v57 = vpop.f32.mrf.mxu3  ;;  %v10164_v32 = vadd.f32 %v3209_v19, %v10095_v16 }
 0x3a7   :  { %v10166_v7 = vadd.f32 %v2851_v57, %v2573_v0  ;;  %v2096_v46 = vpop.f32.mrf.mxu1  ;;  %v3015_v57 = vld [vmem:[#allocation2 + $0x1e0] sm:$0xff] }
 0x3a8   :  { %v2195_v34 = vadd.f32 %v2096_v46, %v9796_v26  ;;  %8047 = vmatmul.msk.bf16.gmra.mxu0 %vm775_vm2, %v3053_v44 }
 0x3aa   :  { %7981 = vmatmul.msk.bf16.gmra.mxu2 %vm775_vm2, %v2299_v9  ;;  %8016 = vmatmul.msk.bf16.gmra.mxu3 %vm775_vm2, %v3052_v14  ;;  %v2575_v47 = vadd.f32 %v2476_v33, %v2195_v34  ;;  %v3054_v34 = vpack.c.bf16 %v3016_v15, %v3015_v57 }
 0x3ad   :  { %v2479_v53 = vpop.f32.mrf.mxu2  ;;  %v3211_v52 = vpop.f32.mrf.mxu0 }
 0x3ae   :  { %v2854_v28 = vpop.f32.mrf.mxu3  ;;  %v10173_v16 = vadd.f32 %v3211_v52, %v10102_v43 }
 0x3af   :  { %v10175_v39 = vadd.f32 %v2854_v28, %v2574_v31  ;;  %v2099_v0 = vpop.f32.mrf.mxu1  ;;  %v2300_v31 = vpack.c.bf16 %v3015_v57, %v3014_v61 }
 0x3b0   :  { %v2196_v12 = vadd.f32 %v2099_v0, %v9802_v38 }
 0x3b2   :  { %7945 = vmatmul.msk.bf16.gmra.mxu1 %vm775_vm2, %v3052_v14  ;;  %v2576_v26 = vadd.f32 %v2479_v53, %v2196_v12  ;;  %v3018_v12 = vld [vmem:[#allocation2 + $0x1f8] sm:$0xff] }
 0x3b5   :  { %v2481_v19 = vpop.f32.mrf.mxu2  ;;  %v3214_v56 = vpop.f32.mrf.mxu0 }
 0x3b6   :  { %v2856_v46 = vpop.f32.mrf.mxu3  ;;  %v10180_v33 = vadd.f32 %v3214_v56, %v10111_v48  ;;  %v3017_v56 = vld [vmem:[#allocation2 + $0x1f0] sm:$0xff] }
 0x3b7   :  { %v10182_v9 = vadd.f32 %v2856_v46, %v2575_v47  ;;  %v2101_v43 = vpop.f32.mrf.mxu1 }
 0x3b8   :  { %8048 = vmatmul.msk.bf16.gmra.mxu0 %vm775_vm2, %v3054_v34  ;;  %v3055_v43 = vpack.c.bf16 %v3018_v12, %v3017_v56 }
 0x3ba   :  { %7982 = vmatmul.msk.bf16.gmra.mxu2 %vm775_vm2, %v2300_v31  ;;  %8017 = vmatmul.msk.bf16.gmra.mxu3 %vm775_vm2, %v3053_v44 }
 0x3bd   :  { %v2483_v38 = vpop.f32.mrf.mxu2  ;;  %v3216_v14 = vpop.f32.mrf.mxu0 }
 0x3be   :  { %v2859_v53 = vpop.f32.mrf.mxu3  ;;  %v10188_v52 = vadd.f32 %v3216_v14, %v10118_v35 }
 0x3bf   :  { %v10190_v28 = vadd.f32 %v2859_v53, %v2576_v26  ;;  %v2103_v48 = vpop.f32.mrf.mxu1  ;;  %v2301_v26 = vpack.c.bf16 %v3017_v56, %v3016_v15  ;;  %v3020_v15 = vld [vmem:[#allocation2 + $0x208] sm:$0xff] }
 0x3c0   :  { %v2197_v47 = vadd.f32 %v2103_v48, %v9813_v2 }
 0x3c2   :  { %7946 = vmatmul.msk.bf16.gmra.mxu1 %vm775_vm2, %v3053_v44  ;;  %v2577_v0 = vadd.f32 %v2483_v38, %v2197_v47 }
 0x3c5   :  { %v2485_v61 = vpop.f32.mrf.mxu2  ;;  %v3219_v19 = vpop.f32.mrf.mxu0 }
 0x3c6   :  { %v2861_v57 = vpop.f32.mrf.mxu3  ;;  %v10195_v46 = vadd.f32 %v3219_v19, %v10127_v10 }
 0x3c7   :  { %v2105_v31 = vpop.f32.mrf.mxu1  ;;  %v3019_v57 = vld [vmem:[#allocation2 + $0x200] sm:$0xff] }
 0x3c8   :  { %v2198_v35 = vadd.f32 %v2105_v31, %v9820_v18  ;;  %8049 = vmatmul.msk.bf16.gmra.mxu0 %vm775_vm2, %v3055_v43 }
 0x3ca   :  { %7983 = vmatmul.msk.bf16.gmra.mxu2 %vm775_vm2, %v2301_v26  ;;  %8018 = vmatmul.msk.bf16.gmra.mxu3 %vm775_vm2, %v3054_v34  ;;  %v2578_v2 = vadd.f32 %v2485_v61, %v2198_v35  ;;  %v3056_v35 = vpack.c.bf16 %v3020_v15, %v3019_v57 }
 0x3cd   :  { %v2488_v44 = vpop.f32.mrf.mxu2  ;;  %v3221_v38 = vpop.f32.mrf.mxu0 }
 0x3ce   :  { %v2863_v14 = vpop.f32.mrf.mxu3  ;;  %v10202_v53 = vadd.f32 %v3221_v38, %v10137_v23 }
 0x3cf   :  { %v10204_v10 = vadd.f32 %v2863_v14, %v2577_v0  ;;  %v2108_v48 = vpop.f32.mrf.mxu1 }
 0x3d0   :  { %v2199_v47 = vadd.f32 %v2108_v48, %v9826_v36  ;;  %v2302_v36 = vpack.c.bf16 %v3019_v57, %v3018_v12  ;;  %v3022_v12 = vld [vmem:[#allocation2 + $0x218] sm:$0xff] }
 0x3d2   :  { %7947 = vmatmul.msk.bf16.gmra.mxu1 %vm775_vm2, %v3054_v34  ;;  %v2579_v18 = vadd.f32 %v2488_v44, %v2199_v47 }
 0x3d5   :  { %v2490_v19 = vpop.f32.mrf.mxu2  ;;  %v3224_v56 = vpop.f32.mrf.mxu0 }
 0x3d6   :  { %v2865_v31 = vpop.f32.mrf.mxu3  ;;  %v10209_v61 = vadd.f32 %v3224_v56, %v10146_v5 }
 0x3d7   :  { %v10211_v26 = vadd.f32 %v2865_v31, %v2578_v2  ;;  %v2110_v23 = vpop.f32.mrf.mxu1  ;;  %v3021_v31 = vld [vmem:[#allocation2 + $0x210] sm:$0xff] }
 0x3d8   :  { %v2200_v0 = vadd.f32 %v2110_v23, %v9833_v51  ;;  %8050 = vmatmul.msk.bf16.gmra.mxu0 %vm775_vm2, %v3056_v35 }
 0x3da   :  { %7984 = vmatmul.msk.bf16.gmra.mxu2 %vm775_vm2, %v2302_v36  ;;  %8019 = vmatmul.msk.bf16.gmra.mxu3 %vm775_vm2, %v3055_v43  ;;  %v2580_v34 = vadd.f32 %v2490_v19, %v2200_v0  ;;  %v3057_v0 = vpack.c.bf16 %v3022_v12, %v3021_v31 }
 0x3dd   :  { %v2493_v44 = vpop.f32.mrf.mxu2  ;;  %v3226_v38 = vpop.f32.mrf.mxu0 }
 0x3de   :  { %v2868_v14 = vpop.f32.mrf.mxu3  ;;  %v10218_v5 = vadd.f32 %v3226_v38, %v10153_v58 }
 0x3df   :  { %v10220_v48 = vadd.f32 %v2868_v14, %v2579_v18  ;;  %v2113_v2 = vpop.f32.mrf.mxu1 }
 0x3e0   :  { %v2201_v47 = vadd.f32 %v2113_v2, %v9842_v4  ;;  %v2303_v4 = vpack.c.bf16 %v3021_v31, %v3020_v15 }
 0x3e2   :  { %7948 = vmatmul.msk.bf16.gmra.mxu1 %vm775_vm2, %v3055_v43  ;;  %v2581_v51 = vadd.f32 %v2493_v44, %v2201_v47  ;;  %v9168_v47 = vld [vmem:[%s11747_s6 + $0x1f0] sm:$0xff] }
 0x3e3   :  { %5019 = vmatpush.bf16.msra.mxu0 %v9168_v47  ;;  %v3025_v47 = vld [vmem:[#allocation2 + $0x230] sm:$0xff] }
 0x3e5   :  { %v2495_v56 = vpop.f32.mrf.mxu2  ;;  %v3229_v57 = vpop.f32.mrf.mxu0 }
 0x3e6   :  { %v2870_v23 = vpop.f32.mrf.mxu3  ;;  %v10225_v19 = vadd.f32 %v3229_v57, %v10159_v62 }
 0x3e7   :  { %v10227_v36 = vadd.f32 %v2870_v23, %v2580_v34  ;;  %v2115_v58 = vpop.f32.mrf.mxu1  ;;  %v3023_v23 = vld [vmem:[#allocation2 + $0x220] sm:$0xff] }
 0x3e8   :  { %v2202_v18 = vadd.f32 %v2115_v58, %v9849_v25  ;;  %8051 = vmatmul.msk.bf16.gmra.mxu0 %vm775_vm2, %v3057_v0 }
 0x3ea   :  { %7985 = vmatmul.msk.bf16.gmra.mxu2 %vm775_vm2, %v2303_v4  ;;  %8020 = vmatmul.msk.bf16.gmra.mxu3 %vm775_vm2, %v3056_v35  ;;  %v10233_v43 = vadd.f32 %v2495_v56, %v2202_v18  ;;  %v3024_v56 = vld [vmem:[#allocation2 + $0x228] sm:$0xff] }
 0x3ed   :  { %v2498_v44 = vpop.f32.mrf.mxu2  ;;  %v3231_v38 = vpop.f32.mrf.mxu0 }
 0x3ee   :  { %v2873_v14 = vpop.f32.mrf.mxu3  ;;  %v10236_v62 = vadd.f32 %v3231_v38, %v10166_v7 }
 0x3ef   :  { %v10238_v34 = vadd.f32 %v2873_v14, %v2581_v51  ;;  %v2118_v2 = vpop.f32.mrf.mxu1  ;;  %v3058_v51 = vpack.c.bf16 %v3024_v56, %v3023_v23 }
 0x3f0   :  { %v2203_v25 = vadd.f32 %v2118_v2, %v9858_v42 }
 0x3f2   :  { %7949 = vmatmul.msk.bf16.gmra.mxu1 %vm775_vm2, %v3056_v35  ;;  %v2583_v15 = vadd.f32 %v2498_v44, %v2203_v25  ;;  %v2304_v35 = vpack.c.bf16 %v3023_v23, %v3022_v12 }
 0x3f5   :  { %v2500_v57 = vpop.f32.mrf.mxu2  ;;  %v3234_v31 = vpop.f32.mrf.mxu0 }
 0x3f6   :  { %v10245_v58 = vpop.f32.mrf.mxu3  ;;  %v10248_v7 = vadd.f32 %v3234_v31, %v10175_v39  ;;  %v3026_v31 = vld [vmem:[#allocation2 + $0x238] sm:$0xff] }
 0x3f7   :  { %v2120_v18 = vpop.f32.mrf.mxu1 }
 0x3f8   :  { %v2204_v42 = vadd.f32 %v2120_v18, %v9874_v3  ;;  %8052 = vmatmul.msk.bf16.gmra.mxu0 %vm775_vm2, %v3058_v51 }
 0x3fa   :  { %7986 = vmatmul.msk.bf16.gmra.mxu2 %vm775_vm2, %v2304_v35  ;;  %8021 = vmatmul.msk.bf16.gmra.mxu3 %vm775_vm2, %v3057_v0  ;;  %v10254_v4 = vadd.f32 %v2500_v57, %v2204_v42 }
 0x3fc   :  { %11756 = vst [vmem:[#allocation13_spill] sm:$0xff] %v10254_v4  ;;  %v3059_v4 = vpack.c.bf16 %v3026_v31, %v3025_v47  ;;  %v1925_v31 = vpack.c.bf16 %v3023_v23, %v3023_v23 }
 0x3fd   :  { %v2503_v44 = vpop.f32.mrf.mxu2  ;;  %v3236_v38 = vpop.f32.mrf.mxu0 }
 0x3fe   :  { %v2878_v14 = vpop.f32.mrf.mxu3  ;;  %v10257_v2 = vadd.f32 %v3236_v38, %v10182_v9  ;;  %v2305_v38 = vpack.c.bf16 %v3024_v56, %v3024_v56  ;;  %v3028_v56 = vld [vmem:[#allocation2 + $0x248] sm:$0xff] }
 0x3ff   :  { %v10259_v39 = vadd.f32 %v2878_v14, %v2583_v15  ;;  %v2123_v25 = vpop.f32.mrf.mxu1 }
 0x400   :  { %v2205_v3 = vadd.f32 %v2123_v25, %v9880_v27 }
 0x402   :  { %7950 = vmatmul.msk.bf16.gmra.mxu1 %vm775_vm2, %v3057_v0  ;;  %v2585_v12 = vadd.f32 %v2503_v44, %v2205_v3 }
 0x405   :  { %v2505_v18 = vpop.f32.mrf.mxu2  ;;  %v3239_v35 = vpop.f32.mrf.mxu0 }
 0x406   :  { %v10263_v57 = vpop.f32.mrf.mxu3  ;;  %v10266_v42 = vadd.f32 %v3239_v35, %v10190_v28 }
 0x407   :  { %v2125_v9 = vpop.f32.mrf.mxu1 }
 0x408   :  { %v2206_v15 = vadd.f32 %v2125_v9, %v9887_v49  ;;  %8053 = vmatmul.msk.bf16.gmra.mxu0 %vm775_vm2, %v3059_v4  ;;  %v3027_v4 = vld [vmem:[#allocation2 + $0x240] sm:$0xff] }
 0x40a   :  { %7987 = vmatmul.msk.bf16.gmra.mxu2 %vm775_vm2, %v2305_v38  ;;  %8022 = vmatmul.msk.bf16.gmra.mxu3 %vm775_vm2, %v3058_v51  ;;  %v10272_v27 = vadd.f32 %v2505_v18, %v2206_v15  ;;  %v3744_v38 = vld [vmem:[#allocation2 + $0xf8] sm:$0xff]  ;;  %v3060_v15 = vpack.c.bf16 %v3028_v56, %v3027_v4 }
 0x40c   :  { %11757 = vst [vmem:[#allocation14_spill] sm:$0xff] %v10272_v27  ;;  %v3756_v27 = vld [vmem:[#allocation2 + $0x158] sm:$0xff] }
 0x40d   :  { %v2508_v0 = vpop.f32.mrf.mxu2  ;;  %v3241_v44 = vpop.f32.mrf.mxu0 }
 0x40e   :  { %v2883_v14 = vpop.f32.mrf.mxu3  ;;  %v3743_v44 = vld [vmem:[#allocation2 + $0xf0] sm:$0xff] }
 0x40f   :  { %v10274_v25 = vadd.f32 %v2883_v14, %v2585_v12  ;;  %v2128_v28 = vpop.f32.mrf.mxu1  ;;  %v3798_v23 = vpack.c.bf16 %v3744_v38, %v3743_v44 }
 0x410   :  { %v2207_v3 = vadd.f32 %v2128_v28, %v9893_v6  ;;  %v2685_v6 = vpack.c.bf16 %v3025_v47, %v3025_v47 }
 0x412   :  { %7951 = vmatmul.msk.bf16.gmra.mxu1 %vm775_vm2, %v1925_v31  ;;  %v2587_v49 = vadd.f32 %v2508_v0, %v2207_v3 }
 0x415   :  { %v2510_v35 = vpop.f32.mrf.mxu2  ;;  %v3243_v9 = vpop.f32.mrf.mxu0 }
 0x416   :  { %v10278_v51 = vpop.f32.mrf.mxu3  ;;  %v10281_v18 = vadd.f32 %v3243_v9, %v10204_v10 }
 0x417   :  { %11758 = vst [vmem:[#allocation15_spill] sm:$0xff] %v10278_v51  ;;  %v2130_v12 = vpop.f32.mrf.mxu1 }
 0x418   :  { %v2208_v14 = vadd.f32 %v2130_v12, %v9900_v29  ;;  %8054 = vmatmul.msk.bf16.gmra.mxu0 %vm775_vm2, %v3060_v15  ;;  %v3363_v29 = vld [vmem:[#allocation2 + $0xe8] sm:$0xff]  ;;  %v3029_v12 = vld [vmem:[#allocation2 + $0x250] sm:$0xff] }
 0x419   :  { %v3418_v47 = vpack.c.bf16 %v3743_v44, %v3363_v29 }
 0x41a   :  { %8023 = vmatmul.msk.bf16.gmra.mxu3 %vm775_vm2, %v2685_v6  ;;  %8104 = vmatmul.msk.bf16.vlgmr.msra.gmra.mxu2 %vm775_vm2, %v3798_v23  ;;  %v10287_v0 = vadd.f32 %v2510_v35, %v2208_v14  ;;  %v3030_v6 = vld [vmem:[#allocation2 + $0x258] sm:$0xff]  ;;  %v3746_v23 = vld [vmem:[#allocation2 + $0x108] sm:$0xff] }
 0x41c   :  { %11759 = vst [vmem:[#allocation16_spill] sm:$0xff] %v10287_v0 }
 0x41d   :  { %v2513_v28 = vpop.f32.mrf.mxu2  ;;  %v3245_v3 = vpop.f32.mrf.mxu0 }
 0x41e   :  { %v2888_v31 = vpop.f32.mrf.mxu3  ;;  %v10290_v10 = vadd.f32 %v3245_v3, %v10211_v26 }
 0x41f   :  { %v10292_v4 = vadd.f32 %v2888_v31, %v2587_v49  ;;  %v2133_v56 = vpop.f32.mrf.mxu1  ;;  %v3061_v49 = vpack.c.bf16 %v3030_v6, %v3029_v12  ;;  %v3745_v31 = vld [vmem:[#allocation2 + $0x100] sm:$0xff] }
 0x420   :  { %v2209_v9 = vadd.f32 %v2133_v56, %v9906_v55  ;;  %v3799_v55 = vpack.c.bf16 %v3746_v23, %v3745_v31  ;;  %v3031_v6 = vld [vmem:[#allocation2 + $0x260] sm:$0xff] }
 0x422   :  { %8068 = vmatmul.msk.bf16.vlgmr.msra.gmra.mxu1 %vm775_vm2, %v3418_v47  ;;  %v2589_v15 = vadd.f32 %v2513_v28, %v2209_v9 }
 0x425   :  { %v2515_v35 = vpop.f32.mrf.mxu2  ;;  %v3248_v14 = vpop.f32.mrf.mxu0 }
 0x426   :  { %v10296_v0 = vpop.f32.mrf.mxu3  ;;  %v10299_v26 = vadd.f32 %v3248_v14, %v10220_v48  ;;  %v3419_v35 = vpack.c.bf16 %v3745_v31, %v3744_v38  ;;  %v3032_v14 = vld [vmem:[#allocation2 + $0x268] sm:$0xff] }
 0x427   :  { %11760 = vst [vmem:[#allocation17_spill] sm:$0xff] %v10296_v0  ;;  %v2135_v3 = vpop.f32.mrf.mxu1 }
 0x428   :  { %8055 = vmatmul.msk.bf16.gmra.mxu0 %vm775_vm2, %v3061_v49 }
 0x42a   :  { %8105 = vmatmul.msk.bf16.gmra.mxu2 %vm775_vm2, %v3799_v55  ;;  %v3748_v55 = vld [vmem:[#allocation2 + $0x118] sm:$0xff] }
 0x42d   :  { %v2517_v44 = vpop.f32.mrf.mxu2  ;;  %v3250_v28 = vpop.f32.mrf.mxu0 }
 0x42e   :  { %v2893_v56 = vpop.f32.mrf.mxu3  ;;  %v10304_v29 = vadd.f32 %v3250_v28, %v10227_v36  ;;  %v3062_v36 = vpack.c.bf16 %v3032_v14, %v3031_v6  ;;  %v3033_v6 = vld [vmem:[#allocation2 + $0x270] sm:$0xff]  ;;  %v3034_v14 = vld [vmem:[#allocation2 + $0x278] sm:$0xff] }
 0x42f   :  { %v10306_v9 = vadd.f32 %v2893_v56, %v2589_v15  ;;  %v2137_v47 = vpop.f32.mrf.mxu1  ;;  %v3747_v15 = vld [vmem:[#allocation2 + $0x110] sm:$0xff] }
 0x430   :  { %v2210_v48 = vadd.f32 %v2137_v47, %v9917_v37  ;;  %v3800_v37 = vpack.c.bf16 %v3748_v55, %v3747_v15 }
 0x432   :  { %8069 = vmatmul.msk.bf16.gmra.mxu1 %vm775_vm2, %v3419_v35  ;;  %v2590_v12 = vadd.f32 %v2517_v44, %v2210_v48  ;;  %v3420_v35 = vpack.c.bf16 %v3747_v15, %v3746_v23 }
 0x435   :  { %v2519_v49 = vpop.f32.mrf.mxu2  ;;  %v3253_v3 = vpop.f32.mrf.mxu0 }
 0x436   :  { %v2895_v0 = vpop.f32.mrf.mxu3  ;;  %v10311_v51 = vadd.f32 %v3253_v3, %v10238_v34 }
 0x437   :  { %v2139_v28 = vpop.f32.mrf.mxu1 }
 0x438   :  { %v2211_v56 = vadd.f32 %v2139_v28, %v9924_v60  ;;  %8056 = vmatmul.msk.bf16.gmra.mxu0 %vm775_vm2, %v3062_v36  ;;  %v3750_v28 = vld [vmem:[#allocation2 + $0x128] sm:$0xff] }
 0x43a   :  { %8106 = vmatmul.msk.bf16.gmra.mxu2 %vm775_vm2, %v3800_v37  ;;  %v10316_v38 = vadd.f32 %v2519_v49, %v2211_v56  ;;  %v3063_v37 = vpack.c.bf16 %v3034_v14, %v3033_v6 }
 0x43c   :  { %11761 = vst [vmem:[#allocation18_spill] sm:$0xff] %v10316_v38 }
 0x43d   :  { %v2522_v31 = vpop.f32.mrf.mxu2  ;;  %v10318_v44 = vpop.f32.mrf.mxu0 }
 0x43e   :  { %v2897_v47 = vpop.f32.mrf.mxu3 }
 0x43f   :  { %v10320_v0 = vadd.f32 %v2897_v47, %v2590_v12  ;;  %v2142_v34 = vpop.f32.mrf.mxu1  ;;  %v3749_v47 = vld [vmem:[#allocation2 + $0x120] sm:$0xff] }
 0x440   :  { %v2212_v48 = vadd.f32 %v2142_v34, %v9930_v20  ;;  %v3801_v20 = vpack.c.bf16 %v3750_v28, %v3749_v47  ;;  %v3421_v14 = vpack.c.bf16 %v3749_v47, %v3748_v55  ;;  %v3751_v47 = vld [vmem:[#allocation2 + $0x130] sm:$0xff] }
 0x442   :  { %8070 = vmatmul.msk.bf16.gmra.mxu1 %vm775_vm2, %v3420_v35  ;;  %v2592_v60 = vadd.f32 %v2522_v31, %v2212_v48  ;;  %v11764_v35 = vld [vmem:[#allocation6_spill] sm:$0xff] }
 0x445   :  { %v2524_v3 = vpop.f32.mrf.mxu2  ;;  %v3258_v36 = vpop.f32.mrf.mxu0 }
 0x446   :  { %v10324_v49 = vpop.f32.mrf.mxu3  ;;  %v10327_v56 = vadd.f32 %v3258_v36, %v10259_v39  ;;  %v9277_v36 = vld [vmem:[%s11747_s6 + $0x558] sm:$0xff] }
 0x447   :  { %11762 = vst [vmem:[#allocation19_spill] sm:$0xff] %v10324_v49  ;;  %v2144_v12 = vpop.f32.mrf.mxu1  ;;  %6368 = vmatpush.bf16.msrb.mxu1 %v9277_v36 }
 0x448   :  { %v2213_v38 = vadd.f32 %v2144_v12, %v9937_v50  ;;  %8057 = vmatmul.msk.bf16.gmra.mxu0 %vm775_vm2, %v3063_v37  ;;  %v3035_v37 = vld [vmem:[#allocation2 + $0x280] sm:$0xff] }
 0x44a   :  { %8107 = vmatmul.msk.bf16.gmra.mxu2 %vm775_vm2, %v3801_v20  ;;  %v10332_v23 = vadd.f32 %v2524_v3, %v2213_v38  ;;  %v3036_v38 = vld [vmem:[#allocation2 + $0x288] sm:$0xff]  ;;  %v3752_v20 = vld [vmem:[#allocation2 + $0x138] sm:$0xff] }
 0x44c   :  { %11763 = vst [vmem:[#allocation20_spill] sm:$0xff] %v10332_v23 }
 0x44d   :  { %v2527_v15 = vpop.f32.mrf.mxu2  ;;  %v10334_v31 = vpop.f32.mrf.mxu0 }
 0x44e   :  { %v2902_v34 = vpop.f32.mrf.mxu3 }
 0x44f   :  { %v10336_v48 = vadd.f32 %v2902_v34, %v2592_v60  ;;  %v2147_v39 = vpop.f32.mrf.mxu1  ;;  %v3064_v34 = vpack.c.bf16 %v3036_v38, %v3035_v37  ;;  %v3422_v38 = vpack.c.bf16 %v3751_v47, %v3750_v28  ;;  %v3753_v28 = vld [vmem:[#allocation2 + $0x140] sm:$0xff] }
 0x450   :  { %v2214_v6 = vadd.f32 %v2147_v39, %v11764_v35  ;;  %v11767_v39 = vld [vmem:[#allocation7_spill] sm:$0xff]  ;;  %v3802_v35 = vpack.c.bf16 %v3752_v20, %v3751_v47  ;;  %v11773_v47 = vld [vmem:[#allocation9_spill] sm:$0xff] }
 0x452   :  { %8071 = vmatmul.msk.bf16.gmra.mxu1 %vm775_vm2, %v3421_v14  ;;  %v2594_v50 = vadd.f32 %v2527_v15, %v2214_v6 }
 0x455   :  { %v2529_v3 = vpop.f32.mrf.mxu2  ;;  %v3263_v12 = vpop.f32.mrf.mxu0 }
 0x456   :  { %v10343_v23 = vpop.f32.mrf.mxu3  ;;  %v10346_v60 = vadd.f32 %v3263_v12, %v10274_v25  ;;  %v11770_v12 = vld [vmem:[#allocation8_spill] sm:$0xff] }
 0x457   :  { %11765 = vst [vmem:[#allocation6_spill] sm:$0xff] %v10343_v23  ;;  %v2149_v55 = vpop.f32.mrf.mxu1 }
 0x458   :  { %11766 = vst [vmem:[#allocation21_spill] sm:$0xff] %v10346_v60  ;;  %v2215_v15 = vadd.f32 %v2149_v55, %v11767_v39  ;;  %8058 = vmatmul.msk.bf16.gmra.mxu0 %vm775_vm2, %v3064_v34  ;;  %v9167_v34 = vld [vmem:[%s11747_s6 + $0x1e8] sm:$0xff]  ;;  %v3037_v39 = vld [vmem:[#allocation2 + $0x290] sm:$0xff] }
 0x459   :  { %5020 = vmatpush.bf16.msra.mxu0 %v9167_v34 }
 0x45a   :  { %8108 = vmatmul.msk.bf16.gmra.mxu2 %vm775_vm2, %v3802_v35  ;;  %v10351_v6 = vadd.f32 %v2529_v3, %v2215_v15  ;;  %v3754_v35 = vld [vmem:[#allocation2 + $0x148] sm:$0xff] }
 0x45c   :  { %11768 = vst [vmem:[#allocation7_spill] sm:$0xff] %v10351_v6 }
 0x45d   :  { %v2532_v14 = vpop.f32.mrf.mxu2  ;;  %v10353_v36 = vpop.f32.mrf.mxu0 }
 0x45e   :  { %11769 = vst [vmem:[#allocation22_spill] sm:$0xff] %v10353_v36  ;;  %v2907_v49 = vpop.f32.mrf.mxu3 }
 0x45f   :  { %v10355_v23 = vadd.f32 %v2907_v49, %v2594_v50  ;;  %v2152_v25 = vpop.f32.mrf.mxu1  ;;  %v3065_v50 = vpack.c.bf16 %v3037_v39, %v3037_v39 }
 0x460   :  { %v2216_v37 = vadd.f32 %v2152_v25, %v11770_v12 }
 0x462   :  { %8072 = vmatmul.msk.bf16.gmra.mxu1 %vm775_vm2, %v3422_v38  ;;  %v2596_v55 = vadd.f32 %v2532_v14, %v2216_v37  ;;  %v3803_v14 = vpack.c.bf16 %v3754_v35, %v3753_v28 }
 0x465   :  { %v2534_v3 = vpop.f32.mrf.mxu2  ;;  %v3268_v15 = vpop.f32.mrf.mxu0 }
 0x466   :  { %v10362_v6 = vpop.f32.mrf.mxu3  ;;  %v10365_v49 = vadd.f32 %v3268_v15, %v10292_v4  ;;  %v11775_v15 = vld [vmem:[#allocation10_spill] sm:$0xff] }
 0x467   :  { %11771 = vst [vmem:[#allocation8_spill] sm:$0xff] %v10362_v6  ;;  %v2154_v25 = vpop.f32.mrf.mxu1 }
 0x468   :  { %11772 = vst [vmem:[#allocation23_spill] sm:$0xff] %v10365_v49  ;;  %v2217_v12 = vadd.f32 %v2154_v25, %v11773_v47  ;;  %8059 = vmatmul.msk.bf16.gmra.mxu0 %vm775_vm2, %v3065_v50  ;;  %v3423_v49 = vpack.c.bf16 %v3753_v28, %v3752_v20 }
 0x46a   :  { %8109 = vmatmul.msk.bf16.gmra.mxu2 %vm775_vm2, %v3803_v14  ;;  %v10370_v37 = vadd.f32 %v2534_v3, %v2217_v12  ;;  %v3755_v14 = vld [vmem:[#allocation2 + $0x150] sm:$0xff] }
 0x46c   :  { %11774 = vst [vmem:[#allocation9_spill] sm:$0xff] %v10370_v37  ;;  %v11778_v37 = vld [vmem:[#allocation11_spill] sm:$0xff] }
 0x46d   :  { %v2537_v38 = vpop.f32.mrf.mxu2  ;;  %v10372_v34 = vpop.f32.mrf.mxu0 }
 0x46e   :  { %v2912_v36 = vpop.f32.mrf.mxu3 }
 0x46f   :  { %v10374_v6 = vadd.f32 %v2912_v36, %v2596_v55  ;;  %v2157_v4 = vpop.f32.mrf.mxu1  ;;  %v3804_v55 = vpack.c.bf16 %v3756_v27, %v3755_v14 }
 0x470   :  { %v2218_v39 = vadd.f32 %v2157_v4, %v11775_v15 }
 0x472   :  { %8073 = vmatmul.msk.bf16.gmra.mxu1 %vm775_vm2, %v3423_v49  ;;  %v2598_v25 = vadd.f32 %v2537_v38, %v2218_v39 }
 0x475   :  { %v2539_v47 = vpop.f32.mrf.mxu2  ;;  %v3273_v50 = vpop.f32.mrf.mxu0 }
 0x476   :  { %v10378_v60 = vpop.f32.mrf.mxu3  ;;  %v10381_v3 = vadd.f32 %v3273_v50, %v10306_v9 }
 0x477   :  { %11776 = vst [vmem:[#allocation10_spill] sm:$0xff] %v10378_v60  ;;  %v2159_v12 = vpop.f32.mrf.mxu1  ;;  %v3424_v60 = vpack.c.bf16 %v3755_v14, %v3754_v35  ;;  %v11781_v14 = vld [vmem:[#allocation12_spill] sm:$0xff] }
 0x478   :  { %11777 = vst [vmem:[#allocation24_spill] sm:$0xff] %v10381_v3  ;;  %v2219_v36 = vadd.f32 %v2159_v12, %v11778_v37  ;;  %v9113_v37 = vld [vmem:[%s11747_s6 + $0x38] sm:$0xff]  ;;  %v3758_v12 = vld [vmem:[#allocation2 + $0x168] sm:$0xff] }
 0x479   :  { %4279 = vmatpush.bf16.msra.mxu3 %v9113_v37  ;;  %v9110_v37 = vld [vmem:[%s11747_s6 + $0x20] sm:$0xff] }
 0x47a   :  { %8110 = vmatmul.msk.bf16.gmra.mxu2 %vm775_vm2, %v3804_v55  ;;  %v10385_v4 = vadd.f32 %v2539_v47, %v2219_v36 }
 0x47c   :  { %11779 = vst [vmem:[#allocation11_spill] sm:$0xff] %v10385_v4 }
 0x47d   :  { %v2542_v20 = vpop.f32.mrf.mxu2  ;;  %v3275_v49 = vpop.f32.mrf.mxu0 }
 0x47e   :  { %v2917_v28 = vpop.f32.mrf.mxu3 }
 0x47f   :  { %v10387_v38 = vadd.f32 %v2917_v28, %v2598_v25  ;;  %v2162_v15 = vpop.f32.mrf.mxu1  ;;  %v9111_v28 = vld [vmem:[%s11747_s6 + $0x28] sm:$0xff] }
 0x480   :  { %v2220_v39 = vadd.f32 %v2162_v15, %v9976_v21  ;;  %v9112_v21 = vld [vmem:[%s11747_s6 + $0x30] sm:$0xff] }
 0x481   :  { %4280 = vmatpush.bf16.msra.mxu3 %v9112_v21 }
 0x482   :  { %8074 = vmatmul.msk.bf16.gmra.mxu1 %vm775_vm2, %v3424_v60  ;;  %v2600_v9 = vadd.f32 %v2542_v20, %v2220_v39  ;;  %v3757_v60 = vld [vmem:[#allocation2 + $0x160] sm:$0xff] }
 0x483   :  { %v3805_v20 = vpack.c.bf16 %v3758_v12, %v3757_v60 }
 0x485   :  { %v2544_v50 = vpop.f32.mrf.mxu2  ;;  %v3277_v47 = vpop.f32.mrf.mxu0  ;;  %4281 = vmatpush.bf16.msra.mxu3 %v9111_v28 }
 0x486   :  { %v10394_v36 = vpop.f32.mrf.mxu3  ;;  %v10397_v25 = vadd.f32 %v3277_v47, %v10320_v0 }
 0x487   :  { %11780 = vst [vmem:[#allocation25_spill] sm:$0xff] %v10394_v36  ;;  %v2164_v35 = vpop.f32.mrf.mxu1  ;;  %v3761_v36 = vld [vmem:[#allocation2 + $0x180] sm:$0xff] }
 0x488   :  { %v2221_v55 = vadd.f32 %v2164_v35, %v11781_v14 }
 0x489   :  { %4282 = vmatpush.bf16.msra.mxu3 %v9110_v37 }
 0x48a   :  { %8111 = vmatmul.msk.bf16.gmra.mxu2 %vm775_vm2, %v3805_v20  ;;  %v10404_v49 = vadd.f32 %v2544_v50, %v2221_v55  ;;  %v3425_v50 = vpack.c.bf16 %v3757_v60, %v3756_v27  ;;  %v9109_v55 = vld [vmem:[%s11747_s6 + $0x18] sm:$0xff]  ;;  %v3759_v60 = vld [vmem:[#allocation2 + $0x170] sm:$0xff] }
 0x48c   :  { %11782 = vst [vmem:[#allocation12_spill] sm:$0xff] %v10404_v49  ;;  %v3760_v49 = vld [vmem:[#allocation2 + $0x178] sm:$0xff] }
 0x48d   :  { %v2547_v0 = vpop.f32.mrf.mxu2  ;;  %v10409_v15 = vpop.f32.mrf.mxu0  ;;  %4319 = vmatpush.bf16.msrb.mxu3 %v9109_v55 }
 0x48e   :  { %v2922_v39 = vpop.f32.mrf.mxu3 }
 0x48f   :  { %v10414_v47 = vadd.f32 %v2922_v39, %v2600_v9  ;;  %v2167_v21 = vpop.f32.mrf.mxu1  ;;  %v9107_v39 = vld [vmem:[%s11747_s6 + $0x8] sm:$0xff] }
 0x490   :  { %v2222_v35 = vadd.f32 %v2167_v21, %v9986_v54  ;;  %v9108_v54 = vld [vmem:[%s11747_s6 + $0x10] sm:$0xff] }
 0x491   :  { %4320 = vmatpush.bf16.msrb.mxu3 %v9108_v54 }
 0x492   :  { %8075 = vmatmul.msk.bf16.gmra.mxu1 %vm775_vm2, %v3425_v50  ;;  %v2602_v14 = vadd.f32 %v2547_v0, %v2222_v35  ;;  %v3806_v0 = vpack.c.bf16 %v3760_v49, %v3759_v60  ;;  %v9106_v35 = vld [vmem:[%s11747_s6] sm:$0xff] }
 0x495   :  { %v2549_v20 = vpop.f32.mrf.mxu2  ;;  %v3282_v28 = vpop.f32.mrf.mxu0  ;;  %4321 = vmatpush.bf16.msrb.mxu3 %v9107_v39 }
 0x496   :  { %v10421_v3 = vpop.f32.mrf.mxu3  ;;  %v10424_v9 = vadd.f32 %v3282_v28, %v10336_v48  ;;  %v3426_v20 = vpack.c.bf16 %v3759_v60, %v3758_v12 }
 0x497   :  { %11783 = vst [vmem:[#allocation26_spill] sm:$0xff] %v10421_v3  ;;  %v2169_v27 = vpop.f32.mrf.mxu1 }
 0x498   :  { %v3762_v27 = vld [vmem:[#allocation2 + $0x188] sm:$0xff] }
 0x499   :  { %4322 = vmatpush.bf16.msrb.mxu3 %v9106_v35 }
 0x49a   :  { %8112 = vmatmul.msk.bf16.gmra.mxu2 %vm775_vm2, %v3806_v0 }
 0x49d   :  { %v10433_v37 = vpop.f32.mrf.mxu0  ;;  %v3935_v21 = vpop.f32.mrf.mxu2 }
 0x49e   :  { %11784 = vst [vmem:[#allocation27_spill] sm:$0xff] %v10433_v37  ;;  %v2927_v48 = vpop.f32.mrf.mxu3  ;;  %v3807_v37 = vpack.c.bf16 %v3762_v27, %v3761_v36 }
 0x49f   :  { %v10438_v50 = vadd.f32 %v2927_v48, %v2602_v14  ;;  %v3555_v55 = vpop.f32.mrf.mxu1  ;;  %v10448_v14 = vld [vmem:[%s11745_s4] ss:$0 sm:$0xff] }
 0x4a2   :  { %8076 = vmatmul.msk.bf16.gmra.mxu1 %vm775_vm2, %v3426_v20 }
 0x4a5   :  { %v3287_v28 = vpop.f32.mrf.mxu0  ;;  %v3937_v54 = vpop.f32.mrf.mxu2 }
 0x4a6   :  { %v2929_v0 = vpop.f32.mrf.mxu3  ;;  %v10442_v39 = vadd.f32 %v3287_v28, %v10355_v23 }
 0x4a7   :  { %v3557_v3 = vpop.f32.mrf.mxu1  ;;  %v3427_v0 = vpack.c.bf16 %v3761_v36, %v3760_v49  ;;  %v9115_v36 = vld [vmem:[%s11747_s6 + $0x48] sm:$0xff] }
 0x4a8   :  { %11785 = vst [vmem:[#allocation28_spill] sm:$0xff] %v10442_v39  ;;  %v3692_v4 = vadd.f32 %v3557_v3, %v10064_v40  ;;  %v9117_v40 = vld [vmem:[%s11747_s6 + $0x58] sm:$0xff]  ;;  %v3691_v3 = vadd.f32 %v3555_v55, %v10055_v59  ;;  %v3763_v59 = vld [vmem:[#allocation2 + $0x190] sm:$0xff] }
 0x4aa   :  { %v4072_v12 = vadd.f32 %v3937_v54, %v3692_v4  ;;  %8113 = vmatmul.msk.bf16.gmra.mxu2 %vm775_vm2, %v3807_v37  ;;  %v9116_v4 = vld [vmem:[%s11747_s6 + $0x50] sm:$0xff]  ;;  %v4071_v37 = vadd.f32 %v3935_v21, %v3691_v3  ;;  %v9114_v21 = vld [vmem:[%s11747_s6 + $0x40] sm:$0xff] }
 0x4ac   :  { %v4126_v60 = vadd.f32 %v10448_v14, %v4072_v12  ;;  %v4125_v49 = vadd.f32 %v10448_v14, %v4071_v37  ;;  %v3428_v37 = vpack.c.bf16 %v3763_v59, %v3762_v27  ;;  %v9119_v27 = vld [vmem:[%s11747_s6 + $0x68] sm:$0xff] }
 0x4ad   :  { %v10452_v48 = vpop.f32.mrf.mxu0  ;;  %v3940_v35 = vpop.f32.mrf.mxu2 }
 0x4ae   :  { %11786 = vst [vmem:[#allocation29_spill] sm:$0xff] %v10452_v48  ;;  %v4178_v23 = vmax.f32 %v4126_v60, 0.0  ;;  %v3764_v60 = vld [vmem:[#allocation2 + $0x198] sm:$0xff] }
 0x4af   :  { %v3560_v20 = vpop.f32.mrf.mxu1  ;;  %v3808_v55 = vpack.c.bf16 %v3764_v60, %v3763_v59 }
 0x4b0   :  { %v4238_v28 = vpack.c.bf16 %v4178_v23, %v4178_v23  ;;  %v4177_v23 = vmax.f32 %v4125_v49, 0.0 }
 0x4b2   :  { %8077 = vmatmul.msk.bf16.gmra.mxu1 %vm775_vm2, %v3427_v0  ;;  %8148 = vmatmul.msk.bf16.vlgmr.msra.gmra.mxu3 %vm4271_vm3, %v4238_v28  ;;  %v9121_v28 = vld [vmem:[%s11747_s6 + $0x78] sm:$0xff]  ;;  %v4229_v0 = vpack.c.bf16 %v4177_v23, %v4177_v23 }
 0x4b3   :  { %4368 = vmatpush.bf16.msra.mxu3 %v9117_v40 }
 0x4b5   :  { %v3292_v54 = vpop.f32.mrf.mxu0  ;;  %v3942_v12 = vpop.f32.mrf.mxu2 }
 0x4b6   :  { %v10464_v48 = vadd.f32 %v3292_v54, %v10374_v6  ;;  %v9120_v54 = vld [vmem:[%s11747_s6 + $0x70] sm:$0xff] }
 0x4b7   :  { %v3562_v39 = vpop.f32.mrf.mxu1  ;;  %4369 = vmatpush.bf16.msra.mxu3 %v9116_v4  ;;  %v3693_v4 = vadd.f32 %v3560_v20, %v10071_v17  ;;  %v3765_v17 = vld [vmem:[#allocation2 + $0x1a0] sm:$0xff] }
 0x4b8   :  { %11787 = vst [vmem:[#allocation30_spill] sm:$0xff] %v10464_v48  ;;  %v3767_v48 = vld [vmem:[#allocation2 + $0x1b0] sm:$0xff] }
 0x4ba   :  { %8114 = vmatmul.msk.bf16.gmra.mxu2 %vm775_vm2, %v3808_v55 }
 0x4bb   :  { %4370 = vmatpush.bf16.msra.mxu3 %v9115_v36  ;;  %v4073_v36 = vadd.f32 %v3940_v35, %v3693_v4  ;;  %v9276_v35 = vld [vmem:[%s11747_s6 + $0x550] sm:$0xff] }
 0x4bc   :  { %6369 = vmatpush.bf16.msrb.mxu1 %v9276_v35 }
 0x4bd   :  { %v10474_v6 = vpop.f32.mrf.mxu0  ;;  %v10476_v40 = vpop.f32.mrf.mxu2  ;;  %v4127_v20 = vadd.f32 %v10448_v14, %v4073_v36 }
 0x4be   :  { %11788 = vst [vmem:[#allocation31_spill] sm:$0xff] %v10474_v6 }
 0x4bf   :  { %v10478_v3 = vpop.f32.mrf.mxu1  ;;  %4371 = vmatpush.bf16.msra.mxu3 %v9114_v21  ;;  %v3766_v21 = vld [vmem:[#allocation2 + $0x1a8] sm:$0xff] }
 0x4c0   :  { %v3809_v59 = vpack.c.bf16 %v3766_v21, %v3765_v17 }
 0x4c2   :  { %8078 = vmatmul.msk.bf16.gmra.mxu1 %vm775_vm2, %v3428_v37  ;;  %8165 = vmatmul.msk.bf16.vlgmr.msrb.gmra.mxu3 %vm4271_vm3, %v4229_v0 }
 0x4c3   :  { %4418 = vmatpush.bf16.msrb.mxu3 %v9121_v28  ;;  %v4179_v28 = vmax.f32 %v4127_v20, 0.0  ;;  %v9124_v20 = vld [vmem:[%s11747_s6 + $0x90] sm:$0xff] }
 0x4c5   :  { %v3297_v49 = vpop.f32.mrf.mxu0  ;;  %v10489_v55 = vpop.f32.mrf.mxu2  ;;  %v4328_v36 = vpack.c.bf16 %v4179_v28, %v4179_v28 }
 0x4c6   :  { %v10492_v6 = vadd.f32 %v3297_v49, %v10387_v38  ;;  %v9118_v38 = vld [vmem:[%s11747_s6 + $0x60] sm:$0xff]  ;;  %v3694_v49 = vadd.f32 %v3562_v39, %v10079_v63  ;;  %v9123_v63 = vld [vmem:[%s11747_s6 + $0x88] sm:$0xff] }
 0x4c7   :  { %v10494_v23 = vpop.f32.mrf.mxu1  ;;  %4419 = vmatpush.bf16.msrb.mxu3 %v9120_v54  ;;  %v9125_v54 = vld [vmem:[%s11747_s6 + $0x98] sm:$0xff] }
 0x4c8   :  { %11789 = vst [vmem:[#allocation32_spill] sm:$0xff] %v10492_v6 }
 0x4ca   :  { %8115 = vmatmul.msk.bf16.gmra.mxu2 %vm775_vm2, %v3809_v59  ;;  %v4074_v59 = vadd.f32 %v3942_v12, %v3694_v49  ;;  %v9166_v12 = vld [vmem:[%s11747_s6 + $0x1e0] sm:$0xff] }
 0x4cb   :  { %4420 = vmatpush.bf16.msrb.mxu3 %v9119_v27  ;;  %v3429_v27 = vpack.c.bf16 %v3765_v17, %v3764_v60  ;;  %5021 = vmatpush.bf16.msra.mxu0 %v9166_v12 }
 0x4cc   :  { %v4128_v39 = vadd.f32 %v10448_v14, %v4074_v59 }
 0x4cd   :  { %v10507_v0 = vpop.f32.mrf.mxu0  ;;  %v10509_v4 = vpop.f32.mrf.mxu2 }
 0x4ce   :  { %11790 = vst [vmem:[#allocation33_spill] sm:$0xff] %v10507_v0  ;;  %v3768_v0 = vld [vmem:[#allocation2 + $0x1b8] sm:$0xff] }
 0x4cf   :  { %v10511_v37 = vpop.f32.mrf.mxu1  ;;  %4421 = vmatpush.bf16.msrb.mxu3 %v9118_v38  ;;  %v3810_v17 = vpack.c.bf16 %v3768_v0, %v3767_v48 }
 0x4d2   :  { %8079 = vmatmul.msk.bf16.gmra.mxu1 %vm775_vm2, %v3429_v27  ;;  %8182 = vmatmul.msk.bf16.vlgmr.msra.gmra.mxu3 %vm4271_vm3, %v4328_v36  ;;  %v4180_v36 = vmax.f32 %v4128_v39, 0.0  ;;  %v9128_v39 = vld [vmem:[%s11747_s6 + $0xb0] sm:$0xff] }
 0x4d3   :  { %4468 = vmatpush.bf16.msra.mxu3 %v9125_v54 }
 0x4d4   :  { %v4378_v59 = vpack.c.bf16 %v4180_v36, %v4180_v36 }
 0x4d5   :  { %v3302_v35 = vpop.f32.mrf.mxu0  ;;  %v3952_v38 = vpop.f32.mrf.mxu2 }
 0x4d6   :  { %v10523_v6 = vadd.f32 %v3302_v35, %v10414_v47  ;;  %v9122_v47 = vld [vmem:[%s11747_s6 + $0x80] sm:$0xff]  ;;  %v3695_v35 = vadd.f32 %v10478_v3, %v10086_v30  ;;  %v9127_v3 = vld [vmem:[%s11747_s6 + $0xa8] sm:$0xff] }
 0x4d7   :  { %v3572_v28 = vpop.f32.mrf.mxu1  ;;  %4469 = vmatpush.bf16.msra.mxu3 %v9124_v20  ;;  %v9129_v20 = vld [vmem:[%s11747_s6 + $0xb8] sm:$0xff] }
 0x4d8   :  { %v3698_v60 = vadd.f32 %v3572_v28, %v10109_v45  ;;  %v3430_v28 = vpack.c.bf16 %v3767_v48, %v3766_v21  ;;  %v3769_v48 = vld [vmem:[#allocation2 + $0x1c0] sm:$0xff] }
 0x4da   :  { %v10533_v54 = vadd.f32 %v3952_v38, %v3698_v60  ;;  %8116 = vmatmul.msk.bf16.gmra.mxu2 %vm775_vm2, %v3810_v17  ;;  %v4075_v60 = vadd.f32 %v10476_v40, %v3695_v35 }
 0x4db   :  { %4470 = vmatpush.bf16.msra.mxu3 %v9123_v63 }
 0x4dc   :  { %v4129_v21 = vadd.f32 %v10448_v14, %v4075_v60  ;;  %v3431_v60 = vpack.c.bf16 %v3769_v48, %v3768_v0 }
 0x4dd   :  { %v10539_v49 = vpop.f32.mrf.mxu0  ;;  %v3955_v27 = vpop.f32.mrf.mxu2 }
 0x4de   :  { %v4181_v40 = vmax.f32 %v4129_v21, 0.0  ;;  %v3772_v21 = vld [vmem:[#allocation2 + $0x1d8] sm:$0xff] }
 0x4df   :  { %v3575_v45 = vpop.f32.mrf.mxu1  ;;  %4471 = vmatpush.bf16.msra.mxu3 %v9122_v47  ;;  %v3770_v47 = vld [vmem:[#allocation2 + $0x1c8] sm:$0xff] }
 0x4e0   :  { %v3699_v38 = vadd.f32 %v3575_v45, %v10116_v24 }
 0x4e2   :  { %v10547_v63 = vadd.f32 %v3955_v27, %v3699_v38  ;;  %8080 = vmatmul.msk.bf16.gmra.mxu1 %vm775_vm2, %v3430_v28  ;;  %8199 = vmatmul.msk.bf16.vlgmr.msrb.gmra.mxu3 %vm4271_vm3, %v4378_v59  ;;  %v3811_v27 = vpack.c.bf16 %v3770_v47, %v3769_v48  ;;  %v9133_v38 = vld [vmem:[%s11747_s6 + $0xd8] sm:$0xff]  ;;  %v3696_v28 = vadd.f32 %v10494_v23, %v10093_v8  ;;  %v3771_v8 = vld [vmem:[#allocation2 + $0x1d0] sm:$0xff] }
 0x4e3   :  { %4518 = vmatpush.bf16.msrb.mxu3 %v9129_v20  ;;  %v3812_v48 = vpack.c.bf16 %v3772_v21, %v3771_v8 }
 0x4e5   :  { %v3307_v17 = vpop.f32.mrf.mxu0  ;;  %v3957_v12 = vpop.f32.mrf.mxu2 }
 0x4e6   :  { %v10556_v30 = vadd.f32 %v3307_v17, %v10438_v50  ;;  %v9126_v50 = vld [vmem:[%s11747_s6 + $0xa0] sm:$0xff] }
 0x4e7   :  { %v3577_v24 = vpop.f32.mrf.mxu1  ;;  %4519 = vmatpush.bf16.msrb.mxu3 %v9128_v39 }
 0x4e8   :  { %v3700_v36 = vadd.f32 %v3577_v24, %v10125_v1  ;;  %v4428_v1 = vpack.c.bf16 %v4181_v40, %v4181_v40  ;;  %v4076_v24 = vadd.f32 %v10489_v55, %v3696_v28  ;;  %v9130_v55 = vld [vmem:[%s11747_s6 + $0xc0] sm:$0xff] }
 0x4ea   :  { %v10563_v45 = vadd.f32 %v3957_v12, %v3700_v36  ;;  %8117 = vmatmul.msk.bf16.gmra.mxu2 %vm775_vm2, %v3811_v27  ;;  %v9132_v12 = vld [vmem:[%s11747_s6 + $0xd0] sm:$0xff]  ;;  %v4130_v23 = vadd.f32 %v10448_v14, %v4076_v24  ;;  %v3774_v24 = vld [vmem:[#allocation2 + $0x1e8] sm:$0xff] }
 0x4eb   :  { %4520 = vmatpush.bf16.msrb.mxu3 %v9127_v3 }
 0x4ed   :  { %v3309_v20 = vpop.f32.mrf.mxu0  ;;  %v3960_v59 = vpop.f32.mrf.mxu2 }
 0x4ef   :  { %v3580_v35 = vpop.f32.mrf.mxu1  ;;  %4521 = vmatpush.bf16.msrb.mxu3 %v9126_v50  ;;  %v4182_v50 = vmax.f32 %v4130_v23, 0.0  ;;  %v9176_v23 = vld [vmem:[%s11747_s6 + $0x230] sm:$0xff] }
 0x4f0   :  { %v3701_v39 = vadd.f32 %v3580_v35, %v10135_v11  ;;  %v9131_v11 = vld [vmem:[%s11747_s6 + $0xc8] sm:$0xff] }
 0x4f1   :  { %v4478_v35 = vpack.c.bf16 %v4182_v50, %v4182_v50 }
 0x4f2   :  { %v10575_v17 = vadd.f32 %v3960_v59, %v3701_v39  ;;  %8081 = vmatmul.msk.bf16.gmra.mxu1 %vm775_vm2, %v3431_v60  ;;  %8216 = vmatmul.msk.bf16.vlgmr.msra.gmra.mxu3 %vm4271_vm3, %v4428_v1  ;;  %v9137_v59 = vld [vmem:[%s11747_s6 + $0xf8] sm:$0xff]  ;;  %v3432_v1 = vpack.c.bf16 %v3771_v8, %v3770_v47  ;;  %v9136_v39 = vld [vmem:[%s11747_s6 + $0xf0] sm:$0xff] }
 0x4f3   :  { %4568 = vmatpush.bf16.msra.mxu3 %v9133_v38 }
 0x4f5   :  { %v3962_v3 = vpop.f32.mrf.mxu2 }
 0x4f7   :  { %v3582_v36 = vpop.f32.mrf.mxu1  ;;  %4569 = vmatpush.bf16.msra.mxu3 %v9132_v12 }
 0x4f8   :  { %v3702_v0 = vadd.f32 %v3582_v36, %v10144_v13  ;;  %v3697_v13 = vadd.f32 %v10511_v37, %v10100_v22  ;;  %v3773_v22 = vld [vmem:[#allocation2 + $0x1e0] sm:$0xff]  ;;  %v9177_v36 = vld [vmem:[%s11747_s6 + $0x238] sm:$0xff] }
 0x4f9   :  { %v3813_v47 = vpack.c.bf16 %v3774_v24, %v3773_v22  ;;  %5118 = vmatpush.bf16.msrb.mxu0 %v9177_v36 }
 0x4fa   :  { %v10588_v27 = vadd.f32 %v3962_v3, %v3702_v0  ;;  %8118 = vmatmul.msk.bf16.gmra.mxu2 %vm775_vm2, %v3812_v48  ;;  %v4077_v60 = vadd.f32 %v10509_v4, %v3697_v13  ;;  %v9134_v4 = vld [vmem:[%s11747_s6 + $0xe0] sm:$0xff]  ;;  %v9141_v48 = vld [vmem:[%s11747_s6 + $0x118] sm:$0xff] }
 0x4fb   :  { %4570 = vmatpush.bf16.msra.mxu3 %v9131_v11 }
 0x4fc   :  { %v4131_v37 = vadd.f32 %v10448_v14, %v4077_v60  ;;  %v4132_v60 = vadd.f32 %v10448_v14, %v10533_v54  ;;  %v9145_v54 = vld [vmem:[%s11747_s6 + $0x138] sm:$0xff] }
 0x4fd   :  { %v3965_v40 = vpop.f32.mrf.mxu2  ;;  %5119 = vmatpush.bf16.msrb.mxu0 %v9176_v23  ;;  %v9144_v23 = vld [vmem:[%s11747_s6 + $0x130] sm:$0xff] }
 0x4fe   :  { %v4183_v8 = vmax.f32 %v4131_v37, 0.0  ;;  %v4184_v37 = vmax.f32 %v4132_v60, 0.0 }
 0x4ff   :  { %v3585_v20 = vpop.f32.mrf.mxu1  ;;  %4571 = vmatpush.bf16.msra.mxu3 %v9130_v55 }
 0x500   :  { %v3703_v38 = vadd.f32 %v3585_v20, %v10151_v41  ;;  %v9135_v41 = vld [vmem:[%s11747_s6 + $0xe8] sm:$0xff]  ;;  %v4528_v55 = vpack.c.bf16 %v4183_v8, %v4183_v8 }
 0x502   :  { %v10600_v28 = vadd.f32 %v3965_v40, %v3703_v38  ;;  %8082 = vmatmul.msk.bf16.gmra.mxu1 %vm775_vm2, %v3432_v1  ;;  %8233 = vmatmul.msk.bf16.vlgmr.msrb.gmra.mxu3 %vm4271_vm3, %v4478_v35  ;;  %v3433_v40 = vpack.c.bf16 %v3773_v22, %v3772_v21  ;;  %v9140_v35 = vld [vmem:[%s11747_s6 + $0x110] sm:$0xff]  ;;  %v9174_v21 = vld [vmem:[%s11747_s6 + $0x220] sm:$0xff] }
 0x503   :  { %4618 = vmatpush.bf16.msrb.mxu3 %v9137_v59  ;;  %v9175_v59 = vld [vmem:[%s11747_s6 + $0x228] sm:$0xff]  ;;  %v3775_v1 = vld [vmem:[#allocation2 + $0x1f0] sm:$0xff] }
 0x504   :  { %5120 = vmatpush.bf16.msrb.mxu0 %v9175_v59  ;;  %v3434_v8 = vpack.c.bf16 %v3775_v1, %v3774_v24  ;;  %v3777_v59 = vld [vmem:[#allocation2 + $0x200] sm:$0xff]  ;;  %v9185_v24 = vld [vmem:[%s11747_s6 + $0x278] sm:$0xff] }
 0x505   :  { %v3967_v12 = vpop.f32.mrf.mxu2 }
 0x507   :  { %v3587_v3 = vpop.f32.mrf.mxu1  ;;  %4619 = vmatpush.bf16.msrb.mxu3 %v9136_v39  ;;  %v9139_v39 = vld [vmem:[%s11747_s6 + $0x108] sm:$0xff] }
 0x508   :  { %5121 = vmatpush.bf16.msrb.mxu0 %v9174_v21 }
 0x50a   :  { %8119 = vmatmul.msk.bf16.gmra.mxu2 %vm775_vm2, %v3813_v47 }
 0x50b   :  { %4620 = vmatpush.bf16.msrb.mxu3 %v9135_v41  ;;  %v9138_v41 = vld [vmem:[%s11747_s6 + $0x100] sm:$0xff] }
 0x50d   :  { %v3969_v11 = vpop.f32.mrf.mxu2 }
 0x50f   :  { %v3589_v0 = vpop.f32.mrf.mxu1  ;;  %4621 = vmatpush.bf16.msrb.mxu3 %v9134_v4 }
 0x510   :  { %v3704_v50 = vadd.f32 %v3589_v0, %v10164_v32  ;;  %v3776_v32 = vld [vmem:[#allocation2 + $0x1f8] sm:$0xff] }
 0x511   :  { %v3814_v3 = vpack.c.bf16 %v3776_v32, %v3775_v1 }
 0x512   :  { %v10626_v20 = vadd.f32 %v3969_v11, %v3704_v50  ;;  %8083 = vmatmul.msk.bf16.gmra.mxu1 %vm775_vm2, %v3433_v40  ;;  %8250 = vmatmul.msk.bf16.vlgmr.msra.gmra.mxu3 %vm4271_vm3, %v4528_v55  ;;  %v10661_v55 = vld [vmem:[#allocation2 + $0x208] sm:$0xff] }
 0x513   :  { %4668 = vmatpush.bf16.msra.mxu3 %v9141_v48 }
 0x515   :  { %v3971_v13 = vpop.f32.mrf.mxu2 }
 0x517   :  { %v3591_v38 = vpop.f32.mrf.mxu1  ;;  %4669 = vmatpush.bf16.msra.mxu3 %v9140_v35  ;;  %v4133_v35 = vadd.f32 %v10448_v14, %v10547_v63  ;;  %v9184_v63 = vld [vmem:[%s11747_s6 + $0x270] sm:$0xff] }
 0x518   :  { %v3705_v12 = vadd.f32 %v3591_v38, %v10173_v16  ;;  %v4578_v16 = vpack.c.bf16 %v4184_v37, %v4184_v37  ;;  %v3815_v38 = vpack.c.bf16 %v10661_v55, %v3777_v59 }
 0x519   :  { %v4185_v60 = vmax.f32 %v4133_v35, 0.0 }
 0x51a   :  { %v10645_v22 = vadd.f32 %v3971_v13, %v3705_v12  ;;  %8120 = vmatmul.msk.bf16.gmra.mxu2 %vm775_vm2, %v3814_v3  ;;  %v9149_v3 = vld [vmem:[%s11747_s6 + $0x158] sm:$0xff] }
 0x51b   :  { %4670 = vmatpush.bf16.msra.mxu3 %v9139_v39  ;;  %v9142_v39 = vld [vmem:[%s11747_s6 + $0x120] sm:$0xff]  ;;  %v4628_v37 = vpack.c.bf16 %v4185_v60, %v4185_v60 }
 0x51d   :  { %v3974_v47 = vpop.f32.mrf.mxu2 }
 0x51f   :  { %v3594_v36 = vpop.f32.mrf.mxu1  ;;  %4671 = vmatpush.bf16.msra.mxu3 %v9138_v41  ;;  %v9183_v41 = vld [vmem:[%s11747_s6 + $0x268] sm:$0xff] }
 0x520   :  { %v3706_v4 = vadd.f32 %v3594_v36, %v10180_v33  ;;  %v9143_v33 = vld [vmem:[%s11747_s6 + $0x128] sm:$0xff]  ;;  %v3435_v36 = vpack.c.bf16 %v3777_v59, %v3776_v32  ;;  %v10699_v32 = vld [vmem:[#allocation2 + $0x218] sm:$0xff]  ;;  %v4134_v59 = vadd.f32 %v10448_v14, %v10563_v45  ;;  %v9146_v45 = vld [vmem:[%s11747_s6 + $0x140] sm:$0xff] }
 0x522   :  { %v4086_v11 = vadd.f32 %v3974_v47, %v3706_v4  ;;  %8084 = vmatmul.msk.bf16.gmra.mxu1 %vm775_vm2, %v3434_v8  ;;  %8267 = vmatmul.msk.bf16.vlgmr.msrb.gmra.mxu3 %vm4271_vm3, %v4578_v16  ;;  %v9148_v16 = vld [vmem:[%s11747_s6 + $0x150] sm:$0xff]  ;;  %v9182_v4 = vld [vmem:[%s11747_s6 + $0x260] sm:$0xff] }
 0x523   :  { %4718 = vmatpush.bf16.msrb.mxu3 %v9145_v54 }
 0x524   :  { %v4140_v0 = vadd.f32 %v10448_v14, %v4086_v11 }
 0x525   :  { %v3976_v48 = vpop.f32.mrf.mxu2 }
 0x526   :  { %v4192_v50 = vmax.f32 %v4140_v0, 0.0 }
 0x527   :  { %v3596_v40 = vpop.f32.mrf.mxu1  ;;  %4719 = vmatpush.bf16.msrb.mxu3 %v9144_v23 }
 0x528   :  { %v4978_v13 = vpack.c.bf16 %v4192_v50, %v4192_v50  ;;  %v3707_v21 = vadd.f32 %v3596_v40, %v10188_v52  ;;  %v9147_v50 = vld [vmem:[%s11747_s6 + $0x148] sm:$0xff]  ;;  %v9193_v40 = vld [vmem:[%s11747_s6 + $0x2b8] sm:$0xff] }
 0x52a   :  { %v10673_v1 = vadd.f32 %v3976_v48, %v3707_v21  ;;  %8121 = vmatmul.msk.bf16.gmra.mxu2 %vm775_vm2, %v3815_v38  ;;  %8403 = vmatmul.msk.bf16.vlgmr.msra.gmra.mxu0 %vm4271_vm3, %v4978_v13  ;;  %v3779_v48 = vld [vmem:[#allocation2 + $0x210] sm:$0xff]  ;;  %v9275_v13 = vld [vmem:[%s11747_s6 + $0x548] sm:$0xff]  ;;  %v4186_v38 = vmax.f32 %v4134_v59, 0.0 }
 0x52b   :  { %4720 = vmatpush.bf16.msrb.mxu3 %v9143_v33  ;;  %5218 = vmatpush.bf16.msra.mxu0 %v9185_v24  ;;  %v3816_v35 = vpack.c.bf16 %v10699_v32, %v3779_v48 }
 0x52c   :  { %6370 = vmatpush.bf16.msrb.mxu1 %v9275_v13 }
 0x52d   :  { %v3979_v52 = vpop.f32.mrf.mxu2 }
 0x52f   :  { %v3599_v12 = vpop.f32.mrf.mxu1  ;;  %4721 = vmatpush.bf16.msrb.mxu3 %v9142_v39  ;;  %5219 = vmatpush.bf16.msra.mxu0 %v9184_v63 }
 0x530   :  { %v3708_v47 = vadd.f32 %v3599_v12, %v10195_v46  ;;  %v9191_v12 = vld [vmem:[%s11747_s6 + $0x2a8] sm:$0xff] }
 0x532   :  { %v4088_v54 = vadd.f32 %v3979_v52, %v3708_v47  ;;  %8085 = vmatmul.msk.bf16.gmra.mxu1 %vm775_vm2, %v3435_v36  ;;  %8284 = vmatmul.msk.bf16.vlgmr.msra.gmra.mxu3 %vm4271_vm3, %v4628_v37  ;;  %v9153_v52 = vld [vmem:[%s11747_s6 + $0x178] sm:$0xff]  ;;  %v3436_v37 = vpack.c.bf16 %v3779_v48, %v10661_v55  ;;  %v9152_v36 = vld [vmem:[%s11747_s6 + $0x170] sm:$0xff]  ;;  %v10741_v55 = vld [vmem:[#allocation2 + $0x228] sm:$0xff] }
 0x533   :  { %4768 = vmatpush.bf16.msra.mxu3 %v9149_v3  ;;  %5220 = vmatpush.bf16.msra.mxu0 %v9183_v41  ;;  %v4678_v3 = vpack.c.bf16 %v4186_v38, %v4186_v38  ;;  %v9151_v48 = vld [vmem:[%s11747_s6 + $0x168] sm:$0xff]  ;;  %v9157_v38 = vld [vmem:[%s11747_s6 + $0x198] sm:$0xff] }
 0x534   :  { %v4142_v8 = vadd.f32 %v10448_v14, %v4088_v54  ;;  %v9190_v54 = vld [vmem:[%s11747_s6 + $0x2a0] sm:$0xff] }
 0x535   :  { %v3981_v11 = vpop.f32.mrf.mxu2  ;;  %v4284_v46 = vpop.f32.mrf.mxu3 }
 0x536   :  { %v4194_v23 = vmax.f32 %v4142_v8, 0.0 }
 0x537   :  { %v3601_v0 = vpop.f32.mrf.mxu1  ;;  %4769 = vmatpush.bf16.msra.mxu3 %v9148_v16  ;;  %5221 = vmatpush.bf16.msra.mxu0 %v9182_v4 }
 0x538   :  { %v5078_v33 = vpack.c.bf16 %v4194_v23, %v4194_v23  ;;  %v3709_v24 = vadd.f32 %v3601_v0, %v10202_v53  ;;  %v9192_v53 = vld [vmem:[%s11747_s6 + $0x2b0] sm:$0xff]  ;;  %v3781_v0 = vld [vmem:[#allocation2 + $0x220] sm:$0xff] }
 0x53a   :  { %v10714_v21 = vadd.f32 %v3981_v11, %v3709_v24  ;;  %8122 = vmatmul.msk.bf16.gmra.mxu2 %vm775_vm2, %v3816_v35  ;;  %8437 = vmatmul.msk.bf16.vlgmr.msrb.gmra.mxu0 %vm4271_vm3, %v5078_v33  ;;  %v9150_v35 = vld [vmem:[%s11747_s6 + $0x160] sm:$0xff] }
 0x53b   :  { %4770 = vmatpush.bf16.msra.mxu3 %v9147_v50  ;;  %5318 = vmatpush.bf16.msrb.mxu0 %v9193_v40  ;;  %v9201_v50 = vld [vmem:[%s11747_s6 + $0x2f8] sm:$0xff]  ;;  %v4135_v40 = vadd.f32 %v10448_v14, %v10575_v17  ;;  %v9200_v17 = vld [vmem:[%s11747_s6 + $0x2f0] sm:$0xff] }
 0x53d   :  { %v3984_v39 = vpop.f32.mrf.mxu2  ;;  %v4286_v63 = vpop.f32.mrf.mxu3  ;;  %v4187_v13 = vmax.f32 %v4135_v40, 0.0  ;;  %v9154_v40 = vld [vmem:[%s11747_s6 + $0x180] sm:$0xff] }
 0x53f   :  { %v3604_v60 = vpop.f32.mrf.mxu1  ;;  %4771 = vmatpush.bf16.msra.mxu3 %v9146_v45  ;;  %5319 = vmatpush.bf16.msrb.mxu0 %v9192_v53  ;;  %v4728_v63 = vpack.c.bf16 %v4187_v13, %v4187_v13 }
 0x540   :  { %v3710_v41 = vadd.f32 %v3604_v60, %v10209_v61 }
 0x542   :  { %v4090_v47 = vadd.f32 %v3984_v39, %v3710_v41  ;;  %8086 = vmatmul.msk.bf16.gmra.mxu1 %vm775_vm2, %v3436_v37  ;;  %8301 = vmatmul.msk.bf16.vlgmr.msrb.gmra.mxu3 %vm4271_vm3, %v4678_v3  ;;  %v9199_v39 = vld [vmem:[%s11747_s6 + $0x2e8] sm:$0xff]  ;;  %v9156_v3 = vld [vmem:[%s11747_s6 + $0x190] sm:$0xff]  ;;  %v9198_v41 = vld [vmem:[%s11747_s6 + $0x2e0] sm:$0xff] }
 0x543   :  { %4818 = vmatpush.bf16.msrb.mxu3 %v9153_v52  ;;  %5320 = vmatpush.bf16.msrb.mxu0 %v9191_v12  ;;  %v3437_v52 = vpack.c.bf16 %v3781_v0, %v10699_v32  ;;  %v10780_v32 = vld [vmem:[#allocation2 + $0x238] sm:$0xff] }
 0x544   :  { %v4144_v16 = vadd.f32 %v10448_v14, %v4090_v47 }
 0x545   :  { %v3986_v61 = vpop.f32.mrf.mxu2  ;;  %v4324_v4 = vpop.f32.mrf.mxu3 }
 0x546   :  { %v4196_v8 = vmax.f32 %v4144_v16, 0.0  ;;  %v4325_v11 = vadd.f32 %v4324_v4, %v4284_v46  ;;  %v3817_v46 = vpack.c.bf16 %v10741_v55, %v3781_v0  ;;  %v9155_v4 = vld [vmem:[%s11747_s6 + $0x188] sm:$0xff] }
 0x547   :  { %v3606_v23 = vpop.f32.mrf.mxu1  ;;  %4819 = vmatpush.bf16.msrb.mxu3 %v9152_v36  ;;  %5321 = vmatpush.bf16.msrb.mxu0 %v9190_v54 }
 0x548   :  { %v5178_v59 = vpack.c.bf16 %v4196_v8, %v4196_v8  ;;  %v3711_v33 = vadd.f32 %v3606_v23, %v10218_v5  ;;  %v9209_v8 = vld [vmem:[%s11747_s6 + $0x338] sm:$0xff]  ;;  %v4136_v23 = vadd.f32 %v10448_v14, %v10588_v27  ;;  %v9208_v27 = vld [vmem:[%s11747_s6 + $0x330] sm:$0xff] }
 0x54a   :  { %v10753_v24 = vadd.f32 %v3986_v61, %v3711_v33  ;;  %8123 = vmatmul.msk.bf16.gmra.mxu2 %vm775_vm2, %v3817_v46  ;;  %8471 = vmatmul.msk.bf16.vlgmr.msra.gmra.mxu0 %vm4271_vm3, %v5178_v59  ;;  %v3783_v61 = vld [vmem:[#allocation2 + $0x230] sm:$0xff]  ;;  %v4188_v59 = vmax.f32 %v4136_v23, 0.0 }
 0x54b   :  { %4820 = vmatpush.bf16.msrb.mxu3 %v9151_v48  ;;  %5418 = vmatpush.bf16.msra.mxu0 %v9201_v50 }
 0x54c   :  { %v4778_v13 = vpack.c.bf16 %v4188_v59, %v4188_v59 }
 0x54d   :  { %v3989_v5 = vpop.f32.mrf.mxu2  ;;  %v4326_v45 = vpop.f32.mrf.mxu3 }
 0x54e   :  { %v3438_v45 = vpack.c.bf16 %v3783_v61, %v10741_v55  ;;  %v10819_v55 = vld [vmem:[#allocation2 + $0x248] sm:$0xff] }
 0x54f   :  { %v3609_v53 = vpop.f32.mrf.mxu1  ;;  %4821 = vmatpush.bf16.msrb.mxu3 %v9150_v35  ;;  %5419 = vmatpush.bf16.msra.mxu0 %v9200_v17  ;;  %v9161_v35 = vld [vmem:[%s11747_s6 + $0x1b8] sm:$0xff]  ;;  %v9207_v17 = vld [vmem:[%s11747_s6 + $0x328] sm:$0xff] }
 0x550   :  { %v3712_v60 = vadd.f32 %v3609_v53, %v10225_v19 }
 0x552   :  { %v4092_v12 = vadd.f32 %v3989_v5, %v3712_v60  ;;  %8087 = vmatmul.msk.bf16.gmra.mxu1 %vm775_vm2, %v3437_v52  ;;  %8318 = vmatmul.msk.bf16.vlgmr.msra.gmra.mxu3 %vm4271_vm3, %v4728_v63 }
 0x553   :  { %4868 = vmatpush.bf16.msra.mxu3 %v9157_v38  ;;  %5420 = vmatpush.bf16.msra.mxu0 %v9199_v39  ;;  %v9160_v38 = vld [vmem:[%s11747_s6 + $0x1b0] sm:$0xff]  ;;  %v9206_v39 = vld [vmem:[%s11747_s6 + $0x320] sm:$0xff] }
 0x554   :  { %v4146_v37 = vadd.f32 %v10448_v14, %v4092_v12 }
 0x555   :  { %v3991_v19 = vpop.f32.mrf.mxu2  ;;  %v4373_v47 = vpop.f32.mrf.mxu3 }
 0x556   :  { %v4198_v36 = vmax.f32 %v4146_v37, 0.0  ;;  %v4377_v54 = vadd.f32 %v4373_v47, %v4325_v11  ;;  %v3818_v11 = vpack.c.bf16 %v10780_v32, %v3783_v61  ;;  %v9159_v37 = vld [vmem:[%s11747_s6 + $0x1a8] sm:$0xff]  ;;  %v4137_v47 = vadd.f32 %v10448_v14, %v10600_v28  ;;  %v9216_v28 = vld [vmem:[%s11747_s6 + $0x370] sm:$0xff] }
 0x557   :  { %v3611_v16 = vpop.f32.mrf.mxu1  ;;  %4869 = vmatpush.bf16.msra.mxu3 %v9156_v3  ;;  %5421 = vmatpush.bf16.msra.mxu0 %v9198_v41  ;;  %v3785_v41 = vld [vmem:[#allocation2 + $0x240] sm:$0xff] }
 0x558   :  { %v5278_v0 = vpack.c.bf16 %v4198_v36, %v4198_v36  ;;  %v3713_v48 = vadd.f32 %v3611_v16, %v10236_v62  ;;  %v3439_v59 = vpack.c.bf16 %v3785_v41, %v10780_v32  ;;  %v10858_v32 = vld [vmem:[#allocation2 + $0x258] sm:$0xff] }
 0x55a   :  { %v10792_v50 = vadd.f32 %v3991_v19, %v3713_v48  ;;  %8124 = vmatmul.msk.bf16.gmra.mxu2 %vm775_vm2, %v3818_v11  ;;  %8505 = vmatmul.msk.bf16.vlgmr.msrb.gmra.mxu0 %vm4271_vm3, %v5278_v0  ;;  %v9217_v19 = vld [vmem:[%s11747_s6 + $0x378] sm:$0xff]  ;;  %v9215_v11 = vld [vmem:[%s11747_s6 + $0x368] sm:$0xff] }
 0x55b   :  { %4870 = vmatpush.bf16.msra.mxu3 %v9155_v4  ;;  %5518 = vmatpush.bf16.msrb.mxu0 %v9209_v8  ;;  %v9158_v4 = vld [vmem:[%s11747_s6 + $0x1a0] sm:$0xff]  ;;  %v4189_v8 = vmax.f32 %v4137_v47, 0.0  ;;  %v9165_v48 = vld [vmem:[%s11747_s6 + $0x1d8] sm:$0xff]  ;;  %v9223_v47 = vld [vmem:[%s11747_s6 + $0x3a8] sm:$0xff] }
 0x55d   :  { %v3994_v62 = vpop.f32.mrf.mxu2  ;;  %v4375_v33 = vpop.f32.mrf.mxu3 }
 0x55e   :  { %v9164_v33 = vld [vmem:[%s11747_s6 + $0x1d0] sm:$0xff] }
 0x55f   :  { %v3614_v46 = vpop.f32.mrf.mxu1  ;;  %4871 = vmatpush.bf16.msra.mxu3 %v9154_v40  ;;  %5519 = vmatpush.bf16.msrb.mxu0 %v9208_v27  ;;  %v4828_v40 = vpack.c.bf16 %v4189_v8, %v4189_v8  ;;  %v9222_v8 = vld [vmem:[%s11747_s6 + $0x3a0] sm:$0xff] }
 0x560   :  { %v3714_v5 = vadd.f32 %v3614_v46, %v10248_v7  ;;  %v9214_v46 = vld [vmem:[%s11747_s6 + $0x360] sm:$0xff] }
 0x562   :  { %v4094_v53 = vadd.f32 %v3994_v62, %v3714_v5  ;;  %8088 = vmatmul.msk.bf16.gmra.mxu1 %vm775_vm2, %v3438_v45  ;;  %8335 = vmatmul.msk.bf16.vlgmr.msrb.gmra.mxu3 %vm4271_vm3, %v4778_v13 }
 0x563   :  { %4918 = vmatpush.bf16.msrb.mxu3 %v9161_v35  ;;  %5520 = vmatpush.bf16.msrb.mxu0 %v9207_v17 }
 0x564   :  { %v4148_v63 = vadd.f32 %v10448_v14, %v4094_v53  ;;  %v3787_v53 = vld [vmem:[#allocation2 + $0x250] sm:$0xff] }
 0x565   :  { %v3996_v7 = vpop.f32.mrf.mxu2  ;;  %v4423_v60 = vpop.f32.mrf.mxu3 }
 0x566   :  { %v4200_v52 = vmax.f32 %v4148_v63, 0.0  ;;  %v4427_v12 = vadd.f32 %v4423_v60, %v4377_v54  ;;  %v3819_v54 = vpack.c.bf16 %v10819_v55, %v3785_v41  ;;  %v4138_v63 = vadd.f32 %v10448_v14, %v10626_v20 }
 0x567   :  { %v3616_v3 = vpop.f32.mrf.mxu1  ;;  %4919 = vmatpush.bf16.msrb.mxu3 %v9160_v38  ;;  %5521 = vmatpush.bf16.msrb.mxu0 %v9206_v39  ;;  %v9163_v38 = vld [vmem:[%s11747_s6 + $0x1c8] sm:$0xff]  ;;  %v9225_v39 = vld [vmem:[%s11747_s6 + $0x3b8] sm:$0xff]  ;;  %v3820_v60 = vpack.c.bf16 %v10858_v32, %v3787_v53 }
 0x568   :  { %v5378_v36 = vpack.c.bf16 %v4200_v52, %v4200_v52  ;;  %v3715_v16 = vadd.f32 %v3616_v3, %v10257_v2  ;;  %v9162_v52 = vld [vmem:[%s11747_s6 + $0x1c0] sm:$0xff]  ;;  %v4190_v3 = vmax.f32 %v4138_v63, 0.0 }
 0x56a   :  { %v10831_v61 = vadd.f32 %v3996_v7, %v3715_v16  ;;  %8125 = vmatmul.msk.bf16.gmra.mxu2 %vm775_vm2, %v3819_v54  ;;  %8539 = vmatmul.msk.bf16.vlgmr.msra.gmra.mxu0 %vm4271_vm3, %v5378_v36  ;;  %v4878_v36 = vpack.c.bf16 %v4190_v3, %v4190_v3  ;;  %v3440_v54 = vpack.c.bf16 %v3787_v53, %v10819_v55 }
 0x56b   :  { %4920 = vmatpush.bf16.msrb.mxu3 %v9159_v37  ;;  %5618 = vmatpush.bf16.msra.mxu0 %v9217_v19  ;;  %v9173_v19 = vld [vmem:[%s11747_s6 + $0x218] sm:$0xff] }
 0x56d   :  { %v3999_v2 = vpop.f32.mrf.mxu2  ;;  %v4425_v23 = vpop.f32.mrf.mxu3 }
 0x56e   :  { %v10895_v23 = vld [vmem:[#allocation2 + $0x268] sm:$0xff] }
 0x56f   :  { %v3619_v0 = vpop.f32.mrf.mxu1  ;;  %4921 = vmatpush.bf16.msrb.mxu3 %v9158_v4  ;;  %5619 = vmatpush.bf16.msra.mxu0 %v9216_v28  ;;  %v9172_v28 = vld [vmem:[%s11747_s6 + $0x210] sm:$0xff] }
 0x570   :  { %v3716_v27 = vadd.f32 %v3619_v0, %v10266_v42 }
 0x572   :  { %v4096_v62 = vadd.f32 %v3999_v2, %v3716_v27  ;;  %8089 = vmatmul.msk.bf16.gmra.mxu1 %vm775_vm2, %v3439_v59  ;;  %8352 = vmatmul.msk.bf16.vlgmr.msra.gmra.mxu3 %vm4271_vm3, %v4828_v40  ;;  %v4139_v40 = vadd.f32 %v10448_v14, %v10645_v22 }
 0x573   :  { %4968 = vmatpush.bf16.msra.mxu3 %v9165_v48  ;;  %5620 = vmatpush.bf16.msra.mxu0 %v9215_v11  ;;  %v3789_v48 = vld [vmem:[#allocation2 + $0x260] sm:$0xff]  ;;  %v9171_v11 = vld [vmem:[%s11747_s6 + $0x208] sm:$0xff] }
 0x574   :  { %v4150_v35 = vadd.f32 %v10448_v14, %v4096_v62  ;;  %v3821_v59 = vpack.c.bf16 %v10895_v23, %v3789_v48 }
 0x575   :  { %v4001_v42 = vpop.f32.mrf.mxu2  ;;  %v4473_v17 = vpop.f32.mrf.mxu3 }
 0x576   :  { %v4202_v13 = vmax.f32 %v4150_v35, 0.0  ;;  %v4477_v5 = vadd.f32 %v4473_v17, %v4427_v12  ;;  %v9224_v12 = vld [vmem:[%s11747_s6 + $0x3b0] sm:$0xff] }
 0x577   :  { %v3621_v45 = vpop.f32.mrf.mxu1  ;;  %4969 = vmatpush.bf16.msra.mxu3 %v9164_v33  ;;  %5621 = vmatpush.bf16.msra.mxu0 %v9214_v46  ;;  %v9170_v33 = vld [vmem:[%s11747_s6 + $0x200] sm:$0xff]  ;;  %v4191_v46 = vmax.f32 %v4139_v40, 0.0 }
 0x578   :  { %v5478_v7 = vpack.c.bf16 %v4202_v13, %v4202_v13 }
 0x579   :  { %v4928_v22 = vpack.c.bf16 %v4191_v46, %v4191_v46 }
 0x57a   :  { %8126 = vmatmul.msk.bf16.gmra.mxu2 %vm775_vm2, %v3820_v60  ;;  %8573 = vmatmul.msk.bf16.vlgmr.msrb.gmra.mxu0 %vm4271_vm3, %v5478_v7  ;;  %v9180_v7 = vld [vmem:[%s11747_s6 + $0x250] sm:$0xff] }
 0x57b   :  { %4970 = vmatpush.bf16.msra.mxu3 %v9163_v38  ;;  %5718 = vmatpush.bf16.msrb.mxu0 %v9225_v39  ;;  %v3441_v38 = vpack.c.bf16 %v3789_v48, %v10858_v32  ;;  %v9233_v39 = vld [vmem:[%s11747_s6 + $0x3f8] sm:$0xff] }
 0x57d   :  { %v4003_v41 = vpop.f32.mrf.mxu2  ;;  %v4475_v20 = vpop.f32.mrf.mxu3 }
 0x57e   :  { %v9179_v20 = vld [vmem:[%s11747_s6 + $0x248] sm:$0xff] }
 0x57f   :  { %v3623_v37 = vpop.f32.mrf.mxu1  ;;  %4971 = vmatpush.bf16.msra.mxu3 %v9162_v52  ;;  %5719 = vmatpush.bf16.msrb.mxu0 %v9224_v12  ;;  %v10928_v52 = vld [vmem:[#allocation2 + $0x278] sm:$0xff] }
 0x580   :  { %v3717_v16 = vadd.f32 %v3623_v37, %v10281_v18  ;;  %v4141_v37 = vadd.f32 %v10448_v14, %v10673_v1  ;;  %v9230_v1 = vld [vmem:[%s11747_s6 + $0x3e0] sm:$0xff] }
 0x582   :  { %v10885_v4 = vadd.f32 %v4003_v41, %v3717_v16  ;;  %8090 = vmatmul.msk.bf16.gmra.mxu1 %vm775_vm2, %v3440_v54  ;;  %8369 = vmatmul.msk.bf16.vlgmr.msrb.gmra.mxu3 %vm4271_vm3, %v4878_v36  ;;  %v3791_v41 = vld [vmem:[#allocation2 + $0x270] sm:$0xff]  ;;  %v9231_v36 = vld [vmem:[%s11747_s6 + $0x3e8] sm:$0xff]  ;;  %v9178_v54 = vld [vmem:[%s11747_s6 + $0x240] sm:$0xff] }
 0x583   :  { %5068 = vmatpush.bf16.msrb.mxu3 %v9173_v19  ;;  %5720 = vmatpush.bf16.msrb.mxu0 %v9223_v47  ;;  %v3822_v47 = vpack.c.bf16 %v10928_v52, %v3791_v41 }
 0x585   :  { %v4005_v2 = vpop.f32.mrf.mxu2  ;;  %v4523_v18 = vpop.f32.mrf.mxu3 }
 0x586   :  { %v4527_v55 = vadd.f32 %v4523_v18, %v4477_v5 }
 0x587   :  { %v3625_v0 = vpop.f32.mrf.mxu1  ;;  %5069 = vmatpush.bf16.msrb.mxu3 %v9172_v28  ;;  %5721 = vmatpush.bf16.msrb.mxu0 %v9222_v8  ;;  %v4193_v28 = vmax.f32 %v4141_v37, 0.0  ;;  %v9197_v37 = vld [vmem:[%s11747_s6 + $0x2d8] sm:$0xff] }
 0x588   :  { %v3718_v27 = vadd.f32 %v3625_v0, %v10290_v10  ;;  %v9181_v10 = vld [vmem:[%s11747_s6 + $0x258] sm:$0xff] }
 0x589   :  { %v9189_v0 = vld [vmem:[%s11747_s6 + $0x298] sm:$0xff]  ;;  %v5028_v48 = vpack.c.bf16 %v4193_v28, %v4193_v28 }
 0x58a   :  { %v4098_v62 = vadd.f32 %v4005_v2, %v3718_v27  ;;  %8127 = vmatmul.msk.bf16.gmra.mxu2 %vm775_vm2, %v3821_v59  ;;  %v3442_v27 = vpack.c.bf16 %v3791_v41, %v10895_v23  ;;  %v9241_v59 = vld [vmem:[%s11747_s6 + $0x438] sm:$0xff]  ;;  %v2962_v23 = vadd.f32 %v10245_v58, %v10233_v43  ;;  %v9187_v43 = vld [vmem:[%s11747_s6 + $0x288] sm:$0xff] }
 0x58b   :  { %5070 = vmatpush.bf16.msrb.mxu3 %v9171_v11 }
 0x58c   :  { %v4152_v35 = vadd.f32 %v10448_v14, %v4098_v62 }
 0x58d   :  { %v4008_v42 = vpop.f32.mrf.mxu2  ;;  %v4525_v17 = vpop.f32.mrf.mxu3 }
 0x58e   :  { %v4204_v13 = vmax.f32 %v4152_v35, 0.0  ;;  %v3342_v17 = vadd.f32 %v10318_v44, %v2962_v23  ;;  %v9239_v44 = vld [vmem:[%s11747_s6 + $0x428] sm:$0xff] }
 0x58f   :  { %v3628_v5 = vpop.f32.mrf.mxu1  ;;  %5071 = vmatpush.bf16.msrb.mxu3 %v9170_v33  ;;  %v9240_v33 = vld [vmem:[%s11747_s6 + $0x430] sm:$0xff] }
 0x590   :  { %v5578_v45 = vpack.c.bf16 %v4204_v13, %v4204_v13  ;;  %v3719_v53 = vadd.f32 %v3628_v5, %v10299_v26  ;;  %v9232_v26 = vld [vmem:[%s11747_s6 + $0x3f0] sm:$0xff] }
 0x592   :  { %v10917_v63 = vadd.f32 %v4008_v42, %v3719_v53  ;;  %8091 = vmatmul.msk.bf16.gmra.mxu1 %vm775_vm2, %v3441_v38  ;;  %8386 = vmatmul.msk.bf16.vlgmr.msra.gmra.mxu3 %vm4271_vm3, %v4928_v22  ;;  %v10974_v42 = vld [vmem:[#allocation2 + $0x288] sm:$0xff]  ;;  %v3793_v22 = vld [vmem:[#allocation2 + $0x280] sm:$0xff] }
 0x593   :  { %8607 = vmatmul.msk.bf16.vlgmr.msra.gmra.mxu0 %vm4271_vm3, %v5578_v45  ;;  %5168 = vmatpush.bf16.msra.mxu3 %v9181_v10  ;;  %v3823_v53 = vpack.c.bf16 %v10974_v42, %v3793_v22  ;;  %v9274_v38 = vld [vmem:[%s11747_s6 + $0x540] sm:$0xff] }
 0x594   :  { %5818 = vmatpush.bf16.msra.mxu0 %v9233_v39  ;;  %6371 = vmatpush.bf16.msrb.mxu1 %v9274_v38 }
 0x595   :  { %v4010_v32 = vpop.f32.mrf.mxu2  ;;  %v4573_v60 = vpop.f32.mrf.mxu3 }
 0x596   :  { %v4577_v12 = vadd.f32 %v4573_v60, %v4527_v55 }
 0x597   :  { %v3630_v3 = vpop.f32.mrf.mxu1  ;;  %5169 = vmatpush.bf16.msra.mxu3 %v9180_v7 }
 0x598   :  { %v3720_v19 = vadd.f32 %v3630_v3, %v10304_v29  ;;  %5819 = vmatpush.bf16.msra.mxu0 %v9232_v26  ;;  %v10947_v29 = vld [vmem:[%s11745_s4] ss:$0 sm:$0xff] }
 0x599   :  { %v4143_v58 = vadd.f32 %v10947_v29, %v10714_v21  ;;  %v9186_v21 = vld [vmem:[%s11747_s6 + $0x280] sm:$0xff] }
 0x59a   :  { %v4100_v16 = vadd.f32 %v4010_v32, %v3720_v19  ;;  %8128 = vmatmul.msk.bf16.gmra.mxu2 %vm775_vm2, %v3822_v47  ;;  %v9238_v32 = vld [vmem:[%s11747_s6 + $0x420] sm:$0xff] }
 0x59b   :  { %5170 = vmatpush.bf16.msra.mxu3 %v9179_v20  ;;  %v4195_v7 = vmax.f32 %v4143_v58, 0.0  ;;  %v9205_v58 = vld [vmem:[%s11747_s6 + $0x318] sm:$0xff] }
 0x59c   :  { %v4154_v14 = vadd.f32 %v10947_v29, %v4100_v16  ;;  %5820 = vmatpush.bf16.msra.mxu0 %v9231_v36  ;;  %v3443_v16 = vpack.c.bf16 %v3793_v22, %v10928_v52 }
 0x59d   :  { %v4013_v8 = vpop.f32.mrf.mxu2  ;;  %v4575_v2 = vpop.f32.mrf.mxu3  ;;  %v5128_v19 = vpack.c.bf16 %v4195_v7, %v4195_v7 }
 0x59e   :  { %v4206_v18 = vmax.f32 %v4154_v14, 0.0  ;;  %v11791_v14 = vld [vmem:[#allocation13_spill] sm:$0xff] }
 0x59f   :  { %v3633_v55 = vpop.f32.mrf.mxu1  ;;  %5171 = vmatpush.bf16.msra.mxu3 %v9178_v54  ;;  %v9249_v54 = vld [vmem:[%s11747_s6 + $0x478] sm:$0xff]  ;;  %v2964_v52 = vadd.f32 %v10263_v57, %v11791_v14  ;;  %v9195_v57 = vld [vmem:[%s11747_s6 + $0x2c8] sm:$0xff] }
 0x5a0   :  { %v5678_v11 = vpack.c.bf16 %v4206_v18, %v4206_v18  ;;  %v3721_v40 = vadd.f32 %v3633_v55, %v10311_v51  ;;  %5821 = vmatpush.bf16.msra.mxu0 %v9230_v1  ;;  %v9188_v51 = vld [vmem:[%s11747_s6 + $0x290] sm:$0xff]  ;;  %v11020_v18 = vld [vmem:[#allocation2 + $0x298] sm:$0xff] }
 0x5a1   :  { %v9248_v1 = vld [vmem:[%s11747_s6 + $0x470] sm:$0xff]  ;;  %v3344_v55 = vadd.f32 %v10334_v31, %v2964_v52  ;;  %v9247_v31 = vld [vmem:[%s11747_s6 + $0x468] sm:$0xff] }
 0x5a2   :  { %v10961_v62 = vadd.f32 %v4013_v8, %v3721_v40  ;;  %8092 = vmatmul.msk.bf16.gmra.mxu1 %vm775_vm2, %v3442_v27  ;;  %8420 = vmatmul.msk.bf16.vlgmr.msrb.gmra.mxu3 %vm4271_vm3, %v5028_v48  ;;  %v3795_v40 = vld [vmem:[#allocation2 + $0x290] sm:$0xff]  ;;  %v4145_v27 = vadd.f32 %v10947_v29, %v10753_v24  ;;  %v9246_v24 = vld [vmem:[%s11747_s6 + $0x460] sm:$0xff] }
 0x5a3   :  { %8641 = vmatmul.msk.bf16.vlgmr.msrb.gmra.mxu0 %vm4271_vm3, %v5678_v11  ;;  %5268 = vmatpush.bf16.msrb.mxu3 %v9189_v0 }
 0x5a4   :  { %5918 = vmatpush.bf16.msrb.mxu0 %v9241_v59 }
 0x5a5   :  { %v4015_v46 = vpop.f32.mrf.mxu2  ;;  %v4623_v35 = vpop.f32.mrf.mxu3 }
 0x5a6   :  { %v4627_v13 = vadd.f32 %v4623_v35, %v4577_v12 }
 0x5a7   :  { %v3635_v5 = vpop.f32.mrf.mxu1  ;;  %v10977_v10 = vpop.f32.mrf.mxu0  ;;  %5269 = vmatpush.bf16.msrb.mxu3 %v9188_v51  ;;  %v3824_v51 = vpack.c.bf16 %v11020_v18, %v3795_v40 }
 0x5a8   :  { %v3722_v45 = vadd.f32 %v3635_v5, %v3342_v17  ;;  %5919 = vmatpush.bf16.msrb.mxu0 %v9240_v33  ;;  %v9194_v33 = vld [vmem:[%s11747_s6 + $0x2c0] sm:$0xff] }
 0x5aa   :  { %v4102_v39 = vadd.f32 %v4015_v46, %v3722_v45  ;;  %8129 = vmatmul.msk.bf16.gmra.mxu2 %vm775_vm2, %v3823_v53  ;;  %v4197_v46 = vmax.f32 %v4145_v27, 0.0 }
 0x5ab   :  { %5270 = vmatpush.bf16.msrb.mxu3 %v9187_v43 }
 0x5ac   :  { %v4156_v26 = vadd.f32 %v10947_v29, %v4102_v39  ;;  %5920 = vmatpush.bf16.msrb.mxu0 %v9239_v44  ;;  %v5228_v45 = vpack.c.bf16 %v4197_v46, %v4197_v46  ;;  %v11792_v44 = vld [vmem:[#allocation21_spill] sm:$0xff]  ;;  %v3444_v39 = vpack.c.bf16 %v3795_v40, %v10974_v42  ;;  %v11794_v42 = vld [vmem:[#allocation15_spill] sm:$0xff] }
 0x5ad   :  { %v4018_v60 = vpop.f32.mrf.mxu2  ;;  %v4625_v12 = vpop.f32.mrf.mxu3  ;;  %v9265_v46 = vld [vmem:[%s11747_s6 + $0x4f8] sm:$0xff] }
 0x5ae   :  { %v4208_v3 = vmax.f32 %v4156_v26, 0.0  ;;  %v9204_v26 = vld [vmem:[%s11747_s6 + $0x310] sm:$0xff] }
 0x5af   :  { %v3638_v41 = vpop.f32.mrf.mxu1  ;;  %v5025_v20 = vpop.f32.mrf.mxu0  ;;  %5271 = vmatpush.bf16.msrb.mxu3 %v9186_v21  ;;  %v9257_v21 = vld [vmem:[%s11747_s6 + $0x4b8] sm:$0xff]  ;;  %v9256_v12 = vld [vmem:[%s11747_s6 + $0x4b0] sm:$0xff] }
 0x5b0   :  { %v5778_v47 = vpack.c.bf16 %v4208_v3, %v4208_v3  ;;  %v3723_v36 = vadd.f32 %v3638_v41, %v10327_v56  ;;  %5921 = vmatpush.bf16.msrb.mxu0 %v9238_v32  ;;  %v9196_v56 = vld [vmem:[%s11747_s6 + $0x2d0] sm:$0xff]  ;;  %v3797_v20 = vld [vmem:[#allocation2 + $0x2a0] sm:$0xff] }
 0x5b1   :  { %v11793_v32 = vld [vmem:[#allocation14_spill] sm:$0xff]  ;;  %v3825_v52 = vpack.c.bf16 %v3797_v20, %v3797_v20 }
 0x5b2   :  { %v11007_v28 = vadd.f32 %v4018_v60, %v3723_v36  ;;  %8093 = vmatmul.msk.bf16.gmra.mxu1 %vm775_vm2, %v3443_v16  ;;  %8454 = vmatmul.msk.bf16.vlgmr.msra.gmra.mxu3 %vm4271_vm3, %v5128_v19  ;;  %v2966_v60 = vadd.f32 %v11794_v42, %v11793_v32 }
 0x5b3   :  { %8675 = vmatmul.msk.bf16.vlgmr.msra.gmra.mxu0 %vm4271_vm3, %v5778_v47  ;;  %5368 = vmatpush.bf16.msra.mxu3 %v9197_v37  ;;  %v11795_v37 = vld [vmem:[#allocation22_spill] sm:$0xff] }
 0x5b4   :  { %6018 = vmatpush.bf16.msra.mxu0 %v9249_v54  ;;  %v3346_v19 = vadd.f32 %v11795_v37, %v2966_v60  ;;  %v9203_v54 = vld [vmem:[%s11747_s6 + $0x308] sm:$0xff]  ;;  %v9221_v37 = vld [vmem:[%s11747_s6 + $0x398] sm:$0xff] }
 0x5b5   :  { %v4020_v8 = vpop.f32.mrf.mxu2  ;;  %v4673_v2 = vpop.f32.mrf.mxu3 }
 0x5b6   :  { %v4677_v0 = vadd.f32 %v4673_v2, %v4627_v13  ;;  %v9202_v2 = vld [vmem:[%s11747_s6 + $0x300] sm:$0xff] }
 0x5b7   :  { %v3640_v48 = vpop.f32.mrf.mxu1  ;;  %v11023_v11 = vpop.f32.mrf.mxu0  ;;  %5369 = vmatpush.bf16.msra.mxu3 %v9196_v56  ;;  %v4147_v56 = vadd.f32 %v10947_v29, %v10792_v50  ;;  %v9254_v50 = vld [vmem:[%s11747_s6 + $0x4a0] sm:$0xff] }
 0x5b8   :  { %v3724_v59 = vadd.f32 %v3640_v48, %v3344_v55  ;;  %6019 = vmatpush.bf16.msra.mxu0 %v9248_v1  ;;  %v9255_v1 = vld [vmem:[%s11747_s6 + $0x4a8] sm:$0xff] }
 0x5b9   :  { %v4199_v55 = vmax.f32 %v4147_v56, 0.0  ;;  %v9272_v56 = vld [vmem:[%s11747_s6 + $0x530] sm:$0xff] }
 0x5ba   :  { %v4104_v23 = vadd.f32 %v4020_v8, %v3724_v59  ;;  %8130 = vmatmul.msk.bf16.gmra.mxu2 %vm775_vm2, %v3824_v51  ;;  %v9213_v51 = vld [vmem:[%s11747_s6 + $0x358] sm:$0xff] }
 0x5bb   :  { %5370 = vmatpush.bf16.msra.mxu3 %v9195_v57 }
 0x5bc   :  { %v4158_v35 = vadd.f32 %v10947_v29, %v4104_v23  ;;  %6020 = vmatpush.bf16.msra.mxu0 %v9247_v31  ;;  %v5328_v31 = vpack.c.bf16 %v4199_v55, %v4199_v55  ;;  %v9219_v55 = vld [vmem:[%s11747_s6 + $0x388] sm:$0xff] }
 0x5bd   :  { %v4023_v17 = vpop.f32.mrf.mxu2  ;;  %v4675_v13 = vpop.f32.mrf.mxu3 }
 0x5be   :  { %v4210_v5 = vmax.f32 %v4158_v35, 0.0  ;;  %v9212_v35 = vld [vmem:[%s11747_s6 + $0x350] sm:$0xff] }
 0x5bf   :  { %v3643_v22 = vpop.f32.mrf.mxu1  ;;  %v5125_v43 = vpop.f32.mrf.mxu0  ;;  %5371 = vmatpush.bf16.msra.mxu3 %v9194_v33  ;;  %v3445_v33 = vpack.c.bf16 %v11020_v18, %v11020_v18  ;;  %v9264_v18 = vld [vmem:[%s11747_s6 + $0x4f0] sm:$0xff] }
 0x5c0   :  { %v5878_v53 = vpack.c.bf16 %v4210_v5, %v4210_v5  ;;  %v3725_v38 = vadd.f32 %v3643_v22, %v11792_v44  ;;  %6021 = vmatpush.bf16.msra.mxu0 %v9246_v24  ;;  %v11796_v24 = vld [vmem:[#allocation16_spill] sm:$0xff]  ;;  %v9211_v44 = vld [vmem:[%s11747_s6 + $0x348] sm:$0xff] }
 0x5c2   :  { %v11050_v7 = vadd.f32 %v4023_v17, %v3725_v38  ;;  %8094 = vmatmul.msk.bf16.gmra.mxu1 %vm775_vm2, %v3444_v39  ;;  %8488 = vmatmul.msk.bf16.vlgmr.msrb.gmra.mxu3 %vm4271_vm3, %v5228_v45  ;;  %v11797_v17 = vld [vmem:[#allocation17_spill] sm:$0xff]  ;;  %v4149_v38 = vadd.f32 %v10947_v29, %v10831_v61  ;;  %v9262_v61 = vld [vmem:[%s11747_s6 + $0x4e0] sm:$0xff] }
 0x5c3   :  { %8709 = vmatmul.msk.bf16.vlgmr.msrb.gmra.mxu0 %vm4271_vm3, %v5878_v53  ;;  %5468 = vmatpush.bf16.msrb.mxu3 %v9205_v58  ;;  %v2968_v13 = vadd.f32 %v11797_v17, %v11796_v24 }
 0x5c4   :  { %6118 = vmatpush.bf16.msrb.mxu0 %v9257_v21  ;;  %v9263_v21 = vld [vmem:[%s11747_s6 + $0x4e8] sm:$0xff]  ;;  %v4201_v32 = vmax.f32 %v4149_v38, 0.0 }
 0x5c5   :  { %v4025_v3 = vpop.f32.mrf.mxu2  ;;  %v4723_v41 = vpop.f32.mrf.mxu3  ;;  %v3348_v43 = vadd.f32 %v10372_v34, %v2968_v13  ;;  %v9210_v34 = vld [vmem:[%s11747_s6 + $0x340] sm:$0xff] }
 0x5c6   :  { %v4727_v47 = vadd.f32 %v4723_v41, %v4677_v0 }
 0x5c7   :  { %v3645_v36 = vpop.f32.mrf.mxu1  ;;  %v11064_v16 = vpop.f32.mrf.mxu0  ;;  %5469 = vmatpush.bf16.msrb.mxu3 %v9204_v26 }
 0x5c8   :  { %v3726_v14 = vadd.f32 %v3645_v36, %v3346_v19  ;;  %6119 = vmatpush.bf16.msrb.mxu0 %v9256_v12  ;;  %v5428_v19 = vpack.c.bf16 %v4201_v32, %v4201_v32  ;;  %v9273_v36 = vld [vmem:[%s11747_s6 + $0x538] sm:$0xff] }
 0x5ca   :  { %v4106_v8 = vadd.f32 %v4025_v3, %v3726_v14  ;;  %8131 = vmatmul.msk.bf16.gmra.mxu2 %vm775_vm2, %v3825_v52 }
 0x5cb   :  { %5470 = vmatpush.bf16.msrb.mxu3 %v9203_v54  ;;  %v9220_v54 = vld [vmem:[%s11747_s6 + $0x390] sm:$0xff] }
 0x5cc   :  { %v4160_v0 = vadd.f32 %v10947_v29, %v4106_v8  ;;  %6120 = vmatpush.bf16.msrb.mxu0 %v9255_v1 }
 0x5cd   :  { %v11082_v48 = vpop.f32.mrf.mxu2  ;;  %v4725_v40 = vpop.f32.mrf.mxu3 }
 0x5ce   :  { %v4212_v57 = vmax.f32 %v4160_v0, 0.0  ;;  %v4151_v0 = vadd.f32 %v10947_v29, %v10885_v4  ;;  %v9281_v40 = vld [vmem:[%s11747_s6 + $0x578] sm:$0xff]  ;;  %v9270_v4 = vld [vmem:[%s11747_s6 + $0x520] sm:$0xff] }
 0x5cf   :  { %v11084_v27 = vpop.f32.mrf.mxu1  ;;  %v5225_v59 = vpop.f32.mrf.mxu0  ;;  %5471 = vmatpush.bf16.msrb.mxu3 %v9202_v2  ;;  %6418 = vmatpush.bf16.msrb.mxu2 %v9281_v40  ;;  %v11800_v40 = vld [vmem:[#allocation20_spill] sm:$0xff] }
 0x5d0   :  { %v5978_v23 = vpack.c.bf16 %v4212_v57, %v4212_v57  ;;  %6121 = vmatpush.bf16.msrb.mxu0 %v9254_v50  ;;  %v9271_v50 = vld [vmem:[%s11747_s6 + $0x528] sm:$0xff]  ;;  %v9218_v57 = vld [vmem:[%s11747_s6 + $0x380] sm:$0xff]  ;;  %v4203_v59 = vmax.f32 %v4151_v0, 0.0  ;;  %v9293_v0 = vld [vmem:[%s11747_s6 + $0x5d8] sm:$0xff] }
 0x5d1   :  { %6568 = vmatpush.bf16.msra.mxu1 %v9293_v0 }
 0x5d2   :  { %8095 = vmatmul.msk.bf16.gmra.mxu1 %vm775_vm2, %v3445_v33  ;;  %8522 = vmatmul.msk.bf16.vlgmr.msra.gmra.mxu3 %vm4271_vm3, %v5328_v31  ;;  %v5528_v24 = vpack.c.bf16 %v4203_v59, %v4203_v59 }
 0x5d3   :  { %8743 = vmatmul.msk.bf16.vlgmr.msra.gmra.mxu0 %vm4271_vm3, %v5978_v23  ;;  %5568 = vmatpush.bf16.msra.mxu3 %v9213_v51  ;;  %v9280_v23 = vld [vmem:[%s11747_s6 + $0x570] sm:$0xff] }
 0x5d4   :  { %6218 = vmatpush.bf16.msra.mxu0 %v9265_v46  ;;  %6419 = vmatpush.bf16.msrb.mxu2 %v9280_v23 }
 0x5d5   :  { %v4030_v5 = vpop.f32.mrf.mxu2  ;;  %v4773_v22 = vpop.f32.mrf.mxu3 }
 0x5d6   :  { %v4777_v58 = vadd.f32 %v4773_v22, %v4727_v47  ;;  %v11798_v22 = vld [vmem:[#allocation18_spill] sm:$0xff] }
 0x5d7   :  { %v3650_v45 = vpop.f32.mrf.mxu1  ;;  %v11106_v53 = vpop.f32.mrf.mxu0  ;;  %5569 = vmatpush.bf16.msra.mxu3 %v9212_v35  ;;  %v9229_v35 = vld [vmem:[%s11747_s6 + $0x3d8] sm:$0xff] }
 0x5d8   :  { %v3728_v39 = vadd.f32 %v3650_v45, %v3348_v43  ;;  %6219 = vmatpush.bf16.msra.mxu0 %v9264_v18  ;;  %v9279_v18 = vld [vmem:[%s11747_s6 + $0x568] sm:$0xff]  ;;  %v11799_v43 = vld [vmem:[#allocation19_spill] sm:$0xff] }
 0x5d9   :  { %6420 = vmatpush.bf16.msrb.mxu2 %v9279_v18  ;;  %v4155_v18 = vadd.f32 %v10947_v29, %v10961_v62  ;;  %v9234_v62 = vld [vmem:[%s11747_s6 + $0x400] sm:$0xff] }
 0x5da   :  { %v4108_v26 = vadd.f32 %v4030_v5, %v3728_v39  ;;  %v9228_v5 = vld [vmem:[%s11747_s6 + $0x3d0] sm:$0xff] }
 0x5db   :  { %5570 = vmatpush.bf16.msra.mxu3 %v9211_v44 }
 0x5dc   :  { %v4162_v42 = vadd.f32 %v10947_v29, %v4108_v26  ;;  %6220 = vmatpush.bf16.msra.mxu0 %v9263_v21  ;;  %v9278_v26 = vld [vmem:[%s11747_s6 + $0x560] sm:$0xff] }
 0x5dd   :  { %v11123_v60 = vpop.f32.mrf.mxu2  ;;  %v4775_v12 = vpop.f32.mrf.mxu3  ;;  %6421 = vmatpush.bf16.msrb.mxu2 %v9278_v26  ;;  %v9290_v26 = vld [vmem:[%s11747_s6 + $0x5c0] sm:$0xff] }
 0x5de   :  { %v4214_v3 = vmax.f32 %v4162_v42, 0.0  ;;  %v9227_v42 = vld [vmem:[%s11747_s6 + $0x3c8] sm:$0xff] }
 0x5df   :  { %v11125_v41 = vpop.f32.mrf.mxu1  ;;  %v5325_v20 = vpop.f32.mrf.mxu0  ;;  %5571 = vmatpush.bf16.msra.mxu3 %v9210_v34 }
 0x5e0   :  { %v6078_v47 = vpack.c.bf16 %v4214_v3, %v4214_v3  ;;  %6221 = vmatpush.bf16.msra.mxu0 %v9262_v61  ;;  %v4153_v61 = vadd.f32 %v10947_v29, %v10917_v63  ;;  %v9289_v20 = vld [vmem:[%s11747_s6 + $0x5b8] sm:$0xff] }
 0x5e2   :  { %8556 = vmatmul.msk.bf16.vlgmr.msrb.gmra.mxu3 %vm4271_vm3, %v5428_v19  ;;  %v4205_v19 = vmax.f32 %v4153_v61, 0.0  ;;  %v9245_v61 = vld [vmem:[%s11747_s6 + $0x458] sm:$0xff] }
 0x5e3   :  { %8777 = vmatmul.msk.bf16.vlgmr.msrb.gmra.mxu0 %vm4271_vm3, %v6078_v47  ;;  %5668 = vmatpush.bf16.msrb.mxu3 %v9221_v37  ;;  %v9226_v37 = vld [vmem:[%s11747_s6 + $0x3c0] sm:$0xff] }
 0x5e4   :  { %6318 = vmatpush.bf16.msrb.mxu0 %v9273_v36  ;;  %v9288_v36 = vld [vmem:[%s11747_s6 + $0x5b0] sm:$0xff] }
 0x5e5   :  { %v4035_v14 = vpop.f32.mrf.mxu2  ;;  %v4823_v52 = vpop.f32.mrf.mxu3 }
 0x5e6   :  { %v4827_v1 = vadd.f32 %v4823_v52, %v4777_v58  ;;  %v2971_v58 = vadd.f32 %v11799_v43, %v11798_v22  ;;  %v9237_v14 = vld [vmem:[%s11747_s6 + $0x418] sm:$0xff]  ;;  %v5628_v52 = vpack.c.bf16 %v4205_v19, %v4205_v19 }
 0x5e7   :  { %v3655_v8 = vpop.f32.mrf.mxu1  ;;  %v11141_v2 = vpop.f32.mrf.mxu0  ;;  %5669 = vmatpush.bf16.msrb.mxu3 %v9220_v54 }
 0x5e8   :  { %6319 = vmatpush.bf16.msrb.mxu0 %v9272_v56  ;;  %v3351_v38 = vadd.f32 %v10409_v15, %v2971_v58  ;;  %v9291_v58 = vld [vmem:[%s11747_s6 + $0x5c8] sm:$0xff] }
 0x5eb   :  { %5670 = vmatpush.bf16.msrb.mxu3 %v9219_v55  ;;  %v9287_v55 = vld [vmem:[%s11747_s6 + $0x5a8] sm:$0xff] }
 0x5ec   :  { %6320 = vmatpush.bf16.msrb.mxu0 %v9271_v50  ;;  %v9236_v50 = vld [vmem:[%s11747_s6 + $0x410] sm:$0xff] }
 0x5ed   :  { %v4037_v51 = vpop.f32.mrf.mxu2  ;;  %v4825_v31 = vpop.f32.mrf.mxu3 }
 0x5ee   :  { %v11802_v31 = vld [vmem:[#allocation27_spill] sm:$0xff] }
 0x5ef   :  { %v3657_v33 = vpop.f32.mrf.mxu1  ;;  %v5425_v46 = vpop.f32.mrf.mxu0  ;;  %5671 = vmatpush.bf16.msrb.mxu3 %v9218_v57  ;;  %v11801_v57 = vld [vmem:[#allocation6_spill] sm:$0xff] }
 0x5f0   :  { %v3730_v17 = vadd.f32 %v3657_v33, %v10397_v25  ;;  %6321 = vmatpush.bf16.msrb.mxu0 %v9270_v4 }
 0x5f2   :  { %v4110_v13 = vadd.f32 %v4037_v51, %v3730_v17  ;;  %8590 = vmatmul.msk.bf16.vlgmr.msra.gmra.mxu3 %vm4271_vm3, %v5528_v24  ;;  %v9292_v24 = vld [vmem:[%s11747_s6 + $0x5d0] sm:$0xff] }
 0x5f3   :  { %5768 = vmatpush.bf16.msra.mxu3 %v9229_v35  ;;  %v9286_v35 = vld [vmem:[%s11747_s6 + $0x5a0] sm:$0xff]  ;;  %6569 = vmatpush.bf16.msra.mxu1 %v9292_v24 }
 0x5f4   :  { %v4164_v45 = vadd.f32 %v10947_v29, %v4110_v13  ;;  %v9235_v13 = vld [vmem:[%s11747_s6 + $0x408] sm:$0xff] }
 0x5f5   :  { %v4039_v25 = vpop.f32.mrf.mxu2  ;;  %v4873_v44 = vpop.f32.mrf.mxu3 }
 0x5f6   :  { %v4216_v39 = vmax.f32 %v4164_v45, 0.0  ;;  %v4877_v21 = vadd.f32 %v4873_v44, %v4827_v1  ;;  %v9297_v45 = vld [vmem:[%s11747_s6 + $0x5f8] sm:$0xff] }
 0x5f7   :  { %v3659_v34 = vpop.f32.mrf.mxu1  ;;  %v11181_v32 = vpop.f32.mrf.mxu0  ;;  %5769 = vmatpush.bf16.msra.mxu3 %v9228_v5  ;;  %6570 = vmatpush.bf16.msra.mxu1 %v9291_v58 }
 0x5f8   :  { %v6178_v12 = vpack.c.bf16 %v4216_v39, %v4216_v39  ;;  %v3731_v3 = vadd.f32 %v3659_v34, %v3351_v38  ;;  %6618 = vmatpush.bf16.msra.mxu2 %v9297_v45  ;;  %v9296_v34 = vld [vmem:[%s11747_s6 + $0x5f0] sm:$0xff] }
 0x5fa   :  { %v11188_v15 = vadd.f32 %v4039_v25, %v3731_v3  ;;  %8811 = vmatmul.msk.bf16.vlgmr.msra.gmra.mxu0 %vm4271_vm3, %v6178_v12  ;;  %v4207_v25 = vmax.f32 %v4155_v18, 0.0 }
 0x5fb   :  { %5770 = vmatpush.bf16.msra.mxu3 %v9227_v42  ;;  %6518 = vmatpush.bf16.msra.mxu0 %v9289_v20  ;;  %v11803_v20 = vld [vmem:[#allocation28_spill] sm:$0xff] }
 0x5fc   :  { %v5728_v12 = vpack.c.bf16 %v4207_v25, %v4207_v25  ;;  %6571 = vmatpush.bf16.msra.mxu1 %v9290_v26  ;;  %6619 = vmatpush.bf16.msra.mxu2 %v9296_v34  ;;  %v9309_v25 = vld [vmem:[%s11747_s6 + $0x658] sm:$0xff] }
 0x5fd   :  { %v4042_v47 = vpop.f32.mrf.mxu2  ;;  %v4875_v63 = vpop.f32.mrf.mxu3 }
 0x5fe   :  { %v9295_v63 = vld [vmem:[%s11747_s6 + $0x5e8] sm:$0xff] }
 0x5ff   :  { %v3662_v54 = vpop.f32.mrf.mxu1  ;;  %v5525_v56 = vpop.f32.mrf.mxu0  ;;  %5771 = vmatpush.bf16.msra.mxu3 %v9226_v37  ;;  %6519 = vmatpush.bf16.msra.mxu0 %v9288_v36  ;;  %v9244_v36 = vld [vmem:[%s11747_s6 + $0x450] sm:$0xff] }
 0x600   :  { %v3732_v1 = vadd.f32 %v3662_v54, %v10424_v9  ;;  %v2973_v9 = vadd.f32 %v11801_v57, %v11800_v40  ;;  %v11804_v54 = vld [vmem:[#allocation7_spill] sm:$0xff]  ;;  %v11805_v56 = vld [vmem:[#allocation8_spill] sm:$0xff]  ;;  %6620 = vmatpush.bf16.msra.mxu2 %v9295_v63  ;;  %v9308_v63 = vld [vmem:[%s11747_s6 + $0x650] sm:$0xff] }
 0x601   :  { %v9294_v57 = vld [vmem:[%s11747_s6 + $0x5e0] sm:$0xff] }
 0x602   :  { %v4112_v8 = vadd.f32 %v4042_v47, %v3732_v1  ;;  %8624 = vmatmul.msk.bf16.vlgmr.msrb.gmra.mxu3 %vm4271_vm3, %v5628_v52  ;;  %v3353_v23 = vadd.f32 %v11802_v31, %v2973_v9 }
 0x603   :  { %5868 = vmatpush.bf16.msrb.mxu3 %v9237_v14  ;;  %6520 = vmatpush.bf16.msra.mxu0 %v9287_v55  ;;  %v2975_v14 = vadd.f32 %v11805_v56, %v11804_v54  ;;  %v11806_v55 = vld [vmem:[#allocation29_spill] sm:$0xff]  ;;  %v4159_v54 = vadd.f32 %v10947_v29, %v11050_v7  ;;  %v9313_v7 = vld [vmem:[%s11747_s6 + $0x678] sm:$0xff] }
 0x604   :  { %v4166_v59 = vadd.f32 %v10947_v29, %v4112_v8  ;;  %6621 = vmatpush.bf16.msra.mxu2 %v9294_v57  ;;  %v9251_v56 = vld [vmem:[%s11747_s6 + $0x488] sm:$0xff] }
 0x605   :  { %v4044_v4 = vpop.f32.mrf.mxu2  ;;  %v4923_v51 = vpop.f32.mrf.mxu3  ;;  %v3355_v0 = vadd.f32 %v11806_v55, %v2975_v14  ;;  %v9307_v55 = vld [vmem:[%s11747_s6 + $0x648] sm:$0xff] }
 0x606   :  { %v4218_v33 = vmax.f32 %v4166_v59, 0.0  ;;  %v4927_v46 = vadd.f32 %v4923_v51, %v4877_v21  ;;  %v9243_v59 = vld [vmem:[%s11747_s6 + $0x448] sm:$0xff] }
 0x607   :  { %v3664_v17 = vpop.f32.mrf.mxu1  ;;  %5869 = vmatpush.bf16.msrb.mxu3 %v9236_v50  ;;  %6521 = vmatpush.bf16.msra.mxu0 %v9286_v35  ;;  %v9242_v35 = vld [vmem:[%s11747_s6 + $0x440] sm:$0xff] }
 0x608   :  { %v6278_v5 = vpack.c.bf16 %v4218_v33, %v4218_v33  ;;  %v3733_v22 = vadd.f32 %v3664_v17, %v3353_v23 }
 0x60a   :  { %v4113_v43 = vadd.f32 %v4044_v4, %v3733_v22  ;;  %8845 = vmatmul.msk.bf16.vlgmr.msrb.gmra.mxu0 %vm4271_vm3, %v6278_v5  ;;  %v4157_v4 = vadd.f32 %v10947_v29, %v11007_v28  ;;  %v9253_v5 = vld [vmem:[%s11747_s6 + $0x498] sm:$0xff] }
 0x60b   :  { %5870 = vmatpush.bf16.msrb.mxu3 %v9235_v13  ;;  %v9304_v13 = vld [vmem:[%s11747_s6 + $0x630] sm:$0xff] }
 0x60c   :  { %v4167_v44 = vadd.f32 %v10947_v29, %v4113_v43  ;;  %v4209_v24 = vmax.f32 %v4157_v4, 0.0  ;;  %v11807_v43 = vld [vmem:[#allocation30_spill] sm:$0xff]  ;;  %v9306_v4 = vld [vmem:[%s11747_s6 + $0x640] sm:$0xff] }
 0x60d   :  { %v4047_v38 = vpop.f32.mrf.mxu2  ;;  %v4925_v39 = vpop.f32.mrf.mxu3 }
 0x60e   :  { %v4219_v21 = vmax.f32 %v4167_v44, 0.0  ;;  %v5828_v22 = vpack.c.bf16 %v4209_v24, %v4209_v24  ;;  %v9303_v44 = vld [vmem:[%s11747_s6 + $0x628] sm:$0xff] }
 0x60f   :  { %v3667_v42 = vpop.f32.mrf.mxu1  ;;  %5871 = vmatpush.bf16.msrb.mxu3 %v9234_v62  ;;  %v11808_v39 = vld [vmem:[#allocation9_spill] sm:$0xff] }
 0x610   :  { %v6328_v3 = vpack.c.bf16 %v4219_v21, %v4219_v21  ;;  %v3734_v37 = vadd.f32 %v3667_v42, %v11803_v20  ;;  %v11250_v19 = vpop.f32.mrf.mxu0  ;;  %v11809_v21 = vld [vmem:[#allocation10_spill] sm:$0xff] }
 0x611   :  { %v2977_v26 = vadd.f32 %v11809_v21, %v11808_v39 }
 0x612   :  { %v4114_v47 = vadd.f32 %v4047_v38, %v3734_v37  ;;  %8658 = vmatmul.msk.bf16.vlgmr.msra.gmra.mxu3 %vm4271_vm3, %v5728_v12  ;;  %8862 = vmatmul.msk.bf16.vlgmr.msrb.gmra.mxu1 %vm4271_vm3, %v6328_v3  ;;  %v9252_v38 = vld [vmem:[%s11747_s6 + $0x490] sm:$0xff]  ;;  %v11810_v3 = vld [vmem:[#allocation31_spill] sm:$0xff] }
 0x613   :  { %5968 = vmatpush.bf16.msra.mxu3 %v9245_v61  ;;  %6768 = vmatpush.bf16.msrb.mxu1 %v9309_v25  ;;  %v3357_v20 = vadd.f32 %v11810_v3, %v2977_v26  ;;  %v11357_v26 = vld [vmem:[%s11745_s4 + $0x38] sm:$0xf]  ;;  %v9259_v3 = vld [vmem:[%s11747_s6 + $0x4c8] sm:$0xff] }
 0x614   :  { %v4168_v52 = vadd.f32 %v10947_v29, %v4114_v47 }
 0x615   :  { %v4049_v1 = vpop.f32.mrf.mxu2  ;;  %v4973_v8 = vpop.f32.mrf.mxu3 }
 0x616   :  { %v4220_v50 = vmax.f32 %v4168_v52, 0.0  ;;  %v4977_v40 = vadd.f32 %v4973_v8, %v4927_v46  ;;  %v9305_v46 = vld [vmem:[%s11747_s6 + $0x638] sm:$0xff] }
 0x617   :  { %v3669_v9 = vpop.f32.mrf.mxu1  ;;  %5969 = vmatpush.bf16.msra.mxu3 %v9244_v36  ;;  %6718 = vmatpush.bf16.msrb.mxu0 %v9305_v46  ;;  %v9302_v36 = vld [vmem:[%s11747_s6 + $0x620] sm:$0xff]  ;;  %v9261_v46 = vld [vmem:[%s11747_s6 + $0x4d8] sm:$0xff] }
 0x618   :  { %v6378_v51 = vpack.c.bf16 %v4220_v50, %v4220_v50  ;;  %v3735_v31 = vadd.f32 %v3669_v9, %v3355_v0  ;;  %v5625_v23 = vpop.f32.mrf.mxu0  ;;  %v5027_v42 = vadd.f32 %v10977_v10, %v4977_v40  ;;  %6769 = vmatpush.bf16.msrb.mxu1 %v9308_v63  ;;  %v4211_v0 = vmax.f32 %v4159_v54, 0.0  ;;  %v9250_v50 = vld [vmem:[%s11747_s6 + $0x480] sm:$0xff]  ;;  %v11377_v54 = vld [vmem:[%s11745_s4 + $0x58] sm:$0xff] }
 0x61a   :  { %v11272_v33 = vadd.f32 %v4049_v1, %v3735_v31  ;;  %8879 = vmatmul.msk.bf16.vlgmr.msrb.gmra.mxu2 %vm4271_vm3, %v6378_v51  ;;  %v9312_v51 = vld [vmem:[%s11747_s6 + $0x670] sm:$0xff]  ;;  %v5928_v31 = vpack.c.bf16 %v4211_v0, %v4211_v0 }
 0x61b   :  { %5970 = vmatpush.bf16.msra.mxu3 %v9243_v59  ;;  %6719 = vmatpush.bf16.msrb.mxu0 %v9304_v13 }
 0x61c   :  { %6770 = vmatpush.bf16.msrb.mxu1 %v9307_v55  ;;  %6818 = vmatpush.bf16.msrb.mxu2 %v9313_v7  ;;  %v11412_v55 = vld [vmem:[%s11745_s4 + $0x18] sm:$0xff] }
 0x61d   :  { %v4052_v28 = vpop.f32.mrf.mxu2  ;;  %v4975_v17 = vpop.f32.mrf.mxu3 }
 0x61e   :  { %v11812_v17 = vld [vmem:[#allocation32_spill] sm:$0xff] }
 0x61f   :  { %v3672_v18 = vpop.f32.mrf.mxu1  ;;  %5971 = vmatpush.bf16.msra.mxu3 %v9242_v35  ;;  %6720 = vmatpush.bf16.msrb.mxu0 %v9303_v44  ;;  %v11811_v35 = vld [vmem:[#allocation23_spill] sm:$0xff] }
 0x620   :  { %v3736_v58 = vadd.f32 %v3672_v18, %v11807_v43  ;;  %v11288_v45 = vpop.f32.mrf.mxu0  ;;  %v3727_v24 = vadd.f32 %v11084_v27, %v11811_v35  ;;  %6771 = vmatpush.bf16.msrb.mxu1 %v9306_v4  ;;  %6819 = vmatpush.bf16.msrb.mxu2 %v9312_v51  ;;  %v9260_v27 = vld [vmem:[%s11747_s6 + $0x4d0] sm:$0xff]  ;;  %v11813_v43 = vld [vmem:[#allocation11_spill] sm:$0xff]  ;;  %v11816_v4 = vld [vmem:[#allocation24_spill] sm:$0xff] }
 0x621   :  { %v3729_v51 = vadd.f32 %v11125_v41, %v11816_v4  ;;  %v11441_v35 = vld [vmem:[%s11745_s4 + $0x40] sm:$0xff]  ;;  %v9283_v4 = vld [vmem:[%s11747_s6 + $0x588] sm:$0xff] }
 0x622   :  { %v4116_v62 = vadd.f32 %v4052_v28, %v3736_v58  ;;  %8692 = vmatmul.msk.bf16.vlgmr.msrb.gmra.mxu3 %vm4271_vm3, %v5828_v22  ;;  %v9311_v22 = vld [vmem:[%s11747_s6 + $0x668] sm:$0xff]  ;;  %v4107_v25 = vadd.f32 %v11082_v48, %v3727_v24  ;;  %v11817_v24 = vld [vmem:[#allocation12_spill] sm:$0xff] }
 0x623   :  { %6068 = vmatpush.bf16.msrb.mxu3 %v9253_v5  ;;  %6721 = vmatpush.bf16.msrb.mxu0 %v9302_v36  ;;  %v11814_v58 = vld [vmem:[#allocation25_spill] sm:$0xff] }
 0x624   :  { %v4170_v34 = vadd.f32 %v10947_v29, %v4116_v62  ;;  %v2979_v62 = vadd.f32 %v11814_v58, %v11813_v43  ;;  %6820 = vmatpush.bf16.msrb.mxu2 %v9311_v22 }
 0x625   :  { %v4054_v61 = vpop.f32.mrf.mxu2  ;;  %v5073_v12 = vpop.f32.mrf.mxu3 }
 0x626   :  { %v4222_v37 = vmax.f32 %v4170_v34, 0.0  ;;  %v5077_v47 = vadd.f32 %v5073_v12, %v5027_v42  ;;  %v11815_v34 = vld [vmem:[#allocation33_spill] sm:$0xff] }
 0x627   :  { %v3674_v10 = vpop.f32.mrf.mxu1  ;;  %6069 = vmatpush.bf16.msrb.mxu3 %v9252_v38  ;;  %v3359_v42 = vadd.f32 %v11815_v34, %v2979_v62 }
 0x628   :  { %v6478_v14 = vpack.c.bf16 %v4222_v37, %v4222_v37  ;;  %v3737_v52 = vadd.f32 %v3674_v10, %v3357_v20  ;;  %v5725_v1 = vpop.f32.mrf.mxu0  ;;  %v5127_v38 = vadd.f32 %v11023_v11, %v5077_v47  ;;  %v9310_v11 = vld [vmem:[%s11747_s6 + $0x660] sm:$0xff]  ;;  %v11371_v20 = vld [vmem:[%s11745_s4 + $0x30] sm:$0xff]  ;;  %v4161_v37 = vadd.f32 %v10947_v29, %v4107_v25  ;;  %v11383_v10 = vld [vmem:[%s11745_s4 + $0x28] sm:$0xff] }
 0x629   :  { %6821 = vmatpush.bf16.msrb.mxu2 %v9310_v11  ;;  %v11403_v1 = vld [vmem:[%s11745_s4 + $0x48] sm:$0xff] }
 0x62a   :  { %v4117_v8 = vadd.f32 %v4054_v61, %v3737_v52  ;;  %8913 = vmatmul.msk.bf16.vlgmr.msra.gmra.mxu0 %vm4271_vm3, %v6478_v14  ;;  %v11394_v14 = vld [vmem:[%s11745_s4 + $0x20] sm:$0xff]  ;;  %v4213_v7 = vmax.f32 %v4161_v37, 0.0  ;;  %v9285_v37 = vld [vmem:[%s11747_s6 + $0x598] sm:$0xff] }
 0x62b   :  { %6070 = vmatpush.bf16.msrb.mxu3 %v9251_v56  ;;  %v11388_v56 = vld [vmem:[%s11745_s4 + $0x50] sm:$0xff]  ;;  %6934 = vmatpush.msra.mxu0 %v11377_v54 }
 0x62c   :  { %v4171_v40 = vadd.f32 %v10947_v29, %v4117_v8  ;;  %v9258_v8 = vld [vmem:[%s11747_s6 + $0x4c0] sm:$0xff] }
 0x62d   :  { %v4057_v57 = vpop.f32.mrf.mxu2  ;;  %v5075_v9 = vpop.f32.mrf.mxu3  ;;  %6935 = vmatpush.msra.mxu0 %v11388_v56 }
 0x62e   :  { %v4223_v59 = vmax.f32 %v4171_v40, 0.0  ;;  %v11420_v40 = vld [vmem:[%s11745_s4 + $0x10] sm:$0xff]  ;;  %v9269_v9 = vld [vmem:[%s11747_s6 + $0x518] sm:$0xff] }
 0x62f   :  { %v3677_v23 = vpop.f32.mrf.mxu1  ;;  %6071 = vmatpush.bf16.msrb.mxu3 %v9250_v50  ;;  %6936 = vmatpush.msra.mxu0 %v11403_v1 }
 0x630   :  { %v6528_v28 = vpack.c.bf16 %v4223_v59, %v4223_v59  ;;  %v3738_v13 = vadd.f32 %v3677_v23, %v11812_v17  ;;  %v11339_v18 = vpop.f32.mrf.mxu0  ;;  %v6028_v59 = vpack.c.bf16 %v4213_v7, %v4213_v7  ;;  %v9284_v7 = vld [vmem:[%s11747_s6 + $0x590] sm:$0xff] }
 0x631   :  { %6937 = vmatpush.msra.mxu0 %v11441_v35 }
 0x632   :  { %v4118_v5 = vadd.f32 %v4057_v57, %v3738_v13  ;;  %8726 = vmatmul.msk.bf16.vlgmr.msra.gmra.mxu3 %vm4271_vm3, %v5928_v31  ;;  %8930 = vmatmul.msk.bf16.vlgmr.msra.gmra.mxu1 %vm4271_vm3, %v6528_v28  ;;  %v11818_v28 = vld [vmem:[#allocation26_spill] sm:$0xff]  ;;  %v4109_v13 = vadd.f32 %v11123_v60, %v3729_v51 }
 0x633   :  { %6168 = vmatpush.bf16.msra.mxu3 %v9261_v46  ;;  %9016 = vmatpush.msk.msra.mxu1 %vm6874_vm4, %v11357_v26  ;;  %v11436_v46 = vld [vmem:[%s11745_s4 + $0x8] sm:$0xff]  ;;  %v2981_v17 = vadd.f32 %v11818_v28, %v11817_v24  ;;  %v9282_v24 = vld [vmem:[%s11747_s6 + $0x580] sm:$0xff] }
 0x634   :  { %v4172_v44 = vadd.f32 %v10947_v29, %v4118_v5 }
 0x635   :  { %v4059_v39 = vpop.f32.mrf.mxu2  ;;  %v5173_v21 = vpop.f32.mrf.mxu3  ;;  %6888 = vmatpush.msra.mxu1 %v11371_v20  ;;  %v3361_v58 = vadd.f32 %v10539_v49, %v2981_v17  ;;  %v9266_v49 = vld [vmem:[%s11747_s6 + $0x500] sm:$0xff] }
 0x636   :  { %v4224_v61 = vmax.f32 %v4172_v44, 0.0  ;;  %v5177_v12 = vadd.f32 %v5173_v21, %v5127_v38  ;;  %v9267_v38 = vld [vmem:[%s11747_s6 + $0x508] sm:$0xff] }
 0x637   :  { %v3679_v48 = vpop.f32.mrf.mxu1  ;;  %6169 = vmatpush.bf16.msra.mxu3 %v9260_v27  ;;  %6889 = vmatpush.msra.mxu1 %v11383_v10 }
 0x638   :  { %v6578_v47 = vpack.c.bf16 %v4224_v61, %v4224_v61  ;;  %v3739_v63 = vadd.f32 %v3679_v48, %v3359_v42  ;;  %v5825_v36 = vpop.f32.mrf.mxu0  ;;  %v5227_v22 = vadd.f32 %v11064_v16, %v5177_v12 }
 0x639   :  { %6890 = vmatpush.msra.mxu1 %v11394_v14 }
 0x63a   :  { %v11396_v52 = vadd.f32 %v4059_v39, %v3739_v63  ;;  %8947 = vmatmul.msk.bf16.vlgmr.msra.gmra.mxu2 %vm4271_vm3, %v6578_v47  ;;  %v4163_v39 = vadd.f32 %v10947_v29, %v4109_v13  ;;  %v9301_v13 = vld [vmem:[%s11747_s6 + $0x618] sm:$0xff] }
 0x63b   :  { %6170 = vmatpush.bf16.msra.mxu3 %v9259_v3  ;;  %7060 = vmatpush.msra.mxu2 %v11377_v54 }
 0x63c   :  { %6891 = vmatpush.msra.mxu1 %v11412_v55  ;;  %v4215_v16 = vmax.f32 %v4163_v39, 0.0 }
 0x63d   :  { %v4062_v0 = vpop.f32.mrf.mxu2  ;;  %v5175_v50 = vpop.f32.mrf.mxu3  ;;  %7061 = vmatpush.msra.mxu2 %v11388_v56 }
 0x63e   :  { %6892 = vmatpush.msra.mxu1 %v11420_v40  ;;  %v6128_v47 = vpack.c.bf16 %v4215_v16, %v4215_v16 }
 0x63f   :  { %v3682_v57 = vpop.f32.mrf.mxu1  ;;  %6171 = vmatpush.bf16.msra.mxu3 %v9258_v8  ;;  %7062 = vmatpush.msra.mxu2 %v11403_v1 }
 0x640   :  { %v3740_v31 = vadd.f32 %v3682_v57, %v10523_v6  ;;  %v11430_v23 = vpop.f32.mrf.mxu0  ;;  %6893 = vmatpush.msra.mxu1 %v11436_v46  ;;  %v9268_v6 = vld [vmem:[%s11747_s6 + $0x510] sm:$0xff] }
 0x641   :  { %7063 = vmatpush.msra.mxu2 %v11441_v35 }
 0x642   :  { %v4120_v41 = vadd.f32 %v4062_v0, %v3740_v31  ;;  %8760 = vmatmul.msk.bf16.vlgmr.msrb.gmra.mxu3 %vm4271_vm3, %v6028_v59 }
 0x643   :  { %6268 = vmatpush.bf16.msrb.mxu3 %v9269_v9 }
 0x644   :  { %v4174_v5 = vadd.f32 %v10947_v29, %v4120_v41 }
 0x645   :  { %v4064_v27 = vpop.f32.mrf.mxu2  ;;  %v5273_v43 = vpop.f32.mrf.mxu3 }
 0x646   :  { %v4226_v62 = vmax.f32 %v4174_v5, 0.0  ;;  %v11457_v25 = vadd.f32 %v5273_v43, %v5227_v22 }
 0x647   :  { %v3684_v44 = vpop.f32.mrf.mxu1  ;;  %6269 = vmatpush.bf16.msrb.mxu3 %v9268_v6  ;;  %v9427_v6 = vmov 0.0  }
 0x648   :  { %v6678_v60 = vpack.c.bf16 %v4226_v62, %v4226_v62  ;;  %v3741_v21 = vadd.f32 %v3684_v44, %v3361_v58  ;;  %v5925_v34 = vpop.f32.mrf.mxu0  ;;  %v9299_v58 = vld [vmem:[%s11747_s6 + $0x608] sm:$0xff]  ;;  %v5327_v16 = vadd.f32 %v11106_v53, %v11457_v25 }
 0x64a   :  { %v4121_v42 = vadd.f32 %v4064_v27, %v3741_v21  ;;  %8981 = vmatmul.msk.bf16.vlgmr.msrb.gmra.mxu0 %vm4271_vm3, %v6678_v60  ;;  %v9300_v27 = vld [vmem:[%s11747_s6 + $0x610] sm:$0xff] }
 0x64b   :  { %6270 = vmatpush.bf16.msrb.mxu3 %v9267_v38  ;;  %7123 = vmatpush.msrb.mxu0 %v11377_v54  ;;  %v9298_v38 = vld [vmem:[%s11747_s6 + $0x600] sm:$0xff] }
 0x64c   :  { %v4175_v61 = vadd.f32 %v10947_v29, %v4121_v42 }
 0x64d   :  { %v4067_v12 = vpop.f32.mrf.mxu2  ;;  %v5275_v11 = vpop.f32.mrf.mxu3  ;;  %7124 = vmatpush.msrb.mxu0 %v11388_v56 }
 0x64e   :  { %v4227_v48 = vmax.f32 %v4175_v61, 0.0 }
 0x64f   :  { %v3687_v3 = vpop.f32.mrf.mxu1  ;;  %6271 = vmatpush.bf16.msrb.mxu3 %v9266_v49  ;;  %7125 = vmatpush.msrb.mxu0 %v11403_v1 }
 0x650   :  { %v6728_v63 = vpack.c.bf16 %v4227_v48, %v4227_v48  ;;  %v3742_v36 = vadd.f32 %v3687_v3, %v10556_v30  ;;  %v11475_v8 = vpop.f32.mrf.mxu0  ;;  %v9400_v30 = vld [vmem:[%s11745_s4] ss:$0 sm:$0xff] }
 0x651   :  { %7126 = vmatpush.msrb.mxu0 %v11441_v35  ;;  %v4165_v51 = vadd.f32 %v9400_v30, %v11188_v15  ;;  %v6840_v15 = vld [vmem:[%s11742_s1] sm:$0xff]  ;;  %v4169_v62 = vadd.f32 %v9400_v30, %v11272_v33  ;;  %v4173_v42 = vadd.f32 %v9400_v30, %v11396_v52 }
 0x652   :  { %v4122_v29 = vadd.f32 %v4067_v12, %v3742_v36  ;;  %8794 = vmatmul.msk.bf16.vlgmr.msra.gmra.mxu3 %vm4271_vm3, %v6128_v47  ;;  %8998 = vmatmul.msk.bf16.vlgmr.msrb.gmra.mxu1 %vm4271_vm3, %v6728_v63 }
 0x653   :  { %6468 = vmatpush.bf16.msra.mxu3 %v9285_v37  ;;  %6997 = vmatpush.msrb.mxu1 %v11377_v54  ;;  %v4217_v28 = vmax.f32 %v4165_v51, 0.0  ;;  %v4221_v39 = vmax.f32 %v4169_v62, 0.0  ;;  %v4225_v49 = vmax.f32 %v4173_v42, 0.0 }
 0x654   :  { %v4176_v0 = vadd.f32 %v9400_v30, %v4122_v29 }
 0x655   :  { %v4069_v50 = vpop.f32.mrf.mxu2  ;;  %v11487_v57 = vpop.f32.mrf.mxu3  ;;  %6998 = vmatpush.msrb.mxu1 %v11388_v56  ;;  %v6228_v5 = vpack.c.bf16 %v4217_v28, %v4217_v28  ;;  %v6428_v21 = vpack.c.bf16 %v4221_v39, %v4221_v39  ;;  %v6628_v12 = vpack.c.bf16 %v4225_v49, %v4225_v49 }
 0x656   :  { %v4228_v9 = vmax.f32 %v4176_v0, 0.0 }
 0x657   :  { %v3689_v59 = vpop.f32.mrf.mxu1  ;;  %6469 = vmatpush.bf16.msra.mxu3 %v9284_v7  ;;  %6999 = vmatpush.msrb.mxu1 %v11403_v1 }
 0x658   :  { %v6778_v31 = vpack.c.bf16 %v4228_v9, %v4228_v9  ;;  %v6025_v41 = vpop.f32.mrf.mxu0 }
 0x659   :  { %7000 = vmatpush.msrb.mxu1 %v11441_v35 }
 0x65a   :  { %9015 = vmatmul.msk.bf16.vlgmr.msrb.gmra.mxu2 %vm4271_vm3, %v6778_v31  ;;  %6938 = vmatmul.f32.vlgmr.msra.gmra.mxu0 %v9427_v6 }
 0x65b   :  { %6470 = vmatpush.bf16.msra.mxu3 %v9283_v4  ;;  %7249 = vmatpush.msrb.mxu2 %v11377_v54 }
 0x65c   :  { %7312 = vmatpush.msra.mxu0 %v11377_v54 }
 0x65d   :  { %v5375_v17 = vpop.f32.mrf.mxu3  ;;  %7250 = vmatpush.msrb.mxu2 %v11388_v56 }
 0x65e   :  { %7313 = vmatpush.msra.mxu0 %v11388_v56 }
 0x65f   :  { %6471 = vmatpush.bf16.msra.mxu3 %v9282_v24  ;;  %7251 = vmatpush.msrb.mxu2 %v11403_v1 }
 0x660   :  { %v11511_v22 = vpop.f32.mrf.mxu0  ;;  %7314 = vmatpush.msra.mxu0 %v11403_v1 }
 0x661   :  { %7252 = vmatpush.msrb.mxu2 %v11441_v35 }
 0x662   :  { %8828 = vmatmul.msk.bf16.vlgmr.msrb.gmra.mxu3 %vm4271_vm3, %v6228_v5  ;;  %9017 = vmatmul.msk.f32.vlgmr.msra.gmra.mxu1 %vm6849_vm5, %v6840_v15 }
 0x663   :  { %6668 = vmatpush.bf16.msrb.mxu3 %v9301_v13  ;;  %7186 = vmatpush.msra.mxu1 %v11377_v54 }
 0x664   :  { %7315 = vmatpush.msra.mxu0 %v11441_v35 }
 0x665   :  { %v5473_v43 = vpop.f32.mrf.mxu3  ;;  %7187 = vmatpush.msra.mxu1 %v11388_v56 }
 0x667   :  { %6669 = vmatpush.bf16.msrb.mxu3 %v9300_v27  ;;  %7188 = vmatpush.msra.mxu1 %v11403_v1 }
 0x668   :  { %v6125_v44 = vpop.f32.mrf.mxu0 }
 0x669   :  { %7189 = vmatpush.msra.mxu1 %v11441_v35 }
 0x66b   :  { %6670 = vmatpush.bf16.msrb.mxu3 %v9299_v58 }
 0x66d   :  { %v5475_v60 = vpop.f32.mrf.mxu3 }
 0x66f   :  { %6671 = vmatpush.bf16.msrb.mxu3 %v9298_v38 }
 0x672   :  { %8896 = vmatmul.msk.bf16.vlgmr.msra.gmra.mxu3 %vm4271_vm3, %v6428_v21 }
 0x673   :  { %9314 = vmatpush.msk.msra.mxu3 %vm6874_vm4, %v11357_v26  ;;  %v5377_v26 = vadd.f32 %v11487_v57, %v5327_v16 }
 0x675   :  { %v5573_v34 = vpop.f32.mrf.mxu3  ;;  %9315 = vmatpush.msra.mxu3 %v11371_v20 }
 0x677   :  { %v11536_v33 = vpop.f32.mrf.mxu0  ;;  %9316 = vmatpush.msra.mxu3 %v11383_v10  ;;  %v5427_v10 = vadd.f32 %v11141_v2, %v5377_v26 }
 0x679   :  { %9317 = vmatpush.msra.mxu3 %v11394_v14  ;;  %v5477_v14 = vadd.f32 %v5473_v43, %v5427_v10 }
 0x67b   :  { %9318 = vmatpush.msra.mxu3 %v11412_v55  ;;  %v5527_v11 = vadd.f32 %v11181_v32, %v5477_v14 }
 0x67d   :  { %v5575_v61 = vpop.f32.mrf.mxu3  ;;  %9319 = vmatpush.msra.mxu3 %v11420_v40  ;;  %v5577_v48 = vadd.f32 %v5573_v34, %v5527_v11 }
 0x67f   :  { %v6225_v20 = vpop.f32.mrf.mxu0  ;;  %9320 = vmatpush.msra.mxu3 %v11436_v46  ;;  %v5627_v25 = vadd.f32 %v11250_v19, %v5577_v48 }
 0x682   :  { %8964 = vmatmul.msk.bf16.vlgmr.msrb.gmra.mxu3 %vm4271_vm3, %v6628_v12 }
 0x685   :  { %v5673_v52 = vpop.f32.mrf.mxu3 }
 0x686   :  { %v5677_v37 = vadd.f32 %v5673_v52, %v5627_v25 }
 0x687   :  { %v6323_v55 = vpop.f32.mrf.mxu0 }
 0x688   :  { %v5727_v47 = vadd.f32 %v11288_v45, %v5677_v37 }
 0x68d   :  { %v5675_v53 = vpop.f32.mrf.mxu3 }
 0x68f   :  { %v6325_v40 = vpop.f32.mrf.mxu0  ;;  %v6373_v3 = vpop.f32.mrf.mxu1 }
 0x695   :  { %v5773_v46 = vpop.f32.mrf.mxu3 }
 0x696   :  { %v5777_v63 = vadd.f32 %v5773_v46, %v5727_v47 }
 0x697   :  { %v6375_v36 = vpop.f32.mrf.mxu1 }
 0x698   :  { %v5827_v7 = vadd.f32 %v11339_v18, %v5777_v63 }
 0x69d   :  { %v5775_v2 = vpop.f32.mrf.mxu3  ;;  %v6423_v29 = vpop.f32.mrf.mxu2 }
 0x6a5   :  { %v5873_v30 = vpop.f32.mrf.mxu3  ;;  %v6425_v0 = vpop.f32.mrf.mxu2 }
 0x6a6   :  { %v5877_v50 = vadd.f32 %v5873_v30, %v5827_v7 }
 0x6a7   :  { %v6523_v32 = vpop.f32.mrf.mxu0 }
 0x6a8   :  { %v5927_v19 = vadd.f32 %v11430_v23, %v5877_v50  ;;  %v11559_v23 = vld [vmem:[%s11745_s4 + $0x60] ss:$0 sm:$0xff] }
 0x6ad   :  { %v5875_v57 = vpop.f32.mrf.mxu3 }
 0x6af   :  { %v6525_v9 = vpop.f32.mrf.mxu0  ;;  %v6573_v59 = vpop.f32.mrf.mxu1 }
 0x6b5   :  { %v5973_v4 = vpop.f32.mrf.mxu3 }
 0x6b6   :  { %v5977_v51 = vadd.f32 %v5973_v4, %v5927_v19 }
 0x6b7   :  { %v6575_v31 = vpop.f32.mrf.mxu1 }
 0x6b8   :  { %v6027_v6 = vadd.f32 %v11475_v8, %v5977_v51 }
 0x6bd   :  { %v5975_v45 = vpop.f32.mrf.mxu3  ;;  %v6623_v41 = vpop.f32.mrf.mxu2 }
 0x6c5   :  { %v6073_v24 = vpop.f32.mrf.mxu3  ;;  %v6625_v28 = vpop.f32.mrf.mxu2 }
 0x6c6   :  { %v6077_v17 = vadd.f32 %v6073_v24, %v6027_v6 }
 0x6c7   :  { %v6723_v18 = vpop.f32.mrf.mxu0 }
 0x6c8   :  { %v6127_v27 = vadd.f32 %v11511_v22, %v6077_v17 }
 0x6cd   :  { %v6075_v15 = vpop.f32.mrf.mxu3 }
 0x6cf   :  { %v6725_v13 = vpop.f32.mrf.mxu0  ;;  %v6773_v5 = vpop.f32.mrf.mxu1 }
 0x6d5   :  { %v6173_v43 = vpop.f32.mrf.mxu3 }
 0x6d6   :  { %v6177_v58 = vadd.f32 %v6173_v43, %v6127_v27 }
 0x6d7   :  { %v6775_v62 = vpop.f32.mrf.mxu1  ;;  %v6939_v39 = vpop.f32.mrf.mxu0 }
 0x6d8   :  { %v6227_v34 = vadd.f32 %v11536_v33, %v6177_v58 }
 0x6dd   :  { %v6175_v44 = vpop.f32.mrf.mxu3  ;;  %v6823_v38 = vpop.f32.mrf.mxu2 }
 0x6df   :  { %v6895_v8 = vpop.f32.mrf.mxu1 }
 0x6e0   :  { %v6896_v60 = vadd.f32 %v11559_v23, %v6895_v8 }
 0x6e2   :  { %v6942_v21 = vadd.f32 %v6939_v39, %v6896_v60 }
 0x6e4   :  { %9331 = vtanh.f32 %v6942_v21  ;;  %v9025_v63 = vmul.f32 -1.442695, %v6942_v21 }
 0x6e5   :  { %v6273_v42 = vpop.f32.mrf.mxu3  ;;  %v6825_v22 = vpop.f32.mrf.mxu2 }
 0x6e6   :  { %v6277_v49 = vadd.f32 %v6273_v42, %v6227_v34  ;;  %9333 = vpow2.f32 %v9025_v63 }
 0x6e8   :  { %v6327_v61 = vadd.f32 %v6323_v55, %v6277_v49 }
 0x6ea   :  { %v9332_v16 = vpop.eup %9331  ;;  %v6377_v20 = vadd.f32 %v6373_v3, %v6327_v61  ;;  %v6842_v61 = vld [vmem:[%s11742_s1 + $0x10] sm:$0xff] }
 0x6eb   :  { %6965 = vrot.lane.b32.xlu0 %v9332_v16, %s9428_s8 }
 0x6ec   :  { %v6427_v12 = vadd.f32 %v6423_v29, %v6377_v20  ;;  %v9334_v36 = vpop.eup %9333 }
 0x6ed   :  { %v6275_v26 = vpop.f32.mrf.mxu3  ;;  %v6946_v55 = vadd.f32 1.0, %v9334_v36 }
 0x6ef   :  { %9335 = vrcp.f32 %v6946_v55  ;;  %v6958_v0 = vand.u32 2147483648, %v6946_v55  ;;  %vm6952_vm7 = vweird.f32 %v6946_v55  ;;  %v6956_v50 = vand.u32 2147483647, %v6946_v55 }
 0x6f1   :  { %v6959_v57 = vor.u32 1.1754944e-38, %v6958_v0  ;;  %vm6957_vm9 = vcmp.eq.f32.partialorder %v6956_v50, 8.507059e+37 }
 0x6f5   :  { %v6473_v10 = vpop.f32.mrf.mxu3  ;;  %v9336_v3 = vpop.eup %9335 }
 0x6f6   :  { %v6477_v14 = vadd.f32 %v6473_v10, %v6427_v12  ;;  %v6948_v2 = vmul.f32 %v9336_v3, %v6946_v55  ;;  %vm6953_vm6 = vweird.f32 %v9336_v3 }
 0x6f7   :  { %vm6954_vm8 = vmor %vm6952_vm7, %vm6953_vm6 }
 0x6f8   :  { %v6527_v52 = vadd.f32 %v6523_v32, %v6477_v14  ;;  %v6949_v29 = vsub.f32 1.0, %v6948_v2 }
 0x6fa   :  { %v6577_v11 = vadd.f32 %v6573_v59, %v6527_v52  ;;  %v6950_v7 = vmul.f32 %v9336_v3, %v6949_v29 }
 0x6fc   :  { %v6627_v48 = vadd.f32 %v6623_v41, %v6577_v11  ;;  %v6951_v30 = vadd.f32 %v9336_v3, %v6950_v7  ;;  %v6841_v41 = vld [vmem:[%s11742_s1 + $0x8] sm:$0xff] }
 0x6fd   :  { %v6475_v53 = vpop.f32.mrf.mxu3  ;;  %9018 = vmatmul.msk.f32.vlgmr.msra.gmra.mxu3 %vm6849_vm5, %v6841_v41 }
 0x6fe   :  { %v6955_v32 = vsel %vm6954_vm8, %v9336_v3, %v6951_v30 }
 0x6ff   :  { %v6960_v59 = vsel %vm6957_vm9, %v6959_v57, %v6955_v32 }
 0x700   :  { %v6963_v4 = vmul.f32 0.0, %v6960_v59 }
 0x705   :  { %v6673_v25 = vpop.f32.mrf.mxu3  ;;  %9019 = vmatmul.msk.f32.gmra.mxu3 %vm6849_vm5, %v6842_v61 }
 0x706   :  { %v6677_v40 = vadd.f32 %v6673_v25, %v6627_v48 }
 0x708   :  { %v6727_v33 = vadd.f32 %v6723_v18, %v6677_v40 }
 0x70a   :  { %v6777_v37 = vadd.f32 %v6773_v5, %v6727_v33 }
 0x70c   :  { %v11564_v47 = vadd.f32 %v6823_v38, %v6777_v37 }
 0x70d   :  { %v6675_v46 = vpop.f32.mrf.mxu3 }
 0x75d   :  { %v6966_v9 = vpop.permute.xlu0 %6965 }
 0x75e   :  { %v6968_v19 = vmul.f32 %v6966_v9, %v6960_v59 }
 0x760   :  { %6970 = vrot.lane.b32.xlu0 %v6968_v19, %s9428_s8 }
 0x780   :  { %v6898_v17 = vpop.f32.mrf.mxu3 }
 0x781   :  { %v6899_v18 = vadd.f32 %v11559_v23, %v6898_v17 }
 0x788   :  { %v6901_v10 = vpop.f32.mrf.mxu3 }
 0x789   :  { %v6902_v14 = vadd.f32 %v11559_v23, %v6901_v10 }
 0x7d2   :  { %v6971_v51 = vpop.permute.xlu0 %6970 }
 0x7d3   :  { %v6973_v31 = vadd.f32 %v6971_v51, %v6963_v4 }
 0x7d5   :  { %9337 = vtanh.f32 %v6973_v31 }
 0x7db   :  { %v9338_v45 = vpop.eup %9337 }
 0x7dc   :  { %6976 = vrot.lane.b32.xlu1 %v9338_v45, %s9428_s8 }
 0x84e   :  { %v6977_v6 = vpop.permute.xlu1 %6976 }
 0x84f   :  { %v6979_v24 = vmul.f32 %v6977_v6, %v6960_v59  ;;  %v6843_v59 = vld [vmem:[%s11742_s1 + $0x18] sm:$0xff] }
 0x850   :  { %9020 = vmatmul.msk.f32.gmra.mxu3 %vm6849_vm5, %v6843_v59 }
 0x851   :  { %6981 = vrot.lane.b32.xlu1 %v6979_v24, %s9429_s5 }
 0x8c3   :  { %v6982_v28 = vpop.permute.xlu1 %6981 }
 0x8c4   :  { %9026 = vmatmul.msk.f32.vlgmr.msrb.gmra.mxu1 %vm775_vm2, %v6982_v28 }
 0x8c5   :  { %7375 = vmatpush.msrb.mxu1 %v11377_v54 }
 0x8c7   :  { %7376 = vmatpush.msrb.mxu1 %v11388_v56 }
 0x8c9   :  { %7377 = vmatpush.msrb.mxu1 %v11403_v1 }
 0x8cb   :  { %7378 = vmatpush.msrb.mxu1 %v11441_v35 }
 0x941   :  { %v7002_v15 = vpop.f32.mrf.mxu1 }
 0x942   :  { %v7005_v13 = vadd.f32 %v7002_v15, %v6899_v18 }
 0x944   :  { %9339 = vtanh.f32 %v7005_v13  ;;  %v9027_v27 = vmul.f32 -1.442695, %v7005_v13 }
 0x946   :  { %9341 = vpow2.f32 %v9027_v27 }
 0x94a   :  { %v9340_v5 = vpop.eup %9339 }
 0x94b   :  { %7028 = vrot.lane.b32.xlu2 %v9340_v5, %s9428_s8 }
 0x94c   :  { %v9342_v43 = vpop.eup %9341 }
 0x94d   :  { %v7009_v58 = vadd.f32 1.0, %v9342_v43 }
 0x94f   :  { %9343 = vrcp.f32 %v7009_v58  ;;  %v7021_v35 = vand.u32 2147483648, %v7009_v58  ;;  %vm7015_vm11 = vweird.f32 %v7009_v58  ;;  %v7019_v38 = vand.u32 2147483647, %v7009_v58 }
 0x951   :  { %v7022_v39 = vor.u32 1.1754944e-38, %v7021_v35  ;;  %vm7020_vm13 = vcmp.eq.f32.partialorder %v7019_v38, 8.507059e+37 }
 0x955   :  { %v9344_v54 = vpop.eup %9343 }
 0x956   :  { %v7011_v56 = vmul.f32 %v9344_v54, %v7009_v58  ;;  %vm7016_vm10 = vweird.f32 %v9344_v54 }
 0x957   :  { %vm7017_vm12 = vmor %vm7015_vm11, %vm7016_vm10 }
 0x958   :  { %v7012_v62 = vsub.f32 1.0, %v7011_v56 }
 0x95a   :  { %v7013_v1 = vmul.f32 %v9344_v54, %v7012_v62 }
 0x95c   :  { %v7014_v44 = vadd.f32 %v9344_v54, %v7013_v1 }
 0x95e   :  { %v7018_v8 = vsel %vm7017_vm12, %v9344_v54, %v7014_v44 }
 0x95f   :  { %v7023_v21 = vsel %vm7020_vm13, %v7022_v39, %v7018_v8 }
 0x960   :  { %v7026_v42 = vmul.f32 %v7023_v21, %v6973_v31  ;;  %v6904_v31 = vpop.f32.mrf.mxu3 }
 0x961   :  { %v6905_v45 = vadd.f32 %v11559_v23, %v6904_v31 }
 0x9a5   :  { %v7029_v60 = vpop.permute.xlu2 %7028 }
 0x9a6   :  { %v7031_v34 = vmul.f32 %v7029_v60, %v7023_v21 }
 0x9a8   :  { %7033 = vrot.lane.b32.xlu2 %v7031_v34, %s9428_s8 }
 0xa02   :  { %v7034_v22 = vpop.permute.xlu2 %7033 }
 0xa03   :  { %v7036_v49 = vadd.f32 %v7034_v22, %v7026_v42 }
 0xa05   :  { %9345 = vtanh.f32 %v7036_v49 }
 0xa0b   :  { %v9346_v16 = vpop.eup %9345 }
 0xa0c   :  { %7039 = vrot.lane.b32.xlu0 %v9346_v16, %s9428_s8 }
 0xa7e   :  { %v7040_v26 = vpop.permute.xlu0 %7039 }
 0xa7f   :  { %v7042_v20 = vmul.f32 %v7040_v26, %v7023_v21  ;;  %v6844_v21 = vld [vmem:[%s11742_s1 + $0x20] sm:$0xff] }
 0xa80   :  { %9021 = vmatmul.msk.f32.gmra.mxu3 %vm6849_vm5, %v6844_v21 }
 0xa81   :  { %7044 = vrot.lane.b32.xlu1 %v7042_v20, %s9429_s5 }
 0xaf3   :  { %v7045_v12 = vpop.permute.xlu1 %7044 }
 0xaf4   :  { %9028 = vmatmul.msk.f32.vlgmr.msra.gmra.mxu2 %vm775_vm2, %v7045_v12 }
 0xb77   :  { %v7065_v52 = vpop.f32.mrf.mxu2 }
 0xb78   :  { %v7068_v11 = vadd.f32 %v7065_v52, %v6902_v14 }
 0xb7a   :  { %9347 = vtanh.f32 %v7068_v11  ;;  %v9029_v53 = vmul.f32 -1.442695, %v7068_v11 }
 0xb7c   :  { %9349 = vpow2.f32 %v9029_v53 }
 0xb80   :  { %v9348_v48 = vpop.eup %9347 }
 0xb81   :  { %7091 = vrot.lane.b32.xlu2 %v9348_v48, %s9428_s8 }
 0xb82   :  { %v9350_v25 = vpop.eup %9349 }
 0xb83   :  { %v7072_v40 = vadd.f32 1.0, %v9350_v25 }
 0xb85   :  { %9351 = vrcp.f32 %v7072_v40  ;;  %v7084_v55 = vand.u32 2147483648, %v7072_v40  ;;  %vm7078_vm15 = vweird.f32 %v7072_v40  ;;  %v7082_v3 = vand.u32 2147483647, %v7072_v40 }
 0xb87   :  { %v7085_v29 = vor.u32 1.1754944e-38, %v7084_v55  ;;  %vm7083_vm1 = vcmp.eq.f32.partialorder %v7082_v3, 8.507059e+37 }
 0xb8b   :  { %v9352_v33 = vpop.eup %9351 }
 0xb8c   :  { %v7074_v37 = vmul.f32 %v9352_v33, %v7072_v40  ;;  %vm7079_vm14 = vweird.f32 %v9352_v33 }
 0xb8d   :  { %vm7080_vm0 = vmor %vm7078_vm15, %vm7079_vm14 }
 0xb8e   :  { %v7075_v46 = vsub.f32 1.0, %v7074_v37 }
 0xb90   :  { %v7076_v63 = vmul.f32 %v9352_v33, %v7075_v46 }
 0xb92   :  { %v7077_v36 = vadd.f32 %v9352_v33, %v7076_v63 }
 0xb94   :  { %v7081_v2 = vsel %vm7080_vm0, %v9352_v33, %v7077_v36 }
 0xb95   :  { %v7086_v30 = vsel %vm7083_vm1, %v7085_v29, %v7081_v2 }
 0xb96   :  { %v7089_v50 = vmul.f32 %v7086_v30, %v7036_v49  ;;  %v6907_v49 = vpop.f32.mrf.mxu3 }
 0xb97   :  { %v6908_v16 = vadd.f32 %v11559_v23, %v6907_v49 }
 0xbdb   :  { %v7092_v7 = vpop.permute.xlu2 %7091 }
 0xbdc   :  { %v7094_v0 = vmul.f32 %v7092_v7, %v7086_v30 }
 0xbde   :  { %7096 = vrot.lane.b32.xlu0 %v7094_v0, %s9428_s8 }
 0xc50   :  { %v7097_v32 = vpop.permute.xlu0 %7096 }
 0xc51   :  { %v7099_v57 = vadd.f32 %v7097_v32, %v7089_v50 }
 0xc53   :  { %9353 = vtanh.f32 %v7099_v57 }
 0xc59   :  { %v9354_v9 = vpop.eup %9353 }
 0xc5a   :  { %7102 = vrot.lane.b32.xlu1 %v9354_v9, %s9428_s8 }
 0xccc   :  { %v7103_v19 = vpop.permute.xlu1 %7102 }
 0xccd   :  { %v7105_v4 = vmul.f32 %v7103_v19, %v7086_v30  ;;  %v6845_v30 = vld [vmem:[%s11742_s1 + $0x28] sm:$0xff] }
 0xcce   :  { %9022 = vmatmul.msk.f32.gmra.mxu3 %vm6849_vm5, %v6845_v30 }
 0xccf   :  { %7107 = vrot.lane.b32.xlu2 %v7105_v4, %s9429_s5 }
 0xd29   :  { %v7108_v51 = vpop.permute.xlu2 %7107 }
 0xd2a   :  { %9030 = vmatmul.msk.f32.vlgmr.msrb.gmra.mxu0 %vm775_vm2, %v7108_v51 }
 0xda7   :  { %v7128_v41 = vpop.f32.mrf.mxu0 }
 0xda8   :  { %v7131_v6 = vadd.f32 %v7128_v41, %v6905_v45 }
 0xdaa   :  { %9355 = vtanh.f32 %v7131_v6  ;;  %v9031_v28 = vmul.f32 -1.442695, %v7131_v6 }
 0xdac   :  { %9357 = vpow2.f32 %v9031_v28 }
 0xdb0   :  { %v9356_v24 = vpop.eup %9355 }
 0xdb1   :  { %7154 = vrot.lane.b32.xlu0 %v9356_v24, %s9428_s8 }
 0xdb2   :  { %v9358_v17 = vpop.eup %9357 }
 0xdb3   :  { %v7135_v18 = vadd.f32 1.0, %v9358_v17 }
 0xdb5   :  { %9359 = vrcp.f32 %v7135_v18  ;;  %v7147_v58 = vand.u32 2147483648, %v7135_v18  ;;  %vm7141_vm7 = vweird.f32 %v7135_v18  ;;  %v7145_v54 = vand.u32 2147483647, %v7135_v18 }
 0xdb7   :  { %v7148_v62 = vor.u32 1.1754944e-38, %v7147_v58  ;;  %vm7146_vm9 = vcmp.eq.f32.partialorder %v7145_v54, 8.507059e+37 }
 0xdbb   :  { %v9360_v15 = vpop.eup %9359 }
 0xdbc   :  { %v7137_v13 = vmul.f32 %v9360_v15, %v7135_v18  ;;  %vm7142_vm6 = vweird.f32 %v9360_v15 }
 0xdbd   :  { %vm7143_vm8 = vmor %vm7141_vm7, %vm7142_vm6 }
 0xdbe   :  { %v7138_v5 = vsub.f32 1.0, %v7137_v13 }
 0xdc0   :  { %v7139_v27 = vmul.f32 %v9360_v15, %v7138_v5 }
 0xdc2   :  { %v7140_v43 = vadd.f32 %v9360_v15, %v7139_v27 }
 0xdc4   :  { %v7144_v56 = vsel %vm7143_vm8, %v9360_v15, %v7140_v43 }
 0xdc5   :  { %v7149_v44 = vsel %vm7146_vm9, %v7148_v62, %v7144_v56 }
 0xdc6   :  { %v7152_v38 = vmul.f32 %v7149_v44, %v7099_v57  ;;  %v6910_v57 = vpop.f32.mrf.mxu3 }
 0xdc7   :  { %v6911_v9 = vadd.f32 %v11559_v23, %v6910_v57 }
 0xe23   :  { %v7155_v1 = vpop.permute.xlu0 %7154 }
 0xe24   :  { %v7157_v35 = vmul.f32 %v7155_v1, %v7149_v44 }
 0xe26   :  { %7159 = vrot.lane.b32.xlu1 %v7157_v35, %s9428_s8 }
 0xe98   :  { %v7160_v8 = vpop.permute.xlu1 %7159 }
 0xe99   :  { %v7162_v39 = vadd.f32 %v7160_v8, %v7152_v38 }
 0xe9b   :  { %9361 = vtanh.f32 %v7162_v39 }
 0xea1   :  { %v9362_v60 = vpop.eup %9361 }
 0xea2   :  { %7165 = vrot.lane.b32.xlu2 %v9362_v60, %s9428_s8 }
 0xefc   :  { %v7166_v34 = vpop.permute.xlu2 %7165 }
 0xefd   :  { %v7168_v42 = vmul.f32 %v7166_v34, %v7149_v44  ;;  %v6846_v44 = vld [vmem:[%s11742_s1 + $0x30] sm:$0xff] }
 0xefe   :  { %9023 = vmatmul.msk.f32.gmra.mxu3 %vm6849_vm5, %v6846_v44 }
 0xeff   :  { %7170 = vrot.lane.b32.xlu0 %v7168_v42, %s9429_s5 }
 0xf71   :  { %v7171_v22 = vpop.permute.xlu0 %7170 }
 0xf72   :  { %9032 = vmatmul.msk.f32.vlgmr.msra.gmra.mxu1 %vm775_vm2, %v7171_v22 }
 0xfef   :  { %v7191_v61 = vpop.f32.mrf.mxu1 }
 0xff0   :  { %v7194_v26 = vadd.f32 %v7191_v61, %v6908_v16 }
 0xff2   :  { %9363 = vtanh.f32 %v7194_v26  ;;  %v9033_v12 = vmul.f32 -1.442695, %v7194_v26 }
 0xff4   :  { %9365 = vpow2.f32 %v9033_v12 }
 0xff8   :  { %v9364_v20 = vpop.eup %9363 }
 0xff9   :  { %7217 = vrot.lane.b32.xlu1 %v9364_v20, %s9428_s8 }
 0xffa   :  { %v9366_v10 = vpop.eup %9365 }
 0xffb   :  { %v7198_v14 = vadd.f32 1.0, %v9366_v10 }
 0xffd   :  { %9367 = vrcp.f32 %v7198_v14  ;;  %v7210_v40 = vand.u32 2147483648, %v7198_v14  ;;  %vm7204_vm11 = vweird.f32 %v7198_v14  ;;  %v7208_v33 = vand.u32 2147483647, %v7198_v14 }
 0xfff   :  { %v7211_v46 = vor.u32 1.1754944e-38, %v7210_v40  ;;  %vm7209_vm13 = vcmp.eq.f32.partialorder %v7208_v33, 8.507059e+37 }
0x1003   :  { %v9368_v52 = vpop.eup %9367 }
0x1004   :  { %v7200_v11 = vmul.f32 %v9368_v52, %v7198_v14  ;;  %vm7205_vm10 = vweird.f32 %v9368_v52 }
0x1005   :  { %vm7206_vm12 = vmor %vm7204_vm11, %vm7205_vm10 }
0x1006   :  { %v7201_v48 = vsub.f32 1.0, %v7200_v11 }
0x1008   :  { %v7202_v53 = vmul.f32 %v9368_v52, %v7201_v48 }
0x100a   :  { %v7203_v25 = vadd.f32 %v9368_v52, %v7202_v53 }
0x100c   :  { %v7207_v37 = vsel %vm7206_vm12, %v9368_v52, %v7203_v25 }
0x100d   :  { %v7212_v36 = vsel %vm7209_vm13, %v7211_v46, %v7207_v37 }
0x100e   :  { %v7215_v3 = vmul.f32 %v7212_v36, %v7162_v39  ;;  %v6913_v39 = vpop.f32.mrf.mxu3 }
0x100f   :  { %v6914_v60 = vadd.f32 %v11559_v23, %v6913_v39  ;;  %v7471_v39 = vld [vmem:[%s11745_s4 + $0xc8] sm:$0xff] }
0x106b   :  { %v7218_v63 = vpop.permute.xlu1 %7217 }
0x106c   :  { %v7220_v55 = vmul.f32 %v7218_v63, %v7212_v36 }
0x106e   :  { %7222 = vrot.lane.b32.xlu2 %v7220_v55, %s9428_s8 }
0x10c8   :  { %v7223_v2 = vpop.permute.xlu2 %7222 }
0x10c9   :  { %v7225_v29 = vadd.f32 %v7223_v2, %v7215_v3 }
0x10cb   :  { %9369 = vtanh.f32 %v7225_v29 }
0x10d1   :  { %v9370_v7 = vpop.eup %9369 }
0x10d2   :  { %7228 = vrot.lane.b32.xlu0 %v9370_v7, %s9428_s8 }
0x1144   :  { %v7229_v0 = vpop.permute.xlu0 %7228 }
0x1145   :  { %v7231_v50 = vmul.f32 %v7229_v0, %v7212_v36  ;;  %v6847_v36 = vld [vmem:[%s11742_s1 + $0x38] sm:$0xff] }
0x1146   :  { %9024 = vmatmul.msk.f32.gmra.mxu3 %vm6849_vm5, %v6847_v36 }
0x1147   :  { %7233 = vrot.lane.b32.xlu1 %v7231_v50, %s9429_s5 }
0x11b9   :  { %v7234_v32 = vpop.permute.xlu1 %7233 }
0x11ba   :  { %9034 = vmatmul.msk.f32.vlgmr.msrb.gmra.mxu2 %vm775_vm2, %v7234_v32 }
0x123d   :  { %v7254_v59 = vpop.f32.mrf.mxu2 }
0x123e   :  { %v7257_v19 = vadd.f32 %v7254_v59, %v6911_v9 }
0x1240   :  { %9371 = vtanh.f32 %v7257_v19  ;;  %v9035_v51 = vmul.f32 -1.442695, %v7257_v19 }
0x1242   :  { %9373 = vpow2.f32 %v9035_v51 }
0x1246   :  { %v9372_v4 = vpop.eup %9371 }
0x1247   :  { %7280 = vrot.lane.b32.xlu2 %v9372_v4, %s9428_s8 }
0x1248   :  { %v9374_v31 = vpop.eup %9373 }
0x1249   :  { %v7261_v45 = vadd.f32 1.0, %v9374_v31 }
0x124b   :  { %9375 = vrcp.f32 %v7261_v45  ;;  %v7273_v18 = vand.u32 2147483648, %v7261_v45  ;;  %vm7267_vm15 = vweird.f32 %v7261_v45  ;;  %v7271_v15 = vand.u32 2147483647, %v7261_v45 }
0x124d   :  { %v7274_v5 = vor.u32 1.1754944e-38, %v7273_v18  ;;  %vm7272_vm1 = vcmp.eq.f32.partialorder %v7271_v15, 8.507059e+37  ;;  %v7428_v18 = vld [vmem:[%s11745_s4 + $0x98] sm:$0xf]  ;;  %v7427_v15 = vld [vmem:[%s11745_s4 + $0x90] sm:$0xff] }
0x124e   :  { %9040 = vmatpush.msk.msra.mxu2 %vm6874_vm4, %v7428_v18 }
0x1250   :  { %7447 = vmatpush.msra.mxu2 %v7427_v15 }
0x1251   :  { %v9376_v41 = vpop.eup %9375 }
0x1252   :  { %v7263_v6 = vmul.f32 %v9376_v41, %v7261_v45  ;;  %vm7268_vm14 = vweird.f32 %v9376_v41 }
0x1253   :  { %vm7269_vm0 = vmor %vm7267_vm15, %vm7268_vm14 }
0x1254   :  { %v7264_v24 = vsub.f32 1.0, %v7263_v6 }
0x1256   :  { %v7265_v28 = vmul.f32 %v9376_v41, %v7264_v24 }
0x1258   :  { %v7266_v17 = vadd.f32 %v9376_v41, %v7265_v28 }
0x125a   :  { %v7270_v13 = vsel %vm7269_vm0, %v9376_v41, %v7266_v17 }
0x125b   :  { %v7275_v43 = vsel %vm7272_vm1, %v7274_v5, %v7270_v13  ;;  %v7426_v13 = vld [vmem:[%s11745_s4 + $0x88] sm:$0xff]  ;;  %v7425_v5 = vld [vmem:[%s11745_s4 + $0x80] sm:$0xff] }
0x125c   :  { %v7278_v54 = vmul.f32 %v7275_v43, %v7225_v29  ;;  %v6916_v29 = vpop.f32.mrf.mxu3  ;;  %7448 = vmatpush.msra.mxu2 %v7426_v13 }
0x125d   :  { %v6917_v7 = vadd.f32 %v11559_v23, %v6916_v29 }
0x125e   :  { %7449 = vmatpush.msra.mxu2 %v7425_v5 }
0x12a1   :  { %v7281_v27 = vpop.permute.xlu2 %7280 }
0x12a2   :  { %v7283_v58 = vmul.f32 %v7281_v27, %v7275_v43  ;;  %v7424_v27 = vld [vmem:[%s11745_s4 + $0x78] sm:$0xff] }
0x12a3   :  { %7450 = vmatpush.msra.mxu2 %v7424_v27 }
0x12a4   :  { %7285 = vrot.lane.b32.xlu0 %v7283_v58, %s9428_s8  ;;  %v7422_v58 = vld [vmem:[%s11745_s4 + $0x68] sm:$0xff] }
0x1316   :  { %v7286_v56 = vpop.permute.xlu0 %7285 }
0x1317   :  { %v7288_v62 = vadd.f32 %v7286_v56, %v7278_v54  ;;  %v7421_v54 = vld [vmem:[%s11743_s2] sm:$0xff] }
0x1319   :  { %9377 = vtanh.f32 %v7288_v62 }
0x131f   :  { %v9378_v1 = vpop.eup %9377 }
0x1320   :  { %7291 = vrot.lane.b32.xlu1 %v9378_v1, %s9428_s8 }
0x1392   :  { %v7292_v35 = vpop.permute.xlu1 %7291 }
0x1393   :  { %v7294_v38 = vmul.f32 %v7292_v35, %v7275_v43  ;;  %v7423_v43 = vld [vmem:[%s11745_s4 + $0x70] sm:$0xff]  ;;  %v7474_v35 = vld [vmem:[%s11745_s4 + $0xe0] sm:$0xff] }
0x1394   :  { %7451 = vmatpush.msra.mxu2 %v7423_v43  ;;  %7486 = vmatpush.msrb.mxu0 %v7474_v35 }
0x1395   :  { %7296 = vrot.lane.b32.xlu2 %v7294_v38, %s9429_s5  ;;  %v7473_v38 = vld [vmem:[%s11745_s4 + $0xd8] sm:$0xff] }
0x1396   :  { %7452 = vmatpush.msra.mxu2 %v7422_v58  ;;  %7487 = vmatpush.msrb.mxu0 %v7473_v38 }
0x1397   :  { %9041 = vmatmul.msk.f32.vlgmr.msra.gmra.mxu2 %vm6849_vm5, %v7421_v54 }
0x13ef   :  { %v7297_v8 = vpop.permute.xlu2 %7296 }
0x13f0   :  { %9036 = vmatmul.msk.f32.vlgmr.msra.gmra.mxu0 %vm775_vm2, %v7297_v8  ;;  %v7472_v8 = vld [vmem:[%s11745_s4 + $0xd0] sm:$0xff] }
0x13f1   :  { %7488 = vmatpush.msrb.mxu0 %v7472_v8 }
0x13f3   :  { %7489 = vmatpush.msrb.mxu0 %v7471_v39 }
0x146d   :  { %v7317_v21 = vpop.f32.mrf.mxu0 }
0x146e   :  { %v7320_v34 = vadd.f32 %v7317_v21, %v6914_v60  ;;  %v7470_v60 = vld [vmem:[%s11745_s4 + $0xc0] sm:$0xff]  ;;  %v7469_v21 = vld [vmem:[%s11745_s4 + $0xb8] sm:$0xff] }
0x146f   :  { %7490 = vmatpush.msrb.mxu0 %v7470_v60 }
0x1470   :  { %9379 = vtanh.f32 %v7320_v34  ;;  %v9037_v22 = vmul.f32 -1.442695, %v7320_v34  ;;  %v7468_v34 = vld [vmem:[%s11745_s4 + $0xb0] sm:$0xff] }
0x1471   :  { %7491 = vmatpush.msrb.mxu0 %v7469_v21 }
0x1472   :  { %9381 = vpow2.f32 %v9037_v22  ;;  %v7454_v22 = vpop.f32.mrf.mxu2 }
0x1473   :  { %7492 = vmatpush.msrb.mxu0 %v7468_v34 }
0x1476   :  { %v9380_v42 = vpop.eup %9379 }
0x1477   :  { %7343 = vrot.lane.b32.xlu0 %v9380_v42, %s9428_s8  ;;  %v9327_v42 = vld [vmem:[%s11745_s4 + $0xa0] ss:$0 sm:$0xff] }
0x1478   :  { %v9382_v49 = vpop.eup %9381 }
0x1479   :  { %v7324_v16 = vadd.f32 1.0, %v9382_v49  ;;  %v7455_v49 = vadd.f32 %v9327_v42, %v7454_v22 }
0x147b   :  { %9383 = vrcp.f32 %v7324_v16  ;;  %v7336_v14 = vand.u32 2147483648, %v7324_v16  ;;  %vm7330_vm7 = vweird.f32 %v7324_v16  ;;  %v7334_v52 = vand.u32 2147483647, %v7324_v16 }
0x147d   :  { %v7337_v48 = vor.u32 1.1754944e-38, %v7336_v14  ;;  %vm7335_vm9 = vcmp.eq.f32.partialorder %v7334_v52, 8.507059e+37 }
0x1481   :  { %v9384_v61 = vpop.eup %9383 }
0x1482   :  { %v7326_v26 = vmul.f32 %v9384_v61, %v7324_v16  ;;  %vm7331_vm6 = vweird.f32 %v9384_v61  ;;  %v7457_v16 = vmax.f32 %v7455_v49, 0.0 }
0x1483   :  { %vm7332_vm8 = vmor %vm7330_vm7, %vm7331_vm6 }
0x1484   :  { %v7327_v20 = vsub.f32 1.0, %v7326_v26 }
0x1486   :  { %v7328_v12 = vmul.f32 %v9384_v61, %v7327_v20  ;;  %v7467_v20 = vld [vmem:[%s11745_s4 + $0xa8] sm:$0xff] }
0x1487   :  { %7493 = vmatpush.msrb.mxu0 %v7467_v20 }
0x1488   :  { %v7329_v10 = vadd.f32 %v9384_v61, %v7328_v12  ;;  %v7506_v12 = vld [vmem:[%s11745_s4 + $0x108] sm:$0xff] }
0x1489   :  { %7524 = vmatpush.msra.mxu1 %v7506_v12 }
0x148a   :  { %v7333_v11 = vsel %vm7332_vm8, %v9384_v61, %v7329_v10 }
0x148b   :  { %v7338_v25 = vsel %vm7335_vm9, %v7337_v48, %v7333_v11  ;;  %v7505_v11 = vld [vmem:[%s11745_s4 + $0x100] sm:$0xff]  ;;  %v7504_v48 = vld [vmem:[%s11745_s4 + $0xf8] sm:$0xff] }
0x148c   :  { %v7341_v33 = vmul.f32 %v7338_v25, %v7288_v62  ;;  %7525 = vmatpush.msra.mxu1 %v7505_v11 }
0x148e   :  { %7526 = vmatpush.msra.mxu1 %v7504_v48 }
0x14e9   :  { %v7344_v53 = vpop.permute.xlu0 %7343 }
0x14ea   :  { %v7346_v40 = vmul.f32 %v7344_v53, %v7338_v25  ;;  %v7503_v53 = vld [vmem:[%s11745_s4 + $0xf0] sm:$0xff] }
0x14eb   :  { %7527 = vmatpush.msra.mxu1 %v7503_v53 }
0x14ec   :  { %7348 = vrot.lane.b32.xlu1 %v7346_v40, %s9428_s8  ;;  %v7535_v40 = vld [vmem:[%s11745_s4 + $0x128] sm:$0xff] }
0x155e   :  { %v7349_v37 = vpop.permute.xlu1 %7348 }
0x155f   :  { %v7351_v46 = vadd.f32 %v7349_v37, %v7341_v33  ;;  %v9328_v33 = vld [vmem:[%s11745_s4 + $0xe8] ss:$0 sm:$0xff] }
0x1561   :  { %9385 = vtanh.f32 %v7351_v46 }
0x1567   :  { %v9386_v63 = vpop.eup %9385 }
0x1568   :  { %7354 = vrot.lane.b32.xlu2 %v9386_v63, %s9428_s8 }
0x15c2   :  { %v7355_v55 = vpop.permute.xlu2 %7354 }
0x15c3   :  { %v7357_v3 = vmul.f32 %v7355_v55, %v7338_v25  ;;  %v7536_v25 = vld [vmem:[%s11745_s4 + $0x130] sm:$0xff]  ;;  %v7534_v55 = vld [vmem:[%s11745_s4 + $0x120] sm:$0xff] }
0x15c4   :  { %7554 = vmatpush.msrb.mxu2 %v7536_v25 }
0x15c5   :  { %7359 = vrot.lane.b32.xlu0 %v7357_v3, %s9429_s5  ;;  %v7533_v3 = vld [vmem:[%s11745_s4 + $0x118] sm:$0xff] }
0x15c6   :  { %7555 = vmatpush.msrb.mxu2 %v7535_v40 }
0x15c8   :  { %7556 = vmatpush.msrb.mxu2 %v7534_v55 }
0x15ca   :  { %7557 = vmatpush.msrb.mxu2 %v7533_v3 }
0x1637   :  { %v7360_v2 = vpop.permute.xlu0 %7359 }
0x1638   :  { %9038 = vmatmul.msk.f32.vlgmr.msrb.gmra.mxu1 %vm775_vm2, %v7360_v2  ;;  %v9329_v2 = vld [vmem:[%s11745_s4 + $0x110] ss:$0 sm:$0xff] }
0x16b5   :  { %v7380_v30 = vpop.f32.mrf.mxu1 }
0x16b6   :  { %v7383_v0 = vadd.f32 %v7380_v30, %v6917_v7  ;;  %v9330_v30 = vld [vmem:[%s11745_s4 + $0x138] ss:$0 sm:$0xff]  ;;  %s9430_s4 = smov [#allocation3]  }
0x16b7   :  { %s7582_s26 = sshll.u32 %s9430_s4, 4  ;;  %s7583_s26 = int_to_ptr.vmem [resolvable:$true] %s7582_s26 }
0x16b8   :  { %9387 = vtanh.f32 %v7383_v0  ;;  %v9039_v32 = vmul.f32 -1.442695, %v7383_v0 }
0x16ba   :  { %9389 = vpow2.f32 %v9039_v32 }
0x16be   :  { %v9388_v50 = vpop.eup %9387 }
0x16bf   :  { %7406 = vrot.lane.b32.xlu1 %v9388_v50, %s9428_s8  ;;  %v7562_v50 = vld [vmem:[%s11744_s3] sm:$0xff]  ;;  %s7584_s3 = sshll.u32 %s11748_s7, 4  ;;  %s7585_s3 = int_to_ptr.hbm [resolvable:$true] %s7584_s3 }
0x16c0   :  { %v9390_v57 = vpop.eup %9389 }
0x16c1   :  { %v7387_v9 = vadd.f32 1.0, %v9390_v57 }
0x16c3   :  { %9391 = vrcp.f32 %v7387_v9  ;;  %v7399_v45 = vand.u32 2147483648, %v7387_v9  ;;  %vm7393_vm11 = vweird.f32 %v7387_v9  ;;  %v7397_v23 = vand.u32 2147483647, %v7387_v9 }
0x16c5   :  { %v7400_v6 = vor.u32 1.1754944e-38, %v7399_v45  ;;  %vm7398_vm13 = vcmp.eq.f32.partialorder %v7397_v23, 8.507059e+37 }
0x16c9   :  { %v9392_v59 = vpop.eup %9391 }
0x16ca   :  { %v7389_v19 = vmul.f32 %v9392_v59, %v7387_v9  ;;  %vm7394_vm10 = vweird.f32 %v9392_v59 }
0x16cb   :  { %vm7395_vm12 = vmor %vm7393_vm11, %vm7394_vm10 }
0x16cc   :  { %v7390_v4 = vsub.f32 1.0, %v7389_v19 }
0x16ce   :  { %v7391_v51 = vmul.f32 %v9392_v59, %v7390_v4 }
0x16d0   :  { %v7392_v31 = vadd.f32 %v9392_v59, %v7391_v51 }
0x16d2   :  { %v7396_v41 = vsel %vm7395_vm12, %v9392_v59, %v7392_v31 }
0x16d3   :  { %v7401_v28 = vsel %vm7398_vm13, %v7400_v6, %v7396_v41 }
0x16d4   :  { %v7404_v56 = vmul.f32 %v7401_v28, %v7351_v46 }
0x1731   :  { %v7407_v24 = vpop.permute.xlu1 %7406 }
0x1732   :  { %v7409_v17 = vmul.f32 %v7407_v24, %v7401_v28 }
0x1734   :  { %7411 = vrot.lane.b32.xlu2 %v7409_v17, %s9428_s8 }
0x173c   :  { %7463 = vrot.lane.b32.xlu2 %v7457_v16, %s9428_s8 }
0x178e   :  { %v7412_v62 = vpop.permute.xlu2 %7411 }
0x178f   :  { %v7414_v1 = vadd.f32 %v7412_v62, %v7404_v56 }
0x1791   :  { %9393 = vtanh.f32 %v7414_v1 }
0x1796   :  { %v7464_v10 = vpop.permute.xlu2 %7463 }
0x1797   :  { %v9394_v44 = vpop.eup %9393 }
0x1798   :  { %7417 = vrot.lane.b32.xlu0 %v9394_v44, %s9428_s8 }
0x180a   :  { %v7418_v61 = vpop.permute.xlu0 %7417 }
0x180b   :  { %v7420_v26 = vmul.f32 %v7418_v61, %v7401_v28 }
0x180d   :  { %7459 = vrot.lane.b32.xlu1 %v7420_v26, %s9429_s5 }
0x187f   :  { %v7460_v14 = vpop.permute.xlu1 %7459 }
0x1880   :  { %v7466_v52 = vsel %vm775_vm2, %v7460_v14, %v7464_v10 }
0x1881   :  { %9042 = vmatmul.msk.f32.vlgmr.msrb.gmra.mxu0 %vm4271_vm3, %v7466_v52 }
0x18fe   :  { %v7495_v37 = vpop.f32.mrf.mxu0 }
0x18ff   :  { %v7498_v46 = vadd.f32 %v7495_v37, %v11564_v47 }
0x1901   :  { %v7501_v63 = vadd.f32 %v9328_v33, %v7498_v46 }
0x1903   :  { %v7502_v36 = vmax.f32 %v7501_v63, 0.0 }
0x1905   :  { %9043 = vmatmul.msk.f32.vlgmr.msra.gmra.mxu1 %vm775_vm2, %v7502_v36 }
0x1982   :  { %v7529_v29 = vpop.f32.mrf.mxu1 }
0x1983   :  { %v7530_v47 = vadd.f32 %v9329_v2, %v7529_v29 }
0x1985   :  { %v7532_v7 = vmax.f32 %v7530_v47, 0.0 }
0x1987   :  { %9044 = vmatmul.msk.f32.vlgmr.msrb.gmra.mxu2 %vm775_vm2, %v7532_v7 }
0x1a0a   :  { %v7559_v0 = vpop.f32.mrf.mxu2 }
0x1a0b   :  { %v7560_v32 = vadd.f32 %v9330_v30, %v7559_v0 }
0x1a0d   :  { %v7563_v57 = vadd.f32 %v7562_v50, %v7560_v32 }
0x1a0f   :  { %7564 = vmax.xlane.f32.xlu0 %v7563_v57 }
0x1a82   :  { %v7565_v9 = vpop.xlane.xlu0 %7564 }
0x1a83   :  { %v7566_v59 = vsub.f32 %v7563_v57, %v7565_v9 }
0x1a85   :  { %v7567_v19 = vmul.f32 1.442695, %v7566_v59 }
0x1a87   :  { %9395 = vpow2.f32 %v7567_v19 }
0x1a8d   :  { %v9396_v4 = vpop.eup %9395 }
0x1a8e   :  { %7569 = vadd.xlane.f32.xlu1 %v9396_v4 }
0x1b01   :  { %v7570_v51 = vpop.xlane.xlu1 %7569 }
0x1b02   :  { %9397 = vrcp.f32 %v7570_v51 }
0x1b08   :  { %v9398_v31 = vpop.eup %9397 }
0x1b09   :  { %v7572_v45 = vmul.f32 %v9398_v31, %v7570_v51 }
0x1b0b   :  { %v7573_v23 = vsub.f32 2.0, %v7572_v45 }
0x1b0d   :  { %v7574_v41 = vmul.f32 %v9398_v31, %v7573_v23 }
0x1b0f   :  { %v7575_v6 = vmul.f32 %v9396_v4, %v7574_v41 }
0x1b11   :  { %7576 = vst [vmem:[#allocation3] sm:$0xff] %v7575_v6 }
0x1b12   :  { %7587 = dma.vmem_to_hbm [thread:$0]  %s7583_s26, 128, %s7585_s3, [#allocation4]  }
0x1b13   :  { %9425 = dma.done.wait [#allocation4], 128  }
0x1b14   :  { %9426 = vsyncadd [#allocation4], 4294967168 }
0x1b15   :  { %7592 = vsyncpa [#allocation4], 1 }

</bundles_post_ra>
